<compile_context>
chip_gen: v6e
topology: v6e:2x2x1
jax: 0.10.0
libtpu: 0.0.40
codegen_flags: <defaults>
</compile_context>

<pallas_src>
import functools
import math

import jax
import jax.numpy as jnp
from jax.experimental import pallas as pl
from jax.experimental.pallas import tpu as pltpu

LAYER_DIMS = [1, 128, 128, 600, 1000, 1000, 600, 128, 10]
NUM_LAYERS = len(LAYER_DIMS) - 1      # 8 linear layers
NUM_CLASSES = 10


def _round_up(x, m):
    return ((x + m - 1) // m) * m


# Lane-dense (multiple-of-128) layer widths; input stays width 1.
PADDED_DIMS = [LAYER_DIMS[0]] + [_round_up(d, 128) for d in LAYER_DIMS[1:]]
PADDED_CLASSES = PADDED_DIMS[-1]      # 128-wide lane-dense output slab


def _gelu_tanh(x):
    # TODO(synk): torch nn.GELU() defaults to the exact erf formulation; the
    # tanh approximation (max abs deviation ~3e-3) is used because erf lowering
    # inside Mosaic is not guaranteed on all TPU generations.
    c = math.sqrt(2.0 / math.pi)
    return 0.5 * x * (1.0 + jnp.tanh(c * (x + 0.044715 * (x * x * x))))


def _digit_extractor_kernel(x_ref, *refs):
    """refs = (w1, b1, w2, b2, ..., w8, b8, out_ref)."""
    out_ref = refs[-1]
    wb = refs[:-1]

    # Layer 0: Linear(1, 128).  K == 1, so x @ W1 is an outer-product
    # broadcast; run it on the VPU instead of a K=1 MXU matmul.
    h = x_ref[...] * wb[0][...] + wb[1][...]          # (TB,1)*(1,128)+(1,128)
    h = _gelu_tanh(h)

    # Layers 1..7: dense matmuls on the MXU with f32 accumulation.
    for layer in range(1, NUM_LAYERS):
        w_ref = wb[2 * layer]
        b_ref = wb[2 * layer + 1]
        h = jnp.dot(h, w_ref[...], preferred_element_type=jnp.float32)
        h = h + b_ref[...]
        if layer < NUM_LAYERS - 1:
            h = _gelu_tanh(h)

    out_ref[...] = h                                   # (TB, 128) lane-dense


def init_params(key):
    """Xavier-uniform weights / zero biases (matching torch's init scheme).
    Weights are stored [in_features, out_features] (== torch weight.T)."""
    params = []
    keys = jax.random.split(key, NUM_LAYERS)
    for i in range(NUM_LAYERS):
        fan_in, fan_out = LAYER_DIMS[i], LAYER_DIMS[i + 1]
        limit = math.sqrt(6.0 / (fan_in + fan_out))
        w = jax.random.uniform(keys[i], (fan_in, fan_out), jnp.float32,
                               minval=-limit, maxval=limit)
        b = jnp.zeros((fan_out,), jnp.float32)
        params.append((w, b))
    return params


def prepare_params(params):
    """One-time (hoisted) kernel-layout prep: zero-pad every layer to the
    lane-dense PADDED_DIMS widths and reshape biases to (1, N) rows.  Exact:
    padded units are 0 through GELU and multiply zero-padded weight rows."""
    flat = []
    for i, (w, b) in enumerate(params):
        pin, pout = PADDED_DIMS[i], PADDED_DIMS[i + 1]
        fin, fout = w.shape
        w = jnp.pad(w.astype(jnp.float32), ((0, pin - fin), (0, pout - fout)))
        b = jnp.pad(b.astype(jnp.float32), (0, pout - fout)).reshape(1, -1)
        flat.append(w)
        flat.append(b)
    return tuple(flat)


def _cost_estimate(batch):
    flops = 2 * batch * sum(PADDED_DIMS[i] * PADDED_DIMS[i + 1]
                            for i in range(NUM_LAYERS))
    transcendentals = batch * sum(PADDED_DIMS[1:NUM_LAYERS])     # one tanh/unit
    weight_bytes = 4 * sum(PADDED_DIMS[i] * PADDED_DIMS[i + 1] + PADDED_DIMS[i + 1]
                           for i in range(NUM_LAYERS))
    io_bytes = 4 * batch * (1 + PADDED_CLASSES)
    return pl.CostEstimate(flops=int(flops),
                           transcendentals=int(transcendentals),
                           bytes_accessed=int(weight_bytes + io_bytes))


@functools.partial(jax.jit, static_argnames=("batch_tile",))
def digit_extractor_forward(x, flat_params, *, batch_tile=256):
    """x: (B, 1) f32; flat_params from prepare_params().  Returns (B, 10)."""
    B = x.shape[0]
    tb = min(batch_tile, B)
    grid = (pl.cdiv(B, tb),)

    const_map = lambda i: (0, 0)
    in_specs = [pl.BlockSpec((tb, 1), lambda i: (i, 0))]      # batch-tiled input
    for p in flat_params:
        # Full-array blocks, constant index map -> weights stay VMEM-resident
        # across all batch-grid steps (DMA'd once).
        in_specs.append(pl.BlockSpec(p.shape, const_map))

    out_spec = pl.BlockSpec((tb, PADDED_CLASSES), lambda i: (i, 0))

    padded = pl.pallas_call(
        _digit_extractor_kernel,
        out_shape=jax.ShapeDtypeStruct((B, PADDED_CLASSES), jnp.float32),
        grid=grid,
        in_specs=in_specs,
        out_specs=out_spec,
        cost_estimate=_cost_estimate(B),
        compiler_params=pltpu.CompilerParams(
            dimension_semantics=("parallel",),       # v7x: shard batch over 2 TCs
            vmem_limit_bytes=48 * 1024 * 1024,       # weights (+double buffers)
        ),
    )(x, *flat_params)
    return padded[:, :NUM_CLASSES]


def reference_forward(x, params):
    """Pure-JAX reference of the DigitExtractor forward (same tanh-GELU)."""
    h = x
    for i, (w, b) in enumerate(params):
        h = jnp.dot(h, w, precision=jax.lax.Precision.HIGHEST) + b
        if i < NUM_LAYERS - 1:
            h = _gelu_tanh(h)
    return h


if __name__ == "__main__":
    B = 8
    key = jax.random.PRNGKey(0)
    k_x, k_p = jax.random.split(key)

    # Scalar inputs, e.g. "numbers whose last digit we classify".
    x = jax.random.uniform(k_x, (B, 1), jnp.float32, minval=0.0, maxval=10.0)

    params = init_params(k_p)
    flat_params = prepare_params(params)     # hoisted, one-time layout prep

    out = digit_extractor_forward(x, flat_params)
    out = jax.block_until_ready(out)

    ref = reference_forward(x, params)
    assert out.shape == (B, NUM_CLASSES)
    assert jnp.allclose(out, ref, atol=2e-2, rtol=2e-2), (
        "mismatch vs reference: max abs diff = "
        f"{float(jnp.max(jnp.abs(out - ref)))}")

    print("KERNEL_OK")
</pallas_src>

<mosaic_0001>
module attributes {stable_mosaic.version = 11 : i64} {
  func.func @_digit_extractor_kernel(%arg0: i32, %arg1: memref<8x1xf32, #tpu.memory_space<vmem>>, %arg2: memref<1x128xf32, #tpu.memory_space<vmem>>, %arg3: memref<1x128xf32, #tpu.memory_space<vmem>>, %arg4: memref<128x128xf32, #tpu.memory_space<vmem>>, %arg5: memref<1x128xf32, #tpu.memory_space<vmem>>, %arg6: memref<128x640xf32, #tpu.memory_space<vmem>>, %arg7: memref<1x640xf32, #tpu.memory_space<vmem>>, %arg8: memref<640x1024xf32, #tpu.memory_space<vmem>>, %arg9: memref<1x1024xf32, #tpu.memory_space<vmem>>, %arg10: memref<1024x1024xf32, #tpu.memory_space<vmem>>, %arg11: memref<1x1024xf32, #tpu.memory_space<vmem>>, %arg12: memref<1024x640xf32, #tpu.memory_space<vmem>>, %arg13: memref<1x640xf32, #tpu.memory_space<vmem>>, %arg14: memref<640x128xf32, #tpu.memory_space<vmem>>, %arg15: memref<1x128xf32, #tpu.memory_space<vmem>>, %arg16: memref<128x128xf32, #tpu.memory_space<vmem>>, %arg17: memref<1x128xf32, #tpu.memory_space<vmem>>, %arg18: memref<8x128xf32, #tpu.memory_space<vmem>>) attributes {dimension_semantics = [#tpu.dimension_semantics<parallel>], iteration_bounds = array<i64: 1>, scalar_prefetch = 0 : i64, scratch_operands = 0 : i64, tpu.core_type = #tpu.core_type<tc>, window_params = [{transform_indices = @transform_0, window_bounds = array<i64: 8, 1>}, {pipeline_mode = #tpu.pipeline_mode<synchronous>, transform_indices = @transform_1, window_bounds = array<i64: 1, 128>}, {pipeline_mode = #tpu.pipeline_mode<synchronous>, transform_indices = @transform_2, window_bounds = array<i64: 1, 128>}, {pipeline_mode = #tpu.pipeline_mode<synchronous>, transform_indices = @transform_3, window_bounds = array<i64: 128, 128>}, {pipeline_mode = #tpu.pipeline_mode<synchronous>, transform_indices = @transform_4, window_bounds = array<i64: 1, 128>}, {pipeline_mode = #tpu.pipeline_mode<synchronous>, transform_indices = @transform_5, window_bounds = array<i64: 128, 640>}, {pipeline_mode = #tpu.pipeline_mode<synchronous>, transform_indices = @transform_6, window_bounds = array<i64: 1, 640>}, {pipeline_mode = #tpu.pipeline_mode<synchronous>, transform_indices = @transform_7, window_bounds = array<i64: 640, 1024>}, {pipeline_mode = #tpu.pipeline_mode<synchronous>, transform_indices = @transform_8, window_bounds = array<i64: 1, 1024>}, {pipeline_mode = #tpu.pipeline_mode<synchronous>, transform_indices = @transform_9, window_bounds = array<i64: 1024, 1024>}, {pipeline_mode = #tpu.pipeline_mode<synchronous>, transform_indices = @transform_10, window_bounds = array<i64: 1, 1024>}, {pipeline_mode = #tpu.pipeline_mode<synchronous>, transform_indices = @transform_11, window_bounds = array<i64: 1024, 640>}, {pipeline_mode = #tpu.pipeline_mode<synchronous>, transform_indices = @transform_12, window_bounds = array<i64: 1, 640>}, {pipeline_mode = #tpu.pipeline_mode<synchronous>, transform_indices = @transform_13, window_bounds = array<i64: 640, 128>}, {pipeline_mode = #tpu.pipeline_mode<synchronous>, transform_indices = @transform_14, window_bounds = array<i64: 1, 128>}, {pipeline_mode = #tpu.pipeline_mode<synchronous>, transform_indices = @transform_15, window_bounds = array<i64: 128, 128>}, {pipeline_mode = #tpu.pipeline_mode<synchronous>, transform_indices = @transform_16, window_bounds = array<i64: 1, 128>}, {transform_indices = @transform_17, window_bounds = array<i64: 8, 128>}]} {
    %c0 = arith.constant 0 : index
    %c0_0 = arith.constant 0 : index
    %0 = vector.load %arg1[%c0, %c0_0] : memref<8x1xf32, #tpu.memory_space<vmem>>, vector<8x1xf32>
    %c0_1 = arith.constant 0 : index
    %c0_2 = arith.constant 0 : index
    %1 = vector.load %arg2[%c0_1, %c0_2] : memref<1x128xf32, #tpu.memory_space<vmem>>, vector<1x128xf32>
    %2 = vector.broadcast %0 : vector<8x1xf32> to vector<8x128xf32>
    %3 = vector.broadcast %1 : vector<1x128xf32> to vector<8x128xf32>
    %4 = arith.mulf %2, %3 : vector<8x128xf32>
    %c0_3 = arith.constant 0 : index
    %c0_4 = arith.constant 0 : index
    %5 = vector.load %arg3[%c0_3, %c0_4] : memref<1x128xf32, #tpu.memory_space<vmem>>, vector<1x128xf32>
    %6 = vector.broadcast %5 : vector<1x128xf32> to vector<8x128xf32>
    %7 = arith.addf %4, %6 : vector<8x128xf32>
    %cst = arith.constant 5.000000e-01 : f32
    %8 = vector.broadcast %cst : f32 to vector<8x128xf32>
    %9 = arith.mulf %8, %7 : vector<8x128xf32>
    %10 = arith.mulf %7, %7 : vector<8x128xf32>
    %11 = arith.mulf %10, %7 : vector<8x128xf32>
    %cst_5 = arith.constant 4.471500e-02 : f32
    %12 = vector.broadcast %cst_5 : f32 to vector<8x128xf32>
    %13 = arith.mulf %12, %11 : vector<8x128xf32>
    %14 = arith.addf %7, %13 : vector<8x128xf32>
    %cst_6 = arith.constant 0.797884583 : f32
    %15 = vector.broadcast %cst_6 : f32 to vector<8x128xf32>
    %16 = arith.mulf %15, %14 : vector<8x128xf32>
    %17 = math.tanh %16 : vector<8x128xf32>
    %cst_7 = arith.constant 1.000000e+00 : f32
    %18 = vector.broadcast %cst_7 : f32 to vector<8x128xf32>
    %19 = arith.addf %18, %17 : vector<8x128xf32>
    %20 = arith.mulf %9, %19 : vector<8x128xf32>
    %c0_8 = arith.constant 0 : index
    %c0_9 = arith.constant 0 : index
    %21 = vector.load %arg4[%c0_8, %c0_9] : memref<128x128xf32, #tpu.memory_space<vmem>>, vector<128x128xf32>
    %cst_10 = arith.constant dense<0.000000e+00> : vector<8x128xf32>
    %22 = tpu.matmul %20, %21, %cst_10 {dimension_numbers = #tpu.dot_dimension_numbers<[1], [0], [0], [1], [0, 0, 1, 1], [], []>} : vector<8x128xf32>, vector<128x128xf32>, vector<8x128xf32> -> vector<8x128xf32>
    %c0_11 = arith.constant 0 : index
    %c0_12 = arith.constant 0 : index
    %23 = vector.load %arg5[%c0_11, %c0_12] : memref<1x128xf32, #tpu.memory_space<vmem>>, vector<1x128xf32>
    %24 = vector.broadcast %23 : vector<1x128xf32> to vector<8x128xf32>
    %25 = arith.addf %22, %24 : vector<8x128xf32>
    %cst_13 = arith.constant 5.000000e-01 : f32
    %26 = vector.broadcast %cst_13 : f32 to vector<8x128xf32>
    %27 = arith.mulf %26, %25 : vector<8x128xf32>
    %28 = arith.mulf %25, %25 : vector<8x128xf32>
    %29 = arith.mulf %28, %25 : vector<8x128xf32>
    %cst_14 = arith.constant 4.471500e-02 : f32
    %30 = vector.broadcast %cst_14 : f32 to vector<8x128xf32>
    %31 = arith.mulf %30, %29 : vector<8x128xf32>
    %32 = arith.addf %25, %31 : vector<8x128xf32>
    %cst_15 = arith.constant 0.797884583 : f32
    %33 = vector.broadcast %cst_15 : f32 to vector<8x128xf32>
    %34 = arith.mulf %33, %32 : vector<8x128xf32>
    %35 = math.tanh %34 : vector<8x128xf32>
    %cst_16 = arith.constant 1.000000e+00 : f32
    %36 = vector.broadcast %cst_16 : f32 to vector<8x128xf32>
    %37 = arith.addf %36, %35 : vector<8x128xf32>
    %38 = arith.mulf %27, %37 : vector<8x128xf32>
    %c0_17 = arith.constant 0 : index
    %c0_18 = arith.constant 0 : index
    %39 = vector.load %arg6[%c0_17, %c0_18] : memref<128x640xf32, #tpu.memory_space<vmem>>, vector<128x640xf32>
    %cst_19 = arith.constant dense<0.000000e+00> : vector<8x640xf32>
    %40 = tpu.matmul %38, %39, %cst_19 {dimension_numbers = #tpu.dot_dimension_numbers<[1], [0], [0], [1], [0, 0, 1, 1], [], []>} : vector<8x128xf32>, vector<128x640xf32>, vector<8x640xf32> -> vector<8x640xf32>
    %c0_20 = arith.constant 0 : index
    %c0_21 = arith.constant 0 : index
    %41 = vector.load %arg7[%c0_20, %c0_21] : memref<1x640xf32, #tpu.memory_space<vmem>>, vector<1x640xf32>
    %42 = vector.broadcast %41 : vector<1x640xf32> to vector<8x640xf32>
    %43 = arith.addf %40, %42 : vector<8x640xf32>
    %cst_22 = arith.constant 5.000000e-01 : f32
    %44 = vector.broadcast %cst_22 : f32 to vector<8x640xf32>
    %45 = arith.mulf %44, %43 : vector<8x640xf32>
    %46 = arith.mulf %43, %43 : vector<8x640xf32>
    %47 = arith.mulf %46, %43 : vector<8x640xf32>
    %cst_23 = arith.constant 4.471500e-02 : f32
    %48 = vector.broadcast %cst_23 : f32 to vector<8x640xf32>
    %49 = arith.mulf %48, %47 : vector<8x640xf32>
    %50 = arith.addf %43, %49 : vector<8x640xf32>
    %cst_24 = arith.constant 0.797884583 : f32
    %51 = vector.broadcast %cst_24 : f32 to vector<8x640xf32>
    %52 = arith.mulf %51, %50 : vector<8x640xf32>
    %53 = math.tanh %52 : vector<8x640xf32>
    %cst_25 = arith.constant 1.000000e+00 : f32
    %54 = vector.broadcast %cst_25 : f32 to vector<8x640xf32>
    %55 = arith.addf %54, %53 : vector<8x640xf32>
    %56 = arith.mulf %45, %55 : vector<8x640xf32>
    %c0_26 = arith.constant 0 : index
    %c0_27 = arith.constant 0 : index
    %57 = vector.load %arg8[%c0_26, %c0_27] : memref<640x1024xf32, #tpu.memory_space<vmem>>, vector<640x1024xf32>
    %cst_28 = arith.constant dense<0.000000e+00> : vector<8x1024xf32>
    %58 = tpu.matmul %56, %57, %cst_28 {dimension_numbers = #tpu.dot_dimension_numbers<[1], [0], [0], [1], [0, 0, 1, 1], [], []>} : vector<8x640xf32>, vector<640x1024xf32>, vector<8x1024xf32> -> vector<8x1024xf32>
    %c0_29 = arith.constant 0 : index
    %c0_30 = arith.constant 0 : index
    %59 = vector.load %arg9[%c0_29, %c0_30] : memref<1x1024xf32, #tpu.memory_space<vmem>>, vector<1x1024xf32>
    %60 = vector.broadcast %59 : vector<1x1024xf32> to vector<8x1024xf32>
    %61 = arith.addf %58, %60 : vector<8x1024xf32>
    %cst_31 = arith.constant 5.000000e-01 : f32
    %62 = vector.broadcast %cst_31 : f32 to vector<8x1024xf32>
    %63 = arith.mulf %62, %61 : vector<8x1024xf32>
    %64 = arith.mulf %61, %61 : vector<8x1024xf32>
    %65 = arith.mulf %64, %61 : vector<8x1024xf32>
    %cst_32 = arith.constant 4.471500e-02 : f32
    %66 = vector.broadcast %cst_32 : f32 to vector<8x1024xf32>
    %67 = arith.mulf %66, %65 : vector<8x1024xf32>
    %68 = arith.addf %61, %67 : vector<8x1024xf32>
    %cst_33 = arith.constant 0.797884583 : f32
    %69 = vector.broadcast %cst_33 : f32 to vector<8x1024xf32>
    %70 = arith.mulf %69, %68 : vector<8x1024xf32>
    %71 = math.tanh %70 : vector<8x1024xf32>
    %cst_34 = arith.constant 1.000000e+00 : f32
    %72 = vector.broadcast %cst_34 : f32 to vector<8x1024xf32>
    %73 = arith.addf %72, %71 : vector<8x1024xf32>
    %74 = arith.mulf %63, %73 : vector<8x1024xf32>
    %c0_35 = arith.constant 0 : index
    %c0_36 = arith.constant 0 : index
    %75 = vector.load %arg10[%c0_35, %c0_36] : memref<1024x1024xf32, #tpu.memory_space<vmem>>, vector<1024x1024xf32>
    %cst_37 = arith.constant dense<0.000000e+00> : vector<8x1024xf32>
    %76 = tpu.matmul %74, %75, %cst_37 {dimension_numbers = #tpu.dot_dimension_numbers<[1], [0], [0], [1], [0, 0, 1, 1], [], []>} : vector<8x1024xf32>, vector<1024x1024xf32>, vector<8x1024xf32> -> vector<8x1024xf32>
    %c0_38 = arith.constant 0 : index
    %c0_39 = arith.constant 0 : index
    %77 = vector.load %arg11[%c0_38, %c0_39] : memref<1x1024xf32, #tpu.memory_space<vmem>>, vector<1x1024xf32>
    %78 = vector.broadcast %77 : vector<1x1024xf32> to vector<8x1024xf32>
    %79 = arith.addf %76, %78 : vector<8x1024xf32>
    %cst_40 = arith.constant 5.000000e-01 : f32
    %80 = vector.broadcast %cst_40 : f32 to vector<8x1024xf32>
    %81 = arith.mulf %80, %79 : vector<8x1024xf32>
    %82 = arith.mulf %79, %79 : vector<8x1024xf32>
    %83 = arith.mulf %82, %79 : vector<8x1024xf32>
    %cst_41 = arith.constant 4.471500e-02 : f32
    %84 = vector.broadcast %cst_41 : f32 to vector<8x1024xf32>
    %85 = arith.mulf %84, %83 : vector<8x1024xf32>
    %86 = arith.addf %79, %85 : vector<8x1024xf32>
    %cst_42 = arith.constant 0.797884583 : f32
    %87 = vector.broadcast %cst_42 : f32 to vector<8x1024xf32>
    %88 = arith.mulf %87, %86 : vector<8x1024xf32>
    %89 = math.tanh %88 : vector<8x1024xf32>
    %cst_43 = arith.constant 1.000000e+00 : f32
    %90 = vector.broadcast %cst_43 : f32 to vector<8x1024xf32>
    %91 = arith.addf %90, %89 : vector<8x1024xf32>
    %92 = arith.mulf %81, %91 : vector<8x1024xf32>
    %c0_44 = arith.constant 0 : index
    %c0_45 = arith.constant 0 : index
    %93 = vector.load %arg12[%c0_44, %c0_45] : memref<1024x640xf32, #tpu.memory_space<vmem>>, vector<1024x640xf32>
    %cst_46 = arith.constant dense<0.000000e+00> : vector<8x640xf32>
    %94 = tpu.matmul %92, %93, %cst_46 {dimension_numbers = #tpu.dot_dimension_numbers<[1], [0], [0], [1], [0, 0, 1, 1], [], []>} : vector<8x1024xf32>, vector<1024x640xf32>, vector<8x640xf32> -> vector<8x640xf32>
    %c0_47 = arith.constant 0 : index
    %c0_48 = arith.constant 0 : index
    %95 = vector.load %arg13[%c0_47, %c0_48] : memref<1x640xf32, #tpu.memory_space<vmem>>, vector<1x640xf32>
    %96 = vector.broadcast %95 : vector<1x640xf32> to vector<8x640xf32>
    %97 = arith.addf %94, %96 : vector<8x640xf32>
    %cst_49 = arith.constant 5.000000e-01 : f32
    %98 = vector.broadcast %cst_49 : f32 to vector<8x640xf32>
    %99 = arith.mulf %98, %97 : vector<8x640xf32>
    %100 = arith.mulf %97, %97 : vector<8x640xf32>
    %101 = arith.mulf %100, %97 : vector<8x640xf32>
    %cst_50 = arith.constant 4.471500e-02 : f32
    %102 = vector.broadcast %cst_50 : f32 to vector<8x640xf32>
    %103 = arith.mulf %102, %101 : vector<8x640xf32>
    %104 = arith.addf %97, %103 : vector<8x640xf32>
    %cst_51 = arith.constant 0.797884583 : f32
    %105 = vector.broadcast %cst_51 : f32 to vector<8x640xf32>
    %106 = arith.mulf %105, %104 : vector<8x640xf32>
    %107 = math.tanh %106 : vector<8x640xf32>
    %cst_52 = arith.constant 1.000000e+00 : f32
    %108 = vector.broadcast %cst_52 : f32 to vector<8x640xf32>
    %109 = arith.addf %108, %107 : vector<8x640xf32>
    %110 = arith.mulf %99, %109 : vector<8x640xf32>
    %c0_53 = arith.constant 0 : index
    %c0_54 = arith.constant 0 : index
    %111 = vector.load %arg14[%c0_53, %c0_54] : memref<640x128xf32, #tpu.memory_space<vmem>>, vector<640x128xf32>
    %cst_55 = arith.constant dense<0.000000e+00> : vector<8x128xf32>
    %112 = tpu.matmul %110, %111, %cst_55 {dimension_numbers = #tpu.dot_dimension_numbers<[1], [0], [0], [1], [0, 0, 1, 1], [], []>} : vector<8x640xf32>, vector<640x128xf32>, vector<8x128xf32> -> vector<8x128xf32>
    %c0_56 = arith.constant 0 : index
    %c0_57 = arith.constant 0 : index
    %113 = vector.load %arg15[%c0_56, %c0_57] : memref<1x128xf32, #tpu.memory_space<vmem>>, vector<1x128xf32>
    %114 = vector.broadcast %113 : vector<1x128xf32> to vector<8x128xf32>
    %115 = arith.addf %112, %114 : vector<8x128xf32>
    %cst_58 = arith.constant 5.000000e-01 : f32
    %116 = vector.broadcast %cst_58 : f32 to vector<8x128xf32>
    %117 = arith.mulf %116, %115 : vector<8x128xf32>
    %118 = arith.mulf %115, %115 : vector<8x128xf32>
    %119 = arith.mulf %118, %115 : vector<8x128xf32>
    %cst_59 = arith.constant 4.471500e-02 : f32
    %120 = vector.broadcast %cst_59 : f32 to vector<8x128xf32>
    %121 = arith.mulf %120, %119 : vector<8x128xf32>
    %122 = arith.addf %115, %121 : vector<8x128xf32>
    %cst_60 = arith.constant 0.797884583 : f32
    %123 = vector.broadcast %cst_60 : f32 to vector<8x128xf32>
    %124 = arith.mulf %123, %122 : vector<8x128xf32>
    %125 = math.tanh %124 : vector<8x128xf32>
    %cst_61 = arith.constant 1.000000e+00 : f32
    %126 = vector.broadcast %cst_61 : f32 to vector<8x128xf32>
    %127 = arith.addf %126, %125 : vector<8x128xf32>
    %128 = arith.mulf %117, %127 : vector<8x128xf32>
    %c0_62 = arith.constant 0 : index
    %c0_63 = arith.constant 0 : index
    %129 = vector.load %arg16[%c0_62, %c0_63] : memref<128x128xf32, #tpu.memory_space<vmem>>, vector<128x128xf32>
    %cst_64 = arith.constant dense<0.000000e+00> : vector<8x128xf32>
    %130 = tpu.matmul %128, %129, %cst_64 {dimension_numbers = #tpu.dot_dimension_numbers<[1], [0], [0], [1], [0, 0, 1, 1], [], []>} : vector<8x128xf32>, vector<128x128xf32>, vector<8x128xf32> -> vector<8x128xf32>
    %c0_65 = arith.constant 0 : index
    %c0_66 = arith.constant 0 : index
    %131 = vector.load %arg17[%c0_65, %c0_66] : memref<1x128xf32, #tpu.memory_space<vmem>>, vector<1x128xf32>
    %132 = vector.broadcast %131 : vector<1x128xf32> to vector<8x128xf32>
    %133 = arith.addf %130, %132 : vector<8x128xf32>
    %c0_67 = arith.constant 0 : index
    %c0_68 = arith.constant 0 : index
    %134 = vector.load %arg18[%c0_67, %c0_68] : memref<8x128xf32, #tpu.memory_space<vmem>>, vector<8x128xf32>
    tpu.vector_store %arg18[%c0_67, %c0_68], %133 {strides = array<i32>} : memref<8x128xf32, #tpu.memory_space<vmem>>, vector<8x128xf32>,
    return
  }
  func.func @transform_0(%arg0: i32) -> (i32, i32) {
    %c0_i32 = arith.constant 0 : i32
    %c0_i32_0 = arith.constant 0 : i32
    return %arg0, %c0_i32 : i32, i32
  }
  func.func @transform_1(%arg0: i32) -> (i32, i32) {
    %c0_i32 = arith.constant 0 : i32
    %c0_i32_0 = arith.constant 0 : i32
    %c0_i32_1 = arith.constant 0 : i32
    return %c0_i32, %c0_i32_0 : i32, i32
  }
  func.func @transform_2(%arg0: i32) -> (i32, i32) {
    %c0_i32 = arith.constant 0 : i32
    %c0_i32_0 = arith.constant 0 : i32
    %c0_i32_1 = arith.constant 0 : i32
    return %c0_i32, %c0_i32_0 : i32, i32
  }
  func.func @transform_3(%arg0: i32) -> (i32, i32) {
    %c0_i32 = arith.constant 0 : i32
    %c0_i32_0 = arith.constant 0 : i32
    %c0_i32_1 = arith.constant 0 : i32
    return %c0_i32, %c0_i32_0 : i32, i32
  }
  func.func @transform_4(%arg0: i32) -> (i32, i32) {
    %c0_i32 = arith.constant 0 : i32
    %c0_i32_0 = arith.constant 0 : i32
    %c0_i32_1 = arith.constant 0 : i32
    return %c0_i32, %c0_i32_0 : i32, i32
  }
  func.func @transform_5(%arg0: i32) -> (i32, i32) {
    %c0_i32 = arith.constant 0 : i32
    %c0_i32_0 = arith.constant 0 : i32
    %c0_i32_1 = arith.constant 0 : i32
    return %c0_i32, %c0_i32_0 : i32, i32
  }
  func.func @transform_6(%arg0: i32) -> (i32, i32) {
    %c0_i32 = arith.constant 0 : i32
    %c0_i32_0 = arith.constant 0 : i32
    %c0_i32_1 = arith.constant 0 : i32
    return %c0_i32, %c0_i32_0 : i32, i32
  }
  func.func @transform_7(%arg0: i32) -> (i32, i32) {
    %c0_i32 = arith.constant 0 : i32
    %c0_i32_0 = arith.constant 0 : i32
    %c0_i32_1 = arith.constant 0 : i32
    return %c0_i32, %c0_i32_0 : i32, i32
  }
  func.func @transform_8(%arg0: i32) -> (i32, i32) {
    %c0_i32 = arith.constant 0 : i32
    %c0_i32_0 = arith.constant 0 : i32
    %c0_i32_1 = arith.constant 0 : i32
    return %c0_i32, %c0_i32_0 : i32, i32
  }
  func.func @transform_9(%arg0: i32) -> (i32, i32) {
    %c0_i32 = arith.constant 0 : i32
    %c0_i32_0 = arith.constant 0 : i32
    %c0_i32_1 = arith.constant 0 : i32
    return %c0_i32, %c0_i32_0 : i32, i32
  }
  func.func @transform_10(%arg0: i32) -> (i32, i32) {
    %c0_i32 = arith.constant 0 : i32
    %c0_i32_0 = arith.constant 0 : i32
    %c0_i32_1 = arith.constant 0 : i32
    return %c0_i32, %c0_i32_0 : i32, i32
  }
  func.func @transform_11(%arg0: i32) -> (i32, i32) {
    %c0_i32 = arith.constant 0 : i32
    %c0_i32_0 = arith.constant 0 : i32
    %c0_i32_1 = arith.constant 0 : i32
    return %c0_i32, %c0_i32_0 : i32, i32
  }
  func.func @transform_12(%arg0: i32) -> (i32, i32) {
    %c0_i32 = arith.constant 0 : i32
    %c0_i32_0 = arith.constant 0 : i32
    %c0_i32_1 = arith.constant 0 : i32
    return %c0_i32, %c0_i32_0 : i32, i32
  }
  func.func @transform_13(%arg0: i32) -> (i32, i32) {
    %c0_i32 = arith.constant 0 : i32
    %c0_i32_0 = arith.constant 0 : i32
    %c0_i32_1 = arith.constant 0 : i32
    return %c0_i32, %c0_i32_0 : i32, i32
  }
  func.func @transform_14(%arg0: i32) -> (i32, i32) {
    %c0_i32 = arith.constant 0 : i32
    %c0_i32_0 = arith.constant 0 : i32
    %c0_i32_1 = arith.constant 0 : i32
    return %c0_i32, %c0_i32_0 : i32, i32
  }
  func.func @transform_15(%arg0: i32) -> (i32, i32) {
    %c0_i32 = arith.constant 0 : i32
    %c0_i32_0 = arith.constant 0 : i32
    %c0_i32_1 = arith.constant 0 : i32
    return %c0_i32, %c0_i32_0 : i32, i32
  }
  func.func @transform_16(%arg0: i32) -> (i32, i32) {
    %c0_i32 = arith.constant 0 : i32
    %c0_i32_0 = arith.constant 0 : i32
    %c0_i32_1 = arith.constant 0 : i32
    return %c0_i32, %c0_i32_0 : i32, i32
  }
  func.func @transform_17(%arg0: i32) -> (i32, i32) {
    %c0_i32 = arith.constant 0 : i32
    %c0_i32_0 = arith.constant 0 : i32
    return %arg0, %c0_i32 : i32, i32
  }
}

</mosaic_0001>

<bundles_post_ra>
// kernel: digit_extractor_forward.1
= control target key start
LH: loop header
LB: loop body
LE: loop exit
PB: predicated region body
PF: predicated region fallthrough
CT: control target
= control target key end

     0   :  { %s8104_s0 = inlined_call_operand.vmem [shape: f32[8,1], index: 0, kind: input, shape index: {}]   ;;  %s8105_s1 = inlined_call_operand.hbm [shape: f32[1,128], index: 1, kind: input, shape index: {}]   ;;  %s8106_s2 = inlined_call_operand.hbm [shape: f32[1,128], index: 2, kind: input, shape index: {}]   ;;  %s8107_s3 = inlined_call_operand.hbm [shape: f32[128,128], index: 3, kind: input, shape index: {}]   ;;  %s8108_s4 = inlined_call_operand.hbm [shape: f32[1,128], index: 4, kind: input, shape index: {}]   ;;  %s8109_s5 = inlined_call_operand.hbm [shape: f32[128,640], index: 5, kind: input, shape index: {}]   ;;  %s8110_s6 = inlined_call_operand.hbm [shape: f32[1,640], index: 6, kind: input, shape index: {}]   ;;  %s8111_s7 = inlined_call_operand.hbm [shape: f32[640,1024], index: 7, kind: input, shape index: {}]   ;;  %s8112_s8 = inlined_call_operand.hbm [shape: f32[1,1024], index: 8, kind: input, shape index: {}]   ;;  %s8113_s9 = inlined_call_operand.hbm [shape: f32[1024,1024], index: 9, kind: input, shape index: {}]   ;;  %s8114_s10 = inlined_call_operand.hbm [shape: f32[1,1024], index: 10, kind: input, shape index: {}]   ;;  %s8115_s11 = inlined_call_operand.hbm [shape: f32[1024,640], index: 11, kind: input, shape index: {}]   ;;  %s8116_s12 = inlined_call_operand.hbm [shape: f32[1,640], index: 12, kind: input, shape index: {}]   ;;  %s8117_s13 = inlined_call_operand.hbm [shape: f32[640,128], index: 13, kind: input, shape index: {}]   ;;  %s8118_s14 = inlined_call_operand.hbm [shape: f32[1,128], index: 14, kind: input, shape index: {}]   ;;  %s8119_s15 = inlined_call_operand.hbm [shape: f32[128,128], index: 15, kind: input, shape index: {}]   ;;  %s8120_s16 = inlined_call_operand.hbm [shape: f32[1,128], index: 16, kind: input, shape index: {}]   ;;  %s8121_s17 = inlined_call_operand.hbm [shape: f32[8,128], index: 17, kind: output, shape index: {}]  }
   0x1   :  { %8122 = sst [smem:[#allocation39_spill]] %s8104_s0 }
   0x2   :  { %8123 = sst [smem:[#allocation40_spill]] %s8105_s1 }
   0x3   :  { %22 = vsyncpa [#allocation3], 0 }
   0x4   :  { %23 = vsyncpa [#allocation6], 0 }
   0x5   :  { %24 = vsyncpa [#allocation9], 0 }
   0x6   :  { %25 = vsyncpa [#allocation12], 0 }
   0x7   :  { %26 = vsyncpa [#allocation15], 0 }
   0x8   :  { %27 = vsyncpa [#allocation18], 0 }
   0x9   :  { %28 = vsyncpa [#allocation21], 0 }
   0xa   :  { %29 = vsyncpa [#allocation24], 0 }
   0xb   :  { %30 = vsyncpa [#allocation27], 0 }
   0xc   :  { %31 = vsyncpa [#allocation4], 0  ;;  %s7487_s24 = smov [#allocation5]   ;;  %s7488_s26 = smov [#allocation8]  }
   0xd   :  { %s50_s25 = sshll.u32 %s7487_s24, 4  ;;  %s72_s27 = sshll.u32 %s7488_s26, 4  ;;  %s51_s25 = int_to_ptr.vmem [resolvable:$true] %s50_s25  ;;  %s73_s27 = int_to_ptr.vmem [resolvable:$true] %s72_s27 }
   0xe   :  { %s7135_s28 = scalar_lea.vmem %s51_s25, 16  ;;  %s7139_s29 = scalar_lea.vmem %s51_s25, 32 }
   0xf   :  { %p7136_p0 = scmp.ne.s32.totalorder %s51_s25, %s7135_s28  ;;  %p7140_p1 = scmp.lt.s32.totalorder %s51_s25, %s51_s25 }
  0x10   :  { %p7141_p2 = scmp.lt.s32.totalorder %s7139_s29, %s7135_s28 }
  0x12   :  { %p7142_p3 = por %p7141_p2, %p7140_p1 }
  0x14   :  { %p7143_p4 = pnand %p7142_p3, %p7136_p0 }
  0x16   :  { %7146 = shalt.err (!%p7143_p4)
}
  0x17   :  { %53 = dma.hbm_to_vmem [thread:$0]  %s8106_s2, 16, %s51_s25, [#allocation6]  }
  0x18   :  { %s7155_s18 = scalar_lea.vmem %s73_s27, 16  ;;  %s7159_s19 = scalar_lea.vmem %s73_s27, 32 }
  0x19   :  { %p7156_p5 = scmp.ne.s32.totalorder %s73_s27, %s7155_s18  ;;  %p7160_p6 = scmp.lt.s32.totalorder %s73_s27, %s73_s27 }
  0x1a   :  { %p7161_p7 = scmp.lt.s32.totalorder %s7159_s19, %s7155_s18 }
  0x1c   :  { %p7162_p8 = por %p7161_p7, %p7160_p6 }
  0x1e   :  { %p7163_p9 = pnand %p7162_p8, %p7156_p5 }
  0x20   :  { %7166 = shalt.err (!%p7163_p9)
}
  0x21   :  { %75 = dma.hbm_to_vmem [thread:$0]  %s8108_s4, 16, %s73_s27, [#allocation9]  }
  0x22   :  { %s7489_s21 = smov [#allocation11]   ;;  %s7490_s23 = smov [#allocation14]  }
  0x23   :  { %s94_s22 = sshll.u32 %s7489_s21, 4  ;;  %s116_s24 = sshll.u32 %s7490_s23, 4  ;;  %s95_s22 = int_to_ptr.vmem [resolvable:$true] %s94_s22  ;;  %s117_s24 = int_to_ptr.vmem [resolvable:$true] %s116_s24 }
  0x24   :  { %s7175_s26 = scalar_lea.vmem %s95_s22, 80  ;;  %s7179_s2 = scalar_lea.vmem %s95_s22, 96 }
  0x25   :  { %p7176_p10 = scmp.ne.s32.totalorder %s95_s22, %s7175_s26  ;;  %p7180_p11 = scmp.lt.s32.totalorder %s95_s22, %s95_s22 }
  0x26   :  { %p7181_p12 = scmp.lt.s32.totalorder %s7179_s2, %s7175_s26 }
  0x28   :  { %p7182_p13 = por %p7181_p12, %p7180_p11 }
  0x2a   :  { %p7183_p0 = pnand %p7182_p13, %p7176_p10 }
  0x2c   :  { %7186 = shalt.err (!%p7183_p0)
}
  0x2d   :  { %97 = dma.hbm_to_vmem [thread:$0]  %s8110_s6, 80, %s95_s22, [#allocation12]  }
  0x2e   :  { %s7195_s29 = scalar_lea.vmem %s117_s24, 128  ;;  %p7200_p2 = scmp.lt.s32.totalorder %s117_s24, %s117_s24 }
  0x2f   :  { %p7196_p1 = scmp.ne.s32.totalorder %s117_s24, %s7195_s29  ;;  %p7201_p3 = scmp.lt.s32.totalorder %s7195_s29, %s7195_s29 }
  0x31   :  { %p7202_p4 = por %p7201_p3, %p7200_p2 }
  0x33   :  { %p7203_p5 = pnand %p7202_p4, %p7196_p1 }
  0x35   :  { %7206 = shalt.err (!%p7203_p5)
}
  0x36   :  { %119 = dma.hbm_to_vmem [thread:$0]  %s8112_s8, 128, %s117_s24, [#allocation15]  }
  0x37   :  { %s7491_s0 = smov [#allocation17]   ;;  %s7492_s18 = smov [#allocation20]  }
  0x38   :  { %s138_s30 = sshll.u32 %s7491_s0, 4  ;;  %s160_s19 = sshll.u32 %s7492_s18, 4  ;;  %s139_s30 = int_to_ptr.vmem [resolvable:$true] %s138_s30  ;;  %s161_s19 = int_to_ptr.vmem [resolvable:$true] %s160_s19 }
  0x39   :  { %s7215_s1 = scalar_lea.vmem %s139_s30, 128  ;;  %p7220_p7 = scmp.lt.s32.totalorder %s139_s30, %s139_s30 }
  0x3a   :  { %p7216_p6 = scmp.ne.s32.totalorder %s139_s30, %s7215_s1  ;;  %p7221_p8 = scmp.lt.s32.totalorder %s7215_s1, %s7215_s1 }
  0x3c   :  { %p7222_p9 = por %p7221_p8, %p7220_p7 }
  0x3e   :  { %p7223_p10 = pnand %p7222_p9, %p7216_p6 }
  0x40   :  { %7226 = shalt.err (!%p7223_p10)
}
  0x41   :  { %141 = dma.hbm_to_vmem [thread:$0]  %s8114_s10, 128, %s139_s30, [#allocation18]  }
  0x42   :  { %s7235_s21 = scalar_lea.vmem %s161_s19, 80  ;;  %s7239_s8 = scalar_lea.vmem %s161_s19, 96 }
  0x43   :  { %p7236_p11 = scmp.ne.s32.totalorder %s161_s19, %s7235_s21  ;;  %p7240_p12 = scmp.lt.s32.totalorder %s161_s19, %s161_s19 }
  0x44   :  { %p7241_p13 = scmp.lt.s32.totalorder %s7239_s8, %s7235_s21 }
  0x46   :  { %p7242_p0 = por %p7241_p13, %p7240_p12 }
  0x48   :  { %p7243_p1 = pnand %p7242_p0, %p7236_p11 }
  0x4a   :  { %7246 = shalt.err (!%p7243_p1)
}
  0x4b   :  { %163 = dma.hbm_to_vmem [thread:$0]  %s8116_s12, 80, %s161_s19, [#allocation21]  }
  0x4c   :  { %s7493_s24 = smov [#allocation23]   ;;  %s7494_s2 = smov [#allocation2]  }
  0x4d   :  { %s182_s26 = sshll.u32 %s7493_s24, 4  ;;  %s40_s25 = sshll.u32 %s7494_s2, 4  ;;  %s183_s26 = int_to_ptr.vmem [resolvable:$true] %s182_s26  ;;  %s41_s25 = int_to_ptr.vmem [resolvable:$true] %s40_s25 }
  0x4e   :  { %s7255_s28 = scalar_lea.vmem %s183_s26, 16  ;;  %s7259_s10 = scalar_lea.vmem %s183_s26, 32 }
  0x4f   :  { %p7256_p2 = scmp.ne.s32.totalorder %s183_s26, %s7255_s28  ;;  %p7260_p3 = scmp.lt.s32.totalorder %s183_s26, %s183_s26 }
  0x50   :  { %p7261_p4 = scmp.lt.s32.totalorder %s7259_s10, %s7255_s28 }
  0x52   :  { %p7262_p5 = por %p7261_p4, %p7260_p3 }
  0x54   :  { %p7263_p6 = pnand %p7262_p5, %p7256_p2 }
  0x56   :  { %7266 = shalt.err (!%p7263_p6)
}
  0x57   :  { %185 = dma.hbm_to_vmem [thread:$0]  %s8118_s14, 16, %s183_s26, [#allocation24]  }
  0x58   :  { %s7275_s27 = scalar_lea.vmem %s41_s25, 16  ;;  %s7279_s12 = scalar_lea.vmem %s41_s25, 32 }
  0x59   :  { %p7276_p7 = scmp.ne.s32.totalorder %s41_s25, %s7275_s27  ;;  %p7280_p8 = scmp.lt.s32.totalorder %s41_s25, %s41_s25 }
  0x5a   :  { %p7281_p9 = scmp.lt.s32.totalorder %s7279_s12, %s7275_s27 }
  0x5c   :  { %p7282_p10 = por %p7281_p9, %p7280_p8 }
  0x5e   :  { %p7283_p11 = pnand %p7282_p10, %p7276_p7 }
  0x60   :  { %7286 = shalt.err (!%p7283_p11)
}
  0x61   :  { %s8124_s18 = sld [smem:[#allocation40_spill]]  ;;  %s7495_s19 = smov [#allocation7]  }
  0x62   :  { %s59_s1 = sshll.u32 %s7495_s19, 4  ;;  %s60_s1 = int_to_ptr.vmem [resolvable:$true] %s59_s1 }
  0x63   :  { %s7295_s6 = scalar_lea.vmem %s60_s1, 2048  ;;  %p7300_p13 = scmp.lt.s32.totalorder %s60_s1, %s60_s1 }
  0x64   :  { %p7296_p12 = scmp.ne.s32.totalorder %s60_s1, %s7295_s6  ;;  %p7301_p0 = scmp.lt.s32.totalorder %s7295_s6, %s7295_s6 }
  0x66   :  { %p7302_p1 = por %p7301_p0, %p7300_p13 }
  0x67   :  { %43 = dma.hbm_to_vmem [thread:$0]  %s8124_s18, 16, %s41_s25, [#allocation3]  }
  0x68   :  { %p7303_p2 = pnand %p7302_p1, %p7296_p12 }
  0x6a   :  { %7306 = shalt.err (!%p7303_p2)
}
  0x6b   :  { %s7496_s14 = smov 128   ;;  %s7497_s20 = smov 8  }
  0x6c   :  { %65 = dma.hbm_to_vmem [thread:$0]  %s8107_s3, 2048, %s60_s1, [#allocation6], %s7496_s14, %s7496_s14, %s7497_s20  }
  0x6d   :  { %s7498_s22 = smov [#allocation10]  }
  0x6e   :  { %s81_s23 = sshll.u32 %s7498_s22, 4  ;;  %s82_s23 = int_to_ptr.vmem [resolvable:$true] %s81_s23 }
  0x6f   :  { %s7315_s24 = scalar_lea.vmem %s82_s23, 10240  ;;  %p7320_p4 = scmp.lt.s32.totalorder %s82_s23, %s82_s23 }
  0x70   :  { %p7316_p3 = scmp.ne.s32.totalorder %s82_s23, %s7315_s24  ;;  %p7321_p5 = scmp.lt.s32.totalorder %s7315_s24, %s7315_s24 }
  0x72   :  { %p7322_p6 = por %p7321_p5, %p7320_p4 }
  0x74   :  { %p7323_p7 = pnand %p7322_p6, %p7316_p3 }
  0x76   :  { %7326 = shalt.err (!%p7323_p7)
}
  0x77   :  { %s7499_s26 = smov 640   ;;  %s7500_s2 = smov 40  }
  0x78   :  { %87 = dma.hbm_to_vmem [thread:$0]  %s8109_s5, 10240, %s82_s23, [#allocation9], %s7499_s26, %s7499_s26, %s7500_s2  }
  0x79   :  { %s7501_s3 = smov [#allocation13]  }
  0x7a   :  { %s103_s10 = sshll.u32 %s7501_s3, 4  ;;  %s104_s10 = int_to_ptr.vmem [resolvable:$true] %s103_s10 }
  0x7b   :  { %s7335_s29 = scalar_lea.vmem %s104_s10, 81920  ;;  %p7340_p9 = scmp.lt.s32.totalorder %s104_s10, %s104_s10 }
  0x7c   :  { %p7336_p8 = scmp.ne.s32.totalorder %s104_s10, %s7335_s29  ;;  %p7341_p10 = scmp.lt.s32.totalorder %s7335_s29, %s7335_s29 }
  0x7e   :  { %p7342_p11 = por %p7341_p10, %p7340_p9 }
  0x80   :  { %p7343_p12 = pnand %p7342_p11, %p7336_p8 }
  0x82   :  { %7346 = shalt.err (!%p7343_p12)
}
  0x83   :  { %s7502_s4 = smov 1024   ;;  %s7503_s27 = smov 64  }
  0x84   :  { %109 = dma.hbm_to_vmem [thread:$0]  %s8111_s7, 81920, %s104_s10, [#allocation12], %s7502_s4, %s7502_s4, %s7503_s27  }
  0x85   :  { %s7504_s30 = smov [#allocation16]   ;;  %s7505_s5 = smov [#allocation19]  }
  0x86   :  { %s125_s18 = sshll.u32 %s7504_s30, 4  ;;  %s147_s19 = sshll.u32 %s7505_s5, 4  ;;  %s126_s18 = int_to_ptr.vmem [resolvable:$true] %s125_s18  ;;  %s148_s19 = int_to_ptr.vmem [resolvable:$true] %s147_s19 }
  0x87   :  { %s7355_s1 = scalar_lea.vmem %s126_s18, 131072  ;;  %p7360_p0 = scmp.lt.s32.totalorder %s126_s18, %s126_s18 }
  0x88   :  { %p7356_p13 = scmp.ne.s32.totalorder %s126_s18, %s7355_s1  ;;  %p7361_p1 = scmp.lt.s32.totalorder %s7355_s1, %s7355_s1 }
  0x8a   :  { %p7362_p2 = por %p7361_p1, %p7360_p0 }
  0x8c   :  { %p7363_p3 = pnand %p7362_p2, %p7356_p13 }
  0x8e   :  { %7366 = shalt.err (!%p7363_p3)
}
  0x8f   :  { %131 = dma.hbm_to_vmem [thread:$0]  %s8113_s9, 131072, %s126_s18, [#allocation15], %s7502_s4, %s7502_s4, %s7503_s27  }
  0x90   :  { %s7375_s8 = scalar_lea.vmem %s148_s19, 81920  ;;  %p7380_p5 = scmp.lt.s32.totalorder %s148_s19, %s148_s19 }
  0x91   :  { %p7376_p4 = scmp.ne.s32.totalorder %s148_s19, %s7375_s8  ;;  %p7381_p6 = scmp.lt.s32.totalorder %s7375_s8, %s7375_s8 }
  0x93   :  { %p7382_p7 = por %p7381_p6, %p7380_p5 }
  0x95   :  { %p7383_p8 = pnand %p7382_p7, %p7376_p4 }
  0x97   :  { %7386 = shalt.err (!%p7383_p8)
}
  0x98   :  { %153 = dma.hbm_to_vmem [thread:$0]  %s8115_s11, 81920, %s148_s19, [#allocation18], %s7499_s26, %s7499_s26, %s7500_s2  }
  0x99   :  { %s7506_s23 = smov [#allocation22]   ;;  %s7507_s25 = smov [#allocation25]  }
  0x9a   :  { %s169_s24 = sshll.u32 %s7506_s23, 4  ;;  %s191_s9 = sshll.u32 %s7507_s25, 4  ;;  %s170_s24 = int_to_ptr.vmem [resolvable:$true] %s169_s24  ;;  %s192_s9 = int_to_ptr.vmem [resolvable:$true] %s191_s9 }
  0x9b   :  { %s7395_s28 = scalar_lea.vmem %s170_s24, 10240  ;;  %p7400_p10 = scmp.lt.s32.totalorder %s170_s24, %s170_s24 }
  0x9c   :  { %p7396_p9 = scmp.ne.s32.totalorder %s170_s24, %s7395_s28  ;;  %p7401_p11 = scmp.lt.s32.totalorder %s7395_s28, %s7395_s28 }
  0x9e   :  { %p7402_p12 = por %p7401_p11, %p7400_p10 }
  0xa0   :  { %p7403_p13 = pnand %p7402_p12, %p7396_p9 }
  0xa2   :  { %7406 = shalt.err (!%p7403_p13)
}
  0xa3   :  { %175 = dma.hbm_to_vmem [thread:$0]  %s8117_s13, 10240, %s170_s24, [#allocation21], %s7496_s14, %s7496_s14, %s7497_s20  }
  0xa4   :  { %s7415_s11 = scalar_lea.vmem %s192_s9, 2048  ;;  %p7420_p1 = scmp.lt.s32.totalorder %s192_s9, %s192_s9 }
  0xa5   :  { %p7416_p0 = scmp.ne.s32.totalorder %s192_s9, %s7415_s11  ;;  %p7421_p2 = scmp.lt.s32.totalorder %s7415_s11, %s7415_s11 }
  0xa7   :  { %p7422_p3 = por %p7421_p2, %p7420_p1 }
  0xa9   :  { %p7423_p4 = pnand %p7422_p3, %p7416_p0 }
  0xab   :  { %7426 = shalt.err (!%p7423_p4)
}
  0xac   :  { %197 = dma.hbm_to_vmem [thread:$0]  %s8119_s15, 2048, %s192_s9, [#allocation24], %s7496_s14, %s7496_s14, %s7497_s20  }
  0xad   :  { %s7508_s29 = smov [#allocation26]  }
  0xae   :  { %s204_s4 = sshll.u32 %s7508_s29, 4  ;;  %s205_s4 = int_to_ptr.vmem [resolvable:$true] %s204_s4 }
  0xaf   :  { %s7435_s27 = scalar_lea.vmem %s205_s4, 16  ;;  %s7439_s13 = scalar_lea.vmem %s205_s4, 32 }
  0xb0   :  { %p7436_p5 = scmp.ne.s32.totalorder %s205_s4, %s7435_s27  ;;  %p7440_p6 = scmp.lt.s32.totalorder %s205_s4, %s205_s4 }
  0xb1   :  { %p7441_p7 = scmp.lt.s32.totalorder %s7439_s13, %s7435_s27 }
  0xb3   :  { %p7442_p8 = por %p7441_p7, %p7440_p6 }
  0xb5   :  { %p7443_p9 = pnand %p7442_p8, %p7436_p5 }
  0xb7   :  { %7446 = shalt.err (!%p7443_p9)
}
  0xb8   :  { %207 = dma.hbm_to_vmem [thread:$0]  %s8120_s16, 16, %s205_s4, [#allocation27]  }
  0xb9   :  { %7467 = dma.done.wait [#allocation3], 16  }
  0xba   :  { %7468 = vsyncadd [#allocation3], 4294967280 }
  0xbb   :  { %7469 = dma.done.wait [#allocation6], 2064  }
  0xbc   :  { %7470 = vsyncadd [#allocation6], 4294965232 }
  0xbd   :  { %7471 = dma.done.wait [#allocation9], 10256  }
  0xbe   :  { %7472 = vsyncadd [#allocation9], 4294957040 }
  0xbf   :  { %7473 = dma.done.wait [#allocation12], 82000  }
  0xc0   :  { %7474 = vsyncadd [#allocation12], 4294885296 }
  0xc1   :  { %7475 = dma.done.wait [#allocation15], 131200  }
  0xc2   :  { %7476 = vsyncadd [#allocation15], 4294836096 }
  0xc3   :  { %7477 = dma.done.wait [#allocation18], 82048  }
  0xc4   :  { %7478 = vsyncadd [#allocation18], 4294885248 }
  0xc5   :  { %7479 = dma.done.wait [#allocation21], 10320  }
  0xc6   :  { %7480 = vsyncadd [#allocation21], 4294956976 }
  0xc7   :  { %7481 = dma.done.wait [#allocation24], 2064  }
  0xc8   :  { %7482 = vsyncadd [#allocation24], 4294965232 }
  0xc9   :  { %7483 = dma.done.wait [#allocation27], 16  }
  0xca   :  { %7484 = vsyncadd [#allocation27], 4294967280  ;;  %v7509_v0 = vmov 0   ;;  %v7510_v1 = vmov 0.0   ;;  %s8125_s14 = sld [smem:[#allocation39_spill]]  ;;  %v302_v3 = vld [vmem:[#allocation7 + $0x78] sm:$0xff] }
  0xcb   :  { %7065 = vset.pattern.permute.xlu0 %v7509_v0  ;;  %6899 = vmatprep.subr.mxu0 %v7510_v1  ;;  %v301_v4 = vld [vmem:[#allocation7 + $0x70] sm:$0xff]  ;;  %v300_v5 = vld [vmem:[#allocation7 + $0x68] sm:$0xff]  ;;  %v299_v6 = vld [vmem:[#allocation7 + $0x60] sm:$0xff]  ;;  %vm7511_vm0 = vmmov 0   ;;  %s7512_s20 = smov [#allocation28]  }
  0xcc   :  { %560 = vmatprep.mubr.f32.mxu1 %v7510_v1  ;;  %6900 = vmatpush3.msra.mxu0 %v302_v3  ;;  %v298_v7 = vld [vmem:[#allocation7 + $0x58] sm:$0xff]  ;;  %v297_v8 = vld [vmem:[#allocation7 + $0x50] sm:$0xff]  ;;  %v296_v9 = vld [vmem:[#allocation7 + $0x48] sm:$0xff]  ;;  %s6599_s30 = sshll.u32 %s7512_s20, 4  ;;  %s6600_s30 = int_to_ptr.vmem [resolvable:$true] %s6599_s30 }
  0xcd   :  { %6901 = vmatprep.subr.mxu0 %v7510_v1  ;;  %6931 = vmatprep.mubr.msk.f32.mxu0 %vm7511_vm0, %v7510_v1  ;;  %v295_v10 = vld [vmem:[#allocation7 + $0x40] sm:$0xff]  ;;  %v294_v11 = vld [vmem:[#allocation7 + $0x38] sm:$0xff]  ;;  %v293_v12 = vld [vmem:[#allocation7 + $0x30] sm:$0xff]  ;;  %s7447_s18 = scalar_lea.vmem %s6600_s30, 128  ;;  %p7452_p11 = scmp.lt.s32.totalorder %s6600_s30, %s6600_s30 }
  0xce   :  { %6902 = vmatpush3.msra.mxu0 %v301_v4  ;;  %v292_v13 = vld [vmem:[#allocation7 + $0x28] sm:$0xff]  ;;  %v291_v14 = vld [vmem:[#allocation7 + $0x20] sm:$0xff]  ;;  %v290_v15 = vld [vmem:[#allocation7 + $0x18] sm:$0xff]  ;;  %p7448_p10 = scmp.ne.s32.totalorder %s6600_s30, %s7447_s18  ;;  %p7453_p12 = scmp.lt.s32.totalorder %s7447_s18, %s7447_s18 }
  0xcf   :  { %6903 = vmatprep.subr.mxu0 %v7510_v1  ;;  %v289_v16 = vld [vmem:[#allocation7 + $0x10] sm:$0xff]  ;;  %v288_v17 = vld [vmem:[#allocation7 + $0x8] sm:$0xff]  ;;  %v287_v18 = vld [vmem:[#allocation7] sm:$0xff] }
  0xd0   :  { %v256_v2 = vld [vmem:[%s8125_s14] sm:$0xff]  ;;  %6904 = vmatpush3.msra.mxu0 %v300_v5  ;;  %v467_v21 = vld [vmem:[#allocation10 + $0x270] sm:$0xff]  ;;  %v466_v37 = vld [vmem:[#allocation10 + $0x268] sm:$0xff]  ;;  %p7454_p13 = por %p7453_p12, %p7452_p11 }
  0xd1   :  { %260 = vperm.xlu0 %7065, %v256_v2   ;;  %6905 = vmatprep.subr.mxu0 %v7510_v1  ;;  %v465_v19 = vld [vmem:[#allocation10 + $0x260] sm:$0xff]  ;;  %v464_v20 = vld [vmem:[#allocation10 + $0x258] sm:$0xff]  ;;  %v459_v38 = vld [vmem:[#allocation10 + $0x230] sm:$0xff] }
  0xd2   :  { %6906 = vmatpush3.msra.mxu0 %v299_v6  ;;  %496 = vmatprep.subr.mxu1 %v465_v19  ;;  %v6616_v22 = vld [vmem:[#allocation2] ss:$0 sm:$0xff]  ;;  %v6617_v23 = vld [vmem:[#allocation5] ss:$0 sm:$0xff]  ;;  %v462_v39 = vld [vmem:[#allocation10 + $0x248] sm:$0xff]  ;;  %p7455_p0 = pnand %p7454_p13, %p7448_p10 }
  0xd3   :  { %6907 = vmatprep.subr.mxu0 %v7510_v1  ;;  %497 = vmatpush1.msra.mxu1 %v464_v20  ;;  %v460_v36 = vld [vmem:[#allocation10 + $0x238] sm:$0xff]  ;;  %v455_v40 = vld [vmem:[#allocation10 + $0x210] sm:$0xff]  ;;  %v461_v41 = vld [vmem:[#allocation10 + $0x240] sm:$0xff] }
  0xd4   :  { %6908 = vmatpush3.msra.mxu0 %v298_v7  ;;  %498 = vmatprep.subr.mxu1 %v460_v36  ;;  %v454_v42 = vld [vmem:[#allocation10 + $0x208] sm:$0xff]  ;;  %v457_v43 = vld [vmem:[#allocation10 + $0x220] sm:$0xff]  ;;  %v456_v45 = vld [vmem:[#allocation10 + $0x218] sm:$0xff] }
  0xd5   :  { %6909 = vmatprep.subr.mxu0 %v7510_v1  ;;  %499 = vmatpush1.msra.mxu1 %v459_v38  ;;  %v450_v44 = vld [vmem:[#allocation10 + $0x1e8] sm:$0xff]  ;;  %v449_v46 = vld [vmem:[#allocation10 + $0x1e0] sm:$0xff]  ;;  %v452_v47 = vld [vmem:[#allocation10 + $0x1f8] sm:$0xff] }
  0xd6   :  { %6910 = vmatpush3.msra.mxu0 %v297_v8  ;;  %500 = vmatprep.subr.mxu1 %v455_v40  ;;  %v445_v48 = vld [vmem:[#allocation10 + $0x1c0] sm:$0xff]  ;;  %v451_v49 = vld [vmem:[#allocation10 + $0x1f0] sm:$0xff]  ;;  %v444_v50 = vld [vmem:[#allocation10 + $0x1b8] sm:$0xff] }
  0xd7   :  { %6911 = vmatprep.subr.mxu0 %v7510_v1  ;;  %501 = vmatpush1.msra.mxu1 %v454_v42  ;;  %v447_v51 = vld [vmem:[#allocation10 + $0x1d0] sm:$0xff]  ;;  %v440_v52 = vld [vmem:[#allocation10 + $0x198] sm:$0xff]  ;;  %v446_v53 = vld [vmem:[#allocation10 + $0x1c8] sm:$0xff] }
  0xd8   :  { %6912 = vmatpush3.msra.mxu0 %v296_v9  ;;  %502 = vmatprep.subr.mxu1 %v450_v44  ;;  %v439_v54 = vld [vmem:[#allocation10 + $0x190] sm:$0xff]  ;;  %v442_v55 = vld [vmem:[#allocation10 + $0x1a8] sm:$0xff]  ;;  %v441_v57 = vld [vmem:[#allocation10 + $0x1a0] sm:$0xff] }
  0xd9   :  { %6913 = vmatprep.subr.mxu0 %v7510_v1  ;;  %503 = vmatpush1.msra.mxu1 %v449_v46  ;;  %v435_v56 = vld [vmem:[#allocation10 + $0x170] sm:$0xff]  ;;  %v434_v58 = vld [vmem:[#allocation10 + $0x168] sm:$0xff]  ;;  %v437_v59 = vld [vmem:[#allocation10 + $0x180] sm:$0xff] }
  0xda   :  { %6914 = vmatpush3.msra.mxu0 %v295_v10  ;;  %504 = vmatprep.subr.mxu1 %v445_v48  ;;  %v430_v60 = vld [vmem:[#allocation10 + $0x148] sm:$0xff]  ;;  %v436_v61 = vld [vmem:[#allocation10 + $0x178] sm:$0xff]  ;;  %v429_v62 = vld [vmem:[#allocation10 + $0x140] sm:$0xff] }
  0xdb   :  { %6915 = vmatprep.subr.mxu0 %v7510_v1  ;;  %505 = vmatpush1.msra.mxu1 %v444_v50  ;;  %v432_v63 = vld [vmem:[#allocation10 + $0x158] sm:$0xff]  ;;  %v425_v0 = vld [vmem:[#allocation10 + $0x120] sm:$0xff]  ;;  %v431_v2 = vld [vmem:[#allocation10 + $0x150] sm:$0xff] }
  0xdc   :  { %6916 = vmatpush3.msra.mxu0 %v294_v11  ;;  %506 = vmatprep.subr.mxu1 %v440_v52  ;;  %v424_v3 = vld [vmem:[#allocation10 + $0x118] sm:$0xff]  ;;  %v427_v4 = vld [vmem:[#allocation10 + $0x130] sm:$0xff]  ;;  %v426_v6 = vld [vmem:[#allocation10 + $0x128] sm:$0xff] }
  0xdd   :  { %6917 = vmatprep.subr.mxu0 %v7510_v1  ;;  %507 = vmatpush1.msra.mxu1 %v439_v54  ;;  %v420_v5 = vld [vmem:[#allocation10 + $0xf8] sm:$0xff]  ;;  %v419_v7 = vld [vmem:[#allocation10 + $0xf0] sm:$0xff]  ;;  %v422_v8 = vld [vmem:[#allocation10 + $0x108] sm:$0xff] }
  0xde   :  { %6918 = vmatpush3.msra.mxu0 %v293_v12  ;;  %508 = vmatprep.subr.mxu1 %v435_v56  ;;  %v415_v9 = vld [vmem:[#allocation10 + $0xd0] sm:$0xff]  ;;  %v421_v10 = vld [vmem:[#allocation10 + $0x100] sm:$0xff]  ;;  %v414_v11 = vld [vmem:[#allocation10 + $0xc8] sm:$0xff] }
  0xdf   :  { %6919 = vmatprep.subr.mxu0 %v7510_v1  ;;  %509 = vmatpush1.msra.mxu1 %v434_v58  ;;  %v417_v12 = vld [vmem:[#allocation10 + $0xe0] sm:$0xff]  ;;  %v404_v19 = vld [vmem:[#allocation10 + $0x78] sm:$0xff]  ;;  %v407_v20 = vld [vmem:[#allocation10 + $0x90] sm:$0xff] }
  0xe0   :  { %6920 = vmatpush3.msra.mxu0 %v292_v13  ;;  %510 = vmatprep.subr.mxu1 %v430_v60  ;;  %v410_v13 = vld [vmem:[#allocation10 + $0xa8] sm:$0xff]  ;;  %v468_v48 = vld [vmem:[#allocation10 + $0x278] sm:$0xff]  ;;  %v463_v50 = vld [vmem:[#allocation10 + $0x250] sm:$0xff] }
  0xe1   :  { %6921 = vmatprep.subr.mxu0 %v7510_v1  ;;  %511 = vmatpush1.msra.mxu1 %v429_v62  ;;  %v865_v52 = vld [vmem:[#allocation13 + $0x380] sm:$0xff]  ;;  %v858_v54 = vld [vmem:[#allocation13 + $0x348] sm:$0xff] }
  0xe2   :  { %6922 = vmatpush3.msra.mxu0 %v291_v14  ;;  %512 = vmatprep.subr.mxu1 %v425_v0  ;;  %v416_v14 = vld [vmem:[#allocation10 + $0xd8] sm:$0xff]  ;;  %v453_v56 = vld [vmem:[#allocation10 + $0x200] sm:$0xff]  ;;  %v842_v60 = vld [vmem:[#allocation13 + $0x2c8] sm:$0xff] }
  0xe3   :  { %6923 = vmatprep.subr.mxu0 %v7510_v1  ;;  %513 = vmatpush1.msra.mxu1 %v424_v3  ;;  %v849_v58 = vld [vmem:[#allocation13 + $0x300] sm:$0xff]  ;;  %v443_v62 = vld [vmem:[#allocation10 + $0x1b0] sm:$0xff] }
  0xe4   :  { %6924 = vmatpush3.msra.mxu0 %v290_v15  ;;  %514 = vmatprep.subr.mxu1 %v420_v5  ;;  %v409_v15 = vld [vmem:[#allocation10 + $0xa0] sm:$0xff]  ;;  %v826_v3 = vld [vmem:[#allocation13 + $0x248] sm:$0xff] }
  0xe5   :  { %6925 = vmatprep.subr.mxu0 %v7510_v1  ;;  %515 = vmatpush1.msra.mxu1 %v419_v7  ;;  %v833_v0 = vld [vmem:[#allocation13 + $0x280] sm:$0xff] }
  0xe6   :  { %6926 = vmatpush3.msra.mxu0 %v289_v16  ;;  %516 = vmatprep.subr.mxu1 %v415_v9  ;;  %v412_v16 = vld [vmem:[#allocation10 + $0xb8] sm:$0xff]  ;;  %v433_v5 = vld [vmem:[#allocation10 + $0x160] sm:$0xff]  ;;  %v810_v9 = vld [vmem:[#allocation13 + $0x1c8] sm:$0xff] }
  0xe7   :  { %6927 = vmatprep.subr.mxu0 %v7510_v1  ;;  %517 = vmatpush1.msra.mxu1 %v414_v11  ;;  %v817_v7 = vld [vmem:[#allocation13 + $0x200] sm:$0xff]  ;;  %v423_v11 = vld [vmem:[#allocation10 + $0x110] sm:$0xff] }
  0xe8   :  { %6928 = vmatpush3.msra.mxu0 %v288_v17  ;;  %v405_v17 = vld [vmem:[#allocation10 + $0x80] sm:$0xff]  ;;  %518 = vmatprep.subr.mxu1 %v410_v13 }
  0xe9   :  { %6929 = vmatprep.subr.mxu0 %v7510_v1  ;;  %519 = vmatpush1.msra.mxu1 %v409_v15  ;;  %v801_v13 = vld [vmem:[#allocation13 + $0x180] sm:$0xff]  ;;  %v794_v15 = vld [vmem:[#allocation13 + $0x148] sm:$0xff] }
  0xea   :  { %6930 = vmatpush3.msra.mxu0 %v287_v18  ;;  %v411_v18 = vld [vmem:[#allocation10 + $0xb0] sm:$0xff]  ;;  %520 = vmatprep.subr.mxu1 %v405_v17  ;;  %v413_v17 = vld [vmem:[#allocation10 + $0xc0] sm:$0xff] }
  0xeb   :  { %567 = vmatprep.subr.mxu0 %v467_v21  ;;  %v400_v21 = vld [vmem:[#allocation10 + $0x58] sm:$0xff]  ;;  %521 = vmatpush1.msra.mxu1 %v404_v19  ;;  %v785_v19 = vld [vmem:[#allocation13 + $0x100] sm:$0xff] }
  0xec   :  { %522 = vmatprep.subr.mxu1 %v400_v21  ;;  %v778_v21 = vld [vmem:[#allocation13 + $0xc8] sm:$0xff] }
 0x14c   :  { %v261_v24 = vpop.permute.xlu0 %260 }
 0x14d   :  { %v269_v25 = vmul.f32 %v6616_v22, %v261_v24  ;;  %v406_v22 = vld [vmem:[#allocation10 + $0x88] sm:$0xff] }
 0x14e   :  { %v402_v24 = vld [vmem:[#allocation10 + $0x68] sm:$0xff] }
 0x14f   :  { %v277_v26 = vadd.f32 %v6617_v23, %v269_v25  ;;  %v399_v23 = vld [vmem:[#allocation10 + $0x50] sm:$0xff] }
 0x150   :  { %v395_v25 = vld [vmem:[#allocation10 + $0x30] sm:$0xff]  ;;  %523 = vmatpush1.msra.mxu1 %v399_v23 }
 0x151   :  { %v279_v27 = vmul.f32 %v277_v26, %v277_v26  ;;  %v278_v33 = vmul.f32 0.5, %v277_v26  ;;  %524 = vmatprep.subr.mxu1 %v395_v25  ;;  %v403_v23 = vld [vmem:[#allocation10 + $0x70] sm:$0xff]  ;;  %v769_v25 = vld [vmem:[#allocation13 + $0x80] sm:$0xff] }
 0x153   :  { %v280_v28 = vmul.f32 %v279_v27, %v277_v26  ;;  %v394_v27 = vld [vmem:[#allocation10 + $0x28] sm:$0xff] }
 0x154   :  { %525 = vmatpush1.msra.mxu1 %v394_v27  ;;  %v762_v27 = vld [vmem:[#allocation13 + $0x48] sm:$0xff] }
 0x155   :  { %v281_v29 = vmul.f32 0.044715, %v280_v28  ;;  %v397_v28 = vld [vmem:[#allocation10 + $0x40] sm:$0xff] }
 0x157   :  { %v282_v30 = vadd.f32 %v281_v29, %v277_v26  ;;  %v401_v26 = vld [vmem:[#allocation10 + $0x60] sm:$0xff]  ;;  %v390_v29 = vld [vmem:[#allocation10 + $0x8] sm:$0xff] }
 0x158   :  { %526 = vmatprep.subr.mxu1 %v390_v29  ;;  %v393_v29 = vld [vmem:[#allocation10 + $0x20] sm:$0xff] }
 0x159   :  { %v283_v31 = vmul.f32 0.7978846, %v282_v30  ;;  %v396_v30 = vld [vmem:[#allocation10 + $0x38] sm:$0xff] }
 0x15b   :  { %7066 = vtanh.f32 %v283_v31  ;;  %v389_v31 = vld [vmem:[#allocation10] sm:$0xff] }
 0x15c   :  { %527 = vmatpush1.msra.mxu1 %v389_v31  ;;  %v1130_v31 = vld [vmem:[#allocation13 + $0xbc8] sm:$0xff] }
 0x15d   :  { %6934 = vmatprep.subr.mxu1 %v7510_v1 }
 0x168   :  { %v7067_v32 = vpop.eup %7066 }
 0x169   :  { %v285_v34 = vadd.f32 1.0, %v7067_v32  ;;  %v392_v32 = vld [vmem:[#allocation10 + $0x18] sm:$0xff] }
 0x16b   :  { %v286_v35 = vmul.f32 %v285_v34, %v278_v33  ;;  %v391_v33 = vld [vmem:[#allocation10 + $0x10] sm:$0xff] }
 0x16c   :  { %v874_v34 = vld [vmem:[#allocation13 + $0x3c8] sm:$0xff] }
 0x16d   :  { %6932 = vmatmul.mubr.f32.vlgmr.msra.gmra.mxu0 %v286_v35  ;;  %v6618_v35 = vld [vmem:[#allocation8] ss:$0 sm:$0xff] }
 0x16e   :  { %631 = vmatprep.mubr.f32.mxu0 %v7510_v1  ;;  %568 = vmatpush1.msra.mxu0 %v466_v37 }
 0x16f   :  { %569 = vmatprep.subr.mxu0 %v462_v39 }
 0x170   :  { %570 = vmatpush1.msra.mxu0 %v461_v41 }
 0x171   :  { %571 = vmatprep.subr.mxu0 %v457_v43 }
 0x172   :  { %572 = vmatpush1.msra.mxu0 %v456_v45 }
 0x173   :  { %573 = vmatprep.subr.mxu0 %v452_v47 }
 0x174   :  { %574 = vmatpush1.msra.mxu0 %v451_v49  ;;  %v873_v49 = vld [vmem:[#allocation13 + $0x3c0] sm:$0xff] }
 0x175   :  { %575 = vmatprep.subr.mxu0 %v447_v51  ;;  %v866_v51 = vld [vmem:[#allocation13 + $0x388] sm:$0xff] }
 0x176   :  { %576 = vmatpush1.msra.mxu0 %v446_v53  ;;  %v458_v53 = vld [vmem:[#allocation10 + $0x228] sm:$0xff] }
 0x177   :  { %577 = vmatprep.subr.mxu0 %v442_v55  ;;  %v857_v55 = vld [vmem:[#allocation13 + $0x340] sm:$0xff] }
 0x178   :  { %578 = vmatpush1.msra.mxu0 %v441_v57  ;;  %v850_v57 = vld [vmem:[#allocation13 + $0x308] sm:$0xff] }
 0x179   :  { %579 = vmatprep.subr.mxu0 %v437_v59  ;;  %v448_v59 = vld [vmem:[#allocation10 + $0x1d8] sm:$0xff] }
 0x17a   :  { %580 = vmatpush1.msra.mxu0 %v436_v61  ;;  %v841_v61 = vld [vmem:[#allocation13 + $0x2c0] sm:$0xff] }
 0x17b   :  { %581 = vmatprep.subr.mxu0 %v432_v63  ;;  %v834_v63 = vld [vmem:[#allocation13 + $0x288] sm:$0xff] }
 0x17c   :  { %582 = vmatpush1.msra.mxu0 %v431_v2  ;;  %v438_v2 = vld [vmem:[#allocation10 + $0x188] sm:$0xff] }
 0x17d   :  { %583 = vmatprep.subr.mxu0 %v427_v4  ;;  %v825_v4 = vld [vmem:[#allocation13 + $0x240] sm:$0xff] }
 0x17e   :  { %584 = vmatpush1.msra.mxu0 %v426_v6  ;;  %v818_v6 = vld [vmem:[#allocation13 + $0x208] sm:$0xff] }
 0x17f   :  { %585 = vmatprep.subr.mxu0 %v422_v8  ;;  %v428_v8 = vld [vmem:[#allocation10 + $0x138] sm:$0xff] }
 0x180   :  { %586 = vmatpush1.msra.mxu0 %v421_v10  ;;  %v809_v10 = vld [vmem:[#allocation13 + $0x1c0] sm:$0xff] }
 0x181   :  { %587 = vmatprep.subr.mxu0 %v417_v12  ;;  %v802_v12 = vld [vmem:[#allocation13 + $0x188] sm:$0xff] }
 0x182   :  { %588 = vmatpush1.msra.mxu0 %v416_v14  ;;  %v418_v14 = vld [vmem:[#allocation10 + $0xe8] sm:$0xff] }
 0x183   :  { %589 = vmatprep.subr.mxu0 %v412_v16  ;;  %v793_v16 = vld [vmem:[#allocation13 + $0x140] sm:$0xff] }
 0x184   :  { %590 = vmatpush1.msra.mxu0 %v411_v18  ;;  %v786_v18 = vld [vmem:[#allocation13 + $0x108] sm:$0xff] }
 0x185   :  { %591 = vmatprep.subr.mxu0 %v407_v20  ;;  %v408_v20 = vld [vmem:[#allocation10 + $0x98] sm:$0xff] }
 0x186   :  { %592 = vmatpush1.msra.mxu0 %v406_v22  ;;  %v777_v22 = vld [vmem:[#allocation13 + $0xc0] sm:$0xff] }
 0x187   :  { %593 = vmatprep.subr.mxu0 %v402_v24  ;;  %v770_v24 = vld [vmem:[#allocation13 + $0x88] sm:$0xff] }
 0x188   :  { %594 = vmatpush1.msra.mxu0 %v401_v26  ;;  %v398_v26 = vld [vmem:[#allocation10 + $0x48] sm:$0xff] }
 0x189   :  { %595 = vmatprep.subr.mxu0 %v397_v28  ;;  %v761_v28 = vld [vmem:[#allocation13 + $0x40] sm:$0xff] }
 0x18a   :  { %596 = vmatpush1.msra.mxu0 %v396_v30  ;;  %v754_v30 = vld [vmem:[#allocation13 + $0x8] sm:$0xff] }
 0x18b   :  { %597 = vmatprep.subr.mxu0 %v392_v32  ;;  %v1129_v32 = vld [vmem:[#allocation13 + $0xbc0] sm:$0xff] }
 0x18c   :  { %598 = vmatpush1.msra.mxu0 %v391_v33  ;;  %v1122_v33 = vld [vmem:[#allocation13 + $0xb88] sm:$0xff] }
 0x18d   :  { %1435 = vmatprep.subr.mxu0 %v874_v34  ;;  %v1121_v34 = vld [vmem:[#allocation13 + $0xb80] sm:$0xff] }
 0x22d   :  { %v376_v36 = vpop.f32.mrf.mxu0 }
 0x22e   :  { %v377_v37 = vadd.f32 %v6618_v35, %v376_v36  ;;  %v1114_v35 = vld [vmem:[#allocation13 + $0xb48] sm:$0xff]  ;;  %v1113_v36 = vld [vmem:[#allocation13 + $0xb40] sm:$0xff] }
 0x22f   :  { %v6933_v38 = vpop.f32.mrf.mxu0 }
 0x230   :  { %v381_v39 = vmul.f32 %v377_v37, %v377_v37  ;;  %v380_v45 = vmul.f32 0.5, %v377_v37  ;;  %v1105_v38 = vld [vmem:[#allocation13 + $0xb00] sm:$0xff] }
 0x232   :  { %v382_v40 = vmul.f32 %v381_v39, %v377_v37  ;;  %v1098_v39 = vld [vmem:[#allocation13 + $0xac8] sm:$0xff] }
 0x234   :  { %v383_v41 = vmul.f32 0.044715, %v382_v40  ;;  %v1097_v40 = vld [vmem:[#allocation13 + $0xac0] sm:$0xff] }
 0x236   :  { %v384_v42 = vadd.f32 %v383_v41, %v377_v37  ;;  %v1106_v37 = vld [vmem:[#allocation13 + $0xb08] sm:$0xff] }
 0x237   :  { %v1090_v41 = vld [vmem:[#allocation13 + $0xa88] sm:$0xff] }
 0x238   :  { %v385_v43 = vmul.f32 0.7978846, %v384_v42  ;;  %v1089_v42 = vld [vmem:[#allocation13 + $0xa80] sm:$0xff] }
 0x23a   :  { %7068 = vtanh.f32 %v385_v43  ;;  %v1082_v43 = vld [vmem:[#allocation13 + $0xa48] sm:$0xff] }
 0x247   :  { %v7069_v44 = vpop.eup %7068 }
 0x248   :  { %v387_v46 = vadd.f32 1.0, %v7069_v44  ;;  %v1081_v44 = vld [vmem:[#allocation13 + $0xa40] sm:$0xff] }
 0x24a   :  { %v7690_v47 = vmul.f32 %v387_v46, %v380_v45  ;;  %v1074_v45 = vld [vmem:[#allocation13 + $0xa08] sm:$0xff]  ;;  %v1073_v46 = vld [vmem:[#allocation13 + $0xa00] sm:$0xff] }
 0x24c   :  { %561 = vmatmul.mubr.f32.vlgmr.msra.gmra.mxu1 %v7690_v47  ;;  %632 = vmatmul.mubr.f32.vlgmr.msra.gmra.mxu0 %v7690_v47 }
 0x24d   :  { %6935 = vmatpush3.msra.mxu1 %v468_v48  ;;  %6966 = vmatprep.mubr.msk.f32.mxu1 %vm7511_vm0, %v7510_v1  ;;  %v1065_v48 = vld [vmem:[#allocation13 + $0x9c0] sm:$0xff] }
 0x24e   :  { %6936 = vmatprep.subr.mxu1 %v7510_v1  ;;  %1436 = vmatpush1.msra.mxu0 %v873_v49  ;;  %v1058_v49 = vld [vmem:[#allocation13 + $0x988] sm:$0xff] }
 0x24f   :  { %6937 = vmatpush3.msra.mxu1 %v463_v50  ;;  %1437 = vmatprep.subr.mxu0 %v866_v51  ;;  %v1057_v50 = vld [vmem:[#allocation13 + $0x980] sm:$0xff]  ;;  %v1050_v51 = vld [vmem:[#allocation13 + $0x948] sm:$0xff] }
 0x250   :  { %6938 = vmatprep.subr.mxu1 %v7510_v1  ;;  %1438 = vmatpush1.msra.mxu0 %v865_v52  ;;  %v1049_v52 = vld [vmem:[#allocation13 + $0x940] sm:$0xff] }
 0x251   :  { %6939 = vmatpush3.msra.mxu1 %v458_v53  ;;  %1439 = vmatprep.subr.mxu0 %v858_v54  ;;  %v1042_v53 = vld [vmem:[#allocation13 + $0x908] sm:$0xff]  ;;  %v1041_v54 = vld [vmem:[#allocation13 + $0x900] sm:$0xff] }
 0x252   :  { %6940 = vmatprep.subr.mxu1 %v7510_v1  ;;  %1440 = vmatpush1.msra.mxu0 %v857_v55  ;;  %v1034_v55 = vld [vmem:[#allocation13 + $0x8c8] sm:$0xff] }
 0x253   :  { %6941 = vmatpush3.msra.mxu1 %v453_v56  ;;  %1441 = vmatprep.subr.mxu0 %v850_v57  ;;  %v1033_v56 = vld [vmem:[#allocation13 + $0x8c0] sm:$0xff]  ;;  %v1026_v57 = vld [vmem:[#allocation13 + $0x888] sm:$0xff] }
 0x254   :  { %6942 = vmatprep.subr.mxu1 %v7510_v1  ;;  %1442 = vmatpush1.msra.mxu0 %v849_v58  ;;  %v1025_v58 = vld [vmem:[#allocation13 + $0x880] sm:$0xff] }
 0x255   :  { %6943 = vmatpush3.msra.mxu1 %v448_v59  ;;  %1443 = vmatprep.subr.mxu0 %v842_v60  ;;  %v1018_v59 = vld [vmem:[#allocation13 + $0x848] sm:$0xff]  ;;  %v1017_v60 = vld [vmem:[#allocation13 + $0x840] sm:$0xff] }
 0x256   :  { %6944 = vmatprep.subr.mxu1 %v7510_v1  ;;  %1444 = vmatpush1.msra.mxu0 %v841_v61  ;;  %v1010_v61 = vld [vmem:[#allocation13 + $0x808] sm:$0xff] }
 0x257   :  { %6945 = vmatpush3.msra.mxu1 %v443_v62  ;;  %1445 = vmatprep.subr.mxu0 %v834_v63  ;;  %v753_v62 = vld [vmem:[#allocation13] sm:$0xff] }
 0x258   :  { %6946 = vmatprep.subr.mxu1 %v7510_v1  ;;  %1446 = vmatpush1.msra.mxu0 %v833_v0  ;;  %v1009_v63 = vld [vmem:[#allocation13 + $0x800] sm:$0xff]  ;;  %v1002_v0 = vld [vmem:[#allocation13 + $0x7c8] sm:$0xff] }
 0x259   :  { %6947 = vmatpush3.msra.mxu1 %v438_v2  ;;  %1447 = vmatprep.subr.mxu0 %v826_v3  ;;  %v1258_v2 = vld [vmem:[#allocation13 + $0xfc8] sm:$0xff]  ;;  %v1001_v3 = vld [vmem:[#allocation13 + $0x7c0] sm:$0xff] }
 0x25a   :  { %6948 = vmatprep.subr.mxu1 %v7510_v1  ;;  %1448 = vmatpush1.msra.mxu0 %v825_v4  ;;  %v1257_v4 = vld [vmem:[#allocation13 + $0xfc0] sm:$0xff] }
 0x25b   :  { %6949 = vmatpush3.msra.mxu1 %v433_v5  ;;  %1449 = vmatprep.subr.mxu0 %v818_v6  ;;  %v994_v5 = vld [vmem:[#allocation13 + $0x788] sm:$0xff] }
 0x25c   :  { %6950 = vmatprep.subr.mxu1 %v7510_v1  ;;  %1450 = vmatpush1.msra.mxu0 %v817_v7  ;;  %v1250_v6 = vld [vmem:[#allocation13 + $0xf88] sm:$0xff]  ;;  %v993_v7 = vld [vmem:[#allocation13 + $0x780] sm:$0xff] }
 0x25d   :  { %6951 = vmatpush3.msra.mxu1 %v428_v8  ;;  %1451 = vmatprep.subr.mxu0 %v810_v9  ;;  %v1249_v8 = vld [vmem:[#allocation13 + $0xf80] sm:$0xff]  ;;  %v986_v9 = vld [vmem:[#allocation13 + $0x748] sm:$0xff] }
 0x25e   :  { %6952 = vmatprep.subr.mxu1 %v7510_v1  ;;  %1452 = vmatpush1.msra.mxu0 %v809_v10  ;;  %v1242_v10 = vld [vmem:[#allocation13 + $0xf48] sm:$0xff] }
 0x25f   :  { %6953 = vmatpush3.msra.mxu1 %v423_v11  ;;  %1453 = vmatprep.subr.mxu0 %v802_v12  ;;  %v985_v11 = vld [vmem:[#allocation13 + $0x740] sm:$0xff] }
 0x260   :  { %6954 = vmatprep.subr.mxu1 %v7510_v1  ;;  %1454 = vmatpush1.msra.mxu0 %v801_v13  ;;  %v1241_v12 = vld [vmem:[#allocation13 + $0xf40] sm:$0xff]  ;;  %v978_v13 = vld [vmem:[#allocation13 + $0x708] sm:$0xff] }
 0x261   :  { %6955 = vmatpush3.msra.mxu1 %v418_v14  ;;  %1455 = vmatprep.subr.mxu0 %v794_v15  ;;  %v1234_v14 = vld [vmem:[#allocation13 + $0xf08] sm:$0xff]  ;;  %v977_v15 = vld [vmem:[#allocation13 + $0x700] sm:$0xff] }
 0x262   :  { %6956 = vmatprep.subr.mxu1 %v7510_v1  ;;  %1456 = vmatpush1.msra.mxu0 %v793_v16  ;;  %v1233_v16 = vld [vmem:[#allocation13 + $0xf00] sm:$0xff] }
 0x263   :  { %6957 = vmatpush3.msra.mxu1 %v413_v17  ;;  %1457 = vmatprep.subr.mxu0 %v786_v18  ;;  %v970_v17 = vld [vmem:[#allocation13 + $0x6c8] sm:$0xff] }
 0x264   :  { %6958 = vmatprep.subr.mxu1 %v7510_v1  ;;  %1458 = vmatpush1.msra.mxu0 %v785_v19  ;;  %v1226_v18 = vld [vmem:[#allocation13 + $0xec8] sm:$0xff]  ;;  %v969_v19 = vld [vmem:[#allocation13 + $0x6c0] sm:$0xff] }
 0x265   :  { %6959 = vmatpush3.msra.mxu1 %v408_v20  ;;  %1459 = vmatprep.subr.mxu0 %v778_v21  ;;  %v1225_v20 = vld [vmem:[#allocation13 + $0xec0] sm:$0xff]  ;;  %v962_v21 = vld [vmem:[#allocation13 + $0x688] sm:$0xff] }
 0x266   :  { %6960 = vmatprep.subr.mxu1 %v7510_v1  ;;  %1460 = vmatpush1.msra.mxu0 %v777_v22  ;;  %v1218_v22 = vld [vmem:[#allocation13 + $0xe88] sm:$0xff] }
 0x267   :  { %6961 = vmatpush3.msra.mxu1 %v403_v23  ;;  %1461 = vmatprep.subr.mxu0 %v770_v24  ;;  %v961_v23 = vld [vmem:[#allocation13 + $0x680] sm:$0xff] }
 0x268   :  { %6962 = vmatprep.subr.mxu1 %v7510_v1  ;;  %1462 = vmatpush1.msra.mxu0 %v769_v25  ;;  %v1217_v24 = vld [vmem:[#allocation13 + $0xe80] sm:$0xff]  ;;  %v954_v25 = vld [vmem:[#allocation13 + $0x648] sm:$0xff] }
 0x269   :  { %6963 = vmatpush3.msra.mxu1 %v398_v26  ;;  %1463 = vmatprep.subr.mxu0 %v762_v27  ;;  %v1210_v26 = vld [vmem:[#allocation13 + $0xe48] sm:$0xff]  ;;  %v953_v27 = vld [vmem:[#allocation13 + $0x640] sm:$0xff] }
 0x26a   :  { %6964 = vmatprep.subr.mxu1 %v7510_v1  ;;  %1464 = vmatpush1.msra.mxu0 %v761_v28  ;;  %v1209_v28 = vld [vmem:[#allocation13 + $0xe40] sm:$0xff] }
 0x26b   :  { %6965 = vmatpush3.msra.mxu1 %v393_v29  ;;  %1465 = vmatprep.subr.mxu0 %v754_v30  ;;  %v946_v29 = vld [vmem:[#allocation13 + $0x608] sm:$0xff] }
 0x26c   :  { %6967 = vmatmul.mubr.f32.vlgmr.msra.gmra.mxu1 %v7690_v47  ;;  %1506 = vmatprep.subr.mxu1 %v1130_v31  ;;  %v1066_v47 = vld [vmem:[#allocation13 + $0x9c8] sm:$0xff]  ;;  %v945_v31 = vld [vmem:[#allocation13 + $0x600] sm:$0xff] }
 0x26d   :  { %1507 = vmatpush1.msra.mxu1 %v1129_v32  ;;  %1466 = vmatpush1.msra.mxu0 %v753_v62  ;;  %v1202_v30 = vld [vmem:[#allocation13 + $0xe08] sm:$0xff]  ;;  %v1201_v32 = vld [vmem:[#allocation13 + $0xe00] sm:$0xff] }
 0x26e   :  { %1508 = vmatprep.subr.mxu1 %v1122_v33  ;;  %1467 = vmatprep.subr.mxu0 %v1002_v0  ;;  %v938_v33 = vld [vmem:[#allocation13 + $0x5c8] sm:$0xff]  ;;  %v1137_v0 = vld [vmem:[#allocation13 + $0xc00] sm:$0xff] }
 0x26f   :  { %1509 = vmatpush1.msra.mxu1 %v1121_v34  ;;  %1468 = vmatpush2.msra.mxu0 %v1001_v3  ;;  %v1194_v34 = vld [vmem:[#allocation13 + $0xdc8] sm:$0xff]  ;;  %v876_v3 = vld [vmem:[#allocation13 + $0x3d8] sm:$0xff] }
 0x270   :  { %1510 = vmatprep.subr.mxu1 %v1114_v35  ;;  %1469 = vmatprep.subr.mxu0 %v994_v5  ;;  %v937_v35 = vld [vmem:[#allocation13 + $0x5c0] sm:$0xff]  ;;  %v1138_v62 = vld [vmem:[#allocation13 + $0xc08] sm:$0xff] }
 0x271   :  { %1511 = vmatpush1.msra.mxu1 %v1113_v36  ;;  %1470 = vmatpush2.msra.mxu0 %v993_v7  ;;  %v1193_v36 = vld [vmem:[#allocation13 + $0xdc0] sm:$0xff] }
 0x272   :  { %1512 = vmatprep.subr.mxu1 %v1106_v37  ;;  %1471 = vmatprep.subr.mxu0 %v986_v9  ;;  %v930_v37 = vld [vmem:[#allocation13 + $0x588] sm:$0xff] }
 0x273   :  { %1513 = vmatpush1.msra.mxu1 %v1105_v38  ;;  %1472 = vmatpush2.msra.mxu0 %v985_v11  ;;  %v1186_v38 = vld [vmem:[#allocation13 + $0xd88] sm:$0xff] }
 0x274   :  { %1514 = vmatprep.subr.mxu1 %v1098_v39  ;;  %1473 = vmatprep.subr.mxu0 %v978_v13  ;;  %v929_v39 = vld [vmem:[#allocation13 + $0x580] sm:$0xff] }
 0x275   :  { %1515 = vmatpush1.msra.mxu1 %v1097_v40  ;;  %1474 = vmatpush2.msra.mxu0 %v977_v15  ;;  %v1185_v40 = vld [vmem:[#allocation13 + $0xd80] sm:$0xff] }
 0x276   :  { %1516 = vmatprep.subr.mxu1 %v1090_v41  ;;  %1475 = vmatprep.subr.mxu0 %v970_v17  ;;  %v922_v41 = vld [vmem:[#allocation13 + $0x548] sm:$0xff] }
 0x277   :  { %1517 = vmatpush1.msra.mxu1 %v1089_v42  ;;  %1476 = vmatpush2.msra.mxu0 %v969_v19  ;;  %v1178_v42 = vld [vmem:[#allocation13 + $0xd48] sm:$0xff] }
 0x278   :  { %1518 = vmatprep.subr.mxu1 %v1082_v43  ;;  %1477 = vmatprep.subr.mxu0 %v962_v21  ;;  %v921_v43 = vld [vmem:[#allocation13 + $0x540] sm:$0xff] }
 0x279   :  { %1519 = vmatpush1.msra.mxu1 %v1081_v44  ;;  %1478 = vmatpush2.msra.mxu0 %v961_v23  ;;  %v1177_v44 = vld [vmem:[#allocation13 + $0xd40] sm:$0xff] }
 0x27a   :  { %1520 = vmatprep.subr.mxu1 %v1074_v45  ;;  %1479 = vmatprep.subr.mxu0 %v954_v25  ;;  %v914_v45 = vld [vmem:[#allocation13 + $0x508] sm:$0xff] }
 0x27b   :  { %1521 = vmatpush1.msra.mxu1 %v1073_v46  ;;  %1480 = vmatpush2.msra.mxu0 %v953_v27  ;;  %v1170_v46 = vld [vmem:[#allocation13 + $0xd08] sm:$0xff] }
 0x27c   :  { %1522 = vmatprep.subr.mxu1 %v1066_v47  ;;  %1481 = vmatprep.subr.mxu0 %v946_v29  ;;  %v913_v47 = vld [vmem:[#allocation13 + $0x500] sm:$0xff] }
 0x27d   :  { %1523 = vmatpush1.msra.mxu1 %v1065_v48  ;;  %1482 = vmatpush2.msra.mxu0 %v945_v31  ;;  %v1169_v48 = vld [vmem:[#allocation13 + $0xd00] sm:$0xff] }
 0x27e   :  { %1524 = vmatprep.subr.mxu1 %v1058_v49  ;;  %1483 = vmatprep.subr.mxu0 %v938_v33  ;;  %v906_v49 = vld [vmem:[#allocation13 + $0x4c8] sm:$0xff] }
 0x27f   :  { %1525 = vmatpush1.msra.mxu1 %v1057_v50  ;;  %1484 = vmatpush2.msra.mxu0 %v937_v35  ;;  %v1162_v50 = vld [vmem:[#allocation13 + $0xcc8] sm:$0xff] }
 0x280   :  { %1526 = vmatprep.subr.mxu1 %v1050_v51  ;;  %1485 = vmatprep.subr.mxu0 %v930_v37  ;;  %v905_v51 = vld [vmem:[#allocation13 + $0x4c0] sm:$0xff] }
 0x281   :  { %1527 = vmatpush1.msra.mxu1 %v1049_v52  ;;  %1486 = vmatpush2.msra.mxu0 %v929_v39  ;;  %v1161_v52 = vld [vmem:[#allocation13 + $0xcc0] sm:$0xff] }
 0x282   :  { %1528 = vmatprep.subr.mxu1 %v1042_v53  ;;  %1487 = vmatprep.subr.mxu0 %v922_v41  ;;  %v898_v53 = vld [vmem:[#allocation13 + $0x488] sm:$0xff] }
 0x283   :  { %1529 = vmatpush1.msra.mxu1 %v1041_v54  ;;  %1488 = vmatpush2.msra.mxu0 %v921_v43  ;;  %v1154_v54 = vld [vmem:[#allocation13 + $0xc88] sm:$0xff] }
 0x284   :  { %1530 = vmatprep.subr.mxu1 %v1034_v55  ;;  %1489 = vmatprep.subr.mxu0 %v914_v45  ;;  %v897_v55 = vld [vmem:[#allocation13 + $0x480] sm:$0xff] }
 0x285   :  { %1531 = vmatpush1.msra.mxu1 %v1033_v56  ;;  %1490 = vmatpush2.msra.mxu0 %v913_v47  ;;  %v1153_v56 = vld [vmem:[#allocation13 + $0xc80] sm:$0xff] }
 0x286   :  { %1532 = vmatprep.subr.mxu1 %v1026_v57  ;;  %1491 = vmatprep.subr.mxu0 %v906_v49  ;;  %v890_v57 = vld [vmem:[#allocation13 + $0x448] sm:$0xff] }
 0x287   :  { %1533 = vmatpush1.msra.mxu1 %v1025_v58  ;;  %1492 = vmatpush2.msra.mxu0 %v905_v51  ;;  %v1146_v58 = vld [vmem:[#allocation13 + $0xc48] sm:$0xff] }
 0x288   :  { %1534 = vmatprep.subr.mxu1 %v1018_v59  ;;  %1493 = vmatprep.subr.mxu0 %v898_v53  ;;  %v889_v59 = vld [vmem:[#allocation13 + $0x440] sm:$0xff] }
 0x289   :  { %1535 = vmatpush1.msra.mxu1 %v1017_v60  ;;  %v1145_v60 = vld [vmem:[#allocation13 + $0xc40] sm:$0xff]  ;;  %1494 = vmatpush2.msra.mxu0 %v897_v55 }
 0x28a   :  { %1536 = vmatprep.subr.mxu1 %v1010_v61  ;;  %1495 = vmatprep.subr.mxu0 %v890_v57  ;;  %v882_v61 = vld [vmem:[#allocation13 + $0x408] sm:$0xff] }
 0x28b   :  { %1537 = vmatpush1.msra.mxu1 %v1009_v63  ;;  %1496 = vmatpush2.msra.mxu0 %v889_v59  ;;  %v881_v63 = vld [vmem:[#allocation13 + $0x400] sm:$0xff] }
 0x28c   :  { %1538 = vmatprep.subr.mxu1 %v1258_v2  ;;  %1497 = vmatprep.subr.mxu0 %v882_v61  ;;  %v1386_v2 = vld [vmem:[#allocation13 + $0x13c8] sm:$0xff] }
 0x28d   :  { %1539 = vmatpush2.msra.mxu1 %v1257_v4  ;;  %1498 = vmatpush2.msra.mxu0 %v881_v63  ;;  %v471_v4 = vlaneseq }
 0x28e   :  { %1540 = vmatprep.subr.mxu1 %v1250_v6  ;;  %1577 = vmatprep.subr.mxu0 %v1386_v2  ;;  %v875_v2 = vld [vmem:[#allocation13 + $0x3d0] sm:$0xff] }
 0x28f   :  { %1541 = vmatpush2.msra.mxu1 %v1249_v8  ;;  %v7712_v5 = vshrl.u32 %v471_v4, 7  ;;  %v469_v8 = vld [vmem:[#allocation11] sm:$0x1f] }
 0x290   :  { %1542 = vmatprep.subr.mxu1 %v1242_v10 }
 0x291   :  { %1543 = vmatpush2.msra.mxu1 %v1241_v12  ;;  %v7715_v6 = vsub.s32 0, %v7712_v5  ;;  %v7718_v7 = vsub.s32 2, %v7712_v5  ;;  %v7721_v9 = vsub.s32 1, %v7712_v5  ;;  %v7724_v10 = vsub.s32 3, %v7712_v5 }
 0x292   :  { %1544 = vmatprep.subr.mxu1 %v1234_v14  ;;  %v7731_v43 = vsub.s32 4, %v7712_v5 }
 0x293   :  { %1545 = vmatpush2.msra.mxu1 %v1233_v16  ;;  %v474_v11 = vrot.slane %v469_v8, %v7715_v6  ;;  %v482_v12 = vrot.slane %v469_v8, %v7718_v7  ;;  %v478_v15 = vrot.slane %v469_v8, %v7721_v9  ;;  %v486_v16 = vrot.slane %v469_v8, %v7724_v10 }
 0x294   :  { %1546 = vmatprep.subr.mxu1 %v1226_v18  ;;  %v490_v47 = vrot.slane %v469_v8, %v7731_v43  ;;  %v868_v8 = vld [vmem:[#allocation13 + $0x398] sm:$0xff] }
 0x295   :  { %1547 = vmatpush2.msra.mxu1 %v1225_v20 }
 0x296   :  { %1548 = vmatprep.subr.mxu1 %v1218_v22 }
 0x297   :  { %1549 = vmatpush2.msra.mxu1 %v1217_v24 }
 0x298   :  { %1550 = vmatprep.subr.mxu1 %v1210_v26 }
 0x299   :  { %1551 = vmatpush2.msra.mxu1 %v1209_v28 }
 0x29a   :  { %1552 = vmatprep.subr.mxu1 %v1202_v30 }
 0x29b   :  { %1553 = vmatpush2.msra.mxu1 %v1201_v32 }
 0x29c   :  { %1554 = vmatprep.subr.mxu1 %v1194_v34 }
 0x29d   :  { %1555 = vmatpush2.msra.mxu1 %v1193_v36 }
 0x29e   :  { %1556 = vmatprep.subr.mxu1 %v1186_v38 }
 0x29f   :  { %1557 = vmatpush2.msra.mxu1 %v1185_v40 }
 0x2a0   :  { %1558 = vmatprep.subr.mxu1 %v1178_v42 }
 0x2a1   :  { %1559 = vmatpush2.msra.mxu1 %v1177_v44 }
 0x2a2   :  { %1560 = vmatprep.subr.mxu1 %v1170_v46 }
 0x2a3   :  { %1561 = vmatpush2.msra.mxu1 %v1169_v48 }
 0x2a4   :  { %1562 = vmatprep.subr.mxu1 %v1162_v50 }
 0x2a5   :  { %1563 = vmatpush2.msra.mxu1 %v1161_v52 }
 0x2a6   :  { %1564 = vmatprep.subr.mxu1 %v1154_v54 }
 0x2a7   :  { %1565 = vmatpush2.msra.mxu1 %v1153_v56 }
 0x2a8   :  { %1566 = vmatprep.subr.mxu1 %v1146_v58 }
 0x2a9   :  { %1567 = vmatpush2.msra.mxu1 %v1145_v60 }
 0x2aa   :  { %1568 = vmatprep.subr.mxu1 %v1138_v62  ;;  %v1385_v62 = vld [vmem:[#allocation13 + $0x13c0] sm:$0xff] }
 0x2ab   :  { %1569 = vmatpush2.msra.mxu1 %v1137_v0 }
 0x2ac   :  { %1648 = vmatprep.subr.mxu1 %v876_v3  ;;  %v1378_v3 = vld [vmem:[#allocation13 + $0x1388] sm:$0xff] }
 0x30c   :  { %v562_v13 = vpop.f32.mrf.mxu1  ;;  %v633_v14 = vpop.f32.mrf.mxu0 }
 0x30d   :  { %v563_v17 = vadd.f32 %v562_v13, %v474_v11  ;;  %v634_v18 = vadd.f32 %v633_v14, %v482_v12  ;;  %v1377_v11 = vld [vmem:[#allocation13 + $0x1380] sm:$0xff]  ;;  %v867_v12 = vld [vmem:[#allocation13 + $0x390] sm:$0xff]  ;;  %v1370_v14 = vld [vmem:[#allocation13 + $0x1348] sm:$0xff] }
 0x30e   :  { %v564_v19 = vpop.f32.mrf.mxu1  ;;  %v635_v20 = vpop.f32.mrf.mxu0 }
 0x30f   :  { %v713_v21 = vmul.f32 %v563_v17, %v563_v17  ;;  %v715_v22 = vmul.f32 %v634_v18, %v634_v18  ;;  %v565_v23 = vadd.f32 %v564_v19, %v478_v15  ;;  %v636_v24 = vadd.f32 %v635_v20, %v486_v16  ;;  %v860_v15 = vld [vmem:[#allocation13 + $0x358] sm:$0xff]  ;;  %v1369_v16 = vld [vmem:[#allocation13 + $0x1340] sm:$0xff]  ;;  %v1362_v19 = vld [vmem:[#allocation13 + $0x1308] sm:$0xff] }
 0x310   :  { %v708_v53 = vmul.f32 0.5, %v563_v17  ;;  %v710_v56 = vmul.f32 0.5, %v634_v18  ;;  %v852_v20 = vld [vmem:[#allocation13 + $0x318] sm:$0xff] }
 0x311   :  { %v718_v25 = vmul.f32 %v713_v21, %v563_v17  ;;  %v720_v26 = vmul.f32 %v715_v22, %v634_v18  ;;  %v714_v27 = vmul.f32 %v565_v23, %v565_v23  ;;  %v716_v28 = vmul.f32 %v636_v24, %v636_v24  ;;  %v1361_v21 = vld [vmem:[#allocation13 + $0x1300] sm:$0xff]  ;;  %v851_v22 = vld [vmem:[#allocation13 + $0x310] sm:$0xff] }
 0x312   :  { %v709_v50 = vmul.f32 0.5, %v565_v23  ;;  %v711_v54 = vmul.f32 0.5, %v636_v24 }
 0x313   :  { %v723_v29 = vmul.f32 0.044715, %v718_v25  ;;  %v725_v30 = vmul.f32 0.044715, %v720_v26  ;;  %v719_v31 = vmul.f32 %v714_v27, %v565_v23  ;;  %v721_v32 = vmul.f32 %v716_v28, %v636_v24  ;;  %v844_v25 = vld [vmem:[#allocation13 + $0x2d8] sm:$0xff]  ;;  %v1353_v26 = vld [vmem:[#allocation13 + $0x12c0] sm:$0xff] }
 0x314   :  { %v843_v27 = vld [vmem:[#allocation13 + $0x2d0] sm:$0xff] }
 0x315   :  { %v728_v33 = vadd.f32 %v723_v29, %v563_v17  ;;  %v730_v34 = vadd.f32 %v725_v30, %v634_v18  ;;  %v724_v35 = vmul.f32 0.044715, %v719_v31  ;;  %v726_v36 = vmul.f32 0.044715, %v721_v32  ;;  %v859_v17 = vld [vmem:[#allocation13 + $0x350] sm:$0xff]  ;;  %v1346_v29 = vld [vmem:[#allocation13 + $0x1288] sm:$0xff] }
 0x316   :  { %v836_v30 = vld [vmem:[#allocation13 + $0x298] sm:$0xff]  ;;  %v1345_v31 = vld [vmem:[#allocation13 + $0x1280] sm:$0xff]  ;;  %v835_v32 = vld [vmem:[#allocation13 + $0x290] sm:$0xff] }
 0x317   :  { %v733_v37 = vmul.f32 0.7978846, %v728_v33  ;;  %v735_v38 = vmul.f32 0.7978846, %v730_v34  ;;  %v729_v39 = vadd.f32 %v724_v35, %v565_v23  ;;  %v731_v40 = vadd.f32 %v726_v36, %v636_v24  ;;  %v1354_v24 = vld [vmem:[#allocation13 + $0x12c8] sm:$0xff]  ;;  %v828_v34 = vld [vmem:[#allocation13 + $0x258] sm:$0xff] }
 0x318   :  { %v1338_v33 = vld [vmem:[#allocation13 + $0x1248] sm:$0xff]  ;;  %v1337_v35 = vld [vmem:[#allocation13 + $0x1240] sm:$0xff]  ;;  %v827_v36 = vld [vmem:[#allocation13 + $0x250] sm:$0xff] }
 0x319   :  { %7070 = vtanh.f32 %v733_v37  ;;  %v734_v41 = vmul.f32 0.7978846, %v729_v39  ;;  %v736_v42 = vmul.f32 0.7978846, %v731_v40  ;;  %v1330_v37 = vld [vmem:[#allocation13 + $0x1208] sm:$0xff]  ;;  %v1329_v39 = vld [vmem:[#allocation13 + $0x1200] sm:$0xff] }
 0x31a   :  { %7072 = vtanh.f32 %v735_v38  ;;  %v820_v38 = vld [vmem:[#allocation13 + $0x218] sm:$0xff]  ;;  %v819_v40 = vld [vmem:[#allocation13 + $0x210] sm:$0xff] }
 0x31b   :  { %7074 = vtanh.f32 %v734_v41  ;;  %v1322_v41 = vld [vmem:[#allocation13 + $0x11c8] sm:$0xff] }
 0x31c   :  { %7076 = vtanh.f32 %v736_v42  ;;  %v812_v42 = vld [vmem:[#allocation13 + $0x1d8] sm:$0xff] }
 0x326   :  { %v7071_v44 = vpop.eup %7070 }
 0x327   :  { %v7073_v45 = vpop.eup %7072  ;;  %v743_v48 = vadd.f32 1.0, %v7071_v44  ;;  %v1321_v44 = vld [vmem:[#allocation13 + $0x11c0] sm:$0xff] }
 0x328   :  { %v7075_v46 = vpop.eup %7074  ;;  %v745_v52 = vadd.f32 1.0, %v7073_v45  ;;  %v811_v45 = vld [vmem:[#allocation13 + $0x1d0] sm:$0xff] }
 0x329   :  { %v7077_v49 = vpop.eup %7076  ;;  %v744_v51 = vadd.f32 1.0, %v7075_v46  ;;  %v7740_v61 = vmul.f32 %v743_v48, %v708_v53  ;;  %v1314_v46 = vld [vmem:[#allocation13 + $0x1188] sm:$0xff]  ;;  %v1313_v48 = vld [vmem:[#allocation13 + $0x1180] sm:$0xff]  ;;  %v795_v53 = vld [vmem:[#allocation13 + $0x150] sm:$0xff] }
 0x32a   :  { %v746_v55 = vadd.f32 1.0, %v7077_v49  ;;  %v7743_v0 = vmul.f32 %v745_v52, %v710_v56  ;;  %v803_v49 = vld [vmem:[#allocation13 + $0x190] sm:$0xff]  ;;  %v1305_v52 = vld [vmem:[#allocation13 + $0x1140] sm:$0xff] }
 0x32b   :  { %v7734_v58 = vmul.f32 %v744_v51, %v709_v50  ;;  %v1306_v50 = vld [vmem:[#allocation13 + $0x1148] sm:$0xff]  ;;  %v796_v51 = vld [vmem:[#allocation13 + $0x158] sm:$0xff]  ;;  %v1297_v56 = vld [vmem:[#allocation13 + $0x1100] sm:$0xff] }
 0x32c   :  { %v704_v57 = vpop.f32.mrf.mxu1  ;;  %v7738_v60 = vmul.f32 %v746_v55, %v711_v54  ;;  %v1298_v54 = vld [vmem:[#allocation13 + $0x1108] sm:$0xff]  ;;  %v788_v55 = vld [vmem:[#allocation13 + $0x118] sm:$0xff] }
 0x32d   :  { %v7736_v59 = vadd.f32 %v704_v57, %v490_v47  ;;  %1499 = vmatprep.mubr.f32.mxu0 %v7734_v58  ;;  %v804_v47 = vld [vmem:[#allocation13 + $0x198] sm:$0xff]  ;;  %v787_v57 = vld [vmem:[#allocation13 + $0x110] sm:$0xff] }
 0x32e   :  { %v6968_v63 = vpop.f32.mrf.mxu1  ;;  %1570 = vmatprep.mubr.f32.mxu1 %v7738_v60  ;;  %1500 = vmatmul.mubr.f32.vlgmr.msra.gmra.mxu0 %v7740_v61 }
 0x32f   :  { %v717_v4 = vmul.f32 %v7736_v59, %v7736_v59  ;;  %1571 = vmatmul.mubr.f32.vlgmr.msra.gmra.mxu1 %v7743_v0  ;;  %1578 = vmatpush1.msra.mxu0 %v1385_v62  ;;  %v1290_v62 = vld [vmem:[#allocation13 + $0x10c8] sm:$0xff]  ;;  %v780_v63 = vld [vmem:[#allocation13 + $0xd8] sm:$0xff] }
 0x330   :  { %1649 = vmatpush1.msra.mxu1 %v875_v2  ;;  %1579 = vmatprep.subr.mxu0 %v1378_v3  ;;  %v1289_v2 = vld [vmem:[#allocation13 + $0x10c0] sm:$0xff]  ;;  %v779_v3 = vld [vmem:[#allocation13 + $0xd0] sm:$0xff] }
 0x331   :  { %v722_v13 = vmul.f32 %v717_v4, %v7736_v59  ;;  %1650 = vmatprep.subr.mxu1 %v868_v8  ;;  %1712 = vmatprep.mubr.f32.mxu1 %v7734_v58  ;;  %v1282_v8 = vld [vmem:[#allocation13 + $0x1088] sm:$0xff] }
 0x332   :  { %1580 = vmatpush1.msra.mxu0 %v1377_v11  ;;  %1651 = vmatpush1.msra.mxu1 %v867_v12  ;;  %v772_v11 = vld [vmem:[#allocation13 + $0x98] sm:$0xff]  ;;  %v1281_v12 = vld [vmem:[#allocation13 + $0x1080] sm:$0xff] }
 0x333   :  { %v727_v18 = vmul.f32 0.044715, %v722_v13  ;;  %1581 = vmatprep.subr.mxu0 %v1370_v14  ;;  %1652 = vmatprep.subr.mxu1 %v860_v15  ;;  %v771_v13 = vld [vmem:[#allocation13 + $0x90] sm:$0xff]  ;;  %v1274_v14 = vld [vmem:[#allocation13 + $0x1048] sm:$0xff]  ;;  %v764_v15 = vld [vmem:[#allocation13 + $0x58] sm:$0xff] }
 0x334   :  { %1582 = vmatpush1.msra.mxu0 %v1369_v16  ;;  %1653 = vmatpush1.msra.mxu1 %v859_v17  ;;  %v1273_v16 = vld [vmem:[#allocation13 + $0x1040] sm:$0xff]  ;;  %v763_v17 = vld [vmem:[#allocation13 + $0x50] sm:$0xff] }
 0x335   :  { %v732_v23 = vadd.f32 %v727_v18, %v7736_v59  ;;  %1583 = vmatprep.subr.mxu0 %v1362_v19  ;;  %1654 = vmatprep.subr.mxu1 %v852_v20  ;;  %v1266_v19 = vld [vmem:[#allocation13 + $0x1008] sm:$0xff]  ;;  %v756_v20 = vld [vmem:[#allocation13 + $0x18] sm:$0xff] }
 0x336   :  { %1584 = vmatpush1.msra.mxu0 %v1361_v21  ;;  %1655 = vmatpush1.msra.mxu1 %v851_v22  ;;  %v712_v21 = vmul.f32 0.5, %v7736_v59  ;;  %v1265_v22 = vld [vmem:[#allocation13 + $0x1000] sm:$0xff]  ;;  %v996_v59 = vld [vmem:[#allocation13 + $0x798] sm:$0xff] }
 0x337   :  { %v737_v28 = vmul.f32 0.7978846, %v732_v23  ;;  %1585 = vmatprep.subr.mxu0 %v1354_v24  ;;  %1656 = vmatprep.subr.mxu1 %v844_v25  ;;  %v755_v23 = vld [vmem:[#allocation13 + $0x10] sm:$0xff]  ;;  %v1004_v25 = vld [vmem:[#allocation13 + $0x7d8] sm:$0xff] }
 0x338   :  { %1586 = vmatpush1.msra.mxu0 %v1353_v26  ;;  %1657 = vmatpush1.msra.mxu1 %v843_v27  ;;  %v1132_v26 = vld [vmem:[#allocation13 + $0xbd8] sm:$0xff]  ;;  %v1003_v27 = vld [vmem:[#allocation13 + $0x7d0] sm:$0xff] }
 0x339   :  { %7078 = vtanh.f32 %v737_v28  ;;  %1587 = vmatprep.subr.mxu0 %v1346_v29  ;;  %1658 = vmatprep.subr.mxu1 %v836_v30  ;;  %v1131_v28 = vld [vmem:[#allocation13 + $0xbd0] sm:$0xff]  ;;  %v1124_v29 = vld [vmem:[#allocation13 + $0xb98] sm:$0xff] }
 0x33a   :  { %1588 = vmatpush1.msra.mxu0 %v1345_v31  ;;  %1659 = vmatpush1.msra.mxu1 %v835_v32  ;;  %v995_v30 = vld [vmem:[#allocation13 + $0x790] sm:$0xff]  ;;  %v988_v32 = vld [vmem:[#allocation13 + $0x758] sm:$0xff] }
 0x33b   :  { %1589 = vmatprep.subr.mxu0 %v1338_v33  ;;  %1660 = vmatprep.subr.mxu1 %v828_v34  ;;  %v1123_v31 = vld [vmem:[#allocation13 + $0xb90] sm:$0xff]  ;;  %v1116_v33 = vld [vmem:[#allocation13 + $0xb58] sm:$0xff] }
 0x33c   :  { %1590 = vmatpush1.msra.mxu0 %v1337_v35  ;;  %1661 = vmatpush1.msra.mxu1 %v827_v36  ;;  %v987_v34 = vld [vmem:[#allocation13 + $0x750] sm:$0xff]  ;;  %v980_v36 = vld [vmem:[#allocation13 + $0x718] sm:$0xff] }
 0x33d   :  { %1591 = vmatprep.subr.mxu0 %v1330_v37  ;;  %1662 = vmatprep.subr.mxu1 %v820_v38  ;;  %v1115_v35 = vld [vmem:[#allocation13 + $0xb50] sm:$0xff]  ;;  %v1108_v37 = vld [vmem:[#allocation13 + $0xb18] sm:$0xff] }
 0x33e   :  { %1592 = vmatpush1.msra.mxu0 %v1329_v39  ;;  %1663 = vmatpush1.msra.mxu1 %v819_v40  ;;  %v979_v38 = vld [vmem:[#allocation13 + $0x710] sm:$0xff]  ;;  %v972_v40 = vld [vmem:[#allocation13 + $0x6d8] sm:$0xff] }
 0x33f   :  { %1593 = vmatprep.subr.mxu0 %v1322_v41  ;;  %1664 = vmatprep.subr.mxu1 %v812_v42  ;;  %v1107_v39 = vld [vmem:[#allocation13 + $0xb10] sm:$0xff]  ;;  %v1100_v41 = vld [vmem:[#allocation13 + $0xad8] sm:$0xff] }
 0x340   :  { %1594 = vmatpush1.msra.mxu0 %v1321_v44  ;;  %1665 = vmatpush1.msra.mxu1 %v811_v45  ;;  %v971_v42 = vld [vmem:[#allocation13 + $0x6d0] sm:$0xff]  ;;  %v964_v45 = vld [vmem:[#allocation13 + $0x698] sm:$0xff] }
 0x341   :  { %1595 = vmatprep.subr.mxu0 %v1314_v46  ;;  %1666 = vmatprep.subr.mxu1 %v804_v47  ;;  %v1099_v44 = vld [vmem:[#allocation13 + $0xad0] sm:$0xff]  ;;  %v1092_v46 = vld [vmem:[#allocation13 + $0xa98] sm:$0xff] }
 0x342   :  { %1596 = vmatpush1.msra.mxu0 %v1313_v48  ;;  %1667 = vmatpush1.msra.mxu1 %v803_v49  ;;  %v963_v47 = vld [vmem:[#allocation13 + $0x690] sm:$0xff]  ;;  %v956_v49 = vld [vmem:[#allocation13 + $0x658] sm:$0xff] }
 0x343   :  { %1597 = vmatprep.subr.mxu0 %v1306_v50  ;;  %1668 = vmatprep.subr.mxu1 %v796_v51  ;;  %v1091_v48 = vld [vmem:[#allocation13 + $0xa90] sm:$0xff]  ;;  %v1084_v50 = vld [vmem:[#allocation13 + $0xa58] sm:$0xff] }
 0x344   :  { %1598 = vmatpush1.msra.mxu0 %v1305_v52  ;;  %1669 = vmatpush1.msra.mxu1 %v795_v53  ;;  %v955_v51 = vld [vmem:[#allocation13 + $0x650] sm:$0xff]  ;;  %v948_v53 = vld [vmem:[#allocation13 + $0x618] sm:$0xff] }
 0x345   :  { %1599 = vmatprep.subr.mxu0 %v1298_v54  ;;  %1670 = vmatprep.subr.mxu1 %v788_v55  ;;  %v1083_v52 = vld [vmem:[#allocation13 + $0xa50] sm:$0xff]  ;;  %v1076_v54 = vld [vmem:[#allocation13 + $0xa18] sm:$0xff] }
 0x346   :  { %v7079_v4 = vpop.eup %7078  ;;  %1600 = vmatpush1.msra.mxu0 %v1297_v56  ;;  %1671 = vmatpush1.msra.mxu1 %v787_v57  ;;  %v947_v55 = vld [vmem:[#allocation13 + $0x610] sm:$0xff]  ;;  %v940_v57 = vld [vmem:[#allocation13 + $0x5d8] sm:$0xff] }
 0x347   :  { %1601 = vmatprep.subr.mxu0 %v1290_v62  ;;  %1672 = vmatprep.subr.mxu1 %v780_v63  ;;  %v747_v18 = vadd.f32 1.0, %v7079_v4  ;;  %v1075_v56 = vld [vmem:[#allocation13 + $0xa10] sm:$0xff]  ;;  %v1068_v62 = vld [vmem:[#allocation13 + $0x9d8] sm:$0xff] }
 0x348   :  { %1602 = vmatpush1.msra.mxu0 %v1289_v2  ;;  %1673 = vmatpush1.msra.mxu1 %v779_v3  ;;  %v939_v63 = vld [vmem:[#allocation13 + $0x5d0] sm:$0xff]  ;;  %v932_v3 = vld [vmem:[#allocation13 + $0x598] sm:$0xff] }
 0x349   :  { %1603 = vmatprep.subr.mxu0 %v1282_v8  ;;  %1674 = vmatprep.subr.mxu1 %v772_v11  ;;  %v7754_v24 = vmul.f32 %v747_v18, %v712_v21  ;;  %v1067_v2 = vld [vmem:[#allocation13 + $0x9d0] sm:$0xff]  ;;  %v1060_v4 = vld [vmem:[#allocation13 + $0x998] sm:$0xff] }
 0x34a   :  { %1604 = vmatpush1.msra.mxu0 %v1281_v12  ;;  %1675 = vmatpush1.msra.mxu1 %v771_v13  ;;  %v931_v8 = vld [vmem:[#allocation13 + $0x590] sm:$0xff]  ;;  %v924_v12 = vld [vmem:[#allocation13 + $0x558] sm:$0xff] }
 0x34b   :  { %1605 = vmatprep.subr.mxu0 %v1274_v14  ;;  %1676 = vmatprep.subr.mxu1 %v764_v15  ;;  %v1059_v11 = vld [vmem:[#allocation13 + $0x990] sm:$0xff]  ;;  %v1052_v13 = vld [vmem:[#allocation13 + $0x958] sm:$0xff] }
 0x34c   :  { %1606 = vmatpush1.msra.mxu0 %v1273_v16  ;;  %1677 = vmatpush1.msra.mxu1 %v763_v17  ;;  %v923_v14 = vld [vmem:[#allocation13 + $0x550] sm:$0xff]  ;;  %v916_v16 = vld [vmem:[#allocation13 + $0x518] sm:$0xff] }
 0x34d   :  { %1607 = vmatprep.subr.mxu0 %v1266_v19  ;;  %1678 = vmatprep.subr.mxu1 %v756_v20  ;;  %v1051_v15 = vld [vmem:[#allocation13 + $0x950] sm:$0xff]  ;;  %v1044_v17 = vld [vmem:[#allocation13 + $0x918] sm:$0xff] }
 0x34e   :  { %1608 = vmatpush1.msra.mxu0 %v1265_v22  ;;  %1641 = vmatprep.mubr.f32.mxu0 %v7510_v1  ;;  %v915_v18 = vld [vmem:[#allocation13 + $0x510] sm:$0xff]  ;;  %v908_v20 = vld [vmem:[#allocation13 + $0x4d8] sm:$0xff] }
 0x34f   :  { %1679 = vmatpush1.msra.mxu1 %v755_v23  ;;  %1642 = vmatmul.mubr.f32.vlgmr.msra.gmra.mxu0 %v7754_v24  ;;  %v1043_v19 = vld [vmem:[#allocation13 + $0x910] sm:$0xff]  ;;  %v1036_v21 = vld [vmem:[#allocation13 + $0x8d8] sm:$0xff] }
 0x350   :  { %1680 = vmatprep.subr.mxu1 %v1004_v25  ;;  %1719 = vmatprep.subr.mxu0 %v1132_v26  ;;  %v907_v22 = vld [vmem:[#allocation13 + $0x4d0] sm:$0xff]  ;;  %v900_v25 = vld [vmem:[#allocation13 + $0x498] sm:$0xff] }
 0x351   :  { %1681 = vmatpush2.msra.mxu1 %v1003_v27  ;;  %1720 = vmatpush1.msra.mxu0 %v1131_v28  ;;  %v1035_v23 = vld [vmem:[#allocation13 + $0x8d0] sm:$0xff]  ;;  %v1028_v26 = vld [vmem:[#allocation13 + $0x898] sm:$0xff] }
 0x352   :  { %1783 = vmatprep.mubr.f32.mxu0 %v7738_v60  ;;  %1682 = vmatprep.subr.mxu1 %v996_v59  ;;  %v899_v27 = vld [vmem:[#allocation13 + $0x490] sm:$0xff]  ;;  %v892_v59 = vld [vmem:[#allocation13 + $0x458] sm:$0xff] }
 0x353   :  { %1721 = vmatprep.subr.mxu0 %v1124_v29  ;;  %1683 = vmatpush2.msra.mxu1 %v995_v30  ;;  %v1027_v28 = vld [vmem:[#allocation13 + $0x890] sm:$0xff]  ;;  %v1020_v29 = vld [vmem:[#allocation13 + $0x858] sm:$0xff] }
 0x354   :  { %1722 = vmatpush1.msra.mxu0 %v1123_v31  ;;  %1684 = vmatprep.subr.mxu1 %v988_v32  ;;  %v891_v30 = vld [vmem:[#allocation13 + $0x450] sm:$0xff]  ;;  %v884_v32 = vld [vmem:[#allocation13 + $0x418] sm:$0xff] }
 0x355   :  { %1723 = vmatprep.subr.mxu0 %v1116_v33  ;;  %1685 = vmatpush2.msra.mxu1 %v987_v34  ;;  %v1019_v31 = vld [vmem:[#allocation13 + $0x850] sm:$0xff]  ;;  %v1012_v33 = vld [vmem:[#allocation13 + $0x818] sm:$0xff] }
 0x356   :  { %1724 = vmatpush1.msra.mxu0 %v1115_v35  ;;  %1686 = vmatprep.subr.mxu1 %v980_v36  ;;  %v883_v34 = vld [vmem:[#allocation13 + $0x410] sm:$0xff]  ;;  %v1260_v36 = vld [vmem:[#allocation13 + $0xfd8] sm:$0xff] }
 0x357   :  { %1725 = vmatprep.subr.mxu0 %v1108_v37  ;;  %1687 = vmatpush2.msra.mxu1 %v979_v38  ;;  %v1011_v35 = vld [vmem:[#allocation13 + $0x810] sm:$0xff]  ;;  %v1388_v37 = vld [vmem:[#allocation13 + $0x13d8] sm:$0xff] }
 0x358   :  { %1726 = vmatpush1.msra.mxu0 %v1107_v39  ;;  %1688 = vmatprep.subr.mxu1 %v972_v40  ;;  %v1259_v38 = vld [vmem:[#allocation13 + $0xfd0] sm:$0xff]  ;;  %v1252_v40 = vld [vmem:[#allocation13 + $0xf98] sm:$0xff] }
 0x359   :  { %1727 = vmatprep.subr.mxu0 %v1100_v41  ;;  %1689 = vmatpush2.msra.mxu1 %v971_v42  ;;  %v1387_v39 = vld [vmem:[#allocation13 + $0x13d0] sm:$0xff]  ;;  %v1380_v41 = vld [vmem:[#allocation13 + $0x1398] sm:$0xff] }
 0x35a   :  { %1728 = vmatpush1.msra.mxu0 %v1099_v44  ;;  %1690 = vmatprep.subr.mxu1 %v964_v45  ;;  %v1251_v42 = vld [vmem:[#allocation13 + $0xf90] sm:$0xff]  ;;  %v1244_v45 = vld [vmem:[#allocation13 + $0xf58] sm:$0xff] }
 0x35b   :  { %1729 = vmatprep.subr.mxu0 %v1092_v46  ;;  %1691 = vmatpush2.msra.mxu1 %v963_v47  ;;  %v1379_v44 = vld [vmem:[#allocation13 + $0x1390] sm:$0xff]  ;;  %v1372_v46 = vld [vmem:[#allocation13 + $0x1358] sm:$0xff] }
 0x35c   :  { %1730 = vmatpush1.msra.mxu0 %v1091_v48  ;;  %1692 = vmatprep.subr.mxu1 %v956_v49  ;;  %v1243_v47 = vld [vmem:[#allocation13 + $0xf50] sm:$0xff]  ;;  %v1236_v49 = vld [vmem:[#allocation13 + $0xf18] sm:$0xff] }
 0x35d   :  { %1731 = vmatprep.subr.mxu0 %v1084_v50  ;;  %1693 = vmatpush2.msra.mxu1 %v955_v51  ;;  %v1371_v48 = vld [vmem:[#allocation13 + $0x1350] sm:$0xff]  ;;  %v1364_v50 = vld [vmem:[#allocation13 + $0x1318] sm:$0xff] }
 0x35e   :  { %1732 = vmatpush1.msra.mxu0 %v1083_v52  ;;  %1694 = vmatprep.subr.mxu1 %v948_v53  ;;  %v1235_v51 = vld [vmem:[#allocation13 + $0xf10] sm:$0xff]  ;;  %v1228_v53 = vld [vmem:[#allocation13 + $0xed8] sm:$0xff] }
 0x35f   :  { %1733 = vmatprep.subr.mxu0 %v1076_v54  ;;  %1695 = vmatpush2.msra.mxu1 %v947_v55  ;;  %v1363_v52 = vld [vmem:[#allocation13 + $0x1310] sm:$0xff]  ;;  %v1356_v54 = vld [vmem:[#allocation13 + $0x12d8] sm:$0xff] }
 0x360   :  { %1734 = vmatpush1.msra.mxu0 %v1075_v56  ;;  %1696 = vmatprep.subr.mxu1 %v940_v57  ;;  %v1227_v55 = vld [vmem:[#allocation13 + $0xed0] sm:$0xff]  ;;  %v1220_v57 = vld [vmem:[#allocation13 + $0xe98] sm:$0xff] }
 0x361   :  { %1735 = vmatprep.subr.mxu0 %v1068_v62  ;;  %1697 = vmatpush2.msra.mxu1 %v939_v63  ;;  %v1355_v56 = vld [vmem:[#allocation13 + $0x12d0] sm:$0xff]  ;;  %v1348_v62 = vld [vmem:[#allocation13 + $0x1298] sm:$0xff] }
 0x362   :  { %1736 = vmatpush1.msra.mxu0 %v1067_v2  ;;  %1698 = vmatprep.subr.mxu1 %v932_v3  ;;  %v1219_v63 = vld [vmem:[#allocation13 + $0xe90] sm:$0xff]  ;;  %v1212_v3 = vld [vmem:[#allocation13 + $0xe58] sm:$0xff] }
 0x363   :  { %1737 = vmatprep.subr.mxu0 %v1060_v4  ;;  %1699 = vmatpush2.msra.mxu1 %v931_v8  ;;  %v1347_v2 = vld [vmem:[#allocation13 + $0x1290] sm:$0xff]  ;;  %v1340_v4 = vld [vmem:[#allocation13 + $0x1258] sm:$0xff] }
 0x364   :  { %1738 = vmatpush1.msra.mxu0 %v1059_v11  ;;  %1700 = vmatprep.subr.mxu1 %v924_v12  ;;  %v1211_v8 = vld [vmem:[#allocation13 + $0xe50] sm:$0xff]  ;;  %v1204_v12 = vld [vmem:[#allocation13 + $0xe18] sm:$0xff] }
 0x365   :  { %1739 = vmatprep.subr.mxu0 %v1052_v13  ;;  %1701 = vmatpush2.msra.mxu1 %v923_v14  ;;  %v1339_v11 = vld [vmem:[#allocation13 + $0x1250] sm:$0xff]  ;;  %v1332_v13 = vld [vmem:[#allocation13 + $0x1218] sm:$0xff] }
 0x366   :  { %1740 = vmatpush1.msra.mxu0 %v1051_v15  ;;  %1702 = vmatprep.subr.mxu1 %v916_v16  ;;  %v1203_v14 = vld [vmem:[#allocation13 + $0xe10] sm:$0xff]  ;;  %v1196_v16 = vld [vmem:[#allocation13 + $0xdd8] sm:$0xff] }
 0x367   :  { %1741 = vmatprep.subr.mxu0 %v1044_v17  ;;  %1703 = vmatpush2.msra.mxu1 %v915_v18  ;;  %v1331_v15 = vld [vmem:[#allocation13 + $0x1210] sm:$0xff]  ;;  %v1324_v17 = vld [vmem:[#allocation13 + $0x11d8] sm:$0xff] }
 0x368   :  { %1742 = vmatpush1.msra.mxu0 %v1043_v19  ;;  %1704 = vmatprep.subr.mxu1 %v908_v20  ;;  %v1195_v18 = vld [vmem:[#allocation13 + $0xdd0] sm:$0xff]  ;;  %v1188_v20 = vld [vmem:[#allocation13 + $0xd98] sm:$0xff] }
 0x369   :  { %1743 = vmatprep.subr.mxu0 %v1036_v21  ;;  %1705 = vmatpush2.msra.mxu1 %v907_v22  ;;  %v1323_v19 = vld [vmem:[#allocation13 + $0x11d0] sm:$0xff]  ;;  %v1316_v21 = vld [vmem:[#allocation13 + $0x1198] sm:$0xff] }
 0x36a   :  { %1744 = vmatpush1.msra.mxu0 %v1035_v23  ;;  %1706 = vmatprep.subr.mxu1 %v900_v25  ;;  %v1187_v22 = vld [vmem:[#allocation13 + $0xd90] sm:$0xff]  ;;  %v1180_v25 = vld [vmem:[#allocation13 + $0xd58] sm:$0xff] }
 0x36b   :  { %1745 = vmatprep.subr.mxu0 %v1028_v26  ;;  %1707 = vmatpush2.msra.mxu1 %v899_v27  ;;  %v1315_v23 = vld [vmem:[#allocation13 + $0x1190] sm:$0xff]  ;;  %v1308_v26 = vld [vmem:[#allocation13 + $0x1158] sm:$0xff] }
 0x36c   :  { %1746 = vmatpush1.msra.mxu0 %v1027_v28  ;;  %1708 = vmatprep.subr.mxu1 %v892_v59  ;;  %v1179_v27 = vld [vmem:[#allocation13 + $0xd50] sm:$0xff]  ;;  %v1172_v59 = vld [vmem:[#allocation13 + $0xd18] sm:$0xff] }
 0x36d   :  { %1747 = vmatprep.subr.mxu0 %v1020_v29  ;;  %1709 = vmatpush2.msra.mxu1 %v891_v30  ;;  %v1307_v28 = vld [vmem:[#allocation13 + $0x1150] sm:$0xff]  ;;  %v1300_v29 = vld [vmem:[#allocation13 + $0x1118] sm:$0xff] }
 0x36e   :  { %1748 = vmatpush1.msra.mxu0 %v1019_v31  ;;  %1710 = vmatprep.subr.mxu1 %v884_v32  ;;  %v1171_v30 = vld [vmem:[#allocation13 + $0xd10] sm:$0xff]  ;;  %v1164_v32 = vld [vmem:[#allocation13 + $0xcd8] sm:$0xff] }
 0x36f   :  { %1749 = vmatprep.subr.mxu0 %v1012_v33  ;;  %1711 = vmatpush2.msra.mxu1 %v883_v34  ;;  %v1299_v31 = vld [vmem:[#allocation13 + $0x1110] sm:$0xff]  ;;  %v1292_v33 = vld [vmem:[#allocation13 + $0x10d8] sm:$0xff] }
 0x370   :  { %1750 = vmatpush1.msra.mxu0 %v1011_v35  ;;  %1713 = vmatmul.mubr.f32.vlgmr.msra.gmra.mxu1 %v7740_v61  ;;  %v1163_v34 = vld [vmem:[#allocation13 + $0xcd0] sm:$0xff] }
 0x371   :  { %1751 = vmatprep.subr.mxu0 %v1260_v36  ;;  %1790 = vmatprep.subr.mxu1 %v1388_v37  ;;  %v1291_v35 = vld [vmem:[#allocation13 + $0x10d0] sm:$0xff]  ;;  %v1156_v36 = vld [vmem:[#allocation13 + $0xc98] sm:$0xff] }
 0x372   :  { %1752 = vmatpush2.msra.mxu0 %v1259_v38  ;;  %1791 = vmatpush1.msra.mxu1 %v1387_v39  ;;  %v1284_v37 = vld [vmem:[#allocation13 + $0x1098] sm:$0xff]  ;;  %v1155_v38 = vld [vmem:[#allocation13 + $0xc90] sm:$0xff] }
 0x373   :  { %1753 = vmatprep.subr.mxu0 %v1252_v40  ;;  %1792 = vmatprep.subr.mxu1 %v1380_v41  ;;  %v1283_v39 = vld [vmem:[#allocation13 + $0x1090] sm:$0xff]  ;;  %v1148_v40 = vld [vmem:[#allocation13 + $0xc58] sm:$0xff] }
 0x374   :  { %1754 = vmatpush2.msra.mxu0 %v1251_v42  ;;  %1793 = vmatpush1.msra.mxu1 %v1379_v44  ;;  %v1276_v41 = vld [vmem:[#allocation13 + $0x1058] sm:$0xff]  ;;  %v1147_v42 = vld [vmem:[#allocation13 + $0xc50] sm:$0xff] }
 0x375   :  { %1755 = vmatprep.subr.mxu0 %v1244_v45  ;;  %1794 = vmatprep.subr.mxu1 %v1372_v46  ;;  %v1275_v44 = vld [vmem:[#allocation13 + $0x1050] sm:$0xff]  ;;  %v1140_v45 = vld [vmem:[#allocation13 + $0xc18] sm:$0xff] }
 0x376   :  { %1756 = vmatpush2.msra.mxu0 %v1243_v47  ;;  %1795 = vmatpush1.msra.mxu1 %v1371_v48  ;;  %v1268_v46 = vld [vmem:[#allocation13 + $0x1018] sm:$0xff]  ;;  %v1139_v47 = vld [vmem:[#allocation13 + $0xc10] sm:$0xff] }
 0x377   :  { %1757 = vmatprep.subr.mxu0 %v1236_v49  ;;  %1796 = vmatprep.subr.mxu1 %v1364_v50  ;;  %v1267_v48 = vld [vmem:[#allocation13 + $0x1010] sm:$0xff]  ;;  %v878_v49 = vld [vmem:[#allocation13 + $0x3e8] sm:$0xff] }
 0x378   :  { %1758 = vmatpush2.msra.mxu0 %v1235_v51  ;;  %1797 = vmatpush1.msra.mxu1 %v1363_v52  ;;  %v1134_v50 = vld [vmem:[#allocation13 + $0xbe8] sm:$0xff]  ;;  %v877_v51 = vld [vmem:[#allocation13 + $0x3e0] sm:$0xff] }
 0x379   :  { %1759 = vmatprep.subr.mxu0 %v1228_v53  ;;  %1798 = vmatprep.subr.mxu1 %v1356_v54  ;;  %v1133_v52 = vld [vmem:[#allocation13 + $0xbe0] sm:$0xff]  ;;  %v870_v53 = vld [vmem:[#allocation13 + $0x3a8] sm:$0xff] }
 0x37a   :  { %1760 = vmatpush2.msra.mxu0 %v1227_v55  ;;  %1799 = vmatpush1.msra.mxu1 %v1355_v56  ;;  %v1126_v54 = vld [vmem:[#allocation13 + $0xba8] sm:$0xff]  ;;  %v869_v55 = vld [vmem:[#allocation13 + $0x3a0] sm:$0xff] }
 0x37b   :  { %1761 = vmatprep.subr.mxu0 %v1220_v57  ;;  %1800 = vmatprep.subr.mxu1 %v1348_v62  ;;  %v1125_v56 = vld [vmem:[#allocation13 + $0xba0] sm:$0xff]  ;;  %v862_v57 = vld [vmem:[#allocation13 + $0x368] sm:$0xff] }
 0x37c   :  { %1762 = vmatpush2.msra.mxu0 %v1219_v63  ;;  %1801 = vmatpush1.msra.mxu1 %v1347_v2  ;;  %v1118_v62 = vld [vmem:[#allocation13 + $0xb68] sm:$0xff]  ;;  %v861_v63 = vld [vmem:[#allocation13 + $0x360] sm:$0xff] }
 0x37d   :  { %1763 = vmatprep.subr.mxu0 %v1212_v3  ;;  %1802 = vmatprep.subr.mxu1 %v1340_v4  ;;  %v1117_v2 = vld [vmem:[#allocation13 + $0xb60] sm:$0xff]  ;;  %v854_v3 = vld [vmem:[#allocation13 + $0x328] sm:$0xff] }
 0x37e   :  { %1764 = vmatpush2.msra.mxu0 %v1211_v8  ;;  %1803 = vmatpush1.msra.mxu1 %v1339_v11  ;;  %v1110_v4 = vld [vmem:[#allocation13 + $0xb28] sm:$0xff]  ;;  %v853_v8 = vld [vmem:[#allocation13 + $0x320] sm:$0xff] }
 0x37f   :  { %1765 = vmatprep.subr.mxu0 %v1204_v12  ;;  %1804 = vmatprep.subr.mxu1 %v1332_v13  ;;  %v1109_v11 = vld [vmem:[#allocation13 + $0xb20] sm:$0xff]  ;;  %v846_v12 = vld [vmem:[#allocation13 + $0x2e8] sm:$0xff] }
 0x380   :  { %1766 = vmatpush2.msra.mxu0 %v1203_v14  ;;  %1805 = vmatpush1.msra.mxu1 %v1331_v15  ;;  %v1102_v13 = vld [vmem:[#allocation13 + $0xae8] sm:$0xff]  ;;  %v845_v14 = vld [vmem:[#allocation13 + $0x2e0] sm:$0xff] }
 0x381   :  { %1767 = vmatprep.subr.mxu0 %v1196_v16  ;;  %1806 = vmatprep.subr.mxu1 %v1324_v17  ;;  %v1101_v15 = vld [vmem:[#allocation13 + $0xae0] sm:$0xff]  ;;  %v838_v16 = vld [vmem:[#allocation13 + $0x2a8] sm:$0xff] }
 0x382   :  { %1768 = vmatpush2.msra.mxu0 %v1195_v18  ;;  %1807 = vmatpush1.msra.mxu1 %v1323_v19  ;;  %v1094_v17 = vld [vmem:[#allocation13 + $0xaa8] sm:$0xff]  ;;  %v837_v18 = vld [vmem:[#allocation13 + $0x2a0] sm:$0xff] }
 0x383   :  { %1769 = vmatprep.subr.mxu0 %v1188_v20  ;;  %1808 = vmatprep.subr.mxu1 %v1316_v21  ;;  %v1093_v19 = vld [vmem:[#allocation13 + $0xaa0] sm:$0xff]  ;;  %v830_v20 = vld [vmem:[#allocation13 + $0x268] sm:$0xff] }
 0x384   :  { %1770 = vmatpush2.msra.mxu0 %v1187_v22  ;;  %1809 = vmatpush1.msra.mxu1 %v1315_v23  ;;  %v1086_v21 = vld [vmem:[#allocation13 + $0xa68] sm:$0xff]  ;;  %v829_v22 = vld [vmem:[#allocation13 + $0x260] sm:$0xff] }
 0x385   :  { %1771 = vmatprep.subr.mxu0 %v1180_v25  ;;  %1810 = vmatprep.subr.mxu1 %v1308_v26  ;;  %v1085_v23 = vld [vmem:[#allocation13 + $0xa60] sm:$0xff]  ;;  %v822_v25 = vld [vmem:[#allocation13 + $0x228] sm:$0xff] }
 0x386   :  { %1772 = vmatpush2.msra.mxu0 %v1179_v27  ;;  %1811 = vmatpush1.msra.mxu1 %v1307_v28  ;;  %v1078_v26 = vld [vmem:[#allocation13 + $0xa28] sm:$0xff]  ;;  %v821_v27 = vld [vmem:[#allocation13 + $0x220] sm:$0xff] }
 0x387   :  { %1773 = vmatprep.subr.mxu0 %v1172_v59  ;;  %1812 = vmatprep.subr.mxu1 %v1300_v29  ;;  %v1077_v28 = vld [vmem:[#allocation13 + $0xa20] sm:$0xff]  ;;  %v814_v59 = vld [vmem:[#allocation13 + $0x1e8] sm:$0xff] }
 0x388   :  { %1774 = vmatpush2.msra.mxu0 %v1171_v30  ;;  %1813 = vmatpush1.msra.mxu1 %v1299_v31  ;;  %v1070_v29 = vld [vmem:[#allocation13 + $0x9e8] sm:$0xff]  ;;  %v813_v30 = vld [vmem:[#allocation13 + $0x1e0] sm:$0xff] }
 0x389   :  { %1775 = vmatprep.subr.mxu0 %v1164_v32  ;;  %1814 = vmatprep.subr.mxu1 %v1292_v33  ;;  %v1069_v31 = vld [vmem:[#allocation13 + $0x9e0] sm:$0xff]  ;;  %v806_v32 = vld [vmem:[#allocation13 + $0x1a8] sm:$0xff] }
 0x38a   :  { %1776 = vmatpush2.msra.mxu0 %v1163_v34  ;;  %1815 = vmatpush1.msra.mxu1 %v1291_v35  ;;  %v1062_v33 = vld [vmem:[#allocation13 + $0x9a8] sm:$0xff]  ;;  %v805_v34 = vld [vmem:[#allocation13 + $0x1a0] sm:$0xff] }
 0x38b   :  { %1777 = vmatprep.subr.mxu0 %v1156_v36  ;;  %1816 = vmatprep.subr.mxu1 %v1284_v37  ;;  %v1061_v35 = vld [vmem:[#allocation13 + $0x9a0] sm:$0xff]  ;;  %v798_v36 = vld [vmem:[#allocation13 + $0x168] sm:$0xff] }
 0x38c   :  { %1778 = vmatpush2.msra.mxu0 %v1155_v38  ;;  %1817 = vmatpush1.msra.mxu1 %v1283_v39  ;;  %v1054_v37 = vld [vmem:[#allocation13 + $0x968] sm:$0xff]  ;;  %v797_v38 = vld [vmem:[#allocation13 + $0x160] sm:$0xff] }
 0x38d   :  { %1779 = vmatprep.subr.mxu0 %v1148_v40  ;;  %1818 = vmatprep.subr.mxu1 %v1276_v41  ;;  %v1053_v39 = vld [vmem:[#allocation13 + $0x960] sm:$0xff]  ;;  %v790_v40 = vld [vmem:[#allocation13 + $0x128] sm:$0xff] }
 0x38e   :  { %1780 = vmatpush2.msra.mxu0 %v1147_v42  ;;  %1819 = vmatpush1.msra.mxu1 %v1275_v44  ;;  %v1046_v41 = vld [vmem:[#allocation13 + $0x928] sm:$0xff]  ;;  %v789_v42 = vld [vmem:[#allocation13 + $0x120] sm:$0xff] }
 0x38f   :  { %1781 = vmatprep.subr.mxu0 %v1140_v45  ;;  %1820 = vmatprep.subr.mxu1 %v1268_v46  ;;  %v1045_v44 = vld [vmem:[#allocation13 + $0x920] sm:$0xff]  ;;  %v782_v45 = vld [vmem:[#allocation13 + $0xe8] sm:$0xff] }
 0x390   :  { %1782 = vmatpush2.msra.mxu0 %v1139_v47  ;;  %1821 = vmatpush1.msra.mxu1 %v1267_v48  ;;  %v1038_v46 = vld [vmem:[#allocation13 + $0x8e8] sm:$0xff]  ;;  %v781_v47 = vld [vmem:[#allocation13 + $0xe0] sm:$0xff] }
 0x391   :  { %1854 = vmatprep.mubr.f32.mxu1 %v7510_v1  ;;  %1784 = vmatmul.mubr.f32.vlgmr.msra.gmra.mxu0 %v7743_v0  ;;  %v1037_v48 = vld [vmem:[#allocation13 + $0x8e0] sm:$0xff] }
 0x392   :  { %1855 = vmatmul.mubr.f32.vlgmr.msra.gmra.mxu1 %v7754_v24  ;;  %1861 = vmatprep.subr.mxu0 %v878_v49  ;;  %v774_v49 = vld [vmem:[#allocation13 + $0xa8] sm:$0xff] }
 0x393   :  { %1932 = vmatprep.subr.mxu1 %v1134_v50  ;;  %1862 = vmatpush1.msra.mxu0 %v877_v51  ;;  %v1030_v50 = vld [vmem:[#allocation13 + $0x8a8] sm:$0xff]  ;;  %v773_v51 = vld [vmem:[#allocation13 + $0xa0] sm:$0xff] }
 0x394   :  { %1925 = vmatprep.mubr.f32.mxu0 %v7734_v58  ;;  %1933 = vmatpush1.msra.mxu1 %v1133_v52  ;;  %v1029_v52 = vld [vmem:[#allocation13 + $0x8a0] sm:$0xff] }
 0x395   :  { %1996 = vmatprep.mubr.f32.mxu1 %v7738_v60  ;;  %1863 = vmatprep.subr.mxu0 %v870_v53  ;;  %v766_v53 = vld [vmem:[#allocation13 + $0x68] sm:$0xff] }
 0x396   :  { %1934 = vmatprep.subr.mxu1 %v1126_v54  ;;  %1864 = vmatpush1.msra.mxu0 %v869_v55  ;;  %v1022_v54 = vld [vmem:[#allocation13 + $0x868] sm:$0xff]  ;;  %v765_v55 = vld [vmem:[#allocation13 + $0x60] sm:$0xff] }
 0x397   :  { %1935 = vmatpush1.msra.mxu1 %v1125_v56  ;;  %1865 = vmatprep.subr.mxu0 %v862_v57  ;;  %v1021_v56 = vld [vmem:[#allocation13 + $0x860] sm:$0xff]  ;;  %v758_v57 = vld [vmem:[#allocation13 + $0x28] sm:$0xff] }
 0x398   :  { %1936 = vmatprep.subr.mxu1 %v1118_v62  ;;  %1866 = vmatpush1.msra.mxu0 %v861_v63  ;;  %v1014_v62 = vld [vmem:[#allocation13 + $0x828] sm:$0xff]  ;;  %v757_v63 = vld [vmem:[#allocation13 + $0x20] sm:$0xff] }
 0x399   :  { %1937 = vmatpush1.msra.mxu1 %v1117_v2  ;;  %1867 = vmatprep.subr.mxu0 %v854_v3  ;;  %v1013_v2 = vld [vmem:[#allocation13 + $0x820] sm:$0xff]  ;;  %v1006_v3 = vld [vmem:[#allocation13 + $0x7e8] sm:$0xff] }
 0x39a   :  { %1938 = vmatprep.subr.mxu1 %v1110_v4  ;;  %1868 = vmatpush1.msra.mxu0 %v853_v8  ;;  %v1262_v4 = vld [vmem:[#allocation13 + $0xfe8] sm:$0xff]  ;;  %v1005_v8 = vld [vmem:[#allocation13 + $0x7e0] sm:$0xff] }
 0x39b   :  { %1939 = vmatpush1.msra.mxu1 %v1109_v11  ;;  %1869 = vmatprep.subr.mxu0 %v846_v12  ;;  %v1261_v11 = vld [vmem:[#allocation13 + $0xfe0] sm:$0xff]  ;;  %v998_v12 = vld [vmem:[#allocation13 + $0x7a8] sm:$0xff] }
 0x39c   :  { %1940 = vmatprep.subr.mxu1 %v1102_v13  ;;  %1870 = vmatpush1.msra.mxu0 %v845_v14  ;;  %v1254_v13 = vld [vmem:[#allocation13 + $0xfa8] sm:$0xff]  ;;  %v997_v14 = vld [vmem:[#allocation13 + $0x7a0] sm:$0xff] }
 0x39d   :  { %1941 = vmatpush1.msra.mxu1 %v1101_v15  ;;  %1871 = vmatprep.subr.mxu0 %v838_v16  ;;  %v1253_v15 = vld [vmem:[#allocation13 + $0xfa0] sm:$0xff]  ;;  %v990_v16 = vld [vmem:[#allocation13 + $0x768] sm:$0xff] }
 0x39e   :  { %1942 = vmatprep.subr.mxu1 %v1094_v17  ;;  %1872 = vmatpush1.msra.mxu0 %v837_v18  ;;  %v1246_v17 = vld [vmem:[#allocation13 + $0xf68] sm:$0xff]  ;;  %v989_v18 = vld [vmem:[#allocation13 + $0x760] sm:$0xff] }
 0x39f   :  { %1943 = vmatpush1.msra.mxu1 %v1093_v19  ;;  %1873 = vmatprep.subr.mxu0 %v830_v20  ;;  %v1245_v19 = vld [vmem:[#allocation13 + $0xf60] sm:$0xff]  ;;  %v982_v20 = vld [vmem:[#allocation13 + $0x728] sm:$0xff] }
 0x3a0   :  { %1944 = vmatprep.subr.mxu1 %v1086_v21  ;;  %1874 = vmatpush1.msra.mxu0 %v829_v22  ;;  %v1238_v21 = vld [vmem:[#allocation13 + $0xf28] sm:$0xff]  ;;  %v981_v22 = vld [vmem:[#allocation13 + $0x720] sm:$0xff] }
 0x3a1   :  { %1945 = vmatpush1.msra.mxu1 %v1085_v23  ;;  %1875 = vmatprep.subr.mxu0 %v822_v25  ;;  %v1237_v23 = vld [vmem:[#allocation13 + $0xf20] sm:$0xff]  ;;  %v974_v25 = vld [vmem:[#allocation13 + $0x6e8] sm:$0xff] }
 0x3a2   :  { %1946 = vmatprep.subr.mxu1 %v1078_v26  ;;  %1876 = vmatpush1.msra.mxu0 %v821_v27  ;;  %v1230_v26 = vld [vmem:[#allocation13 + $0xee8] sm:$0xff]  ;;  %v973_v27 = vld [vmem:[#allocation13 + $0x6e0] sm:$0xff] }
 0x3a3   :  { %1947 = vmatpush1.msra.mxu1 %v1077_v28  ;;  %1877 = vmatprep.subr.mxu0 %v814_v59  ;;  %v1229_v28 = vld [vmem:[#allocation13 + $0xee0] sm:$0xff]  ;;  %v966_v59 = vld [vmem:[#allocation13 + $0x6a8] sm:$0xff] }
 0x3a4   :  { %1948 = vmatprep.subr.mxu1 %v1070_v29  ;;  %1878 = vmatpush1.msra.mxu0 %v813_v30  ;;  %v1222_v29 = vld [vmem:[#allocation13 + $0xea8] sm:$0xff]  ;;  %v965_v30 = vld [vmem:[#allocation13 + $0x6a0] sm:$0xff] }
 0x3a5   :  { %1949 = vmatpush1.msra.mxu1 %v1069_v31  ;;  %1879 = vmatprep.subr.mxu0 %v806_v32  ;;  %v1221_v31 = vld [vmem:[#allocation13 + $0xea0] sm:$0xff]  ;;  %v958_v32 = vld [vmem:[#allocation13 + $0x668] sm:$0xff] }
 0x3a6   :  { %1950 = vmatprep.subr.mxu1 %v1062_v33  ;;  %1880 = vmatpush1.msra.mxu0 %v805_v34  ;;  %v1214_v33 = vld [vmem:[#allocation13 + $0xe68] sm:$0xff]  ;;  %v957_v34 = vld [vmem:[#allocation13 + $0x660] sm:$0xff] }
 0x3a7   :  { %1951 = vmatpush1.msra.mxu1 %v1061_v35  ;;  %1881 = vmatprep.subr.mxu0 %v798_v36  ;;  %v1213_v35 = vld [vmem:[#allocation13 + $0xe60] sm:$0xff]  ;;  %v950_v36 = vld [vmem:[#allocation13 + $0x628] sm:$0xff] }
 0x3a8   :  { %1952 = vmatprep.subr.mxu1 %v1054_v37  ;;  %1882 = vmatpush1.msra.mxu0 %v797_v38  ;;  %v1206_v37 = vld [vmem:[#allocation13 + $0xe28] sm:$0xff]  ;;  %v949_v38 = vld [vmem:[#allocation13 + $0x620] sm:$0xff] }
 0x3a9   :  { %1953 = vmatpush1.msra.mxu1 %v1053_v39  ;;  %1883 = vmatprep.subr.mxu0 %v790_v40  ;;  %v1205_v39 = vld [vmem:[#allocation13 + $0xe20] sm:$0xff]  ;;  %v942_v40 = vld [vmem:[#allocation13 + $0x5e8] sm:$0xff] }
 0x3aa   :  { %1954 = vmatprep.subr.mxu1 %v1046_v41  ;;  %1884 = vmatpush1.msra.mxu0 %v789_v42  ;;  %v1198_v41 = vld [vmem:[#allocation13 + $0xde8] sm:$0xff]  ;;  %v941_v42 = vld [vmem:[#allocation13 + $0x5e0] sm:$0xff] }
 0x3ab   :  { %1955 = vmatpush1.msra.mxu1 %v1045_v44  ;;  %1885 = vmatprep.subr.mxu0 %v782_v45  ;;  %v1197_v44 = vld [vmem:[#allocation13 + $0xde0] sm:$0xff]  ;;  %v934_v45 = vld [vmem:[#allocation13 + $0x5a8] sm:$0xff] }
 0x3ac   :  { %1956 = vmatprep.subr.mxu1 %v1038_v46  ;;  %1886 = vmatpush1.msra.mxu0 %v781_v47  ;;  %v1190_v46 = vld [vmem:[#allocation13 + $0xda8] sm:$0xff]  ;;  %v933_v47 = vld [vmem:[#allocation13 + $0x5a0] sm:$0xff] }
 0x3ad   :  { %1957 = vmatpush1.msra.mxu1 %v1037_v48  ;;  %1887 = vmatprep.subr.mxu0 %v774_v49  ;;  %v1189_v48 = vld [vmem:[#allocation13 + $0xda0] sm:$0xff]  ;;  %v926_v49 = vld [vmem:[#allocation13 + $0x568] sm:$0xff] }
 0x3ae   :  { %1958 = vmatprep.subr.mxu1 %v1030_v50  ;;  %1888 = vmatpush1.msra.mxu0 %v773_v51  ;;  %v1182_v50 = vld [vmem:[#allocation13 + $0xd68] sm:$0xff]  ;;  %v925_v51 = vld [vmem:[#allocation13 + $0x560] sm:$0xff] }
 0x3af   :  { %1959 = vmatpush1.msra.mxu1 %v1029_v52  ;;  %1889 = vmatprep.subr.mxu0 %v766_v53  ;;  %v1181_v52 = vld [vmem:[#allocation13 + $0xd60] sm:$0xff]  ;;  %v918_v53 = vld [vmem:[#allocation13 + $0x528] sm:$0xff] }
 0x3b0   :  { %1960 = vmatprep.subr.mxu1 %v1022_v54  ;;  %1890 = vmatpush1.msra.mxu0 %v765_v55  ;;  %v1174_v54 = vld [vmem:[#allocation13 + $0xd28] sm:$0xff]  ;;  %v917_v55 = vld [vmem:[#allocation13 + $0x520] sm:$0xff] }
 0x3b1   :  { %1961 = vmatpush1.msra.mxu1 %v1021_v56  ;;  %1891 = vmatprep.subr.mxu0 %v758_v57  ;;  %v1173_v56 = vld [vmem:[#allocation13 + $0xd20] sm:$0xff]  ;;  %v910_v57 = vld [vmem:[#allocation13 + $0x4e8] sm:$0xff] }
 0x3b2   :  { %1962 = vmatprep.subr.mxu1 %v1014_v62  ;;  %1892 = vmatpush1.msra.mxu0 %v757_v63  ;;  %v1166_v62 = vld [vmem:[#allocation13 + $0xce8] sm:$0xff]  ;;  %v909_v63 = vld [vmem:[#allocation13 + $0x4e0] sm:$0xff] }
 0x3b3   :  { %1963 = vmatpush1.msra.mxu1 %v1013_v2  ;;  %1893 = vmatprep.subr.mxu0 %v1006_v3  ;;  %v1165_v2 = vld [vmem:[#allocation13 + $0xce0] sm:$0xff]  ;;  %v902_v3 = vld [vmem:[#allocation13 + $0x4a8] sm:$0xff] }
 0x3b4   :  { %1964 = vmatprep.subr.mxu1 %v1262_v4  ;;  %1894 = vmatpush2.msra.mxu0 %v1005_v8  ;;  %v1158_v4 = vld [vmem:[#allocation13 + $0xca8] sm:$0xff]  ;;  %v901_v8 = vld [vmem:[#allocation13 + $0x4a0] sm:$0xff] }
 0x3b5   :  { %1965 = vmatpush2.msra.mxu1 %v1261_v11  ;;  %1895 = vmatprep.subr.mxu0 %v998_v12  ;;  %v1157_v11 = vld [vmem:[#allocation13 + $0xca0] sm:$0xff]  ;;  %v894_v12 = vld [vmem:[#allocation13 + $0x468] sm:$0xff] }
 0x3b6   :  { %1966 = vmatprep.subr.mxu1 %v1254_v13  ;;  %1896 = vmatpush2.msra.mxu0 %v997_v14  ;;  %v1150_v13 = vld [vmem:[#allocation13 + $0xc68] sm:$0xff]  ;;  %v893_v14 = vld [vmem:[#allocation13 + $0x460] sm:$0xff] }
 0x3b7   :  { %1967 = vmatpush2.msra.mxu1 %v1253_v15  ;;  %1897 = vmatprep.subr.mxu0 %v990_v16  ;;  %v1149_v15 = vld [vmem:[#allocation13 + $0xc60] sm:$0xff]  ;;  %v886_v16 = vld [vmem:[#allocation13 + $0x428] sm:$0xff] }
 0x3b8   :  { %1968 = vmatprep.subr.mxu1 %v1246_v17  ;;  %1898 = vmatpush2.msra.mxu0 %v989_v18  ;;  %v1142_v17 = vld [vmem:[#allocation13 + $0xc28] sm:$0xff]  ;;  %v885_v18 = vld [vmem:[#allocation13 + $0x420] sm:$0xff] }
 0x3b9   :  { %1969 = vmatpush2.msra.mxu1 %v1245_v19  ;;  %1899 = vmatprep.subr.mxu0 %v982_v20  ;;  %v1141_v19 = vld [vmem:[#allocation13 + $0xc20] sm:$0xff]  ;;  %v1390_v20 = vld [vmem:[#allocation13 + $0x13e8] sm:$0xff] }
 0x3ba   :  { %1970 = vmatprep.subr.mxu1 %v1238_v21  ;;  %1900 = vmatpush2.msra.mxu0 %v981_v22  ;;  %v880_v21 = vld [vmem:[#allocation13 + $0x3f8] sm:$0xff]  ;;  %v1389_v22 = vld [vmem:[#allocation13 + $0x13e0] sm:$0xff] }
 0x3bb   :  { %1971 = vmatpush2.msra.mxu1 %v1237_v23  ;;  %1901 = vmatprep.subr.mxu0 %v974_v25  ;;  %v879_v23 = vld [vmem:[#allocation13 + $0x3f0] sm:$0xff]  ;;  %v1382_v25 = vld [vmem:[#allocation13 + $0x13a8] sm:$0xff] }
 0x3bc   :  { %1972 = vmatprep.subr.mxu1 %v1230_v26  ;;  %1902 = vmatpush2.msra.mxu0 %v973_v27  ;;  %v872_v26 = vld [vmem:[#allocation13 + $0x3b8] sm:$0xff]  ;;  %v1381_v27 = vld [vmem:[#allocation13 + $0x13a0] sm:$0xff] }
 0x3bd   :  { %1973 = vmatpush2.msra.mxu1 %v1229_v28  ;;  %1903 = vmatprep.subr.mxu0 %v966_v59  ;;  %v871_v28 = vld [vmem:[#allocation13 + $0x3b0] sm:$0xff]  ;;  %v1374_v59 = vld [vmem:[#allocation13 + $0x1368] sm:$0xff] }
 0x3be   :  { %1974 = vmatprep.subr.mxu1 %v1222_v29  ;;  %1904 = vmatpush2.msra.mxu0 %v965_v30  ;;  %v864_v29 = vld [vmem:[#allocation13 + $0x378] sm:$0xff]  ;;  %v1373_v30 = vld [vmem:[#allocation13 + $0x1360] sm:$0xff] }
 0x3bf   :  { %1975 = vmatpush2.msra.mxu1 %v1221_v31  ;;  %1905 = vmatprep.subr.mxu0 %v958_v32  ;;  %v863_v31 = vld [vmem:[#allocation13 + $0x370] sm:$0xff]  ;;  %v1366_v32 = vld [vmem:[#allocation13 + $0x1328] sm:$0xff] }
 0x3c0   :  { %1976 = vmatprep.subr.mxu1 %v1214_v33  ;;  %1906 = vmatpush2.msra.mxu0 %v957_v34  ;;  %v856_v33 = vld [vmem:[#allocation13 + $0x338] sm:$0xff]  ;;  %v1365_v34 = vld [vmem:[#allocation13 + $0x1320] sm:$0xff] }
 0x3c1   :  { %1977 = vmatpush2.msra.mxu1 %v1213_v35  ;;  %1907 = vmatprep.subr.mxu0 %v950_v36  ;;  %v855_v35 = vld [vmem:[#allocation13 + $0x330] sm:$0xff]  ;;  %v1358_v36 = vld [vmem:[#allocation13 + $0x12e8] sm:$0xff] }
 0x3c2   :  { %1978 = vmatprep.subr.mxu1 %v1206_v37  ;;  %1908 = vmatpush2.msra.mxu0 %v949_v38  ;;  %v848_v37 = vld [vmem:[#allocation13 + $0x2f8] sm:$0xff]  ;;  %v847_v38 = vld [vmem:[#allocation13 + $0x2f0] sm:$0xff] }
 0x3c3   :  { %1979 = vmatpush2.msra.mxu1 %v1205_v39  ;;  %1909 = vmatprep.subr.mxu0 %v942_v40  ;;  %v1350_v39 = vld [vmem:[#allocation13 + $0x12a8] sm:$0xff]  ;;  %v840_v40 = vld [vmem:[#allocation13 + $0x2b8] sm:$0xff] }
 0x3c4   :  { %1980 = vmatprep.subr.mxu1 %v1198_v41  ;;  %1910 = vmatpush2.msra.mxu0 %v941_v42  ;;  %v1349_v41 = vld [vmem:[#allocation13 + $0x12a0] sm:$0xff]  ;;  %v839_v42 = vld [vmem:[#allocation13 + $0x2b0] sm:$0xff] }
 0x3c5   :  { %1981 = vmatpush2.msra.mxu1 %v1197_v44  ;;  %1911 = vmatprep.subr.mxu0 %v934_v45  ;;  %v1342_v44 = vld [vmem:[#allocation13 + $0x1268] sm:$0xff]  ;;  %v832_v45 = vld [vmem:[#allocation13 + $0x278] sm:$0xff] }
 0x3c6   :  { %1982 = vmatprep.subr.mxu1 %v1190_v46  ;;  %1912 = vmatpush2.msra.mxu0 %v933_v47  ;;  %v1341_v46 = vld [vmem:[#allocation13 + $0x1260] sm:$0xff]  ;;  %v831_v47 = vld [vmem:[#allocation13 + $0x270] sm:$0xff] }
 0x3c7   :  { %1983 = vmatpush2.msra.mxu1 %v1189_v48  ;;  %1913 = vmatprep.subr.mxu0 %v926_v49  ;;  %v1334_v48 = vld [vmem:[#allocation13 + $0x1228] sm:$0xff]  ;;  %v824_v49 = vld [vmem:[#allocation13 + $0x238] sm:$0xff] }
 0x3c8   :  { %1984 = vmatprep.subr.mxu1 %v1182_v50  ;;  %1914 = vmatpush2.msra.mxu0 %v925_v51  ;;  %v1333_v50 = vld [vmem:[#allocation13 + $0x1220] sm:$0xff]  ;;  %v823_v51 = vld [vmem:[#allocation13 + $0x230] sm:$0xff] }
 0x3c9   :  { %1985 = vmatpush2.msra.mxu1 %v1181_v52  ;;  %1915 = vmatprep.subr.mxu0 %v918_v53  ;;  %v1326_v52 = vld [vmem:[#allocation13 + $0x11e8] sm:$0xff]  ;;  %v816_v53 = vld [vmem:[#allocation13 + $0x1f8] sm:$0xff] }
 0x3ca   :  { %1986 = vmatprep.subr.mxu1 %v1174_v54  ;;  %1916 = vmatpush2.msra.mxu0 %v917_v55  ;;  %v1325_v54 = vld [vmem:[#allocation13 + $0x11e0] sm:$0xff]  ;;  %v815_v55 = vld [vmem:[#allocation13 + $0x1f0] sm:$0xff] }
 0x3cb   :  { %1987 = vmatpush2.msra.mxu1 %v1173_v56  ;;  %1917 = vmatprep.subr.mxu0 %v910_v57  ;;  %v1318_v56 = vld [vmem:[#allocation13 + $0x11a8] sm:$0xff]  ;;  %v808_v57 = vld [vmem:[#allocation13 + $0x1b8] sm:$0xff] }
 0x3cc   :  { %1988 = vmatprep.subr.mxu1 %v1166_v62  ;;  %1918 = vmatpush2.msra.mxu0 %v909_v63  ;;  %v1317_v62 = vld [vmem:[#allocation13 + $0x11a0] sm:$0xff]  ;;  %v807_v63 = vld [vmem:[#allocation13 + $0x1b0] sm:$0xff] }
 0x3cd   :  { %1989 = vmatpush2.msra.mxu1 %v1165_v2  ;;  %1919 = vmatprep.subr.mxu0 %v902_v3  ;;  %v1310_v2 = vld [vmem:[#allocation13 + $0x1168] sm:$0xff]  ;;  %v800_v3 = vld [vmem:[#allocation13 + $0x178] sm:$0xff] }
 0x3ce   :  { %1990 = vmatprep.subr.mxu1 %v1158_v4  ;;  %1920 = vmatpush2.msra.mxu0 %v901_v8  ;;  %v1309_v4 = vld [vmem:[#allocation13 + $0x1160] sm:$0xff]  ;;  %v799_v8 = vld [vmem:[#allocation13 + $0x170] sm:$0xff] }
 0x3cf   :  { %1991 = vmatpush2.msra.mxu1 %v1157_v11  ;;  %1921 = vmatprep.subr.mxu0 %v894_v12  ;;  %v1302_v11 = vld [vmem:[#allocation13 + $0x1128] sm:$0xff]  ;;  %v792_v12 = vld [vmem:[#allocation13 + $0x138] sm:$0xff] }
 0x3d0   :  { %1992 = vmatprep.subr.mxu1 %v1150_v13  ;;  %1922 = vmatpush2.msra.mxu0 %v893_v14  ;;  %v7768_v13 = vld [vmem:[#allocation14] sm:$0xff] }
 0x3d1   :  { %1993 = vmatpush2.msra.mxu1 %v1149_v15  ;;  %1923 = vmatprep.subr.mxu0 %v886_v16  ;;  %v1301_v14 = vld [vmem:[#allocation13 + $0x1120] sm:$0xff]  ;;  %v791_v15 = vld [vmem:[#allocation13 + $0x130] sm:$0xff]  ;;  %v1294_v16 = vld [vmem:[#allocation13 + $0x10e8] sm:$0xff] }
 0x3d2   :  { %1994 = vmatprep.subr.mxu1 %v1142_v17  ;;  %1924 = vmatpush2.msra.mxu0 %v885_v18  ;;  %v784_v17 = vld [vmem:[#allocation13 + $0xf8] sm:$0xff]  ;;  %v1293_v18 = vld [vmem:[#allocation13 + $0x10e0] sm:$0xff] }
 0x3d3   :  { %1995 = vmatpush2.msra.mxu1 %v1141_v19  ;;  %1926 = vmatmul.mubr.f32.vlgmr.msra.gmra.mxu0 %v7740_v61  ;;  %v783_v19 = vld [vmem:[#allocation13 + $0xf0] sm:$0xff] }
 0x3d4   :  { %1997 = vmatmul.mubr.f32.vlgmr.msra.gmra.mxu1 %v7743_v0  ;;  %2003 = vmatprep.subr.mxu0 %v1390_v20  ;;  %v1398_v20 = vrot.slane %v7768_v13, %v7715_v6 }
 0x3d5   :  { %2074 = vmatprep.subr.mxu1 %v880_v21  ;;  %2004 = vmatpush1.msra.mxu0 %v1389_v22  ;;  %v1286_v21 = vld [vmem:[#allocation13 + $0x10a8] sm:$0xff]  ;;  %v776_v22 = vld [vmem:[#allocation13 + $0xb8] sm:$0xff] }
 0x3d6   :  { %2075 = vmatpush1.msra.mxu1 %v879_v23  ;;  %2138 = vmatprep.mubr.f32.mxu1 %v7734_v58  ;;  %v1357_v58 = vld [vmem:[#allocation13 + $0x12e0] sm:$0xff] }
 0x3d7   :  { %2005 = vmatprep.subr.mxu0 %v1382_v25  ;;  %2076 = vmatprep.subr.mxu1 %v872_v26  ;;  %v1285_v23 = vld [vmem:[#allocation13 + $0x10a0] sm:$0xff]  ;;  %v775_v25 = vld [vmem:[#allocation13 + $0xb0] sm:$0xff]  ;;  %v1278_v26 = vld [vmem:[#allocation13 + $0x1068] sm:$0xff] }
 0x3d8   :  { %2006 = vmatpush1.msra.mxu0 %v1381_v27  ;;  %2077 = vmatpush1.msra.mxu1 %v871_v28  ;;  %v768_v27 = vld [vmem:[#allocation13 + $0x78] sm:$0xff] }
 0x3d9   :  { %2007 = vmatprep.subr.mxu0 %v1374_v59  ;;  %2078 = vmatprep.subr.mxu1 %v864_v29  ;;  %v1277_v59 = vld [vmem:[#allocation13 + $0x1060] sm:$0xff]  ;;  %v767_v29 = vld [vmem:[#allocation13 + $0x70] sm:$0xff] }
 0x3da   :  { %2008 = vmatpush1.msra.mxu0 %v1373_v30  ;;  %2079 = vmatpush1.msra.mxu1 %v863_v31  ;;  %v1270_v31 = vld [vmem:[#allocation13 + $0x1028] sm:$0xff] }
 0x3db   :  { %2009 = vmatprep.subr.mxu0 %v1366_v32  ;;  %2080 = vmatprep.subr.mxu1 %v856_v33  ;;  %v760_v32 = vld [vmem:[#allocation13 + $0x38] sm:$0xff] }
 0x3dc   :  { %2010 = vmatpush1.msra.mxu0 %v1365_v34  ;;  %2081 = vmatpush1.msra.mxu1 %v855_v35  ;;  %v1269_v34 = vld [vmem:[#allocation13 + $0x1020] sm:$0xff] }
 0x3dd   :  { %2011 = vmatprep.subr.mxu0 %v1358_v36  ;;  %2082 = vmatprep.subr.mxu1 %v848_v37  ;;  %v759_v36 = vld [vmem:[#allocation13 + $0x30] sm:$0xff]  ;;  %v1008_v37 = vld [vmem:[#allocation13 + $0x7f8] sm:$0xff] }
 0x3de   :  { %2012 = vmatpush1.msra.mxu0 %v1357_v58  ;;  %2083 = vmatpush1.msra.mxu1 %v847_v38  ;;  %v1136_v58 = vld [vmem:[#allocation13 + $0xbf8] sm:$0xff]  ;;  %v1007_v38 = vld [vmem:[#allocation13 + $0x7f0] sm:$0xff] }
 0x3df   :  { %2013 = vmatprep.subr.mxu0 %v1350_v39  ;;  %2084 = vmatprep.subr.mxu1 %v840_v40  ;;  %v1135_v39 = vld [vmem:[#allocation13 + $0xbf0] sm:$0xff]  ;;  %v1000_v40 = vld [vmem:[#allocation13 + $0x7b8] sm:$0xff] }
 0x3e0   :  { %2014 = vmatpush1.msra.mxu0 %v1349_v41  ;;  %2085 = vmatpush1.msra.mxu1 %v839_v42  ;;  %v1128_v41 = vld [vmem:[#allocation13 + $0xbb8] sm:$0xff]  ;;  %v999_v42 = vld [vmem:[#allocation13 + $0x7b0] sm:$0xff] }
 0x3e1   :  { %2015 = vmatprep.subr.mxu0 %v1342_v44  ;;  %2086 = vmatprep.subr.mxu1 %v832_v45  ;;  %v1127_v44 = vld [vmem:[#allocation13 + $0xbb0] sm:$0xff]  ;;  %v992_v45 = vld [vmem:[#allocation13 + $0x778] sm:$0xff] }
 0x3e2   :  { %2016 = vmatpush1.msra.mxu0 %v1341_v46  ;;  %2087 = vmatpush1.msra.mxu1 %v831_v47  ;;  %v1120_v46 = vld [vmem:[#allocation13 + $0xb78] sm:$0xff]  ;;  %v991_v47 = vld [vmem:[#allocation13 + $0x770] sm:$0xff] }
 0x3e3   :  { %2017 = vmatprep.subr.mxu0 %v1334_v48  ;;  %2088 = vmatprep.subr.mxu1 %v824_v49  ;;  %v1119_v48 = vld [vmem:[#allocation13 + $0xb70] sm:$0xff]  ;;  %v984_v49 = vld [vmem:[#allocation13 + $0x738] sm:$0xff] }
 0x3e4   :  { %2018 = vmatpush1.msra.mxu0 %v1333_v50  ;;  %2089 = vmatpush1.msra.mxu1 %v823_v51  ;;  %v1112_v50 = vld [vmem:[#allocation13 + $0xb38] sm:$0xff]  ;;  %v983_v51 = vld [vmem:[#allocation13 + $0x730] sm:$0xff] }
 0x3e5   :  { %2019 = vmatprep.subr.mxu0 %v1326_v52  ;;  %2090 = vmatprep.subr.mxu1 %v816_v53  ;;  %v1111_v52 = vld [vmem:[#allocation13 + $0xb30] sm:$0xff]  ;;  %v976_v53 = vld [vmem:[#allocation13 + $0x6f8] sm:$0xff] }
 0x3e6   :  { %2020 = vmatpush1.msra.mxu0 %v1325_v54  ;;  %2091 = vmatpush1.msra.mxu1 %v815_v55  ;;  %v1104_v54 = vld [vmem:[#allocation13 + $0xaf8] sm:$0xff]  ;;  %v975_v55 = vld [vmem:[#allocation13 + $0x6f0] sm:$0xff] }
 0x3e7   :  { %2021 = vmatprep.subr.mxu0 %v1318_v56  ;;  %2092 = vmatprep.subr.mxu1 %v808_v57  ;;  %v968_v56 = vld [vmem:[#allocation13 + $0x6b8] sm:$0xff] }
 0x3e8   :  { %2022 = vmatpush1.msra.mxu0 %v1317_v62  ;;  %2093 = vmatpush1.msra.mxu1 %v807_v63  ;;  %v1096_v57 = vld [vmem:[#allocation13 + $0xab8] sm:$0xff]  ;;  %v967_v62 = vld [vmem:[#allocation13 + $0x6b0] sm:$0xff] }
 0x3e9   :  { %2023 = vmatprep.subr.mxu0 %v1310_v2  ;;  %2094 = vmatprep.subr.mxu1 %v800_v3  ;;  %v1095_v63 = vld [vmem:[#allocation13 + $0xab0] sm:$0xff]  ;;  %v960_v2 = vld [vmem:[#allocation13 + $0x678] sm:$0xff] }
 0x3ea   :  { %2024 = vmatpush1.msra.mxu0 %v1309_v4  ;;  %2095 = vmatpush1.msra.mxu1 %v799_v8  ;;  %v1088_v3 = vld [vmem:[#allocation13 + $0xa78] sm:$0xff]  ;;  %v959_v4 = vld [vmem:[#allocation13 + $0x670] sm:$0xff] }
 0x3eb   :  { %2025 = vmatprep.subr.mxu0 %v1302_v11  ;;  %2096 = vmatprep.subr.mxu1 %v792_v12  ;;  %v1087_v8 = vld [vmem:[#allocation13 + $0xa70] sm:$0xff]  ;;  %v952_v11 = vld [vmem:[#allocation13 + $0x638] sm:$0xff] }
 0x3ec   :  { %2026 = vmatpush1.msra.mxu0 %v1301_v14  ;;  %2097 = vmatpush1.msra.mxu1 %v791_v15  ;;  %v1080_v12 = vld [vmem:[#allocation13 + $0xa38] sm:$0xff]  ;;  %v951_v14 = vld [vmem:[#allocation13 + $0x630] sm:$0xff] }
 0x3ed   :  { %2027 = vmatprep.subr.mxu0 %v1294_v16  ;;  %2098 = vmatprep.subr.mxu1 %v784_v17  ;;  %v1079_v15 = vld [vmem:[#allocation13 + $0xa30] sm:$0xff]  ;;  %v944_v16 = vld [vmem:[#allocation13 + $0x5f8] sm:$0xff] }
 0x3ee   :  { %2028 = vmatpush1.msra.mxu0 %v1293_v18  ;;  %2099 = vmatpush1.msra.mxu1 %v783_v19  ;;  %v1501_v28 = vpop.f32.mrf.mxu0  ;;  %v1072_v17 = vld [vmem:[#allocation13 + $0x9f8] sm:$0xff]  ;;  %v943_v18 = vld [vmem:[#allocation13 + $0x5f0] sm:$0xff] }
 0x3ef   :  { %2029 = vmatprep.subr.mxu0 %v1286_v21  ;;  %2100 = vmatprep.subr.mxu1 %v776_v22  ;;  %v1502_v30 = vadd.f32 %v1501_v28, %v1398_v20  ;;  %v1572_v33 = vpop.f32.mrf.mxu1  ;;  %v1071_v19 = vld [vmem:[#allocation13 + $0x9f0] sm:$0xff]  ;;  %v936_v20 = vld [vmem:[#allocation13 + $0x5b8] sm:$0xff] }
 0x3f0   :  { %2030 = vmatpush1.msra.mxu0 %v1285_v23  ;;  %2101 = vmatpush1.msra.mxu1 %v775_v25  ;;  %v1064_v21 = vld [vmem:[#allocation13 + $0x9b8] sm:$0xff]  ;;  %v935_v22 = vld [vmem:[#allocation13 + $0x5b0] sm:$0xff] }
 0x3f1   :  { %2031 = vmatprep.subr.mxu0 %v1278_v26  ;;  %2102 = vmatprep.subr.mxu1 %v768_v27  ;;  %v7772_v35 = vadd.f32 %v1572_v33, %v1502_v30  ;;  %v1063_v23 = vld [vmem:[#allocation13 + $0x9b0] sm:$0xff]  ;;  %v928_v25 = vld [vmem:[#allocation13 + $0x578] sm:$0xff]  ;;  %v1402_v26 = vrot.slane %v7768_v13, %v7721_v9 }
 0x3f2   :  { %2032 = vmatpush1.msra.mxu0 %v1277_v59  ;;  %2103 = vmatpush1.msra.mxu1 %v767_v29  ;;  %v1056_v27 = vld [vmem:[#allocation13 + $0x978] sm:$0xff]  ;;  %v927_v28 = vld [vmem:[#allocation13 + $0x570] sm:$0xff]  ;;  %v1503_v59 = vpop.f32.mrf.mxu0 }
 0x3f3   :  { %2033 = vmatprep.subr.mxu0 %v1270_v31  ;;  %2104 = vmatprep.subr.mxu1 %v760_v32  ;;  %v1055_v29 = vld [vmem:[#allocation13 + $0x970] sm:$0xff]  ;;  %v920_v30 = vld [vmem:[#allocation13 + $0x538] sm:$0xff] }
 0x3f4   :  { %2034 = vmatpush1.msra.mxu0 %v1269_v34  ;;  %2067 = vmatprep.mubr.f32.mxu0 %v7510_v1  ;;  %v1048_v31 = vld [vmem:[#allocation13 + $0x938] sm:$0xff]  ;;  %v919_v32 = vld [vmem:[#allocation13 + $0x530] sm:$0xff] }
 0x3f5   :  { %2105 = vmatpush1.msra.mxu1 %v759_v36  ;;  %2068 = vmatmul.mubr.f32.vlgmr.msra.gmra.mxu0 %v7754_v24  ;;  %v1047_v33 = vld [vmem:[#allocation13 + $0x930] sm:$0xff]  ;;  %v912_v34 = vld [vmem:[#allocation13 + $0x4f8] sm:$0xff]  ;;  %v1504_v36 = vadd.f32 %v1503_v59, %v1402_v26 }
 0x3f6   :  { %2106 = vmatprep.subr.mxu1 %v1008_v37  ;;  %2145 = vmatprep.subr.mxu0 %v1136_v58  ;;  %v1040_v37 = vld [vmem:[#allocation13 + $0x8f8] sm:$0xff]  ;;  %v911_v58 = vld [vmem:[#allocation13 + $0x4f0] sm:$0xff] }
 0x3f7   :  { %2107 = vmatpush2.msra.mxu1 %v1007_v38  ;;  %2146 = vmatpush1.msra.mxu0 %v1135_v39  ;;  %v1039_v38 = vld [vmem:[#allocation13 + $0x8f0] sm:$0xff]  ;;  %v904_v39 = vld [vmem:[#allocation13 + $0x4b8] sm:$0xff] }
 0x3f8   :  { %2209 = vmatprep.mubr.f32.mxu0 %v7738_v60  ;;  %2108 = vmatprep.subr.mxu1 %v1000_v40  ;;  %v1103_v60 = vld [vmem:[#allocation13 + $0xaf0] sm:$0xff]  ;;  %v1032_v40 = vld [vmem:[#allocation13 + $0x8b8] sm:$0xff] }
 0x3f9   :  { %2147 = vmatprep.subr.mxu0 %v1128_v41  ;;  %2109 = vmatpush2.msra.mxu1 %v999_v42  ;;  %v903_v41 = vld [vmem:[#allocation13 + $0x4b0] sm:$0xff]  ;;  %v1574_v42 = vpop.f32.mrf.mxu1  ;;  %v1224_v59 = vld [vmem:[#allocation13 + $0xeb8] sm:$0xff] }
 0x3fa   :  { %2148 = vmatpush1.msra.mxu0 %v1127_v44  ;;  %2110 = vmatprep.subr.mxu1 %v992_v45  ;;  %v1031_v44 = vld [vmem:[#allocation13 + $0x8b0] sm:$0xff]  ;;  %v896_v45 = vld [vmem:[#allocation13 + $0x478] sm:$0xff] }
 0x3fb   :  { %2149 = vmatprep.subr.mxu0 %v1120_v46  ;;  %2111 = vmatpush2.msra.mxu1 %v991_v47  ;;  %v1575_v47 = vadd.f32 %v1574_v42, %v1504_v36  ;;  %v1343_v36 = vld [vmem:[#allocation13 + $0x1270] sm:$0xff] }
 0x3fc   :  { %2150 = vmatpush1.msra.mxu0 %v1119_v48  ;;  %2112 = vmatprep.subr.mxu1 %v984_v49  ;;  %v1024_v48 = vld [vmem:[#allocation13 + $0x878] sm:$0xff]  ;;  %v895_v49 = vld [vmem:[#allocation13 + $0x470] sm:$0xff] }
 0x3fd   :  { %2151 = vmatprep.subr.mxu0 %v1112_v50  ;;  %2113 = vmatpush2.msra.mxu1 %v983_v51  ;;  %v1023_v51 = vld [vmem:[#allocation13 + $0x870] sm:$0xff] }
 0x3fe   :  { %2152 = vmatpush1.msra.mxu0 %v1111_v52  ;;  %2114 = vmatprep.subr.mxu1 %v976_v53  ;;  %v888_v52 = vld [vmem:[#allocation13 + $0x438] sm:$0xff]  ;;  %v1199_v42 = vld [vmem:[#allocation13 + $0xdf0] sm:$0xff] }
 0x3ff   :  { %2153 = vmatprep.subr.mxu0 %v1104_v54  ;;  %2115 = vmatpush2.msra.mxu1 %v975_v55  ;;  %v1016_v54 = vld [vmem:[#allocation13 + $0x838] sm:$0xff]  ;;  %v887_v55 = vld [vmem:[#allocation13 + $0x430] sm:$0xff] }
 0x400   :  { %2154 = vmatpush1.msra.mxu0 %v1103_v60  ;;  %2116 = vmatprep.subr.mxu1 %v968_v56  ;;  %v1015_v56 = vld [vmem:[#allocation13 + $0x830] sm:$0xff] }
 0x401   :  { %2155 = vmatprep.subr.mxu0 %v1096_v57  ;;  %2117 = vmatpush2.msra.mxu1 %v967_v62  ;;  %v1264_v57 = vld [vmem:[#allocation13 + $0xff8] sm:$0xff] }
 0x402   :  { %2156 = vmatpush1.msra.mxu0 %v1095_v63  ;;  %2118 = vmatprep.subr.mxu1 %v960_v2  ;;  %v1392_v62 = vld [vmem:[#allocation13 + $0x13f8] sm:$0xff]  ;;  %v1263_v63 = vld [vmem:[#allocation13 + $0xff0] sm:$0xff] }
 0x403   :  { %2157 = vmatprep.subr.mxu0 %v1088_v3  ;;  %2119 = vmatpush2.msra.mxu1 %v959_v4  ;;  %v1391_v2 = vld [vmem:[#allocation13 + $0x13f0] sm:$0xff]  ;;  %v1256_v4 = vld [vmem:[#allocation13 + $0xfb8] sm:$0xff] }
 0x404   :  { %2158 = vmatpush1.msra.mxu0 %v1087_v8  ;;  %2120 = vmatprep.subr.mxu1 %v952_v11  ;;  %v1384_v8 = vld [vmem:[#allocation13 + $0x13b8] sm:$0xff]  ;;  %v1255_v11 = vld [vmem:[#allocation13 + $0xfb0] sm:$0xff] }
 0x405   :  { %2159 = vmatprep.subr.mxu0 %v1080_v12  ;;  %2121 = vmatpush2.msra.mxu1 %v951_v14  ;;  %v1383_v12 = vld [vmem:[#allocation13 + $0x13b0] sm:$0xff] }
 0x406   :  { %2160 = vmatpush1.msra.mxu0 %v1079_v15  ;;  %2122 = vmatprep.subr.mxu1 %v944_v16  ;;  %v1248_v15 = vld [vmem:[#allocation13 + $0xf78] sm:$0xff] }
 0x407   :  { %2161 = vmatprep.subr.mxu0 %v1072_v17  ;;  %2123 = vmatpush2.msra.mxu1 %v943_v18  ;;  %v1376_v16 = vld [vmem:[#allocation13 + $0x1378] sm:$0xff]  ;;  %v1247_v17 = vld [vmem:[#allocation13 + $0xf70] sm:$0xff] }
 0x408   :  { %2162 = vmatpush1.msra.mxu0 %v1071_v19  ;;  %2124 = vmatprep.subr.mxu1 %v936_v20  ;;  %v1375_v18 = vld [vmem:[#allocation13 + $0x1370] sm:$0xff]  ;;  %v1368_v20 = vld [vmem:[#allocation13 + $0x1338] sm:$0xff] }
 0x409   :  { %2163 = vmatprep.subr.mxu0 %v1064_v21  ;;  %2125 = vmatpush2.msra.mxu1 %v935_v22  ;;  %v1239_v21 = vld [vmem:[#allocation13 + $0xf30] sm:$0xff] }
 0x40a   :  { %2164 = vmatpush1.msra.mxu0 %v1063_v23  ;;  %2126 = vmatprep.subr.mxu1 %v928_v25  ;;  %v1367_v22 = vld [vmem:[#allocation13 + $0x1330] sm:$0xff]  ;;  %v1232_v23 = vld [vmem:[#allocation13 + $0xef8] sm:$0xff] }
 0x40b   :  { %2165 = vmatprep.subr.mxu0 %v1056_v27  ;;  %2127 = vmatpush2.msra.mxu1 %v927_v28  ;;  %v1360_v25 = vld [vmem:[#allocation13 + $0x12f8] sm:$0xff]  ;;  %v1231_v27 = vld [vmem:[#allocation13 + $0xef0] sm:$0xff] }
 0x40c   :  { %2166 = vmatpush1.msra.mxu0 %v1055_v29  ;;  %2128 = vmatprep.subr.mxu1 %v920_v30  ;;  %v1359_v28 = vld [vmem:[#allocation13 + $0x12f0] sm:$0xff]  ;;  %v1352_v29 = vld [vmem:[#allocation13 + $0x12b8] sm:$0xff] }
 0x40d   :  { %2167 = vmatprep.subr.mxu0 %v1048_v31  ;;  %2129 = vmatpush2.msra.mxu1 %v919_v32  ;;  %v1223_v30 = vld [vmem:[#allocation13 + $0xeb0] sm:$0xff]  ;;  %v1216_v32 = vld [vmem:[#allocation13 + $0xe78] sm:$0xff] }
 0x40e   :  { %2168 = vmatpush1.msra.mxu0 %v1047_v33  ;;  %2130 = vmatprep.subr.mxu1 %v912_v34  ;;  %v1351_v31 = vld [vmem:[#allocation13 + $0x12b0] sm:$0xff]  ;;  %v1344_v33 = vld [vmem:[#allocation13 + $0x1278] sm:$0xff] }
 0x40f   :  { %2169 = vmatprep.subr.mxu0 %v1040_v37  ;;  %2131 = vmatpush2.msra.mxu1 %v911_v58  ;;  %v1643_v46 = vpop.f32.mrf.mxu0  ;;  %v1215_v34 = vld [vmem:[#allocation13 + $0xe70] sm:$0xff]  ;;  %v1208_v37 = vld [vmem:[#allocation13 + $0xe38] sm:$0xff] }
 0x410   :  { %2170 = vmatpush1.msra.mxu0 %v1039_v38  ;;  %2132 = vmatprep.subr.mxu1 %v904_v39  ;;  %v7780_v50 = vadd.f32 %v1643_v46, %v7772_v35  ;;  %v1336_v58 = vld [vmem:[#allocation13 + $0x1238] sm:$0xff]  ;;  %v1207_v38 = vld [vmem:[#allocation13 + $0xe30] sm:$0xff] }
 0x411   :  { %2171 = vmatprep.subr.mxu0 %v1032_v40  ;;  %2133 = vmatpush2.msra.mxu1 %v903_v41  ;;  %v1645_v53 = vpop.f32.mrf.mxu0  ;;  %v1335_v39 = vld [vmem:[#allocation13 + $0x1230] sm:$0xff]  ;;  %v1200_v40 = vld [vmem:[#allocation13 + $0xdf8] sm:$0xff] }
 0x412   :  { %2172 = vmatpush1.msra.mxu0 %v1031_v44  ;;  %2134 = vmatprep.subr.mxu1 %v896_v45  ;;  %v7782_v60 = vadd.f32 %v1645_v53, %v1575_v47  ;;  %v1328_v41 = vld [vmem:[#allocation13 + $0x11f8] sm:$0xff]  ;;  %v1327_v44 = vld [vmem:[#allocation13 + $0x11f0] sm:$0xff] }
 0x413   :  { %2173 = vmatprep.subr.mxu0 %v1024_v48  ;;  %2135 = vmatpush2.msra.mxu1 %v895_v49  ;;  %v1192_v45 = vld [vmem:[#allocation13 + $0xdb8] sm:$0xff]  ;;  %v1191_v47 = vld [vmem:[#allocation13 + $0xdb0] sm:$0xff] }
 0x414   :  { %2174 = vmatpush1.msra.mxu0 %v1023_v51  ;;  %2136 = vmatprep.subr.mxu1 %v888_v52  ;;  %v2296_v35 = vmul.f32 %v7782_v60, %v7782_v60  ;;  %v1320_v46 = vld [vmem:[#allocation13 + $0x11b8] sm:$0xff]  ;;  %v1319_v48 = vld [vmem:[#allocation13 + $0x11b0] sm:$0xff] }
 0x415   :  { %2175 = vmatprep.subr.mxu0 %v1016_v54  ;;  %2137 = vmatpush2.msra.mxu1 %v887_v55  ;;  %v1184_v49 = vld [vmem:[#allocation13 + $0xd78] sm:$0xff]  ;;  %v1183_v52 = vld [vmem:[#allocation13 + $0xd70] sm:$0xff] }
 0x416   :  { %2176 = vmatpush1.msra.mxu0 %v1015_v56  ;;  %2139 = vmatmul.mubr.f32.vlgmr.msra.gmra.mxu1 %v7740_v61  ;;  %v2304_v3 = vmul.f32 %v2296_v35, %v7782_v60  ;;  %v1240_v61 = vld [vmem:[#allocation13 + $0xf38] sm:$0xff]  ;;  %v1311_v53 = vld [vmem:[#allocation13 + $0x1170] sm:$0xff] }
 0x417   :  { %2177 = vmatprep.subr.mxu0 %v1264_v57  ;;  %2216 = vmatprep.subr.mxu1 %v1392_v62  ;;  %v1312_v51 = vld [vmem:[#allocation13 + $0x1178] sm:$0xff]  ;;  %v1175_v56 = vld [vmem:[#allocation13 + $0xd30] sm:$0xff] }
 0x418   :  { %2178 = vmatpush2.msra.mxu0 %v1263_v63  ;;  %2217 = vmatpush1.msra.mxu1 %v1391_v2  ;;  %v2312_v14 = vmul.f32 0.044715, %v2304_v3  ;;  %v1176_v54 = vld [vmem:[#allocation13 + $0xd38] sm:$0xff]  ;;  %v1303_v57 = vld [vmem:[#allocation13 + $0x1130] sm:$0xff] }
 0x419   :  { %2179 = vmatprep.subr.mxu0 %v1256_v4  ;;  %2218 = vmatprep.subr.mxu1 %v1384_v8  ;;  %v1304_v55 = vld [vmem:[#allocation13 + $0x1138] sm:$0xff]  ;;  %v1167_v63 = vld [vmem:[#allocation13 + $0xcf0] sm:$0xff] }
 0x41a   :  { %v2320_v19 = vadd.f32 %v2312_v14, %v7782_v60  ;;  %2180 = vmatpush2.msra.mxu0 %v1255_v11  ;;  %2219 = vmatpush1.msra.mxu1 %v1383_v12  ;;  %v1168_v62 = vld [vmem:[#allocation13 + $0xcf8] sm:$0xff]  ;;  %v1295_v2 = vld [vmem:[#allocation13 + $0x10f0] sm:$0xff] }
 0x41b   :  { %2181 = vmatprep.subr.mxu0 %v1248_v15  ;;  %2220 = vmatprep.subr.mxu1 %v1376_v16  ;;  %v1296_v35 = vld [vmem:[#allocation13 + $0x10f8] sm:$0xff]  ;;  %v1159_v11 = vld [vmem:[#allocation13 + $0xcb0] sm:$0xff] }
 0x41c   :  { %2182 = vmatpush2.msra.mxu0 %v1247_v17  ;;  %2221 = vmatpush1.msra.mxu1 %v1375_v18  ;;  %v2328_v26 = vmul.f32 0.7978846, %v2320_v19  ;;  %v1160_v4 = vld [vmem:[#allocation13 + $0xcb8] sm:$0xff]  ;;  %v1287_v12 = vld [vmem:[#allocation13 + $0x10b0] sm:$0xff] }
 0x41d   :  { %2183 = vmatprep.subr.mxu0 %v1240_v61  ;;  %2222 = vmatprep.subr.mxu1 %v1368_v20  ;;  %v1288_v8 = vld [vmem:[#allocation13 + $0x10b8] sm:$0xff]  ;;  %v1151_v16 = vld [vmem:[#allocation13 + $0xc70] sm:$0xff]  ;;  %v2288_v20 = vmul.f32 0.5, %v7782_v60 }
 0x41e   :  { %2184 = vmatpush2.msra.mxu0 %v1239_v21  ;;  %2223 = vmatpush1.msra.mxu1 %v1367_v22  ;;  %7080 = vtanh.f32 %v2328_v26  ;;  %v1152_v14 = vld [vmem:[#allocation13 + $0xc78] sm:$0xff]  ;;  %v1279_v17 = vld [vmem:[#allocation13 + $0x1070] sm:$0xff]  ;;  %v2479_v26 = vld [vmem:[#allocation16 + $0x3c0] sm:$0xff] }
 0x41f   :  { %2185 = vmatprep.subr.mxu0 %v1232_v23  ;;  %2224 = vmatprep.subr.mxu1 %v1360_v25  ;;  %v1280_v15 = vld [vmem:[#allocation13 + $0x1078] sm:$0xff]  ;;  %v1143_v21 = vld [vmem:[#allocation13 + $0xc30] sm:$0xff] }
 0x420   :  { %2186 = vmatpush2.msra.mxu0 %v1231_v27  ;;  %2225 = vmatpush1.msra.mxu1 %v1359_v28  ;;  %v1144_v19 = vld [vmem:[#allocation13 + $0xc38] sm:$0xff]  ;;  %v1271_v22 = vld [vmem:[#allocation13 + $0x1030] sm:$0xff]  ;;  %v2471_v28 = vld [vmem:[#allocation16 + $0x380] sm:$0xff] }
 0x421   :  { %2187 = vmatprep.subr.mxu0 %v1224_v59  ;;  %2226 = vmatprep.subr.mxu1 %v1352_v29  ;;  %v1272_v61 = vld [vmem:[#allocation13 + $0x1038] sm:$0xff]  ;;  %v2480_v23 = vld [vmem:[#allocation16 + $0x3c8] sm:$0xff]  ;;  %v2735_v59 = vld [vmem:[#allocation16 + $0xbc0] sm:$0xff] }
 0x422   :  { %2188 = vmatpush2.msra.mxu0 %v1223_v30  ;;  %2227 = vmatpush1.msra.mxu1 %v1351_v31  ;;  %v2472_v27 = vld [vmem:[#allocation16 + $0x388] sm:$0xff]  ;;  %v2463_v31 = vld [vmem:[#allocation16 + $0x340] sm:$0xff] }
 0x423   :  { %2189 = vmatprep.subr.mxu0 %v1216_v32  ;;  %2228 = vmatprep.subr.mxu1 %v1344_v33  ;;  %v2736_v60 = vld [vmem:[#allocation16 + $0xbc8] sm:$0xff]  ;;  %v2727_v32 = vld [vmem:[#allocation16 + $0xb80] sm:$0xff] }
 0x424   :  { %2190 = vmatpush2.msra.mxu0 %v1215_v34  ;;  %2229 = vmatpush1.msra.mxu1 %v1343_v36  ;;  %v2464_v29 = vld [vmem:[#allocation16 + $0x348] sm:$0xff]  ;;  %v2455_v34 = vld [vmem:[#allocation16 + $0x300] sm:$0xff] }
 0x425   :  { %2191 = vmatprep.subr.mxu0 %v1208_v37  ;;  %2230 = vmatprep.subr.mxu1 %v1336_v58  ;;  %v2728_v30 = vld [vmem:[#allocation16 + $0xb88] sm:$0xff]  ;;  %v2447_v58 = vld [vmem:[#allocation16 + $0x2c0] sm:$0xff] }
 0x426   :  { %2192 = vmatpush2.msra.mxu0 %v1207_v38  ;;  %2231 = vmatpush1.msra.mxu1 %v1335_v39  ;;  %v2456_v33 = vld [vmem:[#allocation16 + $0x308] sm:$0xff]  ;;  %v2711_v38 = vld [vmem:[#allocation16 + $0xb00] sm:$0xff] }
 0x427   :  { %2193 = vmatprep.subr.mxu0 %v1200_v40  ;;  %2232 = vmatprep.subr.mxu1 %v1328_v41  ;;  %v2448_v36 = vld [vmem:[#allocation16 + $0x2c8] sm:$0xff]  ;;  %v2439_v41 = vld [vmem:[#allocation16 + $0x280] sm:$0xff] }
 0x428   :  { %2194 = vmatpush2.msra.mxu0 %v1199_v42  ;;  %2233 = vmatpush1.msra.mxu1 %v1327_v44  ;;  %v2712_v37 = vld [vmem:[#allocation16 + $0xb08] sm:$0xff]  ;;  %v2703_v42 = vld [vmem:[#allocation16 + $0xac0] sm:$0xff] }
 0x429   :  { %2195 = vmatprep.subr.mxu0 %v1192_v45  ;;  %2234 = vmatprep.subr.mxu1 %v1320_v46  ;;  %v2440_v39 = vld [vmem:[#allocation16 + $0x288] sm:$0xff]  ;;  %v2431_v46 = vld [vmem:[#allocation16 + $0x240] sm:$0xff] }
 0x42a   :  { %2196 = vmatpush2.msra.mxu0 %v1191_v47  ;;  %2235 = vmatpush1.msra.mxu1 %v1319_v48  ;;  %v2704_v40 = vld [vmem:[#allocation16 + $0xac8] sm:$0xff]  ;;  %v2695_v47 = vld [vmem:[#allocation16 + $0xa80] sm:$0xff] }
 0x42b   :  { %2197 = vmatprep.subr.mxu0 %v1184_v49  ;;  %2236 = vmatprep.subr.mxu1 %v1312_v51  ;;  %v7081_v3 = vpop.eup %7080  ;;  %v2432_v44 = vld [vmem:[#allocation16 + $0x248] sm:$0xff]  ;;  %v2423_v51 = vld [vmem:[#allocation16 + $0x200] sm:$0xff] }
 0x42c   :  { %2198 = vmatpush2.msra.mxu0 %v1183_v52  ;;  %2237 = vmatpush1.msra.mxu1 %v1311_v53  ;;  %v2344_v18 = vadd.f32 1.0, %v7081_v3  ;;  %v2696_v45 = vld [vmem:[#allocation16 + $0xa88] sm:$0xff]  ;;  %v2687_v52 = vld [vmem:[#allocation16 + $0xa40] sm:$0xff] }
 0x42d   :  { %2199 = vmatprep.subr.mxu0 %v1176_v54  ;;  %2238 = vmatprep.subr.mxu1 %v1304_v55  ;;  %v2424_v48 = vld [vmem:[#allocation16 + $0x208] sm:$0xff]  ;;  %v2415_v55 = vld [vmem:[#allocation16 + $0x1c0] sm:$0xff] }
 0x42e   :  { %2200 = vmatpush2.msra.mxu0 %v1175_v56  ;;  %2239 = vmatpush1.msra.mxu1 %v1303_v57  ;;  %v7790_v25 = vmul.f32 %v2344_v18, %v2288_v20  ;;  %v2688_v49 = vld [vmem:[#allocation16 + $0xa48] sm:$0xff]  ;;  %v2679_v56 = vld [vmem:[#allocation16 + $0xa00] sm:$0xff]  ;;  %v2295_v18 = vmul.f32 %v7780_v50, %v7780_v50  ;;  %v1410_v20 = vrot.slane %v7768_v13, %v7724_v10 }
 0x42f   :  { %2201 = vmatprep.subr.mxu0 %v1168_v62  ;;  %2240 = vmatprep.subr.mxu1 %v1296_v35  ;;  %v2416_v53 = vld [vmem:[#allocation16 + $0x1c8] sm:$0xff]  ;;  %v2407_v35 = vld [vmem:[#allocation16 + $0x180] sm:$0xff] }
 0x430   :  { %2202 = vmatpush2.msra.mxu0 %v1167_v63  ;;  %2241 = vmatpush1.msra.mxu1 %v1295_v2  ;;  %v2680_v54 = vld [vmem:[#allocation16 + $0xa08] sm:$0xff]  ;;  %v2671_v63 = vld [vmem:[#allocation16 + $0x9c0] sm:$0xff] }
 0x431   :  { %2203 = vmatprep.subr.mxu0 %v1160_v4  ;;  %2242 = vmatprep.subr.mxu1 %v1288_v8  ;;  %v2408_v57 = vld [vmem:[#allocation16 + $0x188] sm:$0xff]  ;;  %v2399_v4 = vld [vmem:[#allocation16 + $0x140] sm:$0xff] }
 0x432   :  { %2204 = vmatpush2.msra.mxu0 %v1159_v11  ;;  %2243 = vmatpush1.msra.mxu1 %v1287_v12  ;;  %v2672_v62 = vld [vmem:[#allocation16 + $0x9c8] sm:$0xff]  ;;  %v2663_v8 = vld [vmem:[#allocation16 + $0x980] sm:$0xff]  ;;  %v1714_v11 = vpop.f32.mrf.mxu1 }
 0x433   :  { %2205 = vmatprep.subr.mxu0 %v1152_v14  ;;  %2244 = vmatprep.subr.mxu1 %v1280_v15  ;;  %v2400_v2 = vld [vmem:[#allocation16 + $0x148] sm:$0xff]  ;;  %v1406_v15 = vrot.slane %v7768_v13, %v7718_v7 }
 0x434   :  { %2206 = vmatpush2.msra.mxu0 %v1151_v16  ;;  %2245 = vmatpush1.msra.mxu1 %v1279_v17  ;;  %v2664_v3 = vld [vmem:[#allocation16 + $0x988] sm:$0xff]  ;;  %v2391_v16 = vld [vmem:[#allocation16 + $0x100] sm:$0xff] }
 0x435   :  { %2207 = vmatprep.subr.mxu0 %v1144_v19  ;;  %2246 = vmatprep.subr.mxu1 %v1272_v61  ;;  %v2392_v12 = vld [vmem:[#allocation16 + $0x108] sm:$0xff]  ;;  %v2655_v17 = vld [vmem:[#allocation16 + $0x940] sm:$0xff] }
 0x436   :  { %2208 = vmatpush2.msra.mxu0 %v1143_v21  ;;  %2247 = vmatpush1.msra.mxu1 %v1271_v22  ;;  %v2656_v14 = vld [vmem:[#allocation16 + $0x948] sm:$0xff]  ;;  %v2383_v21 = vld [vmem:[#allocation16 + $0xc0] sm:$0xff] }
 0x437   :  { %2280 = vmatprep.mubr.f32.mxu1 %v7510_v1  ;;  %2210 = vmatmul.mubr.f32.vlgmr.msra.gmra.mxu0 %v7743_v0  ;;  %v2720_v0 = vld [vmem:[#allocation16 + $0xb48] sm:$0xff]  ;;  %v2647_v22 = vld [vmem:[#allocation16 + $0x900] sm:$0xff] }
 0x438   :  { %2281 = vmatmul.mubr.f32.vlgmr.msra.gmra.mxu1 %v7754_v24  ;;  %3425 = vmatprep.subr.mxu0 %v2480_v23  ;;  %v2719_v24 = vld [vmem:[#allocation16 + $0xb40] sm:$0xff]  ;;  %v2384_v19 = vld [vmem:[#allocation16 + $0xc8] sm:$0xff]  ;;  %v1716_v23 = vpop.f32.mrf.mxu1 }
 0x439   :  { %3426 = vmatpush1.msra.mxu0 %v2479_v26  ;;  %3489 = vmatprep.mubr.f32.mxu0 %v7790_v25  ;;  %v2648_v61 = vld [vmem:[#allocation16 + $0x908] sm:$0xff] }
 0x43a   :  { %3427 = vmatprep.subr.mxu0 %v2472_v27  ;;  %3496 = vmatprep.subr.mxu1 %v2736_v60  ;;  %v2376_v26 = vld [vmem:[#allocation16 + $0x88] sm:$0xff]  ;;  %v1715_v60 = vadd.f32 %v1714_v11, %v1406_v15 }
 0x43b   :  { %3428 = vmatpush1.msra.mxu0 %v2471_v28  ;;  %3497 = vmatpush1.msra.mxu1 %v2735_v59  ;;  %v2640_v27 = vld [vmem:[#allocation16 + $0x8c8] sm:$0xff]  ;;  %v2375_v28 = vld [vmem:[#allocation16 + $0x80] sm:$0xff] }
 0x43c   :  { %3429 = vmatprep.subr.mxu0 %v2464_v29  ;;  %3498 = vmatprep.subr.mxu1 %v2728_v30  ;;  %v2639_v59 = vld [vmem:[#allocation16 + $0x8c0] sm:$0xff]  ;;  %v2303_v29 = vmul.f32 %v2295_v18, %v7780_v50  ;;  %v2368_v30 = vld [vmem:[#allocation16 + $0x48] sm:$0xff] }
 0x43d   :  { %3430 = vmatpush1.msra.mxu0 %v2463_v31  ;;  %3499 = vmatpush1.msra.mxu1 %v2727_v32  ;;  %v2632_v13 = vld [vmem:[#allocation16 + $0x888] sm:$0xff]  ;;  %v1717_v32 = vadd.f32 %v1716_v23, %v1410_v20 }
 0x43e   :  { %3431 = vmatprep.subr.mxu0 %v2456_v33  ;;  %3500 = vmatprep.subr.mxu1 %v2720_v0  ;;  %v2367_v33 = vld [vmem:[#allocation16 + $0x40] sm:$0xff]  ;;  %v2584_v11 = vld [vmem:[#allocation16 + $0x708] sm:$0xff] }
 0x43f   :  { %3432 = vmatpush1.msra.mxu0 %v2455_v34  ;;  %3501 = vmatpush1.msra.mxu1 %v2719_v24  ;;  %v2631_v0 = vld [vmem:[#allocation16 + $0x880] sm:$0xff]  ;;  %v2568_v23 = vld [vmem:[#allocation16 + $0x688] sm:$0xff] }
 0x440   :  { %3433 = vmatprep.subr.mxu0 %v2448_v36  ;;  %3502 = vmatprep.subr.mxu1 %v2712_v37  ;;  %v2360_v36 = vld [vmem:[#allocation16 + $0x8] sm:$0xff] }
 0x441   :  { %3434 = vmatpush1.msra.mxu0 %v2447_v58  ;;  %3503 = vmatpush1.msra.mxu1 %v2711_v38  ;;  %v2624_v37 = vld [vmem:[#allocation16 + $0x848] sm:$0xff]  ;;  %v2359_v38 = vld [vmem:[#allocation16] sm:$0xff] }
 0x442   :  { %3435 = vmatprep.subr.mxu0 %v2440_v39  ;;  %3504 = vmatprep.subr.mxu1 %v2704_v40  ;;  %v2623_v40 = vld [vmem:[#allocation16 + $0x840] sm:$0xff] }
 0x443   :  { %3436 = vmatpush1.msra.mxu0 %v2439_v41  ;;  %3505 = vmatpush1.msra.mxu1 %v2703_v42  ;;  %v2311_v42 = vmul.f32 0.044715, %v2303_v29  ;;  %v2560_v29 = vld [vmem:[#allocation16 + $0x648] sm:$0xff] }
 0x444   :  { %3437 = vmatprep.subr.mxu0 %v2432_v44  ;;  %3506 = vmatprep.subr.mxu1 %v2696_v45  ;;  %v2608_v44 = vld [vmem:[#allocation16 + $0x7c8] sm:$0xff] }
 0x445   :  { %3438 = vmatpush1.msra.mxu0 %v2431_v46  ;;  %3507 = vmatpush1.msra.mxu1 %v2695_v47  ;;  %v2616_v46 = vld [vmem:[#allocation16 + $0x808] sm:$0xff] }
 0x446   :  { %3439 = vmatprep.subr.mxu0 %v2424_v48  ;;  %3508 = vmatprep.subr.mxu1 %v2688_v49  ;;  %v2607_v48 = vld [vmem:[#allocation16 + $0x7c0] sm:$0xff] }
 0x447   :  { %3440 = vmatpush1.msra.mxu0 %v2423_v51  ;;  %3509 = vmatpush1.msra.mxu1 %v2687_v52  ;;  %v2615_v51 = vld [vmem:[#allocation16 + $0x800] sm:$0xff]  ;;  %v2600_v52 = vld [vmem:[#allocation16 + $0x788] sm:$0xff] }
 0x448   :  { %3441 = vmatprep.subr.mxu0 %v2416_v53  ;;  %3510 = vmatprep.subr.mxu1 %v2680_v54  ;;  %v2864_v53 = vld [vmem:[#allocation16 + $0xfc8] sm:$0xff] }
 0x449   :  { %3442 = vmatpush1.msra.mxu0 %v2415_v55  ;;  %3511 = vmatpush1.msra.mxu1 %v2679_v56  ;;  %v2599_v56 = vld [vmem:[#allocation16 + $0x780] sm:$0xff] }
 0x44a   :  { %3443 = vmatprep.subr.mxu0 %v2408_v57  ;;  %3512 = vmatprep.subr.mxu1 %v2672_v62  ;;  %v2863_v57 = vld [vmem:[#allocation16 + $0xfc0] sm:$0xff]  ;;  %v2319_v62 = vadd.f32 %v2311_v42, %v7780_v50 }
 0x44b   :  { %3444 = vmatpush1.msra.mxu0 %v2407_v35  ;;  %3513 = vmatpush1.msra.mxu1 %v2671_v63  ;;  %v2592_v35 = vld [vmem:[#allocation16 + $0x748] sm:$0xff]  ;;  %v2799_v42 = vld [vmem:[#allocation16 + $0xdc0] sm:$0xff] }
 0x44c   :  { %3445 = vmatprep.subr.mxu0 %v2400_v2  ;;  %3514 = vmatprep.subr.mxu1 %v2664_v3  ;;  %v2856_v63 = vld [vmem:[#allocation16 + $0xf88] sm:$0xff]  ;;  %v2327_v18 = vmul.f32 0.7978846, %v2319_v62  ;;  %v2775_v62 = vld [vmem:[#allocation16 + $0xd00] sm:$0xff] }
 0x44d   :  { %3446 = vmatpush1.msra.mxu0 %v2399_v4  ;;  %3515 = vmatpush1.msra.mxu1 %v2663_v8  ;;  %v2591_v4 = vld [vmem:[#allocation16 + $0x740] sm:$0xff] }
 0x44e   :  { %3447 = vmatprep.subr.mxu0 %v2392_v12  ;;  %3516 = vmatprep.subr.mxu1 %v2656_v14  ;;  %v2855_v8 = vld [vmem:[#allocation16 + $0xf80] sm:$0xff]  ;;  %v2848_v12 = vld [vmem:[#allocation16 + $0xf48] sm:$0xff]  ;;  %7082 = vtanh.f32 %v2327_v18 }
 0x44f   :  { %3448 = vmatpush1.msra.mxu0 %v2391_v16  ;;  %3517 = vmatpush1.msra.mxu1 %v2655_v17  ;;  %v2583_v16 = vld [vmem:[#allocation16 + $0x700] sm:$0xff] }
 0x450   :  { %3449 = vmatprep.subr.mxu0 %v2384_v19  ;;  %3518 = vmatprep.subr.mxu1 %v2648_v61  ;;  %v2847_v17 = vld [vmem:[#allocation16 + $0xf40] sm:$0xff]  ;;  %v2576_v19 = vld [vmem:[#allocation16 + $0x6c8] sm:$0xff] }
 0x451   :  { %3450 = vmatpush1.msra.mxu0 %v2383_v21  ;;  %3519 = vmatpush1.msra.mxu1 %v2647_v22  ;;  %v1785_v31 = vpop.f32.mrf.mxu0  ;;  %v2840_v61 = vld [vmem:[#allocation16 + $0xf08] sm:$0xff]  ;;  %v2575_v21 = vld [vmem:[#allocation16 + $0x6c0] sm:$0xff] }
 0x452   :  { %3451 = vmatprep.subr.mxu0 %v2376_v26  ;;  %3520 = vmatprep.subr.mxu1 %v2640_v27  ;;  %v1786_v34 = vadd.f32 %v1785_v31, %v1715_v60  ;;  %v1856_v24 = vpop.f32.mrf.mxu1  ;;  %v2839_v22 = vld [vmem:[#allocation16 + $0xf00] sm:$0xff]  ;;  %v2832_v26 = vld [vmem:[#allocation16 + $0xec8] sm:$0xff] }
 0x453   :  { %3452 = vmatpush1.msra.mxu0 %v2375_v28  ;;  %3521 = vmatpush1.msra.mxu1 %v2639_v59  ;;  %v1787_v58 = vpop.f32.mrf.mxu0  ;;  %v2567_v28 = vld [vmem:[#allocation16 + $0x680] sm:$0xff] }
 0x454   :  { %3453 = vmatprep.subr.mxu0 %v2368_v30  ;;  %3522 = vmatprep.subr.mxu1 %v2632_v13  ;;  %v7803_v39 = vadd.f32 %v1856_v24, %v1786_v34  ;;  %v1788_v41 = vadd.f32 %v1787_v58, %v1717_v32  ;;  %v1858_v45 = vpop.f32.mrf.mxu1  ;;  %v2831_v59 = vld [vmem:[#allocation16 + $0xec0] sm:$0xff]  ;;  %v2824_v30 = vld [vmem:[#allocation16 + $0xe88] sm:$0xff] }
 0x455   :  { %3454 = vmatpush1.msra.mxu0 %v2367_v33  ;;  %3523 = vmatpush1.msra.mxu1 %v2631_v0  ;;  %v2559_v13 = vld [vmem:[#allocation16 + $0x640] sm:$0xff]  ;;  %v2552_v32 = vld [vmem:[#allocation16 + $0x608] sm:$0xff] }
 0x456   :  { %3455 = vmatprep.subr.mxu0 %v2360_v36  ;;  %v2297_v47 = vmul.f32 %v7803_v39, %v7803_v39  ;;  %3524 = vmatprep.subr.mxu1 %v2624_v37  ;;  %v7807_v49 = vadd.f32 %v1858_v45, %v1788_v41  ;;  %v2823_v31 = vld [vmem:[#allocation16 + $0xe80] sm:$0xff]  ;;  %v2816_v33 = vld [vmem:[#allocation16 + $0xe48] sm:$0xff] }
 0x457   :  { %3456 = vmatpush1.msra.mxu0 %v2359_v38  ;;  %3525 = vmatpush1.msra.mxu1 %v2623_v40  ;;  %v2551_v0 = vld [vmem:[#allocation16 + $0x600] sm:$0xff]  ;;  %v2544_v24 = vld [vmem:[#allocation16 + $0x5c8] sm:$0xff] }
 0x458   :  { %v2305_v54 = vmul.f32 %v2297_v47, %v7803_v39  ;;  %3457 = vmatprep.subr.mxu0 %v2608_v44  ;;  %v2298_v55 = vmul.f32 %v7807_v49, %v7807_v49  ;;  %3526 = vmatprep.subr.mxu1 %v2616_v46  ;;  %v2815_v34 = vld [vmem:[#allocation16 + $0xe40] sm:$0xff]  ;;  %v2808_v36 = vld [vmem:[#allocation16 + $0xe08] sm:$0xff]  ;;  %v2290_v18 = vmul.f32 0.5, %v7807_v49 }
 0x459   :  { %3458 = vmatpush2.msra.mxu0 %v2607_v48  ;;  %3527 = vmatpush1.msra.mxu1 %v2615_v51  ;;  %v2543_v37 = vld [vmem:[#allocation16 + $0x5c0] sm:$0xff]  ;;  %v2536_v38 = vld [vmem:[#allocation16 + $0x588] sm:$0xff] }
 0x45a   :  { %v2313_v2 = vmul.f32 0.044715, %v2305_v54  ;;  %v2306_v3 = vmul.f32 %v2298_v55, %v7807_v49  ;;  %3459 = vmatprep.subr.mxu0 %v2600_v52  ;;  %3528 = vmatprep.subr.mxu1 %v2864_v53  ;;  %v2807_v58 = vld [vmem:[#allocation16 + $0xe00] sm:$0xff]  ;;  %v2800_v40 = vld [vmem:[#allocation16 + $0xdc8] sm:$0xff] }
 0x45b   :  { %3460 = vmatpush2.msra.mxu0 %v2599_v56  ;;  %3529 = vmatpush2.msra.mxu1 %v2863_v57  ;;  %v2535_v41 = vld [vmem:[#allocation16 + $0x580] sm:$0xff]  ;;  %v2528_v44 = vld [vmem:[#allocation16 + $0x548] sm:$0xff]  ;;  %v7083_v56 = vpop.eup %7082 }
 0x45c   :  { %v2321_v14 = vadd.f32 %v2313_v2, %v7803_v39  ;;  %v2314_v15 = vmul.f32 0.044715, %v2306_v3  ;;  %3461 = vmatprep.subr.mxu0 %v2592_v35  ;;  %3530 = vmatprep.subr.mxu1 %v2856_v63  ;;  %v2792_v45 = vld [vmem:[#allocation16 + $0xd88] sm:$0xff]  ;;  %v2527_v46 = vld [vmem:[#allocation16 + $0x540] sm:$0xff] }
 0x45d   :  { %3462 = vmatpush2.msra.mxu0 %v2591_v4  ;;  %3531 = vmatpush2.msra.mxu1 %v2855_v8  ;;  %v2791_v47 = vld [vmem:[#allocation16 + $0xd80] sm:$0xff]  ;;  %v2520_v48 = vld [vmem:[#allocation16 + $0x508] sm:$0xff] }
 0x45e   :  { %v2322_v20 = vadd.f32 %v2314_v15, %v7807_v49  ;;  %3463 = vmatprep.subr.mxu0 %v2584_v11  ;;  %3532 = vmatprep.subr.mxu1 %v2848_v12  ;;  %v2329_v27 = vmul.f32 0.7978846, %v2321_v14  ;;  %v2784_v51 = vld [vmem:[#allocation16 + $0xd48] sm:$0xff]  ;;  %v2519_v52 = vld [vmem:[#allocation16 + $0x500] sm:$0xff] }
 0x45f   :  { %3464 = vmatpush2.msra.mxu0 %v2583_v16  ;;  %3533 = vmatpush2.msra.mxu1 %v2847_v17  ;;  %v2783_v53 = vld [vmem:[#allocation16 + $0xd40] sm:$0xff]  ;;  %v2512_v54 = vld [vmem:[#allocation16 + $0x4c8] sm:$0xff]  ;;  %v2343_v17 = vadd.f32 1.0, %v7083_v56 }
 0x460   :  { %v2330_v60 = vmul.f32 0.7978846, %v2322_v20  ;;  %3465 = vmatprep.subr.mxu0 %v2576_v19  ;;  %3534 = vmatprep.subr.mxu1 %v2840_v61  ;;  %v2776_v55 = vld [vmem:[#allocation16 + $0xd08] sm:$0xff]  ;;  %v2511_v57 = vld [vmem:[#allocation16 + $0x4c0] sm:$0xff]  ;;  %v2287_v20 = vmul.f32 0.5, %v7780_v50 }
 0x461   :  { %3466 = vmatpush2.msra.mxu0 %v2575_v21  ;;  %3535 = vmatpush2.msra.mxu1 %v2839_v22  ;;  %v2504_v63 = vld [vmem:[#allocation16 + $0x488] sm:$0xff]  ;;  %v2503_v3 = vld [vmem:[#allocation16 + $0x480] sm:$0xff] }
 0x462   :  { %7084 = vtanh.f32 %v2330_v60  ;;  %3467 = vmatprep.subr.mxu0 %v2568_v23  ;;  %3536 = vmatprep.subr.mxu1 %v2832_v26  ;;  %v2768_v2 = vld [vmem:[#allocation16 + $0xcc8] sm:$0xff]  ;;  %v2767_v4 = vld [vmem:[#allocation16 + $0xcc0] sm:$0xff]  ;;  %v2289_v60 = vmul.f32 0.5, %v7803_v39  ;;  %v7821_v49 = vmul.f32 %v2343_v17, %v2287_v20 }
 0x463   :  { %3468 = vmatpush2.msra.mxu0 %v2567_v28  ;;  %3537 = vmatpush2.msra.mxu1 %v2831_v59  ;;  %7086 = vtanh.f32 %v2329_v27  ;;  %v2496_v11 = vld [vmem:[#allocation16 + $0x448] sm:$0xff]  ;;  %v2495_v15 = vld [vmem:[#allocation16 + $0x440] sm:$0xff] }
 0x464   :  { %3469 = vmatprep.subr.mxu0 %v2560_v29  ;;  %3538 = vmatprep.subr.mxu1 %v2824_v30  ;;  %v2760_v12 = vld [vmem:[#allocation16 + $0xc88] sm:$0xff]  ;;  %v2759_v16 = vld [vmem:[#allocation16 + $0xc80] sm:$0xff] }
 0x465   :  { %3470 = vmatpush2.msra.mxu0 %v2559_v13  ;;  %3539 = vmatpush2.msra.mxu1 %v2823_v31  ;;  %v2488_v19 = vld [vmem:[#allocation16 + $0x408] sm:$0xff]  ;;  %v2487_v21 = vld [vmem:[#allocation16 + $0x400] sm:$0xff] }
 0x466   :  { %3471 = vmatprep.subr.mxu0 %v2552_v32  ;;  %3540 = vmatprep.subr.mxu1 %v2816_v33  ;;  %v2752_v61 = vld [vmem:[#allocation16 + $0xc48] sm:$0xff]  ;;  %v2751_v22 = vld [vmem:[#allocation16 + $0xc40] sm:$0xff] }
 0x467   :  { %3472 = vmatpush2.msra.mxu0 %v2551_v0  ;;  %3541 = vmatpush2.msra.mxu1 %v2815_v34  ;;  %v2744_v26 = vld [vmem:[#allocation16 + $0xc08] sm:$0xff]  ;;  %v2743_v28 = vld [vmem:[#allocation16 + $0xc00] sm:$0xff] }
 0x468   :  { %3473 = vmatprep.subr.mxu0 %v2544_v24  ;;  %3542 = vmatprep.subr.mxu1 %v2808_v36  ;;  %v2992_v50 = vld [vmem:[#allocation16 + $0x13c8] sm:$0xff]  ;;  %v2991_v29 = vld [vmem:[#allocation16 + $0x13c0] sm:$0xff] }
 0x469   :  { %3474 = vmatpush2.msra.mxu0 %v2543_v37  ;;  %3543 = vmatpush2.msra.mxu1 %v2807_v58  ;;  %v3248_v30 = vld [vmem:[#allocation16 + $0x1bc8] sm:$0xff]  ;;  %v3247_v39 = vld [vmem:[#allocation16 + $0x1bc0] sm:$0xff] }
 0x46a   :  { %3475 = vmatprep.subr.mxu0 %v2536_v38  ;;  %3544 = vmatprep.subr.mxu1 %v2800_v40  ;;  %v2984_v13 = vld [vmem:[#allocation16 + $0x1388] sm:$0xff]  ;;  %v2983_v31 = vld [vmem:[#allocation16 + $0x1380] sm:$0xff] }
 0x46b   :  { %3476 = vmatpush2.msra.mxu0 %v2535_v41  ;;  %3545 = vmatpush2.msra.mxu1 %v2799_v42  ;;  %v3240_v32 = vld [vmem:[#allocation16 + $0x1b88] sm:$0xff]  ;;  %v3239_v0 = vld [vmem:[#allocation16 + $0x1b80] sm:$0xff] }
 0x46c   :  { %3477 = vmatprep.subr.mxu0 %v2528_v44  ;;  %3546 = vmatprep.subr.mxu1 %v2792_v45  ;;  %v2976_v33 = vld [vmem:[#allocation16 + $0x1348] sm:$0xff]  ;;  %v2975_v34 = vld [vmem:[#allocation16 + $0x1340] sm:$0xff] }
 0x46d   :  { %3478 = vmatpush2.msra.mxu0 %v2527_v46  ;;  %3547 = vmatpush2.msra.mxu1 %v2791_v47  ;;  %v3232_v24 = vld [vmem:[#allocation16 + $0x1b48] sm:$0xff]  ;;  %v3231_v37 = vld [vmem:[#allocation16 + $0x1b40] sm:$0xff] }
 0x46e   :  { %3479 = vmatprep.subr.mxu0 %v2520_v48  ;;  %3548 = vmatprep.subr.mxu1 %v2784_v51  ;;  %v2968_v36 = vld [vmem:[#allocation16 + $0x1308] sm:$0xff]  ;;  %v2967_v58 = vld [vmem:[#allocation16 + $0x1300] sm:$0xff] }
 0x46f   :  { %v7085_v35 = vpop.eup %7084  ;;  %3480 = vmatpush2.msra.mxu0 %v2519_v52  ;;  %3549 = vmatpush2.msra.mxu1 %v2783_v53  ;;  %v3224_v38 = vld [vmem:[#allocation16 + $0x1b08] sm:$0xff]  ;;  %v3223_v41 = vld [vmem:[#allocation16 + $0x1b00] sm:$0xff] }
 0x470   :  { %3481 = vmatprep.subr.mxu0 %v2512_v54  ;;  %3550 = vmatprep.subr.mxu1 %v2776_v55  ;;  %v7087_v8 = vpop.eup %7086  ;;  %v2346_v14 = vadd.f32 1.0, %v7085_v35  ;;  %v2960_v40 = vld [vmem:[#allocation16 + $0x12c8] sm:$0xff]  ;;  %v2959_v42 = vld [vmem:[#allocation16 + $0x12c0] sm:$0xff] }
 0x471   :  { %3482 = vmatpush2.msra.mxu0 %v2511_v57  ;;  %3551 = vmatpush2.msra.mxu1 %v2775_v62  ;;  %v2345_v23 = vadd.f32 1.0, %v7087_v8  ;;  %v3216_v44 = vld [vmem:[#allocation16 + $0x1ac8] sm:$0xff]  ;;  %v3215_v46 = vld [vmem:[#allocation16 + $0x1ac0] sm:$0xff] }
 0x472   :  { %3483 = vmatprep.subr.mxu0 %v2504_v63  ;;  %3552 = vmatprep.subr.mxu1 %v2768_v2  ;;  %v7818_v27 = vmul.f32 %v2346_v14, %v2290_v18  ;;  %v2952_v45 = vld [vmem:[#allocation16 + $0x1288] sm:$0xff]  ;;  %v2951_v47 = vld [vmem:[#allocation16 + $0x1280] sm:$0xff] }
 0x473   :  { %3484 = vmatpush2.msra.mxu0 %v2503_v3  ;;  %3553 = vmatpush2.msra.mxu1 %v2767_v4  ;;  %v7824_v59 = vmul.f32 %v2345_v23, %v2289_v60  ;;  %v3208_v48 = vld [vmem:[#allocation16 + $0x1a88] sm:$0xff]  ;;  %v3207_v52 = vld [vmem:[#allocation16 + $0x1a80] sm:$0xff] }
 0x474   :  { %3485 = vmatprep.subr.mxu0 %v2496_v11  ;;  %3554 = vmatprep.subr.mxu1 %v2760_v12  ;;  %v2944_v51 = vld [vmem:[#allocation16 + $0x1248] sm:$0xff]  ;;  %v2943_v53 = vld [vmem:[#allocation16 + $0x1240] sm:$0xff] }
 0x475   :  { %3486 = vmatpush2.msra.mxu0 %v2495_v15  ;;  %3555 = vmatpush2.msra.mxu1 %v2759_v16  ;;  %v3200_v54 = vld [vmem:[#allocation16 + $0x1a48] sm:$0xff]  ;;  %v3199_v56 = vld [vmem:[#allocation16 + $0x1a40] sm:$0xff] }
 0x476   :  { %3487 = vmatprep.subr.mxu0 %v2488_v19  ;;  %3556 = vmatprep.subr.mxu1 %v2752_v61  ;;  %v2936_v55 = vld [vmem:[#allocation16 + $0x1208] sm:$0xff]  ;;  %v2935_v57 = vld [vmem:[#allocation16 + $0x1200] sm:$0xff] }
 0x477   :  { %3488 = vmatpush2.msra.mxu0 %v2487_v21  ;;  %3557 = vmatpush2.msra.mxu1 %v2751_v22  ;;  %v3192_v62 = vld [vmem:[#allocation16 + $0x1a08] sm:$0xff]  ;;  %v3191_v63 = vld [vmem:[#allocation16 + $0x1a00] sm:$0xff] }
 0x478   :  { %3490 = vmatmul.mubr.f32.vlgmr.msra.gmra.mxu0 %v7821_v49  ;;  %3558 = vmatprep.subr.mxu1 %v2744_v26  ;;  %v2928_v35 = vld [vmem:[#allocation16 + $0x11c8] sm:$0xff]  ;;  %v2927_v2 = vld [vmem:[#allocation16 + $0x11c0] sm:$0xff] }
 0x479   :  { %3559 = vmatpush2.msra.mxu1 %v2743_v28  ;;  %3560 = vmatprep.mubr.f32.mxu1 %v7818_v27  ;;  %v3184_v3 = vld [vmem:[#allocation16 + $0x19c8] sm:$0xff]  ;;  %v3183_v8 = vld [vmem:[#allocation16 + $0x19c0] sm:$0xff] }
 0x47a   :  { %3561 = vmatmul.mubr.f32.vlgmr.msra.gmra.mxu1 %v7824_v59  ;;  %3567 = vmatprep.subr.mxu0 %v2992_v50  ;;  %v2920_v4 = vld [vmem:[#allocation16 + $0x1188] sm:$0xff]  ;;  %v2919_v11 = vld [vmem:[#allocation16 + $0x1180] sm:$0xff] }
 0x47b   :  { %3568 = vmatpush1.msra.mxu0 %v2991_v29  ;;  %3638 = vmatprep.subr.mxu1 %v3248_v30  ;;  %v3176_v12 = vld [vmem:[#allocation16 + $0x1988] sm:$0xff]  ;;  %v3175_v15 = vld [vmem:[#allocation16 + $0x1980] sm:$0xff] }
 0x47c   :  { %3569 = vmatprep.subr.mxu0 %v2984_v13  ;;  %3639 = vmatpush1.msra.mxu1 %v3247_v39  ;;  %v2912_v14 = vld [vmem:[#allocation16 + $0x1148] sm:$0xff]  ;;  %v2911_v16 = vld [vmem:[#allocation16 + $0x1140] sm:$0xff] }
 0x47d   :  { %3570 = vmatpush1.msra.mxu0 %v2983_v31  ;;  %3640 = vmatprep.subr.mxu1 %v3240_v32  ;;  %v3168_v17 = vld [vmem:[#allocation16 + $0x1948] sm:$0xff]  ;;  %v3167_v19 = vld [vmem:[#allocation16 + $0x1940] sm:$0xff] }
 0x47e   :  { %3571 = vmatprep.subr.mxu0 %v2976_v33  ;;  %3641 = vmatpush1.msra.mxu1 %v3239_v0  ;;  %v2904_v18 = vld [vmem:[#allocation16 + $0x1108] sm:$0xff]  ;;  %v2903_v61 = vld [vmem:[#allocation16 + $0x1100] sm:$0xff] }
 0x47f   :  { %3572 = vmatpush1.msra.mxu0 %v2975_v34  ;;  %3642 = vmatprep.subr.mxu1 %v3232_v24  ;;  %v3160_v20 = vld [vmem:[#allocation16 + $0x1908] sm:$0xff]  ;;  %v3159_v22 = vld [vmem:[#allocation16 + $0x1900] sm:$0xff] }
 0x480   :  { %3573 = vmatprep.subr.mxu0 %v2968_v36  ;;  %3643 = vmatpush1.msra.mxu1 %v3231_v37  ;;  %v2896_v21 = vld [vmem:[#allocation16 + $0x10c8] sm:$0xff]  ;;  %v2895_v23 = vld [vmem:[#allocation16 + $0x10c0] sm:$0xff] }
 0x481   :  { %3574 = vmatpush1.msra.mxu0 %v2967_v58  ;;  %3644 = vmatprep.subr.mxu1 %v3224_v38  ;;  %v3152_v26 = vld [vmem:[#allocation16 + $0x18c8] sm:$0xff]  ;;  %v3151_v28 = vld [vmem:[#allocation16 + $0x18c0] sm:$0xff] }
 0x482   :  { %3575 = vmatprep.subr.mxu0 %v2960_v40  ;;  %3645 = vmatpush1.msra.mxu1 %v3223_v41  ;;  %v2888_v60 = vld [vmem:[#allocation16 + $0x1088] sm:$0xff]  ;;  %v2887_v50 = vld [vmem:[#allocation16 + $0x1080] sm:$0xff] }
 0x483   :  { %3576 = vmatpush1.msra.mxu0 %v2959_v42  ;;  %3646 = vmatprep.subr.mxu1 %v3216_v44  ;;  %v3144_v29 = vld [vmem:[#allocation16 + $0x1888] sm:$0xff]  ;;  %v3143_v13 = vld [vmem:[#allocation16 + $0x1880] sm:$0xff] }
 0x484   :  { %3577 = vmatprep.subr.mxu0 %v2952_v45  ;;  %3647 = vmatpush1.msra.mxu1 %v3215_v46  ;;  %v2880_v30 = vld [vmem:[#allocation16 + $0x1048] sm:$0xff]  ;;  %v2879_v39 = vld [vmem:[#allocation16 + $0x1040] sm:$0xff] }
 0x485   :  { %3578 = vmatpush1.msra.mxu0 %v2951_v47  ;;  %3648 = vmatprep.subr.mxu1 %v3208_v48  ;;  %v3136_v31 = vld [vmem:[#allocation16 + $0x1848] sm:$0xff]  ;;  %v3135_v33 = vld [vmem:[#allocation16 + $0x1840] sm:$0xff] }
 0x486   :  { %3579 = vmatprep.subr.mxu0 %v2944_v51  ;;  %3649 = vmatpush1.msra.mxu1 %v3207_v52  ;;  %v2872_v32 = vld [vmem:[#allocation16 + $0x1008] sm:$0xff]  ;;  %v2871_v0 = vld [vmem:[#allocation16 + $0x1000] sm:$0xff] }
 0x487   :  { %3580 = vmatpush1.msra.mxu0 %v2943_v53  ;;  %3650 = vmatprep.subr.mxu1 %v3200_v54  ;;  %v3128_v34 = vld [vmem:[#allocation16 + $0x1808] sm:$0xff]  ;;  %v3127_v36 = vld [vmem:[#allocation16 + $0x1800] sm:$0xff] }
 0x488   :  { %3581 = vmatprep.subr.mxu0 %v2936_v55  ;;  %3651 = vmatpush1.msra.mxu1 %v3199_v56  ;;  %v3120_v24 = vld [vmem:[#allocation16 + $0x17c8] sm:$0xff]  ;;  %v3119_v37 = vld [vmem:[#allocation16 + $0x17c0] sm:$0xff] }
 0x489   :  { %3582 = vmatpush1.msra.mxu0 %v2935_v57  ;;  %3652 = vmatprep.subr.mxu1 %v3192_v62  ;;  %v3376_v58 = vld [vmem:[#allocation16 + $0x1fc8] sm:$0xff]  ;;  %v3375_v40 = vld [vmem:[#allocation16 + $0x1fc0] sm:$0xff] }
 0x48a   :  { %3583 = vmatprep.subr.mxu0 %v2928_v35  ;;  %3653 = vmatpush1.msra.mxu1 %v3191_v63  ;;  %v3112_v38 = vld [vmem:[#allocation16 + $0x1788] sm:$0xff]  ;;  %v3111_v41 = vld [vmem:[#allocation16 + $0x1780] sm:$0xff] }
 0x48b   :  { %3584 = vmatpush1.msra.mxu0 %v2927_v2  ;;  %3654 = vmatprep.subr.mxu1 %v3184_v3  ;;  %v3368_v42 = vld [vmem:[#allocation16 + $0x1f88] sm:$0xff]  ;;  %v3367_v45 = vld [vmem:[#allocation16 + $0x1f80] sm:$0xff] }
 0x48c   :  { %3585 = vmatprep.subr.mxu0 %v2920_v4  ;;  %3655 = vmatpush1.msra.mxu1 %v3183_v8  ;;  %v3104_v44 = vld [vmem:[#allocation16 + $0x1748] sm:$0xff]  ;;  %v3103_v46 = vld [vmem:[#allocation16 + $0x1740] sm:$0xff] }
 0x48d   :  { %3586 = vmatpush1.msra.mxu0 %v2919_v11  ;;  %3656 = vmatprep.subr.mxu1 %v3176_v12  ;;  %v3360_v47 = vld [vmem:[#allocation16 + $0x1f48] sm:$0xff]  ;;  %v3359_v51 = vld [vmem:[#allocation16 + $0x1f40] sm:$0xff] }
 0x48e   :  { %3587 = vmatprep.subr.mxu0 %v2912_v14  ;;  %3657 = vmatpush1.msra.mxu1 %v3175_v15  ;;  %v3096_v48 = vld [vmem:[#allocation16 + $0x1708] sm:$0xff]  ;;  %v3095_v52 = vld [vmem:[#allocation16 + $0x1700] sm:$0xff] }
 0x48f   :  { %3588 = vmatpush1.msra.mxu0 %v2911_v16  ;;  %3658 = vmatprep.subr.mxu1 %v3168_v17  ;;  %v3352_v53 = vld [vmem:[#allocation16 + $0x1f08] sm:$0xff]  ;;  %v3351_v55 = vld [vmem:[#allocation16 + $0x1f00] sm:$0xff] }
 0x490   :  { %3589 = vmatprep.subr.mxu0 %v2904_v18  ;;  %3659 = vmatpush1.msra.mxu1 %v3167_v19  ;;  %v3088_v54 = vld [vmem:[#allocation16 + $0x16c8] sm:$0xff]  ;;  %v3087_v56 = vld [vmem:[#allocation16 + $0x16c0] sm:$0xff] }
 0x491   :  { %3590 = vmatpush1.msra.mxu0 %v2903_v61  ;;  %3660 = vmatprep.subr.mxu1 %v3160_v20  ;;  %v3344_v57 = vld [vmem:[#allocation16 + $0x1ec8] sm:$0xff]  ;;  %v3343_v35 = vld [vmem:[#allocation16 + $0x1ec0] sm:$0xff] }
 0x492   :  { %3591 = vmatprep.subr.mxu0 %v2896_v21  ;;  %3661 = vmatpush1.msra.mxu1 %v3159_v22  ;;  %v3080_v62 = vld [vmem:[#allocation16 + $0x1688] sm:$0xff]  ;;  %v3079_v63 = vld [vmem:[#allocation16 + $0x1680] sm:$0xff]  ;;  %v1417_v22 = vsub.s32 5, %v7712_v5 }
 0x493   :  { %3592 = vmatpush1.msra.mxu0 %v2895_v23  ;;  %3662 = vmatprep.subr.mxu1 %v3152_v26  ;;  %v3336_v2 = vld [vmem:[#allocation16 + $0x1e88] sm:$0xff]  ;;  %v3335_v4 = vld [vmem:[#allocation16 + $0x1e80] sm:$0xff] }
 0x494   :  { %3593 = vmatprep.subr.mxu0 %v2888_v60  ;;  %3663 = vmatpush1.msra.mxu1 %v3151_v28  ;;  %v3072_v3 = vld [vmem:[#allocation16 + $0x1648] sm:$0xff]  ;;  %v3071_v8 = vld [vmem:[#allocation16 + $0x1640] sm:$0xff]  ;;  %v1927_v60 = vpop.f32.mrf.mxu0 }
 0x495   :  { %3594 = vmatpush1.msra.mxu0 %v2887_v50  ;;  %3664 = vmatprep.subr.mxu1 %v3144_v29  ;;  %v3328_v11 = vld [vmem:[#allocation16 + $0x1e48] sm:$0xff]  ;;  %v3327_v14 = vld [vmem:[#allocation16 + $0x1e40] sm:$0xff]  ;;  %v7829_v29 = vld [vmem:[#allocation14] sm:$0xff] }
 0x496   :  { %3595 = vmatprep.subr.mxu0 %v2880_v30  ;;  %3665 = vmatpush1.msra.mxu1 %v3143_v13  ;;  %v3064_v12 = vld [vmem:[#allocation16 + $0x1608] sm:$0xff]  ;;  %v3063_v15 = vld [vmem:[#allocation16 + $0x1600] sm:$0xff]  ;;  %v1414_v30 = vrot.slane %v7829_v29, %v7731_v43 }
 0x497   :  { %3596 = vmatpush1.msra.mxu0 %v2879_v39  ;;  %3666 = vmatprep.subr.mxu1 %v3136_v31  ;;  %v3320_v16 = vld [vmem:[#allocation16 + $0x1e08] sm:$0xff]  ;;  %v3319_v18 = vld [vmem:[#allocation16 + $0x1e00] sm:$0xff] }
 0x498   :  { %3597 = vmatprep.subr.mxu0 %v2872_v32  ;;  %3667 = vmatpush1.msra.mxu1 %v3135_v33  ;;  %v3056_v17 = vld [vmem:[#allocation16 + $0x15c8] sm:$0xff]  ;;  %v3055_v19 = vld [vmem:[#allocation16 + $0x15c0] sm:$0xff]  ;;  %v1418_v33 = vrot.slane %v7829_v29, %v1417_v22 }
 0x499   :  { %3598 = vmatpush1.msra.mxu0 %v2871_v0  ;;  %3668 = vmatprep.subr.mxu1 %v3128_v34  ;;  %v3312_v61 = vld [vmem:[#allocation16 + $0x1dc8] sm:$0xff]  ;;  %v3311_v21 = vld [vmem:[#allocation16 + $0x1dc0] sm:$0xff] }
 0x49a   :  { %3599 = vmatprep.subr.mxu0 %v3120_v24  ;;  %3669 = vmatpush1.msra.mxu1 %v3127_v36  ;;  %v3048_v20 = vld [vmem:[#allocation16 + $0x1588] sm:$0xff]  ;;  %v3047_v23 = vld [vmem:[#allocation16 + $0x1580] sm:$0xff]  ;;  %v1929_v24 = vpop.f32.mrf.mxu0 }
 0x49b   :  { %3600 = vmatpush2.msra.mxu0 %v3119_v37  ;;  %3670 = vmatprep.subr.mxu1 %v3376_v58  ;;  %v3304_v26 = vld [vmem:[#allocation16 + $0x1d88] sm:$0xff]  ;;  %v3303_v50 = vld [vmem:[#allocation16 + $0x1d80] sm:$0xff]  ;;  %v1928_v58 = vadd.f32 %v1927_v60, %v1414_v30 }
 0x49c   :  { %3601 = vmatprep.subr.mxu0 %v3112_v38  ;;  %3671 = vmatpush2.msra.mxu1 %v3375_v40  ;;  %v3040_v28 = vld [vmem:[#allocation16 + $0x1548] sm:$0xff]  ;;  %v3039_v13 = vld [vmem:[#allocation16 + $0x1540] sm:$0xff] }
 0x49d   :  { %3602 = vmatpush2.msra.mxu0 %v3111_v41  ;;  %3672 = vmatprep.subr.mxu1 %v3368_v42  ;;  %v3296_v39 = vld [vmem:[#allocation16 + $0x1d48] sm:$0xff]  ;;  %v3295_v32 = vld [vmem:[#allocation16 + $0x1d40] sm:$0xff]  ;;  %v1998_v41 = vpop.f32.mrf.mxu1 }
 0x49e   :  { %3603 = vmatprep.subr.mxu0 %v3104_v44  ;;  %3673 = vmatpush2.msra.mxu1 %v3367_v45  ;;  %v3032_v31 = vld [vmem:[#allocation16 + $0x1508] sm:$0xff]  ;;  %v3031_v0 = vld [vmem:[#allocation16 + $0x1500] sm:$0xff]  ;;  %v1930_v45 = vadd.f32 %v1929_v24, %v1418_v33  ;;  %v2481_v33 = vld [vmem:[#allocation16 + $0x3d0] sm:$0xff] }
 0x49f   :  { %3604 = vmatpush2.msra.mxu0 %v3103_v46  ;;  %3674 = vmatprep.subr.mxu1 %v3360_v47  ;;  %v3288_v34 = vld [vmem:[#allocation16 + $0x1d08] sm:$0xff]  ;;  %v3287_v37 = vld [vmem:[#allocation16 + $0x1d00] sm:$0xff]  ;;  %v2466_v24 = vld [vmem:[#allocation16 + $0x358] sm:$0xff] }
 0x4a0   :  { %3605 = vmatprep.subr.mxu0 %v3096_v48  ;;  %3675 = vmatpush2.msra.mxu1 %v3359_v51  ;;  %v3024_v36 = vld [vmem:[#allocation16 + $0x14c8] sm:$0xff]  ;;  %v3023_v38 = vld [vmem:[#allocation16 + $0x14c0] sm:$0xff] }
 0x4a1   :  { %3606 = vmatpush2.msra.mxu0 %v3095_v52  ;;  %3676 = vmatprep.subr.mxu1 %v3352_v53  ;;  %v3280_v40 = vld [vmem:[#allocation16 + $0x1cc8] sm:$0xff]  ;;  %v3279_v44 = vld [vmem:[#allocation16 + $0x1cc0] sm:$0xff]  ;;  %v1999_v52 = vadd.f32 %v1998_v41, %v1928_v58  ;;  %v2457_v58 = vld [vmem:[#allocation16 + $0x310] sm:$0xff] }
 0x4a2   :  { %3607 = vmatprep.subr.mxu0 %v3088_v54  ;;  %3677 = vmatpush2.msra.mxu1 %v3351_v55  ;;  %v3016_v42 = vld [vmem:[#allocation16 + $0x1488] sm:$0xff]  ;;  %v3015_v46 = vld [vmem:[#allocation16 + $0x1480] sm:$0xff]  ;;  %v2000_v55 = vpop.f32.mrf.mxu1  ;;  %v2442_v41 = vld [vmem:[#allocation16 + $0x298] sm:$0xff] }
 0x4a3   :  { %3608 = vmatpush2.msra.mxu0 %v3087_v56  ;;  %3678 = vmatprep.subr.mxu1 %v3344_v57  ;;  %v3272_v47 = vld [vmem:[#allocation16 + $0x1c88] sm:$0xff]  ;;  %v3271_v51 = vld [vmem:[#allocation16 + $0x1c80] sm:$0xff] }
 0x4a4   :  { %3609 = vmatprep.subr.mxu0 %v3080_v62  ;;  %3679 = vmatpush2.msra.mxu1 %v3343_v35  ;;  %v3008_v48 = vld [vmem:[#allocation16 + $0x1448] sm:$0xff]  ;;  %v3007_v53 = vld [vmem:[#allocation16 + $0x1440] sm:$0xff]  ;;  %v2001_v35 = vadd.f32 %v2000_v55, %v1930_v45  ;;  %v2433_v45 = vld [vmem:[#allocation16 + $0x250] sm:$0xff] }
 0x4a5   :  { %3610 = vmatpush2.msra.mxu0 %v3079_v63  ;;  %3680 = vmatprep.subr.mxu1 %v3336_v2  ;;  %v3264_v54 = vld [vmem:[#allocation16 + $0x1c48] sm:$0xff]  ;;  %v3263_v62 = vld [vmem:[#allocation16 + $0x1c40] sm:$0xff]  ;;  %v2401_v55 = vld [vmem:[#allocation16 + $0x150] sm:$0xff] }
 0x4a6   :  { %3611 = vmatprep.subr.mxu0 %v3072_v3  ;;  %3681 = vmatpush2.msra.mxu1 %v3335_v4  ;;  %v3000_v57 = vld [vmem:[#allocation16 + $0x1408] sm:$0xff]  ;;  %v2999_v2 = vld [vmem:[#allocation16 + $0x1400] sm:$0xff] }
 0x4a7   :  { %3612 = vmatpush2.msra.mxu0 %v3071_v8  ;;  %3682 = vmatprep.subr.mxu1 %v3328_v11  ;;  %v3256_v3 = vld [vmem:[#allocation16 + $0x1c08] sm:$0xff]  ;;  %v2482_v8 = vld [vmem:[#allocation16 + $0x3d8] sm:$0xff]  ;;  %v3255_v11 = vld [vmem:[#allocation16 + $0x1c00] sm:$0xff] }
 0x4a8   :  { %3613 = vmatprep.subr.mxu0 %v3064_v12  ;;  %3683 = vmatpush2.msra.mxu1 %v3327_v14 }
 0x4a9   :  { %3614 = vmatpush2.msra.mxu0 %v3063_v15  ;;  %3684 = vmatprep.subr.mxu1 %v3320_v16  ;;  %v2738_v15 = vld [vmem:[#allocation16 + $0xbd8] sm:$0xff] }
 0x4aa   :  { %3615 = vmatprep.subr.mxu0 %v3056_v17  ;;  %3685 = vmatpush2.msra.mxu1 %v3319_v18 }
 0x4ab   :  { %3616 = vmatpush2.msra.mxu0 %v3055_v19  ;;  %3686 = vmatprep.subr.mxu1 %v3312_v61 }
 0x4ac   :  { %3617 = vmatprep.subr.mxu0 %v3048_v20  ;;  %3687 = vmatpush2.msra.mxu1 %v3311_v21 }
 0x4ad   :  { %3618 = vmatpush2.msra.mxu0 %v3047_v23  ;;  %3688 = vmatprep.subr.mxu1 %v3304_v26 }
 0x4ae   :  { %3619 = vmatprep.subr.mxu0 %v3040_v28  ;;  %3689 = vmatpush2.msra.mxu1 %v3303_v50 }
 0x4af   :  { %3620 = vmatpush2.msra.mxu0 %v3039_v13  ;;  %3690 = vmatprep.subr.mxu1 %v3296_v39 }
 0x4b0   :  { %3621 = vmatprep.subr.mxu0 %v3032_v31  ;;  %3691 = vmatpush2.msra.mxu1 %v3295_v32 }
 0x4b1   :  { %3622 = vmatpush2.msra.mxu0 %v3031_v0  ;;  %3692 = vmatprep.subr.mxu1 %v3288_v34  ;;  %v2474_v0 = vld [vmem:[#allocation16 + $0x398] sm:$0xff]  ;;  %v2473_v34 = vld [vmem:[#allocation16 + $0x390] sm:$0xff] }
 0x4b2   :  { %3623 = vmatprep.subr.mxu0 %v3024_v36  ;;  %3693 = vmatpush2.msra.mxu1 %v3287_v37  ;;  %v2465_v36 = vld [vmem:[#allocation16 + $0x350] sm:$0xff]  ;;  %v2458_v37 = vld [vmem:[#allocation16 + $0x318] sm:$0xff] }
 0x4b3   :  { %3624 = vmatpush2.msra.mxu0 %v3023_v38  ;;  %3694 = vmatprep.subr.mxu1 %v3280_v40  ;;  %v2450_v38 = vld [vmem:[#allocation16 + $0x2d8] sm:$0xff]  ;;  %v2449_v40 = vld [vmem:[#allocation16 + $0x2d0] sm:$0xff] }
 0x4b4   :  { %3625 = vmatprep.subr.mxu0 %v3016_v42  ;;  %3695 = vmatpush2.msra.mxu1 %v3279_v44  ;;  %v2441_v42 = vld [vmem:[#allocation16 + $0x290] sm:$0xff]  ;;  %v2434_v44 = vld [vmem:[#allocation16 + $0x258] sm:$0xff] }
 0x4b5   :  { %v2069_v56 = vpop.f32.mrf.mxu0  ;;  %3626 = vmatpush2.msra.mxu0 %v3015_v46  ;;  %3696 = vmatprep.subr.mxu1 %v3272_v47  ;;  %v2426_v46 = vld [vmem:[#allocation16 + $0x218] sm:$0xff]  ;;  %v2425_v47 = vld [vmem:[#allocation16 + $0x210] sm:$0xff] }
 0x4b6   :  { %v2070_v63 = vadd.f32 %v2069_v56, %v1999_v52  ;;  %3627 = vmatprep.subr.mxu0 %v3008_v48  ;;  %3697 = vmatpush2.msra.mxu1 %v3271_v51  ;;  %v2418_v48 = vld [vmem:[#allocation16 + $0x1d8] sm:$0xff]  ;;  %v2417_v51 = vld [vmem:[#allocation16 + $0x1d0] sm:$0xff] }
 0x4b7   :  { %v2071_v4 = vpop.f32.mrf.mxu0  ;;  %3628 = vmatpush2.msra.mxu0 %v3007_v53  ;;  %3698 = vmatprep.subr.mxu1 %v3264_v54  ;;  %v2410_v52 = vld [vmem:[#allocation16 + $0x198] sm:$0xff]  ;;  %v2409_v53 = vld [vmem:[#allocation16 + $0x190] sm:$0xff] }
 0x4b8   :  { %v2299_v12 = vmul.f32 %v2070_v63, %v2070_v63  ;;  %v2072_v14 = vadd.f32 %v2071_v4, %v2001_v35  ;;  %3629 = vmatprep.subr.mxu0 %v3000_v57  ;;  %3699 = vmatpush2.msra.mxu1 %v3263_v62  ;;  %v2291_v39 = vmul.f32 0.5, %v2070_v63  ;;  %v2402_v54 = vld [vmem:[#allocation16 + $0x158] sm:$0xff]  ;;  %v2393_v57 = vld [vmem:[#allocation16 + $0x110] sm:$0xff]  ;;  %v1425_v4 = vsub.s32 7, %v7712_v5 }
 0x4b9   :  { %3630 = vmatpush2.msra.mxu0 %v2999_v2  ;;  %3700 = vmatprep.subr.mxu1 %v3256_v3  ;;  %v2394_v56 = vld [vmem:[#allocation16 + $0x118] sm:$0xff]  ;;  %v2385_v35 = vld [vmem:[#allocation16 + $0xd0] sm:$0xff] }
 0x4ba   :  { %v2307_v16 = vmul.f32 %v2299_v12, %v2070_v63  ;;  %v2300_v17 = vmul.f32 %v2072_v14, %v2072_v14  ;;  %3709 = vmatprep.subr.mxu0 %v2482_v8  ;;  %3701 = vmatpush2.msra.mxu1 %v3255_v11  ;;  %v2292_v30 = vmul.f32 0.5, %v2072_v14  ;;  %v2386_v62 = vld [vmem:[#allocation16 + $0xd8] sm:$0xff]  ;;  %v2377_v3 = vld [vmem:[#allocation16 + $0x90] sm:$0xff] }
 0x4bb   :  { %3780 = vmatprep.subr.mxu1 %v2738_v15  ;;  %v2378_v2 = vld [vmem:[#allocation16 + $0x98] sm:$0xff]  ;;  %v2369_v12 = vld [vmem:[#allocation16 + $0x50] sm:$0xff] }
 0x4bc   :  { %v2315_v18 = vmul.f32 0.044715, %v2307_v16  ;;  %v2308_v19 = vmul.f32 %v2300_v17, %v2072_v14  ;;  %v2370_v8 = vld [vmem:[#allocation16 + $0x58] sm:$0xff]  ;;  %v2361_v16 = vld [vmem:[#allocation16 + $0x10] sm:$0xff]  ;;  %v1426_v17 = vrot.slane %v7829_v29, %v1425_v4 }
 0x4bd   :  { %v2362_v15 = vld [vmem:[#allocation16 + $0x18] sm:$0xff] }
 0x4be   :  { %v2323_v61 = vadd.f32 %v2315_v18, %v2070_v63  ;;  %v2316_v20 = vmul.f32 0.044715, %v2308_v19  ;;  %v1421_v63 = vsub.s32 6, %v7712_v5  ;;  %v2610_v18 = vld [vmem:[#allocation16 + $0x7d8] sm:$0xff] }
 0x4bf   :  { %v5111_v5 = vld [vmem:[#allocation19 + $0xef0] sm:$0xff] }
 0x4c0   :  { %v2331_v21 = vmul.f32 0.7978846, %v2323_v61  ;;  %v2324_v23 = vadd.f32 %v2316_v20, %v2072_v14  ;;  %v1422_v14 = vrot.slane %v7829_v29, %v1421_v63  ;;  %v2609_v61 = vld [vmem:[#allocation16 + $0x7d0] sm:$0xff] }
 0x4c2   :  { %7088 = vtanh.f32 %v2331_v21  ;;  %v2332_v26 = vmul.f32 0.7978846, %v2324_v23  ;;  %v2602_v21 = vld [vmem:[#allocation16 + $0x798] sm:$0xff] }
 0x4c4   :  { %7090 = vtanh.f32 %v2332_v26  ;;  %v2601_v26 = vld [vmem:[#allocation16 + $0x790] sm:$0xff] }
 0x4cf   :  { %v7089_v60 = vpop.eup %7088 }
 0x4d0   :  { %v2347_v50 = vadd.f32 1.0, %v7089_v60 }
 0x4d1   :  { %v7091_v28 = vpop.eup %7090 }
 0x4d2   :  { %v2348_v13 = vadd.f32 1.0, %v7091_v28  ;;  %v7838_v32 = vmul.f32 %v2347_v50, %v2291_v39  ;;  %v2593_v39 = vld [vmem:[#allocation16 + $0x750] sm:$0xff] }
 0x4d4   :  { %v7836_v31 = vmul.f32 %v2348_v13, %v2292_v30  ;;  %v2594_v30 = vld [vmem:[#allocation16 + $0x758] sm:$0xff] }
 0x4d6   :  { %3631 = vmatprep.mubr.f32.mxu0 %v7836_v31  ;;  %v2140_v11 = vpop.f32.mrf.mxu1 }
 0x4d7   :  { %3632 = vmatmul.mubr.f32.vlgmr.msra.gmra.mxu0 %v7838_v32  ;;  %v2141_v20 = vadd.f32 %v2140_v11, %v1422_v14  ;;  %v2529_v11 = vld [vmem:[#allocation16 + $0x550] sm:$0xff] }
 0x4d8   :  { %3710 = vmatpush1.msra.mxu0 %v2481_v33  ;;  %3773 = vmatprep.mubr.f32.mxu0 %v7790_v25  ;;  %v2142_v19 = vpop.f32.mrf.mxu1  ;;  %v2521_v14 = vld [vmem:[#allocation16 + $0x510] sm:$0xff] }
 0x4d9   :  { %3711 = vmatprep.subr.mxu0 %v2474_v0  ;;  %v2143_v60 = vadd.f32 %v2142_v19, %v1426_v17  ;;  %v2586_v0 = vld [vmem:[#allocation16 + $0x718] sm:$0xff] }
 0x4da   :  { %3712 = vmatpush1.msra.mxu0 %v2473_v34  ;;  %v2506_v17 = vld [vmem:[#allocation16 + $0x498] sm:$0xff] }
 0x4db   :  { %3713 = vmatprep.subr.mxu0 %v2466_v24  ;;  %v2585_v24 = vld [vmem:[#allocation16 + $0x710] sm:$0xff]  ;;  %v2498_v19 = vld [vmem:[#allocation16 + $0x458] sm:$0xff] }
 0x4dc   :  { %3714 = vmatpush1.msra.mxu0 %v2465_v36 }
 0x4dd   :  { %3715 = vmatprep.subr.mxu0 %v2458_v37 }
 0x4de   :  { %3716 = vmatpush1.msra.mxu0 %v2457_v58  ;;  %v2578_v58 = vld [vmem:[#allocation16 + $0x6d8] sm:$0xff] }
 0x4df   :  { %3717 = vmatprep.subr.mxu0 %v2450_v38  ;;  %v2577_v38 = vld [vmem:[#allocation16 + $0x6d0] sm:$0xff] }
 0x4e0   :  { %3718 = vmatpush1.msra.mxu0 %v2449_v40 }
 0x4e1   :  { %3719 = vmatprep.subr.mxu0 %v2442_v41 }
 0x4e2   :  { %3720 = vmatpush1.msra.mxu0 %v2441_v42  ;;  %v2570_v42 = vld [vmem:[#allocation16 + $0x698] sm:$0xff] }
 0x4e3   :  { %3721 = vmatprep.subr.mxu0 %v2434_v44  ;;  %v2569_v44 = vld [vmem:[#allocation16 + $0x690] sm:$0xff] }
 0x4e4   :  { %3722 = vmatpush1.msra.mxu0 %v2433_v45 }
 0x4e5   :  { %3723 = vmatprep.subr.mxu0 %v2426_v46 }
 0x4e6   :  { %3724 = vmatpush1.msra.mxu0 %v2425_v47  ;;  %v2562_v47 = vld [vmem:[#allocation16 + $0x658] sm:$0xff] }
 0x4e7   :  { %3725 = vmatprep.subr.mxu0 %v2418_v48  ;;  %v2561_v48 = vld [vmem:[#allocation16 + $0x650] sm:$0xff] }
 0x4e8   :  { %3726 = vmatpush1.msra.mxu0 %v2417_v51 }
 0x4e9   :  { %3727 = vmatprep.subr.mxu0 %v2410_v52 }
 0x4ea   :  { %3728 = vmatpush1.msra.mxu0 %v2409_v53  ;;  %v2554_v53 = vld [vmem:[#allocation16 + $0x618] sm:$0xff] }
 0x4eb   :  { %3729 = vmatprep.subr.mxu0 %v2402_v54  ;;  %v2553_v54 = vld [vmem:[#allocation16 + $0x610] sm:$0xff] }
 0x4ec   :  { %3730 = vmatpush1.msra.mxu0 %v2401_v55 }
 0x4ed   :  { %3731 = vmatprep.subr.mxu0 %v2394_v56 }
 0x4ee   :  { %3732 = vmatpush1.msra.mxu0 %v2393_v57  ;;  %v2546_v57 = vld [vmem:[#allocation16 + $0x5d8] sm:$0xff] }
 0x4ef   :  { %3733 = vmatprep.subr.mxu0 %v2386_v62  ;;  %v2545_v62 = vld [vmem:[#allocation16 + $0x5d0] sm:$0xff] }
 0x4f0   :  { %3734 = vmatpush1.msra.mxu0 %v2385_v35 }
 0x4f1   :  { %3735 = vmatprep.subr.mxu0 %v2378_v2  ;;  %v2538_v2 = vld [vmem:[#allocation16 + $0x598] sm:$0xff] }
 0x4f2   :  { %3736 = vmatpush1.msra.mxu0 %v2377_v3  ;;  %v2537_v3 = vld [vmem:[#allocation16 + $0x590] sm:$0xff] }
 0x4f3   :  { %3737 = vmatprep.subr.mxu0 %v2370_v8  ;;  %v2530_v8 = vld [vmem:[#allocation16 + $0x558] sm:$0xff] }
 0x4f4   :  { %3738 = vmatpush1.msra.mxu0 %v2369_v12  ;;  %v2522_v12 = vld [vmem:[#allocation16 + $0x518] sm:$0xff] }
 0x4f5   :  { %3739 = vmatprep.subr.mxu0 %v2362_v15  ;;  %v2514_v15 = vld [vmem:[#allocation16 + $0x4d8] sm:$0xff] }
 0x4f6   :  { %3740 = vmatpush1.msra.mxu0 %v2361_v16  ;;  %v2513_v16 = vld [vmem:[#allocation16 + $0x4d0] sm:$0xff] }
 0x4f7   :  { %v2211_v23 = vpop.f32.mrf.mxu0  ;;  %3741 = vmatprep.subr.mxu0 %v2610_v18  ;;  %v2505_v18 = vld [vmem:[#allocation16 + $0x490] sm:$0xff] }
 0x4f8   :  { %v2212_v28 = vadd.f32 %v2211_v23, %v2141_v20  ;;  %v2282_v50 = vpop.f32.mrf.mxu1  ;;  %3742 = vmatpush2.msra.mxu0 %v2609_v61  ;;  %v2497_v61 = vld [vmem:[#allocation16 + $0x450] sm:$0xff]  ;;  %v2490_v20 = vld [vmem:[#allocation16 + $0x418] sm:$0xff] }
 0x4f9   :  { %v2213_v13 = vpop.f32.mrf.mxu0  ;;  %3743 = vmatprep.subr.mxu0 %v2602_v21  ;;  %v2489_v23 = vld [vmem:[#allocation16 + $0x410] sm:$0xff] }
 0x4fa   :  { %v7851_v29 = vadd.f32 %v2282_v50, %v2212_v28  ;;  %v2214_v33 = vadd.f32 %v2213_v13, %v2143_v60  ;;  %3744 = vmatpush2.msra.mxu0 %v2601_v26  ;;  %v2284_v34 = vpop.f32.mrf.mxu1  ;;  %v2994_v26 = vld [vmem:[#allocation16 + $0x13d8] sm:$0xff]  ;;  %v2993_v28 = vld [vmem:[#allocation16 + $0x13d0] sm:$0xff] }
 0x4fb   :  { %3745 = vmatprep.subr.mxu0 %v2594_v30 }
 0x4fc   :  { %v2301_v36 = vmul.f32 %v7851_v29, %v7851_v29  ;;  %v7855_v37 = vadd.f32 %v2284_v34, %v2214_v33  ;;  %3746 = vmatpush2.msra.mxu0 %v2593_v39  ;;  %v2986_v39 = vld [vmem:[#allocation16 + $0x1398] sm:$0xff]  ;;  %v2293_v33 = vmul.f32 0.5, %v7851_v29 }
 0x4fd   :  { %3747 = vmatprep.subr.mxu0 %v2586_v0  ;;  %v2985_v0 = vld [vmem:[#allocation16 + $0x1390] sm:$0xff] }
 0x4fe   :  { %v2309_v40 = vmul.f32 %v2301_v36, %v7851_v29  ;;  %v2302_v41 = vmul.f32 %v7855_v37, %v7855_v37  ;;  %3748 = vmatpush2.msra.mxu0 %v2585_v24  ;;  %v2294_v30 = vmul.f32 0.5, %v7855_v37  ;;  %v2978_v24 = vld [vmem:[#allocation16 + $0x1358] sm:$0xff] }
 0x4ff   :  { %3749 = vmatprep.subr.mxu0 %v2578_v58  ;;  %v2737_v58 = vld [vmem:[#allocation16 + $0xbd0] sm:$0xff] }
 0x500   :  { %v2317_v45 = vmul.f32 0.044715, %v2309_v40  ;;  %v2310_v46 = vmul.f32 %v2302_v41, %v7855_v37  ;;  %3750 = vmatpush2.msra.mxu0 %v2577_v38  ;;  %v2977_v38 = vld [vmem:[#allocation16 + $0x1350] sm:$0xff]  ;;  %v2970_v40 = vld [vmem:[#allocation16 + $0x1318] sm:$0xff] }
 0x501   :  { %3751 = vmatprep.subr.mxu0 %v2570_v42  ;;  %v2722_v41 = vld [vmem:[#allocation16 + $0xb58] sm:$0xff]  ;;  %v2969_v42 = vld [vmem:[#allocation16 + $0x1310] sm:$0xff] }
 0x502   :  { %v2325_v51 = vadd.f32 %v2317_v45, %v7851_v29  ;;  %v2318_v52 = vmul.f32 0.044715, %v2310_v46  ;;  %3752 = vmatpush2.msra.mxu0 %v2569_v44  ;;  %v2729_v29 = vld [vmem:[#allocation16 + $0xb90] sm:$0xff]  ;;  %v2962_v45 = vld [vmem:[#allocation16 + $0x12d8] sm:$0xff] }
 0x503   :  { %3753 = vmatprep.subr.mxu0 %v2562_v47  ;;  %v2721_v44 = vld [vmem:[#allocation16 + $0xb50] sm:$0xff]  ;;  %v2714_v46 = vld [vmem:[#allocation16 + $0xb18] sm:$0xff] }
 0x504   :  { %v2333_v55 = vmul.f32 0.7978846, %v2325_v51  ;;  %v2326_v56 = vadd.f32 %v2318_v52, %v7855_v37  ;;  %3754 = vmatpush2.msra.mxu0 %v2561_v48  ;;  %v2730_v37 = vld [vmem:[#allocation16 + $0xb98] sm:$0xff]  ;;  %v2961_v47 = vld [vmem:[#allocation16 + $0x12d0] sm:$0xff] }
 0x505   :  { %3755 = vmatprep.subr.mxu0 %v2554_v53  ;;  %v2713_v48 = vld [vmem:[#allocation16 + $0xb10] sm:$0xff]  ;;  %v2954_v51 = vld [vmem:[#allocation16 + $0x1298] sm:$0xff] }
 0x506   :  { %7092 = vtanh.f32 %v2333_v55  ;;  %v2334_v35 = vmul.f32 0.7978846, %v2326_v56  ;;  %3756 = vmatpush2.msra.mxu0 %v2553_v54  ;;  %v2706_v52 = vld [vmem:[#allocation16 + $0xad8] sm:$0xff]  ;;  %v2953_v53 = vld [vmem:[#allocation16 + $0x1290] sm:$0xff] }
 0x507   :  { %3757 = vmatprep.subr.mxu0 %v2546_v57  ;;  %v2705_v54 = vld [vmem:[#allocation16 + $0xad0] sm:$0xff]  ;;  %v2946_v55 = vld [vmem:[#allocation16 + $0x1258] sm:$0xff] }
 0x508   :  { %7094 = vtanh.f32 %v2334_v35  ;;  %3758 = vmatpush2.msra.mxu0 %v2545_v62  ;;  %v2698_v56 = vld [vmem:[#allocation16 + $0xa98] sm:$0xff]  ;;  %v2945_v57 = vld [vmem:[#allocation16 + $0x1250] sm:$0xff] }
 0x509   :  { %3759 = vmatprep.subr.mxu0 %v2538_v2  ;;  %v2697_v62 = vld [vmem:[#allocation16 + $0xa90] sm:$0xff]  ;;  %v2938_v35 = vld [vmem:[#allocation16 + $0x1218] sm:$0xff] }
 0x50a   :  { %3760 = vmatpush2.msra.mxu0 %v2537_v3  ;;  %v2690_v2 = vld [vmem:[#allocation16 + $0xa58] sm:$0xff]  ;;  %v2937_v3 = vld [vmem:[#allocation16 + $0x1210] sm:$0xff] }
 0x50b   :  { %3761 = vmatprep.subr.mxu0 %v2530_v8  ;;  %v2689_v8 = vld [vmem:[#allocation16 + $0xa50] sm:$0xff] }
 0x50c   :  { %3762 = vmatpush2.msra.mxu0 %v2529_v11  ;;  %v2930_v11 = vld [vmem:[#allocation16 + $0x11d8] sm:$0xff] }
 0x50d   :  { %3763 = vmatprep.subr.mxu0 %v2522_v12  ;;  %v2682_v12 = vld [vmem:[#allocation16 + $0xa18] sm:$0xff] }
 0x50e   :  { %3764 = vmatpush2.msra.mxu0 %v2521_v14  ;;  %v2929_v14 = vld [vmem:[#allocation16 + $0x11d0] sm:$0xff] }
 0x50f   :  { %3765 = vmatprep.subr.mxu0 %v2514_v15  ;;  %v2681_v15 = vld [vmem:[#allocation16 + $0xa10] sm:$0xff] }
 0x510   :  { %3766 = vmatpush2.msra.mxu0 %v2513_v16  ;;  %v2922_v16 = vld [vmem:[#allocation16 + $0x1198] sm:$0xff] }
 0x511   :  { %3767 = vmatprep.subr.mxu0 %v2506_v17  ;;  %v2674_v17 = vld [vmem:[#allocation16 + $0x9d8] sm:$0xff] }
 0x512   :  { %3768 = vmatpush2.msra.mxu0 %v2505_v18  ;;  %v2921_v18 = vld [vmem:[#allocation16 + $0x1190] sm:$0xff] }
 0x513   :  { %v7093_v21 = vpop.eup %7092  ;;  %3769 = vmatprep.subr.mxu0 %v2498_v19  ;;  %v2673_v19 = vld [vmem:[#allocation16 + $0x9d0] sm:$0xff] }
 0x514   :  { %3770 = vmatpush2.msra.mxu0 %v2497_v61  ;;  %v2349_v50 = vadd.f32 1.0, %v7093_v21  ;;  %v2914_v61 = vld [vmem:[#allocation16 + $0x1158] sm:$0xff]  ;;  %v2913_v21 = vld [vmem:[#allocation16 + $0x1150] sm:$0xff] }
 0x515   :  { %v7095_v60 = vpop.eup %7094  ;;  %3771 = vmatprep.subr.mxu0 %v2490_v20  ;;  %v2666_v20 = vld [vmem:[#allocation16 + $0x998] sm:$0xff] }
 0x516   :  { %3772 = vmatpush2.msra.mxu0 %v2489_v23  ;;  %v2350_v13 = vadd.f32 1.0, %v7095_v60  ;;  %v7869_v36 = vmul.f32 %v2349_v50, %v2293_v33  ;;  %v2665_v23 = vld [vmem:[#allocation16 + $0x990] sm:$0xff]  ;;  %v2658_v60 = vld [vmem:[#allocation16 + $0x958] sm:$0xff] }
 0x517   :  { %3774 = vmatmul.mubr.f32.vlgmr.msra.gmra.mxu0 %v7821_v49  ;;  %3851 = vmatprep.subr.mxu0 %v2994_v26  ;;  %v2906_v26 = vld [vmem:[#allocation16 + $0x1118] sm:$0xff]  ;;  %v2657_v50 = vld [vmem:[#allocation16 + $0x950] sm:$0xff] }
 0x518   :  { %3852 = vmatpush1.msra.mxu0 %v2993_v28  ;;  %3915 = vmatprep.mubr.f32.mxu0 %v7836_v31  ;;  %v7867_v34 = vmul.f32 %v2350_v13, %v2294_v30  ;;  %v2905_v28 = vld [vmem:[#allocation16 + $0x1110] sm:$0xff]  ;;  %v2898_v30 = vld [vmem:[#allocation16 + $0x10d8] sm:$0xff] }
 0x519   :  { %3853 = vmatprep.subr.mxu0 %v2986_v39  ;;  %v2650_v13 = vld [vmem:[#allocation16 + $0x918] sm:$0xff]  ;;  %v2897_v39 = vld [vmem:[#allocation16 + $0x10d0] sm:$0xff] }
 0x51a   :  { %3702 = vmatprep.mubr.f32.mxu1 %v7867_v34  ;;  %3854 = vmatpush1.msra.mxu0 %v2985_v0  ;;  %v2649_v33 = vld [vmem:[#allocation16 + $0x910] sm:$0xff]  ;;  %v2890_v0 = vld [vmem:[#allocation16 + $0x1098] sm:$0xff] }
 0x51b   :  { %3703 = vmatmul.mubr.f32.vlgmr.msra.gmra.mxu1 %v7869_v36  ;;  %3855 = vmatprep.subr.mxu0 %v2978_v24  ;;  %v2642_v24 = vld [vmem:[#allocation16 + $0x8d8] sm:$0xff] }
 0x51c   :  { %3781 = vmatpush1.msra.mxu1 %v2737_v58  ;;  %3844 = vmatprep.mubr.f32.mxu1 %v7818_v27  ;;  %v2889_v58 = vld [vmem:[#allocation16 + $0x1090] sm:$0xff] }
 0x51d   :  { %3782 = vmatprep.subr.mxu1 %v2730_v37  ;;  %3856 = vmatpush1.msra.mxu0 %v2977_v38  ;;  %v2641_v37 = vld [vmem:[#allocation16 + $0x8d0] sm:$0xff]  ;;  %v2882_v38 = vld [vmem:[#allocation16 + $0x1058] sm:$0xff] }
 0x51e   :  { %3783 = vmatpush1.msra.mxu1 %v2729_v29  ;;  %3857 = vmatprep.subr.mxu0 %v2970_v40  ;;  %v2634_v29 = vld [vmem:[#allocation16 + $0x898] sm:$0xff]  ;;  %v2881_v40 = vld [vmem:[#allocation16 + $0x1050] sm:$0xff] }
 0x51f   :  { %3784 = vmatprep.subr.mxu1 %v2722_v41  ;;  %3858 = vmatpush1.msra.mxu0 %v2969_v42  ;;  %v3383_v41 = vld [vmem:[#allocation17] sm:$0xff]  ;;  %v2633_v42 = vld [vmem:[#allocation16 + $0x890] sm:$0xff] }
 0x520   :  { %3785 = vmatpush1.msra.mxu1 %v2721_v44  ;;  %3859 = vmatprep.subr.mxu0 %v2962_v45  ;;  %v2874_v44 = vld [vmem:[#allocation16 + $0x1018] sm:$0xff] }
 0x521   :  { %3786 = vmatprep.subr.mxu1 %v2714_v46  ;;  %3860 = vmatpush1.msra.mxu0 %v2961_v47  ;;  %v2626_v45 = vld [vmem:[#allocation16 + $0x858] sm:$0xff]  ;;  %v2873_v46 = vld [vmem:[#allocation16 + $0x1010] sm:$0xff]  ;;  %v3388_v47 = vrot.slane %v3383_v41, %v7715_v6 }
 0x522   :  { %3787 = vmatpush1.msra.mxu1 %v2713_v48  ;;  %3861 = vmatprep.subr.mxu0 %v2954_v51  ;;  %v2625_v48 = vld [vmem:[#allocation16 + $0x850] sm:$0xff]  ;;  %v3122_v51 = vld [vmem:[#allocation16 + $0x17d8] sm:$0xff] }
 0x523   :  { %3788 = vmatprep.subr.mxu1 %v2706_v52  ;;  %3862 = vmatpush1.msra.mxu0 %v2953_v53  ;;  %v2618_v52 = vld [vmem:[#allocation16 + $0x818] sm:$0xff]  ;;  %v3121_v53 = vld [vmem:[#allocation16 + $0x17d0] sm:$0xff] }
 0x524   :  { %3789 = vmatpush1.msra.mxu1 %v2705_v54  ;;  %3863 = vmatprep.subr.mxu0 %v2946_v55  ;;  %v2617_v54 = vld [vmem:[#allocation16 + $0x810] sm:$0xff]  ;;  %v3114_v55 = vld [vmem:[#allocation16 + $0x1798] sm:$0xff] }
 0x525   :  { %3790 = vmatprep.subr.mxu1 %v2698_v56  ;;  %3864 = vmatpush1.msra.mxu0 %v2945_v57  ;;  %v2866_v57 = vld [vmem:[#allocation16 + $0xfd8] sm:$0xff]  ;;  %v2809_v41 = vld [vmem:[#allocation16 + $0xe10] sm:$0xff] }
 0x526   :  { %3791 = vmatpush1.msra.mxu1 %v2697_v62  ;;  %3865 = vmatprep.subr.mxu0 %v2938_v35  ;;  %v3113_v62 = vld [vmem:[#allocation16 + $0x1790] sm:$0xff] }
 0x527   :  { %3792 = vmatprep.subr.mxu1 %v2690_v2  ;;  %3866 = vmatpush1.msra.mxu0 %v2937_v3  ;;  %v2865_v2 = vld [vmem:[#allocation16 + $0xfd0] sm:$0xff]  ;;  %v3106_v3 = vld [vmem:[#allocation16 + $0x1758] sm:$0xff] }
 0x528   :  { %3793 = vmatpush1.msra.mxu1 %v2689_v8  ;;  %3867 = vmatprep.subr.mxu0 %v2930_v11  ;;  %v2858_v11 = vld [vmem:[#allocation16 + $0xf98] sm:$0xff] }
 0x529   :  { %3794 = vmatprep.subr.mxu1 %v2682_v12  ;;  %3868 = vmatpush1.msra.mxu0 %v2929_v14  ;;  %v3105_v12 = vld [vmem:[#allocation16 + $0x1750] sm:$0xff] }
 0x52a   :  { %3795 = vmatpush1.msra.mxu1 %v2681_v15  ;;  %3869 = vmatprep.subr.mxu0 %v2922_v16  ;;  %v2857_v15 = vld [vmem:[#allocation16 + $0xf90] sm:$0xff]  ;;  %v3098_v16 = vld [vmem:[#allocation16 + $0x1718] sm:$0xff] }
 0x52b   :  { %3796 = vmatprep.subr.mxu1 %v2674_v17  ;;  %3870 = vmatpush1.msra.mxu0 %v2921_v18  ;;  %v2850_v17 = vld [vmem:[#allocation16 + $0xf58] sm:$0xff]  ;;  %v3097_v18 = vld [vmem:[#allocation16 + $0x1710] sm:$0xff] }
 0x52c   :  { %3797 = vmatpush1.msra.mxu1 %v2673_v19  ;;  %3871 = vmatprep.subr.mxu0 %v2914_v61  ;;  %v2849_v19 = vld [vmem:[#allocation16 + $0xf50] sm:$0xff]  ;;  %v3090_v61 = vld [vmem:[#allocation16 + $0x16d8] sm:$0xff] }
 0x52d   :  { %3798 = vmatprep.subr.mxu1 %v2666_v20  ;;  %3872 = vmatpush1.msra.mxu0 %v2913_v21  ;;  %v2842_v20 = vld [vmem:[#allocation16 + $0xf18] sm:$0xff]  ;;  %v3089_v21 = vld [vmem:[#allocation16 + $0x16d0] sm:$0xff] }
 0x52e   :  { %3799 = vmatpush1.msra.mxu1 %v2665_v23  ;;  %3873 = vmatprep.subr.mxu0 %v2906_v26  ;;  %v2841_v23 = vld [vmem:[#allocation16 + $0xf10] sm:$0xff]  ;;  %v3082_v26 = vld [vmem:[#allocation16 + $0x1698] sm:$0xff] }
 0x52f   :  { %3800 = vmatprep.subr.mxu1 %v2658_v60  ;;  %3874 = vmatpush1.msra.mxu0 %v2905_v28  ;;  %v2834_v60 = vld [vmem:[#allocation16 + $0xed8] sm:$0xff]  ;;  %v3081_v28 = vld [vmem:[#allocation16 + $0x1690] sm:$0xff] }
 0x530   :  { %3801 = vmatpush1.msra.mxu1 %v2657_v50  ;;  %3875 = vmatprep.subr.mxu0 %v2898_v30  ;;  %v2833_v50 = vld [vmem:[#allocation16 + $0xed0] sm:$0xff]  ;;  %v3074_v30 = vld [vmem:[#allocation16 + $0x1658] sm:$0xff] }
 0x531   :  { %3802 = vmatprep.subr.mxu1 %v2650_v13  ;;  %3876 = vmatpush1.msra.mxu0 %v2897_v39  ;;  %v2826_v13 = vld [vmem:[#allocation16 + $0xe98] sm:$0xff]  ;;  %v3073_v39 = vld [vmem:[#allocation16 + $0x1650] sm:$0xff] }
 0x532   :  { %3803 = vmatpush1.msra.mxu1 %v2649_v33  ;;  %3877 = vmatprep.subr.mxu0 %v2890_v0  ;;  %v2825_v33 = vld [vmem:[#allocation16 + $0xe90] sm:$0xff]  ;;  %v3066_v0 = vld [vmem:[#allocation16 + $0x1618] sm:$0xff] }
 0x533   :  { %3804 = vmatprep.subr.mxu1 %v2642_v24  ;;  %3878 = vmatpush1.msra.mxu0 %v2889_v58  ;;  %v2818_v24 = vld [vmem:[#allocation16 + $0xe58] sm:$0xff]  ;;  %v3065_v58 = vld [vmem:[#allocation16 + $0x1610] sm:$0xff] }
 0x534   :  { %3805 = vmatpush1.msra.mxu1 %v2641_v37  ;;  %3879 = vmatprep.subr.mxu0 %v2882_v38  ;;  %v2817_v37 = vld [vmem:[#allocation16 + $0xe50] sm:$0xff]  ;;  %v3058_v38 = vld [vmem:[#allocation16 + $0x15d8] sm:$0xff] }
 0x535   :  { %3806 = vmatprep.subr.mxu1 %v2634_v29  ;;  %3880 = vmatpush1.msra.mxu0 %v2881_v40  ;;  %v2810_v29 = vld [vmem:[#allocation16 + $0xe18] sm:$0xff]  ;;  %v3057_v40 = vld [vmem:[#allocation16 + $0x15d0] sm:$0xff] }
 0x536   :  { %3807 = vmatpush1.msra.mxu1 %v2633_v42  ;;  %3881 = vmatprep.subr.mxu0 %v2874_v44  ;;  %v3050_v42 = vld [vmem:[#allocation16 + $0x1598] sm:$0xff] }
 0x537   :  { %3808 = vmatprep.subr.mxu1 %v2626_v45  ;;  %3882 = vmatpush1.msra.mxu0 %v2873_v46  ;;  %v2802_v44 = vld [vmem:[#allocation16 + $0xdd8] sm:$0xff]  ;;  %v3049_v45 = vld [vmem:[#allocation16 + $0x1590] sm:$0xff] }
 0x538   :  { %v3491_v56 = vpop.f32.mrf.mxu0  ;;  %3809 = vmatpush1.msra.mxu1 %v2625_v48  ;;  %3883 = vmatprep.subr.mxu0 %v3122_v51  ;;  %v2801_v46 = vld [vmem:[#allocation16 + $0xdd0] sm:$0xff]  ;;  %v2794_v48 = vld [vmem:[#allocation16 + $0xd98] sm:$0xff] }
 0x539   :  { %v3492_v35 = vadd.f32 %v3491_v56, %v3388_v47  ;;  %3810 = vmatprep.subr.mxu1 %v2618_v52  ;;  %3884 = vmatpush2.msra.mxu0 %v3121_v53  ;;  %v3042_v47 = vld [vmem:[#allocation16 + $0x1558] sm:$0xff]  ;;  %v3041_v51 = vld [vmem:[#allocation16 + $0x1550] sm:$0xff] }
 0x53a   :  { %3811 = vmatpush1.msra.mxu1 %v2617_v54  ;;  %3885 = vmatprep.subr.mxu0 %v3114_v55  ;;  %v3562_v8 = vpop.f32.mrf.mxu1  ;;  %v2793_v52 = vld [vmem:[#allocation16 + $0xd90] sm:$0xff]  ;;  %v3034_v53 = vld [vmem:[#allocation16 + $0x1518] sm:$0xff] }
 0x53b   :  { %3812 = vmatprep.subr.mxu1 %v2866_v57  ;;  %v7875_v14 = vadd.f32 %v3562_v8, %v3492_v35  ;;  %3886 = vmatpush2.msra.mxu0 %v3113_v62  ;;  %v2786_v54 = vld [vmem:[#allocation16 + $0xd58] sm:$0xff]  ;;  %v3033_v55 = vld [vmem:[#allocation16 + $0x1510] sm:$0xff] }
 0x53c   :  { %3813 = vmatpush2.msra.mxu1 %v2865_v2  ;;  %3887 = vmatprep.subr.mxu0 %v3106_v3  ;;  %v2785_v56 = vld [vmem:[#allocation16 + $0xd50] sm:$0xff]  ;;  %v3026_v57 = vld [vmem:[#allocation16 + $0x14d8] sm:$0xff] }
 0x53d   :  { %3814 = vmatprep.subr.mxu1 %v2858_v11  ;;  %3888 = vmatpush2.msra.mxu0 %v3105_v12  ;;  %v2778_v62 = vld [vmem:[#allocation16 + $0xd18] sm:$0xff]  ;;  %v3025_v35 = vld [vmem:[#allocation16 + $0x14d0] sm:$0xff] }
 0x53e   :  { %3815 = vmatpush2.msra.mxu1 %v2857_v15  ;;  %3889 = vmatprep.subr.mxu0 %v3098_v16  ;;  %v2777_v2 = vld [vmem:[#allocation16 + $0xd10] sm:$0xff]  ;;  %v3018_v3 = vld [vmem:[#allocation16 + $0x1498] sm:$0xff] }
 0x53f   :  { %3816 = vmatprep.subr.mxu1 %v2850_v17  ;;  %3890 = vmatpush2.msra.mxu0 %v3097_v18  ;;  %v2770_v8 = vld [vmem:[#allocation16 + $0xcd8] sm:$0xff]  ;;  %v3017_v11 = vld [vmem:[#allocation16 + $0x1490] sm:$0xff] }
 0x540   :  { %3817 = vmatpush2.msra.mxu1 %v2849_v19  ;;  %3891 = vmatprep.subr.mxu0 %v3090_v61  ;;  %v2769_v12 = vld [vmem:[#allocation16 + $0xcd0] sm:$0xff]  ;;  %v3010_v15 = vld [vmem:[#allocation16 + $0x1458] sm:$0xff] }
 0x541   :  { %3818 = vmatprep.subr.mxu1 %v2842_v20  ;;  %3892 = vmatpush2.msra.mxu0 %v3089_v21  ;;  %v2762_v16 = vld [vmem:[#allocation16 + $0xc98] sm:$0xff]  ;;  %v3009_v17 = vld [vmem:[#allocation16 + $0x1450] sm:$0xff] }
 0x542   :  { %3819 = vmatpush2.msra.mxu1 %v2841_v23  ;;  %3893 = vmatprep.subr.mxu0 %v3082_v26  ;;  %v2761_v18 = vld [vmem:[#allocation16 + $0xc90] sm:$0xff]  ;;  %v3002_v19 = vld [vmem:[#allocation16 + $0x1418] sm:$0xff]  ;;  %v2484_v26 = vld [vmem:[#allocation16 + $0x3e8] sm:$0xff] }
 0x543   :  { %3820 = vmatprep.subr.mxu1 %v2834_v60  ;;  %3894 = vmatpush2.msra.mxu0 %v3081_v28  ;;  %v2754_v61 = vld [vmem:[#allocation16 + $0xc58] sm:$0xff]  ;;  %v3001_v20 = vld [vmem:[#allocation16 + $0x1410] sm:$0xff]  ;;  %v2483_v28 = vld [vmem:[#allocation16 + $0x3e0] sm:$0xff] }
 0x544   :  { %3821 = vmatpush2.msra.mxu1 %v2833_v50  ;;  %3895 = vmatprep.subr.mxu0 %v3074_v30  ;;  %v2753_v21 = vld [vmem:[#allocation16 + $0xc50] sm:$0xff]  ;;  %v2746_v23 = vld [vmem:[#allocation16 + $0xc18] sm:$0xff]  ;;  %v2476_v30 = vld [vmem:[#allocation16 + $0x3a8] sm:$0xff] }
 0x545   :  { %3822 = vmatprep.subr.mxu1 %v2826_v13  ;;  %3896 = vmatpush2.msra.mxu0 %v3073_v39  ;;  %v2745_v60 = vld [vmem:[#allocation16 + $0xc10] sm:$0xff]  ;;  %v3250_v50 = vld [vmem:[#allocation16 + $0x1bd8] sm:$0xff]  ;;  %v2475_v39 = vld [vmem:[#allocation16 + $0x3a0] sm:$0xff] }
 0x546   :  { %3823 = vmatpush2.msra.mxu1 %v2825_v33  ;;  %3897 = vmatprep.subr.mxu0 %v3066_v0  ;;  %v3249_v13 = vld [vmem:[#allocation16 + $0x1bd0] sm:$0xff]  ;;  %v3242_v33 = vld [vmem:[#allocation16 + $0x1b98] sm:$0xff]  ;;  %v2468_v0 = vld [vmem:[#allocation16 + $0x368] sm:$0xff] }
 0x547   :  { %3824 = vmatprep.subr.mxu1 %v2818_v24  ;;  %3898 = vmatpush2.msra.mxu0 %v3065_v58  ;;  %v3241_v24 = vld [vmem:[#allocation16 + $0x1b90] sm:$0xff]  ;;  %v2467_v58 = vld [vmem:[#allocation16 + $0x360] sm:$0xff] }
 0x548   :  { %3825 = vmatpush2.msra.mxu1 %v2817_v37  ;;  %3899 = vmatprep.subr.mxu0 %v3058_v38  ;;  %v3234_v37 = vld [vmem:[#allocation16 + $0x1b58] sm:$0xff]  ;;  %v2460_v38 = vld [vmem:[#allocation16 + $0x328] sm:$0xff] }
 0x549   :  { %3826 = vmatprep.subr.mxu1 %v2810_v29  ;;  %3900 = vmatpush2.msra.mxu0 %v3057_v40  ;;  %v3233_v29 = vld [vmem:[#allocation16 + $0x1b50] sm:$0xff]  ;;  %v2459_v40 = vld [vmem:[#allocation16 + $0x320] sm:$0xff] }
 0x54a   :  { %3827 = vmatpush2.msra.mxu1 %v2809_v41  ;;  %3901 = vmatprep.subr.mxu0 %v3050_v42  ;;  %v3226_v41 = vld [vmem:[#allocation16 + $0x1b18] sm:$0xff]  ;;  %v2452_v42 = vld [vmem:[#allocation16 + $0x2e8] sm:$0xff] }
 0x54b   :  { %3828 = vmatprep.subr.mxu1 %v2802_v44  ;;  %3902 = vmatpush2.msra.mxu0 %v3049_v45  ;;  %v3225_v44 = vld [vmem:[#allocation16 + $0x1b10] sm:$0xff]  ;;  %v2451_v45 = vld [vmem:[#allocation16 + $0x2e0] sm:$0xff] }
 0x54c   :  { %3829 = vmatpush2.msra.mxu1 %v2801_v46  ;;  %3903 = vmatprep.subr.mxu0 %v3042_v47  ;;  %v3218_v46 = vld [vmem:[#allocation16 + $0x1ad8] sm:$0xff]  ;;  %v2444_v47 = vld [vmem:[#allocation16 + $0x2a8] sm:$0xff] }
 0x54d   :  { %3830 = vmatprep.subr.mxu1 %v2794_v48  ;;  %3904 = vmatpush2.msra.mxu0 %v3041_v51  ;;  %v3217_v48 = vld [vmem:[#allocation16 + $0x1ad0] sm:$0xff]  ;;  %v2443_v51 = vld [vmem:[#allocation16 + $0x2a0] sm:$0xff] }
 0x54e   :  { %3831 = vmatpush2.msra.mxu1 %v2793_v52  ;;  %3905 = vmatprep.subr.mxu0 %v3034_v53  ;;  %v3210_v52 = vld [vmem:[#allocation16 + $0x1a98] sm:$0xff]  ;;  %v2436_v53 = vld [vmem:[#allocation16 + $0x268] sm:$0xff] }
 0x54f   :  { %3832 = vmatprep.subr.mxu1 %v2786_v54  ;;  %3906 = vmatpush2.msra.mxu0 %v3033_v55  ;;  %v3209_v54 = vld [vmem:[#allocation16 + $0x1a90] sm:$0xff]  ;;  %v2435_v55 = vld [vmem:[#allocation16 + $0x260] sm:$0xff] }
 0x550   :  { %3833 = vmatpush2.msra.mxu1 %v2785_v56  ;;  %3907 = vmatprep.subr.mxu0 %v3026_v57  ;;  %v3202_v56 = vld [vmem:[#allocation16 + $0x1a58] sm:$0xff]  ;;  %v2428_v57 = vld [vmem:[#allocation16 + $0x228] sm:$0xff] }
 0x551   :  { %3834 = vmatprep.subr.mxu1 %v2778_v62  ;;  %3908 = vmatpush2.msra.mxu0 %v3025_v35  ;;  %v3201_v62 = vld [vmem:[#allocation16 + $0x1a50] sm:$0xff]  ;;  %v2427_v35 = vld [vmem:[#allocation16 + $0x220] sm:$0xff] }
 0x552   :  { %3835 = vmatpush2.msra.mxu1 %v2777_v2  ;;  %3909 = vmatprep.subr.mxu0 %v3018_v3  ;;  %v3194_v2 = vld [vmem:[#allocation16 + $0x1a18] sm:$0xff]  ;;  %v2420_v3 = vld [vmem:[#allocation16 + $0x1e8] sm:$0xff] }
 0x553   :  { %3836 = vmatprep.subr.mxu1 %v2770_v8  ;;  %3910 = vmatpush2.msra.mxu0 %v3017_v11  ;;  %v3193_v8 = vld [vmem:[#allocation16 + $0x1a10] sm:$0xff]  ;;  %v2419_v11 = vld [vmem:[#allocation16 + $0x1e0] sm:$0xff] }
 0x554   :  { %3837 = vmatpush2.msra.mxu1 %v2769_v12  ;;  %3911 = vmatprep.subr.mxu0 %v3010_v15  ;;  %v3186_v12 = vld [vmem:[#allocation16 + $0x19d8] sm:$0xff]  ;;  %v2412_v15 = vld [vmem:[#allocation16 + $0x1a8] sm:$0xff] }
 0x555   :  { %3838 = vmatprep.subr.mxu1 %v2762_v16  ;;  %3912 = vmatpush2.msra.mxu0 %v3009_v17  ;;  %v3185_v16 = vld [vmem:[#allocation16 + $0x19d0] sm:$0xff]  ;;  %v2411_v17 = vld [vmem:[#allocation16 + $0x1a0] sm:$0xff] }
 0x556   :  { %3839 = vmatpush2.msra.mxu1 %v2761_v18  ;;  %3913 = vmatprep.subr.mxu0 %v3002_v19  ;;  %v3178_v18 = vld [vmem:[#allocation16 + $0x1998] sm:$0xff]  ;;  %v2404_v19 = vld [vmem:[#allocation16 + $0x168] sm:$0xff] }
 0x557   :  { %3840 = vmatprep.subr.mxu1 %v2754_v61  ;;  %3914 = vmatpush2.msra.mxu0 %v3001_v20  ;;  %v3177_v61 = vld [vmem:[#allocation16 + $0x1990] sm:$0xff]  ;;  %v2403_v20 = vld [vmem:[#allocation16 + $0x160] sm:$0xff] }
 0x558   :  { %3841 = vmatpush2.msra.mxu1 %v2753_v21  ;;  %3916 = vmatmul.mubr.f32.vlgmr.msra.gmra.mxu0 %v7838_v32  ;;  %v3170_v21 = vld [vmem:[#allocation16 + $0x1958] sm:$0xff] }
 0x559   :  { %3842 = vmatprep.subr.mxu1 %v2746_v23  ;;  %3993 = vmatprep.subr.mxu0 %v2484_v26  ;;  %v2396_v23 = vld [vmem:[#allocation16 + $0x128] sm:$0xff]  ;;  %v3169_v26 = vld [vmem:[#allocation16 + $0x1950] sm:$0xff] }
 0x55a   :  { %3843 = vmatpush2.msra.mxu1 %v2745_v60  ;;  %3994 = vmatpush1.msra.mxu0 %v2483_v28  ;;  %v2395_v60 = vld [vmem:[#allocation16 + $0x120] sm:$0xff]  ;;  %v3162_v28 = vld [vmem:[#allocation16 + $0x1918] sm:$0xff] }
 0x55b   :  { %4057 = vmatprep.mubr.f32.mxu0 %v7790_v25  ;;  %3845 = vmatmul.mubr.f32.vlgmr.msra.gmra.mxu1 %v7824_v59 }
 0x55c   :  { %3922 = vmatprep.subr.mxu1 %v3250_v50  ;;  %3995 = vmatprep.subr.mxu0 %v2476_v30  ;;  %v2388_v50 = vld [vmem:[#allocation16 + $0xe8] sm:$0xff]  ;;  %v3161_v30 = vld [vmem:[#allocation16 + $0x1910] sm:$0xff] }
 0x55d   :  { %3923 = vmatpush1.msra.mxu1 %v3249_v13  ;;  %3986 = vmatprep.mubr.f32.mxu1 %v7867_v34  ;;  %v2387_v13 = vld [vmem:[#allocation16 + $0xe0] sm:$0xff] }
 0x55e   :  { %3996 = vmatpush1.msra.mxu0 %v2475_v39  ;;  %3924 = vmatprep.subr.mxu1 %v3242_v33  ;;  %v3154_v39 = vld [vmem:[#allocation16 + $0x18d8] sm:$0xff]  ;;  %v2380_v33 = vld [vmem:[#allocation16 + $0xa8] sm:$0xff] }
 0x55f   :  { %3997 = vmatprep.subr.mxu0 %v2468_v0  ;;  %3925 = vmatpush1.msra.mxu1 %v3241_v24  ;;  %v3153_v0 = vld [vmem:[#allocation16 + $0x18d0] sm:$0xff]  ;;  %v2379_v24 = vld [vmem:[#allocation16 + $0xa0] sm:$0xff] }
 0x560   :  { %3998 = vmatpush1.msra.mxu0 %v2467_v58  ;;  %3926 = vmatprep.subr.mxu1 %v3234_v37  ;;  %v3146_v58 = vld [vmem:[#allocation16 + $0x1898] sm:$0xff]  ;;  %v2372_v37 = vld [vmem:[#allocation16 + $0x68] sm:$0xff] }
 0x561   :  { %3999 = vmatprep.subr.mxu0 %v2460_v38  ;;  %3927 = vmatpush1.msra.mxu1 %v3233_v29  ;;  %v3145_v38 = vld [vmem:[#allocation16 + $0x1890] sm:$0xff]  ;;  %v2371_v29 = vld [vmem:[#allocation16 + $0x60] sm:$0xff] }
 0x562   :  { %4000 = vmatpush1.msra.mxu0 %v2459_v40  ;;  %3928 = vmatprep.subr.mxu1 %v3226_v41  ;;  %v3138_v40 = vld [vmem:[#allocation16 + $0x1858] sm:$0xff]  ;;  %v2364_v41 = vld [vmem:[#allocation16 + $0x28] sm:$0xff] }
 0x563   :  { %4001 = vmatprep.subr.mxu0 %v2452_v42  ;;  %3929 = vmatpush1.msra.mxu1 %v3225_v44  ;;  %v3137_v42 = vld [vmem:[#allocation16 + $0x1850] sm:$0xff]  ;;  %v2363_v44 = vld [vmem:[#allocation16 + $0x20] sm:$0xff] }
 0x564   :  { %4002 = vmatpush1.msra.mxu0 %v2451_v45  ;;  %3930 = vmatprep.subr.mxu1 %v3218_v46  ;;  %v3130_v45 = vld [vmem:[#allocation16 + $0x1818] sm:$0xff]  ;;  %v2612_v46 = vld [vmem:[#allocation16 + $0x7e8] sm:$0xff] }
 0x565   :  { %4003 = vmatprep.subr.mxu0 %v2444_v47  ;;  %3931 = vmatpush1.msra.mxu1 %v3217_v48  ;;  %v3129_v47 = vld [vmem:[#allocation16 + $0x1810] sm:$0xff]  ;;  %v2611_v48 = vld [vmem:[#allocation16 + $0x7e0] sm:$0xff] }
 0x566   :  { %4004 = vmatpush1.msra.mxu0 %v2443_v51  ;;  %3932 = vmatprep.subr.mxu1 %v3210_v52  ;;  %v3378_v51 = vld [vmem:[#allocation16 + $0x1fd8] sm:$0xff]  ;;  %v2604_v52 = vld [vmem:[#allocation16 + $0x7a8] sm:$0xff] }
 0x567   :  { %4005 = vmatprep.subr.mxu0 %v2436_v53  ;;  %3933 = vmatpush1.msra.mxu1 %v3209_v54  ;;  %v3377_v53 = vld [vmem:[#allocation16 + $0x1fd0] sm:$0xff]  ;;  %v2603_v54 = vld [vmem:[#allocation16 + $0x7a0] sm:$0xff] }
 0x568   :  { %4006 = vmatpush1.msra.mxu0 %v2435_v55  ;;  %3934 = vmatprep.subr.mxu1 %v3202_v56  ;;  %v3370_v55 = vld [vmem:[#allocation16 + $0x1f98] sm:$0xff]  ;;  %v2596_v56 = vld [vmem:[#allocation16 + $0x768] sm:$0xff] }
 0x569   :  { %4007 = vmatprep.subr.mxu0 %v2428_v57  ;;  %3935 = vmatpush1.msra.mxu1 %v3201_v62  ;;  %v3369_v57 = vld [vmem:[#allocation16 + $0x1f90] sm:$0xff]  ;;  %v2595_v62 = vld [vmem:[#allocation16 + $0x760] sm:$0xff] }
 0x56a   :  { %4008 = vmatpush1.msra.mxu0 %v2427_v35  ;;  %3936 = vmatprep.subr.mxu1 %v3194_v2  ;;  %v3362_v35 = vld [vmem:[#allocation16 + $0x1f58] sm:$0xff]  ;;  %v2588_v2 = vld [vmem:[#allocation16 + $0x728] sm:$0xff] }
 0x56b   :  { %4009 = vmatprep.subr.mxu0 %v2420_v3  ;;  %3937 = vmatpush1.msra.mxu1 %v3193_v8  ;;  %v3361_v3 = vld [vmem:[#allocation16 + $0x1f50] sm:$0xff]  ;;  %v2587_v8 = vld [vmem:[#allocation16 + $0x720] sm:$0xff] }
 0x56c   :  { %4010 = vmatpush1.msra.mxu0 %v2419_v11  ;;  %3938 = vmatprep.subr.mxu1 %v3186_v12  ;;  %v3354_v11 = vld [vmem:[#allocation16 + $0x1f18] sm:$0xff]  ;;  %v2580_v12 = vld [vmem:[#allocation16 + $0x6e8] sm:$0xff] }
 0x56d   :  { %4011 = vmatprep.subr.mxu0 %v2412_v15  ;;  %3939 = vmatpush1.msra.mxu1 %v3185_v16  ;;  %v3353_v15 = vld [vmem:[#allocation16 + $0x1f10] sm:$0xff]  ;;  %v2579_v16 = vld [vmem:[#allocation16 + $0x6e0] sm:$0xff] }
 0x56e   :  { %4012 = vmatpush1.msra.mxu0 %v2411_v17  ;;  %3940 = vmatprep.subr.mxu1 %v3178_v18  ;;  %v3346_v17 = vld [vmem:[#allocation16 + $0x1ed8] sm:$0xff]  ;;  %v2572_v18 = vld [vmem:[#allocation16 + $0x6a8] sm:$0xff] }
 0x56f   :  { %4013 = vmatprep.subr.mxu0 %v2404_v19  ;;  %3941 = vmatpush1.msra.mxu1 %v3177_v61  ;;  %v3345_v19 = vld [vmem:[#allocation16 + $0x1ed0] sm:$0xff]  ;;  %v2571_v61 = vld [vmem:[#allocation16 + $0x6a0] sm:$0xff] }
 0x570   :  { %4014 = vmatpush1.msra.mxu0 %v2403_v20  ;;  %3942 = vmatprep.subr.mxu1 %v3170_v21  ;;  %v3338_v20 = vld [vmem:[#allocation16 + $0x1e98] sm:$0xff]  ;;  %v2564_v21 = vld [vmem:[#allocation16 + $0x668] sm:$0xff] }
 0x571   :  { %4015 = vmatprep.subr.mxu0 %v2396_v23  ;;  %3943 = vmatpush1.msra.mxu1 %v3169_v26  ;;  %v3337_v23 = vld [vmem:[#allocation16 + $0x1e90] sm:$0xff]  ;;  %v2563_v26 = vld [vmem:[#allocation16 + $0x660] sm:$0xff] }
 0x572   :  { %4016 = vmatpush1.msra.mxu0 %v2395_v60  ;;  %3944 = vmatprep.subr.mxu1 %v3162_v28  ;;  %v3330_v60 = vld [vmem:[#allocation16 + $0x1e58] sm:$0xff]  ;;  %v2556_v28 = vld [vmem:[#allocation16 + $0x628] sm:$0xff] }
 0x573   :  { %4017 = vmatprep.subr.mxu0 %v2388_v50  ;;  %3945 = vmatpush1.msra.mxu1 %v3161_v30  ;;  %v3329_v50 = vld [vmem:[#allocation16 + $0x1e50] sm:$0xff]  ;;  %v2555_v30 = vld [vmem:[#allocation16 + $0x620] sm:$0xff] }
 0x574   :  { %4018 = vmatpush1.msra.mxu0 %v2387_v13  ;;  %3946 = vmatprep.subr.mxu1 %v3154_v39  ;;  %v3322_v13 = vld [vmem:[#allocation16 + $0x1e18] sm:$0xff]  ;;  %v2548_v39 = vld [vmem:[#allocation16 + $0x5e8] sm:$0xff] }
 0x575   :  { %4019 = vmatprep.subr.mxu0 %v2380_v33  ;;  %3947 = vmatpush1.msra.mxu1 %v3153_v0  ;;  %v3321_v33 = vld [vmem:[#allocation16 + $0x1e10] sm:$0xff]  ;;  %v2547_v0 = vld [vmem:[#allocation16 + $0x5e0] sm:$0xff] }
 0x576   :  { %4020 = vmatpush1.msra.mxu0 %v2379_v24  ;;  %3948 = vmatprep.subr.mxu1 %v3146_v58  ;;  %v3314_v24 = vld [vmem:[#allocation16 + $0x1dd8] sm:$0xff]  ;;  %v2540_v58 = vld [vmem:[#allocation16 + $0x5a8] sm:$0xff] }
 0x577   :  { %4021 = vmatprep.subr.mxu0 %v2372_v37  ;;  %3949 = vmatpush1.msra.mxu1 %v3145_v38  ;;  %v3313_v37 = vld [vmem:[#allocation16 + $0x1dd0] sm:$0xff]  ;;  %v2539_v38 = vld [vmem:[#allocation16 + $0x5a0] sm:$0xff] }
 0x578   :  { %4022 = vmatpush1.msra.mxu0 %v2371_v29  ;;  %3950 = vmatprep.subr.mxu1 %v3138_v40  ;;  %v3306_v29 = vld [vmem:[#allocation16 + $0x1d98] sm:$0xff]  ;;  %v2532_v40 = vld [vmem:[#allocation16 + $0x568] sm:$0xff] }
 0x579   :  { %4023 = vmatprep.subr.mxu0 %v2364_v41  ;;  %3951 = vmatpush1.msra.mxu1 %v3137_v42  ;;  %v3305_v41 = vld [vmem:[#allocation16 + $0x1d90] sm:$0xff]  ;;  %v2531_v42 = vld [vmem:[#allocation16 + $0x560] sm:$0xff] }
 0x57a   :  { %4024 = vmatpush1.msra.mxu0 %v2363_v44  ;;  %3952 = vmatprep.subr.mxu1 %v3130_v45  ;;  %v3298_v44 = vld [vmem:[#allocation16 + $0x1d58] sm:$0xff]  ;;  %v2524_v45 = vld [vmem:[#allocation16 + $0x528] sm:$0xff] }
 0x57b   :  { %4025 = vmatprep.subr.mxu0 %v2612_v46  ;;  %3953 = vmatpush1.msra.mxu1 %v3129_v47  ;;  %v3297_v46 = vld [vmem:[#allocation16 + $0x1d50] sm:$0xff]  ;;  %v2523_v47 = vld [vmem:[#allocation16 + $0x520] sm:$0xff] }
 0x57c   :  { %4026 = vmatpush2.msra.mxu0 %v2611_v48  ;;  %3954 = vmatprep.subr.mxu1 %v3378_v51  ;;  %v3290_v48 = vld [vmem:[#allocation16 + $0x1d18] sm:$0xff]  ;;  %v2516_v51 = vld [vmem:[#allocation16 + $0x4e8] sm:$0xff] }
 0x57d   :  { %4027 = vmatprep.subr.mxu0 %v2604_v52  ;;  %3955 = vmatpush2.msra.mxu1 %v3377_v53  ;;  %v3289_v52 = vld [vmem:[#allocation16 + $0x1d10] sm:$0xff]  ;;  %v2515_v53 = vld [vmem:[#allocation16 + $0x4e0] sm:$0xff] }
 0x57e   :  { %4028 = vmatpush2.msra.mxu0 %v2603_v54  ;;  %3956 = vmatprep.subr.mxu1 %v3370_v55  ;;  %v3282_v54 = vld [vmem:[#allocation16 + $0x1cd8] sm:$0xff]  ;;  %v2508_v55 = vld [vmem:[#allocation16 + $0x4a8] sm:$0xff] }
 0x57f   :  { %4029 = vmatprep.subr.mxu0 %v2596_v56  ;;  %3957 = vmatpush2.msra.mxu1 %v3369_v57  ;;  %v3281_v56 = vld [vmem:[#allocation16 + $0x1cd0] sm:$0xff]  ;;  %v2507_v57 = vld [vmem:[#allocation16 + $0x4a0] sm:$0xff] }
 0x580   :  { %4030 = vmatpush2.msra.mxu0 %v2595_v62  ;;  %3958 = vmatprep.subr.mxu1 %v3362_v35  ;;  %v3274_v62 = vld [vmem:[#allocation16 + $0x1c98] sm:$0xff]  ;;  %v2500_v35 = vld [vmem:[#allocation16 + $0x468] sm:$0xff] }
 0x581   :  { %4031 = vmatprep.subr.mxu0 %v2588_v2  ;;  %3959 = vmatpush2.msra.mxu1 %v3361_v3  ;;  %v3273_v2 = vld [vmem:[#allocation16 + $0x1c90] sm:$0xff]  ;;  %v7881_v3 = vpop.f32.mrf.mxu0 }
 0x582   :  { %4032 = vmatpush2.msra.mxu0 %v2587_v8  ;;  %3960 = vmatprep.subr.mxu1 %v3354_v11  ;;  %v2499_v8 = vld [vmem:[#allocation16 + $0x460] sm:$0xff]  ;;  %v3266_v11 = vld [vmem:[#allocation16 + $0x1c58] sm:$0xff] }
 0x583   :  { %4033 = vmatprep.subr.mxu0 %v2580_v12  ;;  %3961 = vmatpush2.msra.mxu1 %v3353_v15  ;;  %v2492_v12 = vld [vmem:[#allocation16 + $0x428] sm:$0xff]  ;;  %v3265_v15 = vld [vmem:[#allocation16 + $0x1c50] sm:$0xff] }
 0x584   :  { %4034 = vmatpush2.msra.mxu0 %v2579_v16  ;;  %3962 = vmatprep.subr.mxu1 %v3346_v17  ;;  %v2491_v16 = vld [vmem:[#allocation16 + $0x420] sm:$0xff]  ;;  %v3258_v17 = vld [vmem:[#allocation16 + $0x1c18] sm:$0xff] }
 0x585   :  { %4035 = vmatprep.subr.mxu0 %v2572_v18  ;;  %3963 = vmatpush2.msra.mxu1 %v3345_v19  ;;  %v2996_v19 = vld [vmem:[#allocation16 + $0x13e8] sm:$0xff] }
 0x586   :  { %4036 = vmatpush2.msra.mxu0 %v2571_v61  ;;  %3964 = vmatprep.subr.mxu1 %v3338_v20  ;;  %v3257_v20 = vld [vmem:[#allocation16 + $0x1c10] sm:$0xff] }
 0x587   :  { %4037 = vmatprep.subr.mxu0 %v2564_v21  ;;  %3965 = vmatpush2.msra.mxu1 %v3337_v23  ;;  %v2995_v21 = vld [vmem:[#allocation16 + $0x13e0] sm:$0xff]  ;;  %v2740_v23 = vld [vmem:[#allocation16 + $0xbe8] sm:$0xff] }
 0x588   :  { %4038 = vmatpush2.msra.mxu0 %v2563_v26  ;;  %3966 = vmatprep.subr.mxu1 %v3330_v60  ;;  %v2988_v26 = vld [vmem:[#allocation16 + $0x13a8] sm:$0xff]  ;;  %v2739_v60 = vld [vmem:[#allocation16 + $0xbe0] sm:$0xff] }
 0x589   :  { %4039 = vmatprep.subr.mxu0 %v2556_v28  ;;  %3967 = vmatpush2.msra.mxu1 %v3329_v50  ;;  %v2732_v28 = vld [vmem:[#allocation16 + $0xba8] sm:$0xff] }
 0x58a   :  { %4040 = vmatpush2.msra.mxu0 %v2555_v30  ;;  %3968 = vmatprep.subr.mxu1 %v3322_v13  ;;  %v2980_v50 = vld [vmem:[#allocation16 + $0x1368] sm:$0xff]  ;;  %v2731_v30 = vld [vmem:[#allocation16 + $0xba0] sm:$0xff] }
 0x58b   :  { %4041 = vmatprep.subr.mxu0 %v2548_v39  ;;  %3969 = vmatpush2.msra.mxu1 %v3321_v33  ;;  %v2979_v13 = vld [vmem:[#allocation16 + $0x1360] sm:$0xff]  ;;  %v2724_v39 = vld [vmem:[#allocation16 + $0xb68] sm:$0xff] }
 0x58c   :  { %4042 = vmatpush2.msra.mxu0 %v2547_v0  ;;  %3970 = vmatprep.subr.mxu1 %v3314_v24  ;;  %v2972_v33 = vld [vmem:[#allocation16 + $0x1328] sm:$0xff]  ;;  %v2723_v0 = vld [vmem:[#allocation16 + $0xb60] sm:$0xff] }
 0x58d   :  { %4043 = vmatprep.subr.mxu0 %v2540_v58  ;;  %3971 = vmatpush2.msra.mxu1 %v3313_v37  ;;  %v2971_v24 = vld [vmem:[#allocation16 + $0x1320] sm:$0xff]  ;;  %v2716_v58 = vld [vmem:[#allocation16 + $0xb28] sm:$0xff] }
 0x58e   :  { %4044 = vmatpush2.msra.mxu0 %v2539_v38  ;;  %3972 = vmatprep.subr.mxu1 %v3306_v29  ;;  %v2964_v37 = vld [vmem:[#allocation16 + $0x12e8] sm:$0xff]  ;;  %v2715_v38 = vld [vmem:[#allocation16 + $0xb20] sm:$0xff] }
 0x58f   :  { %4045 = vmatprep.subr.mxu0 %v2532_v40  ;;  %3973 = vmatpush2.msra.mxu1 %v3305_v41  ;;  %v2963_v29 = vld [vmem:[#allocation16 + $0x12e0] sm:$0xff]  ;;  %v2708_v40 = vld [vmem:[#allocation16 + $0xae8] sm:$0xff] }
 0x590   :  { %4046 = vmatpush2.msra.mxu0 %v2531_v42  ;;  %3974 = vmatprep.subr.mxu1 %v3298_v44  ;;  %v2956_v41 = vld [vmem:[#allocation16 + $0x12a8] sm:$0xff]  ;;  %v2707_v42 = vld [vmem:[#allocation16 + $0xae0] sm:$0xff] }
 0x591   :  { %4047 = vmatprep.subr.mxu0 %v2524_v45  ;;  %3975 = vmatpush2.msra.mxu1 %v3297_v46  ;;  %v2955_v44 = vld [vmem:[#allocation16 + $0x12a0] sm:$0xff]  ;;  %v2700_v45 = vld [vmem:[#allocation16 + $0xaa8] sm:$0xff] }
 0x592   :  { %4048 = vmatpush2.msra.mxu0 %v2523_v47  ;;  %3976 = vmatprep.subr.mxu1 %v3290_v48  ;;  %v2948_v46 = vld [vmem:[#allocation16 + $0x1268] sm:$0xff]  ;;  %v2699_v47 = vld [vmem:[#allocation16 + $0xaa0] sm:$0xff] }
 0x593   :  { %4049 = vmatprep.subr.mxu0 %v2516_v51  ;;  %3977 = vmatpush2.msra.mxu1 %v3289_v52  ;;  %v2947_v48 = vld [vmem:[#allocation16 + $0x1260] sm:$0xff]  ;;  %v2692_v51 = vld [vmem:[#allocation16 + $0xa68] sm:$0xff] }
 0x594   :  { %4050 = vmatpush2.msra.mxu0 %v2515_v53  ;;  %3978 = vmatprep.subr.mxu1 %v3282_v54  ;;  %v2940_v52 = vld [vmem:[#allocation16 + $0x1228] sm:$0xff]  ;;  %v2691_v53 = vld [vmem:[#allocation16 + $0xa60] sm:$0xff] }
 0x595   :  { %4051 = vmatprep.subr.mxu0 %v2508_v55  ;;  %3979 = vmatpush2.msra.mxu1 %v3281_v56  ;;  %v2939_v54 = vld [vmem:[#allocation16 + $0x1220] sm:$0xff]  ;;  %v2684_v55 = vld [vmem:[#allocation16 + $0xa28] sm:$0xff] }
 0x596   :  { %4052 = vmatpush2.msra.mxu0 %v2507_v57  ;;  %3980 = vmatprep.subr.mxu1 %v3274_v62  ;;  %v2932_v56 = vld [vmem:[#allocation16 + $0x11e8] sm:$0xff]  ;;  %v2683_v57 = vld [vmem:[#allocation16 + $0xa20] sm:$0xff] }
 0x597   :  { %4053 = vmatprep.subr.mxu0 %v2500_v35  ;;  %3981 = vmatpush2.msra.mxu1 %v3273_v2  ;;  %v3633_v18 = vpop.f32.mrf.mxu0  ;;  %v2931_v62 = vld [vmem:[#allocation16 + $0x11e0] sm:$0xff]  ;;  %v2676_v35 = vld [vmem:[#allocation16 + $0x9e8] sm:$0xff] }
 0x598   :  { %4054 = vmatpush2.msra.mxu0 %v2499_v8  ;;  %3982 = vmatprep.subr.mxu1 %v3266_v11  ;;  %v7884_v61 = vadd.f32 %v3633_v18, %v7875_v14  ;;  %v2987_v14 = vld [vmem:[#allocation16 + $0x13a0] sm:$0xff]  ;;  %v2924_v2 = vld [vmem:[#allocation16 + $0x11a8] sm:$0xff] }
 0x599   :  { %4055 = vmatprep.subr.mxu0 %v2492_v12  ;;  %3983 = vmatpush2.msra.mxu1 %v3265_v15  ;;  %v2675_v8 = vld [vmem:[#allocation16 + $0x9e0] sm:$0xff]  ;;  %v2668_v12 = vld [vmem:[#allocation16 + $0x9a8] sm:$0xff] }
 0x59a   :  { %4056 = vmatpush2.msra.mxu0 %v2491_v16  ;;  %3984 = vmatprep.subr.mxu1 %v3258_v17  ;;  %v2923_v11 = vld [vmem:[#allocation16 + $0x11a0] sm:$0xff]  ;;  %v2916_v15 = vld [vmem:[#allocation16 + $0x1168] sm:$0xff] }
 0x59b   :  { %4058 = vmatmul.mubr.f32.vlgmr.msra.gmra.mxu0 %v7821_v49  ;;  %4135 = vmatprep.subr.mxu0 %v2996_v19  ;;  %v2667_v16 = vld [vmem:[#allocation16 + $0x9a0] sm:$0xff]  ;;  %v2660_v18 = vld [vmem:[#allocation16 + $0x968] sm:$0xff] }
 0x59c   :  { %3985 = vmatpush2.msra.mxu1 %v3257_v20  ;;  %4136 = vmatpush1.msra.mxu0 %v2995_v21  ;;  %v2915_v17 = vld [vmem:[#allocation16 + $0x1160] sm:$0xff]  ;;  %v2908_v19 = vld [vmem:[#allocation16 + $0x1128] sm:$0xff] }
 0x59d   :  { %4199 = vmatprep.mubr.f32.mxu0 %v7836_v31  ;;  %3987 = vmatmul.mubr.f32.vlgmr.msra.gmra.mxu1 %v7869_v36  ;;  %v2659_v20 = vld [vmem:[#allocation16 + $0x960] sm:$0xff] }
 0x59e   :  { %4064 = vmatprep.subr.mxu1 %v2740_v23  ;;  %4137 = vmatprep.subr.mxu0 %v2988_v26  ;;  %v2907_v21 = vld [vmem:[#allocation16 + $0x1120] sm:$0xff]  ;;  %v2652_v23 = vld [vmem:[#allocation16 + $0x928] sm:$0xff] }
 0x59f   :  { %4065 = vmatpush1.msra.mxu1 %v2739_v60  ;;  %4128 = vmatprep.mubr.f32.mxu1 %v7818_v27  ;;  %v2900_v26 = vld [vmem:[#allocation16 + $0x10e8] sm:$0xff]  ;;  %v2651_v60 = vld [vmem:[#allocation16 + $0x920] sm:$0xff] }
 0x5a0   :  { %4138 = vmatpush1.msra.mxu0 %v2987_v14  ;;  %4066 = vmatprep.subr.mxu1 %v2732_v28  ;;  %v2899_v14 = vld [vmem:[#allocation16 + $0x10e0] sm:$0xff]  ;;  %v2644_v28 = vld [vmem:[#allocation16 + $0x8e8] sm:$0xff] }
 0x5a1   :  { %4139 = vmatprep.subr.mxu0 %v2980_v50  ;;  %4067 = vmatpush1.msra.mxu1 %v2731_v30  ;;  %v2892_v50 = vld [vmem:[#allocation16 + $0x10a8] sm:$0xff]  ;;  %v2643_v30 = vld [vmem:[#allocation16 + $0x8e0] sm:$0xff] }
 0x5a2   :  { %4140 = vmatpush1.msra.mxu0 %v2979_v13  ;;  %4068 = vmatprep.subr.mxu1 %v2724_v39  ;;  %v2891_v13 = vld [vmem:[#allocation16 + $0x10a0] sm:$0xff]  ;;  %v2636_v39 = vld [vmem:[#allocation16 + $0x8a8] sm:$0xff] }
 0x5a3   :  { %4141 = vmatprep.subr.mxu0 %v2972_v33  ;;  %4069 = vmatpush1.msra.mxu1 %v2723_v0  ;;  %v2884_v33 = vld [vmem:[#allocation16 + $0x1068] sm:$0xff]  ;;  %v2635_v0 = vld [vmem:[#allocation16 + $0x8a0] sm:$0xff] }
 0x5a4   :  { %4142 = vmatpush1.msra.mxu0 %v2971_v24  ;;  %4070 = vmatprep.subr.mxu1 %v2716_v58  ;;  %v2883_v24 = vld [vmem:[#allocation16 + $0x1060] sm:$0xff]  ;;  %v2628_v58 = vld [vmem:[#allocation16 + $0x868] sm:$0xff] }
 0x5a5   :  { %4143 = vmatprep.subr.mxu0 %v2964_v37  ;;  %4071 = vmatpush1.msra.mxu1 %v2715_v38  ;;  %v2876_v37 = vld [vmem:[#allocation16 + $0x1028] sm:$0xff]  ;;  %v2627_v38 = vld [vmem:[#allocation16 + $0x860] sm:$0xff] }
 0x5a6   :  { %4144 = vmatpush1.msra.mxu0 %v2963_v29  ;;  %4072 = vmatprep.subr.mxu1 %v2708_v40  ;;  %v2875_v29 = vld [vmem:[#allocation16 + $0x1020] sm:$0xff]  ;;  %v2620_v40 = vld [vmem:[#allocation16 + $0x828] sm:$0xff] }
 0x5a7   :  { %4145 = vmatprep.subr.mxu0 %v2956_v41  ;;  %4073 = vmatpush1.msra.mxu1 %v2707_v42  ;;  %v3124_v41 = vld [vmem:[#allocation16 + $0x17e8] sm:$0xff]  ;;  %v2619_v42 = vld [vmem:[#allocation16 + $0x820] sm:$0xff] }
 0x5a8   :  { %4146 = vmatpush1.msra.mxu0 %v2955_v44  ;;  %4074 = vmatprep.subr.mxu1 %v2700_v45  ;;  %v3123_v44 = vld [vmem:[#allocation16 + $0x17e0] sm:$0xff]  ;;  %v2868_v45 = vld [vmem:[#allocation16 + $0xfe8] sm:$0xff] }
 0x5a9   :  { %4147 = vmatprep.subr.mxu0 %v2948_v46  ;;  %4075 = vmatpush1.msra.mxu1 %v2699_v47  ;;  %v3116_v46 = vld [vmem:[#allocation16 + $0x17a8] sm:$0xff]  ;;  %v2867_v47 = vld [vmem:[#allocation16 + $0xfe0] sm:$0xff] }
 0x5aa   :  { %4148 = vmatpush1.msra.mxu0 %v2947_v48  ;;  %4076 = vmatprep.subr.mxu1 %v2692_v51  ;;  %v3115_v48 = vld [vmem:[#allocation16 + $0x17a0] sm:$0xff]  ;;  %v2860_v51 = vld [vmem:[#allocation16 + $0xfa8] sm:$0xff] }
 0x5ab   :  { %4149 = vmatprep.subr.mxu0 %v2940_v52  ;;  %4077 = vmatpush1.msra.mxu1 %v2691_v53  ;;  %v3108_v52 = vld [vmem:[#allocation16 + $0x1768] sm:$0xff]  ;;  %v2859_v53 = vld [vmem:[#allocation16 + $0xfa0] sm:$0xff] }
 0x5ac   :  { %4150 = vmatpush1.msra.mxu0 %v2939_v54  ;;  %4078 = vmatprep.subr.mxu1 %v2684_v55  ;;  %v3107_v54 = vld [vmem:[#allocation16 + $0x1760] sm:$0xff]  ;;  %v2852_v55 = vld [vmem:[#allocation16 + $0xf68] sm:$0xff] }
 0x5ad   :  { %4151 = vmatprep.subr.mxu0 %v2932_v56  ;;  %4079 = vmatpush1.msra.mxu1 %v2683_v57  ;;  %v3100_v56 = vld [vmem:[#allocation16 + $0x1728] sm:$0xff]  ;;  %v2851_v57 = vld [vmem:[#allocation16 + $0xf60] sm:$0xff] }
 0x5ae   :  { %4152 = vmatpush1.msra.mxu0 %v2931_v62  ;;  %4080 = vmatprep.subr.mxu1 %v2676_v35  ;;  %v3099_v62 = vld [vmem:[#allocation16 + $0x1720] sm:$0xff]  ;;  %v2844_v35 = vld [vmem:[#allocation16 + $0xf28] sm:$0xff] }
 0x5af   :  { %4153 = vmatprep.subr.mxu0 %v2924_v2  ;;  %4081 = vmatpush1.msra.mxu1 %v2675_v8  ;;  %v3092_v2 = vld [vmem:[#allocation16 + $0x16e8] sm:$0xff]  ;;  %v2843_v8 = vld [vmem:[#allocation16 + $0xf20] sm:$0xff] }
 0x5b0   :  { %4154 = vmatpush1.msra.mxu0 %v2923_v11  ;;  %4082 = vmatprep.subr.mxu1 %v2668_v12  ;;  %v3091_v11 = vld [vmem:[#allocation16 + $0x16e0] sm:$0xff]  ;;  %v2836_v12 = vld [vmem:[#allocation16 + $0xee8] sm:$0xff] }
 0x5b1   :  { %4155 = vmatprep.subr.mxu0 %v2916_v15  ;;  %4083 = vmatpush1.msra.mxu1 %v2667_v16  ;;  %v3084_v15 = vld [vmem:[#allocation16 + $0x16a8] sm:$0xff]  ;;  %v2835_v16 = vld [vmem:[#allocation16 + $0xee0] sm:$0xff] }
 0x5b2   :  { %4156 = vmatpush1.msra.mxu0 %v2915_v17  ;;  %4084 = vmatprep.subr.mxu1 %v2660_v18  ;;  %v3083_v17 = vld [vmem:[#allocation16 + $0x16a0] sm:$0xff]  ;;  %v2828_v18 = vld [vmem:[#allocation16 + $0xea8] sm:$0xff] }
 0x5b3   :  { %4157 = vmatprep.subr.mxu0 %v2908_v19  ;;  %4085 = vmatpush1.msra.mxu1 %v2659_v20  ;;  %v3076_v19 = vld [vmem:[#allocation16 + $0x1668] sm:$0xff]  ;;  %v2827_v20 = vld [vmem:[#allocation16 + $0xea0] sm:$0xff] }
 0x5b4   :  { %4158 = vmatpush1.msra.mxu0 %v2907_v21  ;;  %4086 = vmatprep.subr.mxu1 %v2652_v23  ;;  %v3075_v21 = vld [vmem:[#allocation16 + $0x1660] sm:$0xff]  ;;  %v2820_v23 = vld [vmem:[#allocation16 + $0xe68] sm:$0xff] }
 0x5b5   :  { %4159 = vmatprep.subr.mxu0 %v2900_v26  ;;  %4087 = vmatpush1.msra.mxu1 %v2651_v60  ;;  %v3068_v26 = vld [vmem:[#allocation16 + $0x1628] sm:$0xff]  ;;  %v2819_v60 = vld [vmem:[#allocation16 + $0xe60] sm:$0xff] }
 0x5b6   :  { %4160 = vmatpush1.msra.mxu0 %v2899_v14  ;;  %4088 = vmatprep.subr.mxu1 %v2644_v28  ;;  %v3067_v14 = vld [vmem:[#allocation16 + $0x1620] sm:$0xff]  ;;  %v2812_v28 = vld [vmem:[#allocation16 + $0xe28] sm:$0xff] }
 0x5b7   :  { %4161 = vmatprep.subr.mxu0 %v2892_v50  ;;  %4089 = vmatpush1.msra.mxu1 %v2643_v30  ;;  %v3060_v50 = vld [vmem:[#allocation16 + $0x15e8] sm:$0xff]  ;;  %v2811_v30 = vld [vmem:[#allocation16 + $0xe20] sm:$0xff] }
 0x5b8   :  { %4162 = vmatpush1.msra.mxu0 %v2891_v13  ;;  %4090 = vmatprep.subr.mxu1 %v2636_v39  ;;  %v3059_v13 = vld [vmem:[#allocation16 + $0x15e0] sm:$0xff]  ;;  %v2804_v39 = vld [vmem:[#allocation16 + $0xde8] sm:$0xff] }
 0x5b9   :  { %4163 = vmatprep.subr.mxu0 %v2884_v33  ;;  %4091 = vmatpush1.msra.mxu1 %v2635_v0  ;;  %v3052_v33 = vld [vmem:[#allocation16 + $0x15a8] sm:$0xff]  ;;  %v2803_v0 = vld [vmem:[#allocation16 + $0xde0] sm:$0xff] }
 0x5ba   :  { %4164 = vmatpush1.msra.mxu0 %v2883_v24  ;;  %4092 = vmatprep.subr.mxu1 %v2628_v58  ;;  %v3051_v24 = vld [vmem:[#allocation16 + $0x15a0] sm:$0xff]  ;;  %v2796_v58 = vld [vmem:[#allocation16 + $0xda8] sm:$0xff] }
 0x5bb   :  { %4165 = vmatprep.subr.mxu0 %v2876_v37  ;;  %4093 = vmatpush1.msra.mxu1 %v2627_v38  ;;  %v3044_v37 = vld [vmem:[#allocation16 + $0x1568] sm:$0xff]  ;;  %v2795_v38 = vld [vmem:[#allocation16 + $0xda0] sm:$0xff] }
 0x5bc   :  { %4166 = vmatpush1.msra.mxu0 %v2875_v29  ;;  %4094 = vmatprep.subr.mxu1 %v2620_v40  ;;  %v3043_v29 = vld [vmem:[#allocation16 + $0x1560] sm:$0xff]  ;;  %v2788_v40 = vld [vmem:[#allocation16 + $0xd68] sm:$0xff] }
 0x5bd   :  { %4167 = vmatprep.subr.mxu0 %v3124_v41  ;;  %4095 = vmatpush1.msra.mxu1 %v2619_v42  ;;  %v3036_v41 = vld [vmem:[#allocation16 + $0x1528] sm:$0xff]  ;;  %v2787_v42 = vld [vmem:[#allocation16 + $0xd60] sm:$0xff] }
 0x5be   :  { %4168 = vmatpush2.msra.mxu0 %v3123_v44  ;;  %4096 = vmatprep.subr.mxu1 %v2868_v45  ;;  %v3035_v44 = vld [vmem:[#allocation16 + $0x1520] sm:$0xff]  ;;  %v2780_v45 = vld [vmem:[#allocation16 + $0xd28] sm:$0xff] }
 0x5bf   :  { %4169 = vmatprep.subr.mxu0 %v3116_v46  ;;  %4097 = vmatpush2.msra.mxu1 %v2867_v47  ;;  %v3028_v46 = vld [vmem:[#allocation16 + $0x14e8] sm:$0xff]  ;;  %v2779_v47 = vld [vmem:[#allocation16 + $0xd20] sm:$0xff] }
 0x5c0   :  { %4170 = vmatpush2.msra.mxu0 %v3115_v48  ;;  %4098 = vmatprep.subr.mxu1 %v2860_v51  ;;  %v3027_v48 = vld [vmem:[#allocation16 + $0x14e0] sm:$0xff]  ;;  %v2772_v51 = vld [vmem:[#allocation16 + $0xce8] sm:$0xff] }
 0x5c1   :  { %4171 = vmatprep.subr.mxu0 %v3108_v52  ;;  %4099 = vmatpush2.msra.mxu1 %v2859_v53  ;;  %v3020_v52 = vld [vmem:[#allocation16 + $0x14a8] sm:$0xff]  ;;  %v2771_v53 = vld [vmem:[#allocation16 + $0xce0] sm:$0xff] }
 0x5c2   :  { %4172 = vmatpush2.msra.mxu0 %v3107_v54  ;;  %4100 = vmatprep.subr.mxu1 %v2852_v55  ;;  %v3019_v54 = vld [vmem:[#allocation16 + $0x14a0] sm:$0xff]  ;;  %v2764_v55 = vld [vmem:[#allocation16 + $0xca8] sm:$0xff] }
 0x5c3   :  { %4173 = vmatprep.subr.mxu0 %v3100_v56  ;;  %4101 = vmatpush2.msra.mxu1 %v2851_v57  ;;  %v3012_v56 = vld [vmem:[#allocation16 + $0x1468] sm:$0xff]  ;;  %v2763_v57 = vld [vmem:[#allocation16 + $0xca0] sm:$0xff] }
 0x5c4   :  { %4174 = vmatpush2.msra.mxu0 %v3099_v62  ;;  %4102 = vmatprep.subr.mxu1 %v2844_v35  ;;  %v3011_v62 = vld [vmem:[#allocation16 + $0x1460] sm:$0xff]  ;;  %v2756_v35 = vld [vmem:[#allocation16 + $0xc68] sm:$0xff] }
 0x5c5   :  { %4175 = vmatprep.subr.mxu0 %v3092_v2  ;;  %4103 = vmatpush2.msra.mxu1 %v2843_v8  ;;  %v3004_v2 = vld [vmem:[#allocation16 + $0x1428] sm:$0xff]  ;;  %v2755_v8 = vld [vmem:[#allocation16 + $0xc60] sm:$0xff] }
 0x5c6   :  { %4176 = vmatpush2.msra.mxu0 %v3091_v11  ;;  %4104 = vmatprep.subr.mxu1 %v2836_v12  ;;  %v7890_v11 = vpop.f32.mrf.mxu1  ;;  %v3003_v12 = vld [vmem:[#allocation16 + $0x1420] sm:$0xff] }
 0x5c7   :  { %4177 = vmatprep.subr.mxu0 %v3084_v15  ;;  %4105 = vmatpush2.msra.mxu1 %v2835_v16  ;;  %v2748_v15 = vld [vmem:[#allocation16 + $0xc28] sm:$0xff]  ;;  %v2486_v16 = vld [vmem:[#allocation16 + $0x3f8] sm:$0xff] }
 0x5c8   :  { %4178 = vmatpush2.msra.mxu0 %v3083_v17  ;;  %4106 = vmatprep.subr.mxu1 %v2828_v18  ;;  %v2747_v17 = vld [vmem:[#allocation16 + $0xc20] sm:$0xff]  ;;  %v2485_v18 = vld [vmem:[#allocation16 + $0x3f0] sm:$0xff] }
 0x5c9   :  { %4179 = vmatprep.subr.mxu0 %v3076_v19  ;;  %4107 = vmatpush2.msra.mxu1 %v2827_v20 }
 0x5ca   :  { %4180 = vmatpush2.msra.mxu0 %v3075_v21  ;;  %4108 = vmatprep.subr.mxu1 %v2820_v23  ;;  %v3252_v21 = vld [vmem:[#allocation16 + $0x1be8] sm:$0xff]  ;;  %v2478_v23 = vld [vmem:[#allocation16 + $0x3b8] sm:$0xff] }
 0x5cb   :  { %4181 = vmatprep.subr.mxu0 %v3068_v26  ;;  %4109 = vmatpush2.msra.mxu1 %v2819_v60  ;;  %v3251_v26 = vld [vmem:[#allocation16 + $0x1be0] sm:$0xff]  ;;  %v2477_v60 = vld [vmem:[#allocation16 + $0x3b0] sm:$0xff] }
 0x5cc   :  { %4182 = vmatpush2.msra.mxu0 %v3067_v14  ;;  %4110 = vmatprep.subr.mxu1 %v2812_v28  ;;  %v3244_v14 = vld [vmem:[#allocation16 + $0x1ba8] sm:$0xff]  ;;  %v2470_v28 = vld [vmem:[#allocation16 + $0x378] sm:$0xff] }
 0x5cd   :  { %4183 = vmatprep.subr.mxu0 %v3060_v50  ;;  %4111 = vmatpush2.msra.mxu1 %v2811_v30  ;;  %v3243_v50 = vld [vmem:[#allocation16 + $0x1ba0] sm:$0xff]  ;;  %v3236_v30 = vld [vmem:[#allocation16 + $0x1b68] sm:$0xff] }
 0x5ce   :  { %4184 = vmatpush2.msra.mxu0 %v3059_v13  ;;  %4112 = vmatprep.subr.mxu1 %v2804_v39  ;;  %v2462_v13 = vld [vmem:[#allocation16 + $0x338] sm:$0xff]  ;;  %v3235_v39 = vld [vmem:[#allocation16 + $0x1b60] sm:$0xff] }
 0x5cf   :  { %4185 = vmatprep.subr.mxu0 %v3052_v33  ;;  %4113 = vmatpush2.msra.mxu1 %v2803_v0  ;;  %v3228_v33 = vld [vmem:[#allocation16 + $0x1b28] sm:$0xff]  ;;  %v2454_v0 = vld [vmem:[#allocation16 + $0x2f8] sm:$0xff] }
 0x5d0   :  { %4186 = vmatpush2.msra.mxu0 %v3051_v24  ;;  %4114 = vmatprep.subr.mxu1 %v2796_v58  ;;  %v3227_v24 = vld [vmem:[#allocation16 + $0x1b20] sm:$0xff]  ;;  %v2453_v58 = vld [vmem:[#allocation16 + $0x2f0] sm:$0xff] }
 0x5d1   :  { %4187 = vmatprep.subr.mxu0 %v3044_v37  ;;  %4115 = vmatpush2.msra.mxu1 %v2795_v38  ;;  %v3220_v37 = vld [vmem:[#allocation16 + $0x1ae8] sm:$0xff]  ;;  %v2446_v38 = vld [vmem:[#allocation16 + $0x2b8] sm:$0xff] }
 0x5d2   :  { %4188 = vmatpush2.msra.mxu0 %v3043_v29  ;;  %4116 = vmatprep.subr.mxu1 %v2788_v40  ;;  %v3219_v29 = vld [vmem:[#allocation16 + $0x1ae0] sm:$0xff]  ;;  %v2445_v40 = vld [vmem:[#allocation16 + $0x2b0] sm:$0xff] }
 0x5d3   :  { %4189 = vmatprep.subr.mxu0 %v3036_v41  ;;  %4117 = vmatpush2.msra.mxu1 %v2787_v42  ;;  %v3212_v41 = vld [vmem:[#allocation16 + $0x1aa8] sm:$0xff]  ;;  %v2438_v42 = vld [vmem:[#allocation16 + $0x278] sm:$0xff] }
 0x5d4   :  { %4190 = vmatpush2.msra.mxu0 %v3035_v44  ;;  %4118 = vmatprep.subr.mxu1 %v2780_v45  ;;  %v3211_v44 = vld [vmem:[#allocation16 + $0x1aa0] sm:$0xff]  ;;  %v2437_v45 = vld [vmem:[#allocation16 + $0x270] sm:$0xff] }
 0x5d5   :  { %4191 = vmatprep.subr.mxu0 %v3028_v46  ;;  %4119 = vmatpush2.msra.mxu1 %v2779_v47  ;;  %v3204_v46 = vld [vmem:[#allocation16 + $0x1a68] sm:$0xff]  ;;  %v2430_v47 = vld [vmem:[#allocation16 + $0x238] sm:$0xff] }
 0x5d6   :  { %4192 = vmatpush2.msra.mxu0 %v3027_v48  ;;  %4120 = vmatprep.subr.mxu1 %v2772_v51  ;;  %v3203_v48 = vld [vmem:[#allocation16 + $0x1a60] sm:$0xff]  ;;  %v2429_v51 = vld [vmem:[#allocation16 + $0x230] sm:$0xff] }
 0x5d7   :  { %4193 = vmatprep.subr.mxu0 %v3020_v52  ;;  %4121 = vmatpush2.msra.mxu1 %v2771_v53  ;;  %v3196_v52 = vld [vmem:[#allocation16 + $0x1a28] sm:$0xff]  ;;  %v2422_v53 = vld [vmem:[#allocation16 + $0x1f8] sm:$0xff] }
 0x5d8   :  { %4194 = vmatpush2.msra.mxu0 %v3019_v54  ;;  %4122 = vmatprep.subr.mxu1 %v2764_v55  ;;  %v3195_v54 = vld [vmem:[#allocation16 + $0x1a20] sm:$0xff]  ;;  %v2421_v55 = vld [vmem:[#allocation16 + $0x1f0] sm:$0xff] }
 0x5d9   :  { %4195 = vmatprep.subr.mxu0 %v3012_v56  ;;  %4123 = vmatpush2.msra.mxu1 %v2763_v57  ;;  %v3188_v56 = vld [vmem:[#allocation16 + $0x19e8] sm:$0xff]  ;;  %v2414_v57 = vld [vmem:[#allocation16 + $0x1b8] sm:$0xff] }
 0x5da   :  { %4196 = vmatpush2.msra.mxu0 %v3011_v62  ;;  %4124 = vmatprep.subr.mxu1 %v2756_v35  ;;  %v3187_v62 = vld [vmem:[#allocation16 + $0x19e0] sm:$0xff]  ;;  %v2413_v35 = vld [vmem:[#allocation16 + $0x1b0] sm:$0xff] }
 0x5db   :  { %4197 = vmatprep.subr.mxu0 %v3004_v2  ;;  %4125 = vmatpush2.msra.mxu1 %v2755_v8  ;;  %v3704_v19 = vpop.f32.mrf.mxu1  ;;  %v3180_v2 = vld [vmem:[#allocation16 + $0x19a8] sm:$0xff]  ;;  %v2406_v8 = vld [vmem:[#allocation16 + $0x178] sm:$0xff] }
 0x5dc   :  { %4198 = vmatpush2.msra.mxu0 %v3003_v12  ;;  %4126 = vmatprep.subr.mxu1 %v2748_v15  ;;  %v7893_v20 = vadd.f32 %v3704_v19, %v7884_v61  ;;  %v2469_v61 = vld [vmem:[#allocation16 + $0x370] sm:$0xff]  ;;  %v3179_v12 = vld [vmem:[#allocation16 + $0x19a0] sm:$0xff] }
 0x5dd   :  { %4200 = vmatmul.mubr.f32.vlgmr.msra.gmra.mxu0 %v7838_v32  ;;  %4277 = vmatprep.subr.mxu0 %v2486_v16  ;;  %v2405_v15 = vld [vmem:[#allocation16 + $0x170] sm:$0xff]  ;;  %v3172_v16 = vld [vmem:[#allocation16 + $0x1968] sm:$0xff] }
 0x5de   :  { %4127 = vmatpush2.msra.mxu1 %v2747_v17  ;;  %4278 = vmatpush1.msra.mxu0 %v2485_v18  ;;  %v2398_v17 = vld [vmem:[#allocation16 + $0x138] sm:$0xff]  ;;  %v3171_v18 = vld [vmem:[#allocation16 + $0x1960] sm:$0xff]  ;;  %v2397_v19 = vld [vmem:[#allocation16 + $0x130] sm:$0xff] }
 0x5df   :  { %4341 = vmatprep.mubr.f32.mxu0 %v7790_v25  ;;  %4129 = vmatmul.mubr.f32.vlgmr.msra.gmra.mxu1 %v7824_v59  ;;  %v2461_v25 = vld [vmem:[#allocation16 + $0x330] sm:$0xff] }
 0x5e0   :  { %4206 = vmatprep.subr.mxu1 %v3252_v21  ;;  %4279 = vmatprep.subr.mxu0 %v2478_v23  ;;  %v3164_v21 = vld [vmem:[#allocation16 + $0x1928] sm:$0xff]  ;;  %v2390_v23 = vld [vmem:[#allocation16 + $0xf8] sm:$0xff] }
 0x5e1   :  { %4207 = vmatpush1.msra.mxu1 %v3251_v26  ;;  %4270 = vmatprep.mubr.f32.mxu1 %v7867_v34  ;;  %v3163_v26 = vld [vmem:[#allocation16 + $0x1920] sm:$0xff] }
 0x5e2   :  { %4280 = vmatpush1.msra.mxu0 %v2477_v60  ;;  %4208 = vmatprep.subr.mxu1 %v3244_v14  ;;  %v2389_v60 = vld [vmem:[#allocation16 + $0xf0] sm:$0xff]  ;;  %v3156_v14 = vld [vmem:[#allocation16 + $0x18e8] sm:$0xff] }
 0x5e3   :  { %4281 = vmatprep.subr.mxu0 %v2470_v28  ;;  %4209 = vmatpush1.msra.mxu1 %v3243_v50  ;;  %v2382_v28 = vld [vmem:[#allocation16 + $0xb8] sm:$0xff]  ;;  %v3155_v50 = vld [vmem:[#allocation16 + $0x18e0] sm:$0xff] }
 0x5e4   :  { %4282 = vmatpush1.msra.mxu0 %v2469_v61  ;;  %4210 = vmatprep.subr.mxu1 %v3236_v30  ;;  %v2381_v61 = vld [vmem:[#allocation16 + $0xb0] sm:$0xff]  ;;  %v3148_v30 = vld [vmem:[#allocation16 + $0x18a8] sm:$0xff] }
 0x5e5   :  { %4283 = vmatprep.subr.mxu0 %v2462_v13  ;;  %4211 = vmatpush1.msra.mxu1 %v3235_v39  ;;  %v2374_v13 = vld [vmem:[#allocation16 + $0x78] sm:$0xff]  ;;  %v3147_v39 = vld [vmem:[#allocation16 + $0x18a0] sm:$0xff] }
 0x5e6   :  { %4284 = vmatpush1.msra.mxu0 %v2461_v25  ;;  %4212 = vmatprep.subr.mxu1 %v3228_v33  ;;  %v2373_v25 = vld [vmem:[#allocation16 + $0x70] sm:$0xff]  ;;  %v3140_v33 = vld [vmem:[#allocation16 + $0x1868] sm:$0xff] }
 0x5e7   :  { %4285 = vmatprep.subr.mxu0 %v2454_v0  ;;  %4213 = vmatpush1.msra.mxu1 %v3227_v24  ;;  %v2366_v0 = vld [vmem:[#allocation16 + $0x38] sm:$0xff]  ;;  %v3139_v24 = vld [vmem:[#allocation16 + $0x1860] sm:$0xff] }
 0x5e8   :  { %4286 = vmatpush1.msra.mxu0 %v2453_v58  ;;  %4214 = vmatprep.subr.mxu1 %v3220_v37  ;;  %v2365_v58 = vld [vmem:[#allocation16 + $0x30] sm:$0xff]  ;;  %v3132_v37 = vld [vmem:[#allocation16 + $0x1828] sm:$0xff] }
 0x5e9   :  { %4287 = vmatprep.subr.mxu0 %v2446_v38  ;;  %4215 = vmatpush1.msra.mxu1 %v3219_v29  ;;  %v2614_v38 = vld [vmem:[#allocation16 + $0x7f8] sm:$0xff]  ;;  %v3131_v29 = vld [vmem:[#allocation16 + $0x1820] sm:$0xff] }
 0x5ea   :  { %4288 = vmatpush1.msra.mxu0 %v2445_v40  ;;  %4216 = vmatprep.subr.mxu1 %v3212_v41  ;;  %v2613_v40 = vld [vmem:[#allocation16 + $0x7f0] sm:$0xff]  ;;  %v3380_v41 = vld [vmem:[#allocation16 + $0x1fe8] sm:$0xff] }
 0x5eb   :  { %4289 = vmatprep.subr.mxu0 %v2438_v42  ;;  %4217 = vmatpush1.msra.mxu1 %v3211_v44  ;;  %v2606_v42 = vld [vmem:[#allocation16 + $0x7b8] sm:$0xff]  ;;  %v3379_v44 = vld [vmem:[#allocation16 + $0x1fe0] sm:$0xff] }
 0x5ec   :  { %4290 = vmatpush1.msra.mxu0 %v2437_v45  ;;  %4218 = vmatprep.subr.mxu1 %v3204_v46  ;;  %v2605_v45 = vld [vmem:[#allocation16 + $0x7b0] sm:$0xff]  ;;  %v3372_v46 = vld [vmem:[#allocation16 + $0x1fa8] sm:$0xff] }
 0x5ed   :  { %4291 = vmatprep.subr.mxu0 %v2430_v47  ;;  %4219 = vmatpush1.msra.mxu1 %v3203_v48  ;;  %v2598_v47 = vld [vmem:[#allocation16 + $0x778] sm:$0xff]  ;;  %v3371_v48 = vld [vmem:[#allocation16 + $0x1fa0] sm:$0xff] }
 0x5ee   :  { %4292 = vmatpush1.msra.mxu0 %v2429_v51  ;;  %4220 = vmatprep.subr.mxu1 %v3196_v52  ;;  %v2597_v51 = vld [vmem:[#allocation16 + $0x770] sm:$0xff]  ;;  %v3364_v52 = vld [vmem:[#allocation16 + $0x1f68] sm:$0xff] }
 0x5ef   :  { %4293 = vmatprep.subr.mxu0 %v2422_v53  ;;  %4221 = vmatpush1.msra.mxu1 %v3195_v54  ;;  %v2590_v53 = vld [vmem:[#allocation16 + $0x738] sm:$0xff]  ;;  %v3363_v54 = vld [vmem:[#allocation16 + $0x1f60] sm:$0xff] }
 0x5f0   :  { %4294 = vmatpush1.msra.mxu0 %v2421_v55  ;;  %4222 = vmatprep.subr.mxu1 %v3188_v56  ;;  %v2589_v55 = vld [vmem:[#allocation16 + $0x730] sm:$0xff]  ;;  %v3356_v56 = vld [vmem:[#allocation16 + $0x1f28] sm:$0xff] }
 0x5f1   :  { %4295 = vmatprep.subr.mxu0 %v2414_v57  ;;  %4223 = vmatpush1.msra.mxu1 %v3187_v62  ;;  %v2582_v57 = vld [vmem:[#allocation16 + $0x6f8] sm:$0xff]  ;;  %v3355_v62 = vld [vmem:[#allocation16 + $0x1f20] sm:$0xff] }
 0x5f2   :  { %4296 = vmatpush1.msra.mxu0 %v2413_v35  ;;  %4224 = vmatprep.subr.mxu1 %v3180_v2  ;;  %v2581_v35 = vld [vmem:[#allocation16 + $0x6f0] sm:$0xff]  ;;  %v3348_v2 = vld [vmem:[#allocation16 + $0x1ee8] sm:$0xff] }
 0x5f3   :  { %4297 = vmatprep.subr.mxu0 %v2406_v8  ;;  %4225 = vmatpush1.msra.mxu1 %v3179_v12  ;;  %v2574_v8 = vld [vmem:[#allocation16 + $0x6b8] sm:$0xff]  ;;  %v3347_v12 = vld [vmem:[#allocation16 + $0x1ee0] sm:$0xff] }
 0x5f4   :  { %4298 = vmatpush1.msra.mxu0 %v2405_v15  ;;  %4226 = vmatprep.subr.mxu1 %v3172_v16  ;;  %v2573_v15 = vld [vmem:[#allocation16 + $0x6b0] sm:$0xff]  ;;  %v3340_v16 = vld [vmem:[#allocation16 + $0x1ea8] sm:$0xff] }
 0x5f5   :  { %4299 = vmatprep.subr.mxu0 %v2398_v17  ;;  %4227 = vmatpush1.msra.mxu1 %v3171_v18  ;;  %v2566_v17 = vld [vmem:[#allocation16 + $0x678] sm:$0xff]  ;;  %v3339_v18 = vld [vmem:[#allocation16 + $0x1ea0] sm:$0xff] }
 0x5f6   :  { %4300 = vmatpush1.msra.mxu0 %v2397_v19  ;;  %4228 = vmatprep.subr.mxu1 %v3164_v21  ;;  %v2565_v19 = vld [vmem:[#allocation16 + $0x670] sm:$0xff]  ;;  %v3332_v21 = vld [vmem:[#allocation16 + $0x1e68] sm:$0xff] }
 0x5f7   :  { %4301 = vmatprep.subr.mxu0 %v2390_v23  ;;  %4229 = vmatpush1.msra.mxu1 %v3163_v26  ;;  %v2558_v23 = vld [vmem:[#allocation16 + $0x638] sm:$0xff]  ;;  %v3331_v26 = vld [vmem:[#allocation16 + $0x1e60] sm:$0xff] }
 0x5f8   :  { %4302 = vmatpush1.msra.mxu0 %v2389_v60  ;;  %4230 = vmatprep.subr.mxu1 %v3156_v14  ;;  %v2557_v60 = vld [vmem:[#allocation16 + $0x630] sm:$0xff]  ;;  %v3324_v14 = vld [vmem:[#allocation16 + $0x1e28] sm:$0xff] }
 0x5f9   :  { %4303 = vmatprep.subr.mxu0 %v2382_v28  ;;  %4231 = vmatpush1.msra.mxu1 %v3155_v50  ;;  %v2550_v28 = vld [vmem:[#allocation16 + $0x5f8] sm:$0xff]  ;;  %v3323_v50 = vld [vmem:[#allocation16 + $0x1e20] sm:$0xff] }
 0x5fa   :  { %4304 = vmatpush1.msra.mxu0 %v2381_v61  ;;  %4232 = vmatprep.subr.mxu1 %v3148_v30  ;;  %v2549_v61 = vld [vmem:[#allocation16 + $0x5f0] sm:$0xff]  ;;  %v3316_v30 = vld [vmem:[#allocation16 + $0x1de8] sm:$0xff] }
 0x5fb   :  { %4305 = vmatprep.subr.mxu0 %v2374_v13  ;;  %4233 = vmatpush1.msra.mxu1 %v3147_v39  ;;  %v2542_v13 = vld [vmem:[#allocation16 + $0x5b8] sm:$0xff]  ;;  %v3315_v39 = vld [vmem:[#allocation16 + $0x1de0] sm:$0xff] }
 0x5fc   :  { %4306 = vmatpush1.msra.mxu0 %v2373_v25  ;;  %4234 = vmatprep.subr.mxu1 %v3140_v33  ;;  %v2541_v25 = vld [vmem:[#allocation16 + $0x5b0] sm:$0xff]  ;;  %v3308_v33 = vld [vmem:[#allocation16 + $0x1da8] sm:$0xff] }
 0x5fd   :  { %4307 = vmatprep.subr.mxu0 %v2366_v0  ;;  %4235 = vmatpush1.msra.mxu1 %v3139_v24  ;;  %v2534_v0 = vld [vmem:[#allocation16 + $0x578] sm:$0xff]  ;;  %v3307_v24 = vld [vmem:[#allocation16 + $0x1da0] sm:$0xff] }
 0x5fe   :  { %4308 = vmatpush1.msra.mxu0 %v2365_v58  ;;  %4236 = vmatprep.subr.mxu1 %v3132_v37  ;;  %v2533_v58 = vld [vmem:[#allocation16 + $0x570] sm:$0xff]  ;;  %v3300_v37 = vld [vmem:[#allocation16 + $0x1d68] sm:$0xff] }
 0x5ff   :  { %4309 = vmatprep.subr.mxu0 %v2614_v38  ;;  %4237 = vmatpush1.msra.mxu1 %v3131_v29  ;;  %v2526_v38 = vld [vmem:[#allocation16 + $0x538] sm:$0xff]  ;;  %v3299_v29 = vld [vmem:[#allocation16 + $0x1d60] sm:$0xff] }
 0x600   :  { %4310 = vmatpush2.msra.mxu0 %v2613_v40  ;;  %4238 = vmatprep.subr.mxu1 %v3380_v41  ;;  %v2525_v40 = vld [vmem:[#allocation16 + $0x530] sm:$0xff]  ;;  %v3292_v41 = vld [vmem:[#allocation16 + $0x1d28] sm:$0xff] }
 0x601   :  { %4311 = vmatprep.subr.mxu0 %v2606_v42  ;;  %4239 = vmatpush2.msra.mxu1 %v3379_v44  ;;  %v2518_v42 = vld [vmem:[#allocation16 + $0x4f8] sm:$0xff]  ;;  %v3291_v44 = vld [vmem:[#allocation16 + $0x1d20] sm:$0xff] }
 0x602   :  { %4312 = vmatpush2.msra.mxu0 %v2605_v45  ;;  %4240 = vmatprep.subr.mxu1 %v3372_v46  ;;  %v7899_v45 = vpop.f32.mrf.mxu0  ;;  %v2517_v46 = vld [vmem:[#allocation16 + $0x4f0] sm:$0xff] }
 0x603   :  { %4313 = vmatprep.subr.mxu0 %v2598_v47  ;;  %4241 = vmatpush2.msra.mxu1 %v3371_v48  ;;  %v3284_v47 = vld [vmem:[#allocation16 + $0x1ce8] sm:$0xff]  ;;  %v7901_v48 = vld [vmem:[#allocation17] sm:$0xff] }
 0x604   :  { %4314 = vmatpush2.msra.mxu0 %v2597_v51  ;;  %4242 = vmatprep.subr.mxu1 %v3364_v52  ;;  %v3396_v51 = vrot.slane %v7901_v48, %v7718_v7  ;;  %v2510_v52 = vld [vmem:[#allocation16 + $0x4b8] sm:$0xff] }
 0x605   :  { %4315 = vmatprep.subr.mxu0 %v2590_v53  ;;  %4243 = vmatpush2.msra.mxu1 %v3363_v54  ;;  %v3283_v53 = vld [vmem:[#allocation16 + $0x1ce0] sm:$0xff]  ;;  %v3775_v54 = vpop.f32.mrf.mxu0 }
 0x606   :  { %4316 = vmatpush2.msra.mxu0 %v2589_v55  ;;  %4244 = vmatprep.subr.mxu1 %v3356_v56  ;;  %v2509_v55 = vld [vmem:[#allocation16 + $0x4b0] sm:$0xff]  ;;  %v3276_v56 = vld [vmem:[#allocation16 + $0x1ca8] sm:$0xff] }
 0x607   :  { %4317 = vmatprep.subr.mxu0 %v2582_v57  ;;  %4245 = vmatpush2.msra.mxu1 %v3355_v62  ;;  %v2502_v57 = vld [vmem:[#allocation16 + $0x478] sm:$0xff]  ;;  %v3275_v62 = vld [vmem:[#allocation16 + $0x1ca0] sm:$0xff] }
 0x608   :  { %4318 = vmatpush2.msra.mxu0 %v2581_v35  ;;  %4246 = vmatprep.subr.mxu1 %v3348_v2  ;;  %v7905_v35 = vpop.f32.mrf.mxu1  ;;  %v2501_v2 = vld [vmem:[#allocation16 + $0x470] sm:$0xff] }
 0x609   :  { %4319 = vmatprep.subr.mxu0 %v2574_v8  ;;  %4247 = vmatpush2.msra.mxu1 %v3347_v12  ;;  %v3268_v8 = vld [vmem:[#allocation16 + $0x1c68] sm:$0xff]  ;;  %v3776_v12 = vadd.f32 %v3775_v54, %v3396_v51  ;;  %v2950_v51 = vld [vmem:[#allocation16 + $0x1278] sm:$0xff]  ;;  %v2949_v54 = vld [vmem:[#allocation16 + $0x1270] sm:$0xff] }
 0x60a   :  { %4320 = vmatpush2.msra.mxu0 %v2573_v15  ;;  %4248 = vmatprep.subr.mxu1 %v3340_v16  ;;  %v2494_v15 = vld [vmem:[#allocation16 + $0x438] sm:$0xff]  ;;  %v3267_v16 = vld [vmem:[#allocation16 + $0x1c60] sm:$0xff] }
 0x60b   :  { %4321 = vmatprep.subr.mxu0 %v2566_v17  ;;  %4249 = vmatpush2.msra.mxu1 %v3339_v18  ;;  %v7907_v17 = vpop.f32.mrf.mxu0  ;;  %v2493_v18 = vld [vmem:[#allocation16 + $0x430] sm:$0xff] }
 0x60c   :  { %4322 = vmatpush2.msra.mxu0 %v2565_v19  ;;  %4250 = vmatprep.subr.mxu1 %v3332_v21  ;;  %v3260_v19 = vld [vmem:[#allocation16 + $0x1c28] sm:$0xff] }
 0x60d   :  { %4323 = vmatprep.subr.mxu0 %v2558_v23  ;;  %4251 = vmatpush2.msra.mxu1 %v3331_v26  ;;  %v2998_v23 = vld [vmem:[#allocation16 + $0x13f8] sm:$0xff] }
 0x60e   :  { %4324 = vmatpush2.msra.mxu0 %v2557_v60  ;;  %4252 = vmatprep.subr.mxu1 %v3324_v14  ;;  %v3259_v14 = vld [vmem:[#allocation16 + $0x1c20] sm:$0xff] }
 0x60f   :  { %4325 = vmatprep.subr.mxu0 %v2550_v28  ;;  %4253 = vmatpush2.msra.mxu1 %v3323_v50  ;;  %v2997_v28 = vld [vmem:[#allocation16 + $0x13f0] sm:$0xff] }
 0x610   :  { %4326 = vmatpush2.msra.mxu0 %v2549_v61  ;;  %4254 = vmatprep.subr.mxu1 %v3316_v30  ;;  %v2742_v61 = vld [vmem:[#allocation16 + $0xbf8] sm:$0xff] }
 0x611   :  { %4327 = vmatprep.subr.mxu0 %v2542_v13  ;;  %4255 = vmatpush2.msra.mxu1 %v3315_v39  ;;  %v2990_v30 = vld [vmem:[#allocation16 + $0x13b8] sm:$0xff]  ;;  %v2741_v13 = vld [vmem:[#allocation16 + $0xbf0] sm:$0xff] }
 0x612   :  { %4328 = vmatpush2.msra.mxu0 %v2541_v25  ;;  %4256 = vmatprep.subr.mxu1 %v3308_v33  ;;  %v2989_v39 = vld [vmem:[#allocation16 + $0x13b0] sm:$0xff]  ;;  %v2734_v25 = vld [vmem:[#allocation16 + $0xbb8] sm:$0xff] }
 0x613   :  { %4329 = vmatprep.subr.mxu0 %v2534_v0  ;;  %4257 = vmatpush2.msra.mxu1 %v3307_v24  ;;  %v2982_v33 = vld [vmem:[#allocation16 + $0x1378] sm:$0xff]  ;;  %v2733_v0 = vld [vmem:[#allocation16 + $0xbb0] sm:$0xff] }
 0x614   :  { %4330 = vmatpush2.msra.mxu0 %v2533_v58  ;;  %4258 = vmatprep.subr.mxu1 %v3300_v37  ;;  %v2726_v24 = vld [vmem:[#allocation16 + $0xb78] sm:$0xff]  ;;  %v2725_v37 = vld [vmem:[#allocation16 + $0xb70] sm:$0xff] }
 0x615   :  { %4331 = vmatprep.subr.mxu0 %v2526_v38  ;;  %4259 = vmatpush2.msra.mxu1 %v3299_v29  ;;  %v2974_v58 = vld [vmem:[#allocation16 + $0x1338] sm:$0xff] }
 0x616   :  { %4332 = vmatpush2.msra.mxu0 %v2525_v40  ;;  %4260 = vmatprep.subr.mxu1 %v3292_v41  ;;  %v2718_v38 = vld [vmem:[#allocation16 + $0xb38] sm:$0xff]  ;;  %v2717_v40 = vld [vmem:[#allocation16 + $0xb30] sm:$0xff] }
 0x617   :  { %4333 = vmatprep.subr.mxu0 %v2518_v42  ;;  %4261 = vmatpush2.msra.mxu1 %v3291_v44  ;;  %v2966_v29 = vld [vmem:[#allocation16 + $0x12f8] sm:$0xff]  ;;  %v2965_v41 = vld [vmem:[#allocation16 + $0x12f0] sm:$0xff] }
 0x618   :  { %4334 = vmatpush2.msra.mxu0 %v2517_v46  ;;  %4262 = vmatprep.subr.mxu1 %v3284_v47  ;;  %v3917_v60 = vpop.f32.mrf.mxu0  ;;  %v2710_v42 = vld [vmem:[#allocation16 + $0xaf8] sm:$0xff]  ;;  %v2709_v44 = vld [vmem:[#allocation16 + $0xaf0] sm:$0xff] }
 0x619   :  { %4335 = vmatprep.subr.mxu0 %v2510_v52  ;;  %4263 = vmatpush2.msra.mxu1 %v3283_v53  ;;  %v2957_v46 = vld [vmem:[#allocation16 + $0x12b0] sm:$0xff]  ;;  %v2702_v47 = vld [vmem:[#allocation16 + $0xab8] sm:$0xff]  ;;  %v3392_v53 = vrot.slane %v7901_v48, %v7721_v9 }
 0x61a   :  { %4336 = vmatpush2.msra.mxu0 %v2509_v55  ;;  %4264 = vmatprep.subr.mxu1 %v3276_v56  ;;  %v2701_v52 = vld [vmem:[#allocation16 + $0xab0] sm:$0xff]  ;;  %v2694_v55 = vld [vmem:[#allocation16 + $0xa78] sm:$0xff] }
 0x61b   :  { %4337 = vmatprep.subr.mxu0 %v2502_v57  ;;  %4265 = vmatpush2.msra.mxu1 %v3275_v62  ;;  %v3846_v21 = vpop.f32.mrf.mxu1  ;;  %v2942_v56 = vld [vmem:[#allocation16 + $0x1238] sm:$0xff]  ;;  %v2693_v57 = vld [vmem:[#allocation16 + $0xa70] sm:$0xff] }
 0x61c   :  { %4338 = vmatpush2.msra.mxu0 %v2501_v2  ;;  %4266 = vmatprep.subr.mxu1 %v3268_v8  ;;  %v3847_v26 = vadd.f32 %v3846_v21, %v3776_v12  ;;  %v2941_v62 = vld [vmem:[#allocation16 + $0x1230] sm:$0xff]  ;;  %v2686_v2 = vld [vmem:[#allocation16 + $0xa38] sm:$0xff] }
 0x61d   :  { %4339 = vmatprep.subr.mxu0 %v2494_v15  ;;  %4267 = vmatpush2.msra.mxu1 %v3267_v16  ;;  %v2934_v8 = vld [vmem:[#allocation16 + $0x11f8] sm:$0xff]  ;;  %v2685_v12 = vld [vmem:[#allocation16 + $0xa30] sm:$0xff]  ;;  %v3494_v15 = vadd.f32 %v7881_v3, %v3392_v53 }
 0x61e   :  { %4340 = vmatpush2.msra.mxu0 %v2493_v18  ;;  %4268 = vmatprep.subr.mxu1 %v3260_v19  ;;  %v7909_v50 = vadd.f32 %v3917_v60, %v3847_v26  ;;  %v2933_v16 = vld [vmem:[#allocation16 + $0x11f0] sm:$0xff]  ;;  %v2678_v18 = vld [vmem:[#allocation16 + $0x9f8] sm:$0xff] }
 0x61f   :  { %4342 = vmatmul.mubr.f32.vlgmr.msra.gmra.mxu0 %v7821_v49  ;;  %4419 = vmatprep.subr.mxu0 %v2998_v23  ;;  %v2981_v49 = vld [vmem:[#allocation16 + $0x1370] sm:$0xff]  ;;  %v2926_v19 = vld [vmem:[#allocation16 + $0x11b8] sm:$0xff]  ;;  %v3565_v23 = vadd.f32 %v7890_v11, %v3494_v15 }
 0x620   :  { %4269 = vmatpush2.msra.mxu1 %v3259_v14  ;;  %4420 = vmatpush1.msra.mxu0 %v2997_v28  ;;  %v2677_v21 = vld [vmem:[#allocation16 + $0x9f0] sm:$0xff]  ;;  %v2670_v60 = vld [vmem:[#allocation16 + $0x9b8] sm:$0xff] }
 0x621   :  { %4483 = vmatprep.mubr.f32.mxu0 %v7836_v31  ;;  %4271 = vmatmul.mubr.f32.vlgmr.msra.gmra.mxu1 %v7869_v36  ;;  %v2973_v31 = vld [vmem:[#allocation16 + $0x1330] sm:$0xff]  ;;  %v2918_v14 = vld [vmem:[#allocation16 + $0x1178] sm:$0xff]  ;;  %v3636_v3 = vadd.f32 %v7899_v45, %v3565_v23 }
 0x622   :  { %4348 = vmatprep.subr.mxu1 %v2742_v61  ;;  %4421 = vmatprep.subr.mxu0 %v2990_v30  ;;  %v2925_v26 = vld [vmem:[#allocation16 + $0x11b0] sm:$0xff]  ;;  %v2662_v30 = vld [vmem:[#allocation16 + $0x978] sm:$0xff] }
 0x623   :  { %4349 = vmatpush1.msra.mxu1 %v2741_v13  ;;  %4412 = vmatprep.mubr.f32.mxu1 %v7818_v27  ;;  %v2958_v27 = vld [vmem:[#allocation16 + $0x12b8] sm:$0xff]  ;;  %v2669_v28 = vld [vmem:[#allocation16 + $0x9b0] sm:$0xff]  ;;  %v7921_v11 = vadd.f32 %v7905_v35, %v3636_v3 }
 0x624   :  { %4422 = vmatpush1.msra.mxu0 %v2989_v39  ;;  %4350 = vmatprep.subr.mxu1 %v2734_v25  ;;  %v2917_v61 = vld [vmem:[#allocation16 + $0x1170] sm:$0xff]  ;;  %v2910_v13 = vld [vmem:[#allocation16 + $0x1138] sm:$0xff] }
 0x625   :  { %4423 = vmatprep.subr.mxu0 %v2982_v33  ;;  %4351 = vmatpush1.msra.mxu1 %v2733_v0  ;;  %v2661_v39 = vld [vmem:[#allocation16 + $0x970] sm:$0xff]  ;;  %v2654_v33 = vld [vmem:[#allocation16 + $0x938] sm:$0xff]  ;;  %v4570_v35 = vmul.f32 %v7921_v11, %v7921_v11 }
 0x626   :  { %4424 = vmatpush1.msra.mxu0 %v2981_v49  ;;  %4352 = vmatprep.subr.mxu1 %v2726_v24  ;;  %v2909_v25 = vld [vmem:[#allocation16 + $0x1130] sm:$0xff]  ;;  %v2902_v0 = vld [vmem:[#allocation16 + $0x10f8] sm:$0xff] }
 0x627   :  { %4425 = vmatprep.subr.mxu0 %v2974_v58  ;;  %4353 = vmatpush1.msra.mxu1 %v2725_v37  ;;  %v2653_v49 = vld [vmem:[#allocation16 + $0x930] sm:$0xff]  ;;  %v2646_v24 = vld [vmem:[#allocation16 + $0x8f8] sm:$0xff] }
 0x628   :  { %4426 = vmatpush1.msra.mxu0 %v2973_v31  ;;  %4354 = vmatprep.subr.mxu1 %v2718_v38  ;;  %v2901_v45 = vld [vmem:[#allocation16 + $0x10f0] sm:$0xff]  ;;  %v2894_v58 = vld [vmem:[#allocation16 + $0x10b8] sm:$0xff] }
 0x629   :  { %4427 = vmatprep.subr.mxu0 %v2966_v29  ;;  %4355 = vmatpush1.msra.mxu1 %v2717_v40  ;;  %v2645_v37 = vld [vmem:[#allocation16 + $0x8f0] sm:$0xff]  ;;  %v2638_v38 = vld [vmem:[#allocation16 + $0x8b8] sm:$0xff] }
 0x62a   :  { %4428 = vmatpush1.msra.mxu0 %v2965_v41  ;;  %4356 = vmatprep.subr.mxu1 %v2710_v42  ;;  %v2893_v31 = vld [vmem:[#allocation16 + $0x10b0] sm:$0xff]  ;;  %v2886_v29 = vld [vmem:[#allocation16 + $0x1078] sm:$0xff] }
 0x62b   :  { %4429 = vmatprep.subr.mxu0 %v2958_v27  ;;  %4357 = vmatpush1.msra.mxu1 %v2709_v44  ;;  %v2637_v40 = vld [vmem:[#allocation16 + $0x8b0] sm:$0xff]  ;;  %v2630_v42 = vld [vmem:[#allocation16 + $0x878] sm:$0xff] }
 0x62c   :  { %4430 = vmatpush1.msra.mxu0 %v2957_v46  ;;  %4358 = vmatprep.subr.mxu1 %v2702_v47  ;;  %v2885_v41 = vld [vmem:[#allocation16 + $0x1070] sm:$0xff]  ;;  %v2878_v27 = vld [vmem:[#allocation16 + $0x1038] sm:$0xff]  ;;  %v4578_v46 = vmul.f32 %v4570_v35, %v7921_v11 }
 0x62d   :  { %4431 = vmatprep.subr.mxu0 %v2950_v51  ;;  %4359 = vmatpush1.msra.mxu1 %v2701_v52  ;;  %v2629_v44 = vld [vmem:[#allocation16 + $0x870] sm:$0xff]  ;;  %v2622_v51 = vld [vmem:[#allocation16 + $0x838] sm:$0xff] }
 0x62e   :  { %4432 = vmatpush1.msra.mxu0 %v2949_v54  ;;  %4360 = vmatprep.subr.mxu1 %v2694_v55  ;;  %v2877_v47 = vld [vmem:[#allocation16 + $0x1030] sm:$0xff]  ;;  %v3126_v52 = vld [vmem:[#allocation16 + $0x17f8] sm:$0xff] }
 0x62f   :  { %4433 = vmatprep.subr.mxu0 %v2942_v56  ;;  %4361 = vmatpush1.msra.mxu1 %v2693_v57  ;;  %v2621_v53 = vld [vmem:[#allocation16 + $0x830] sm:$0xff]  ;;  %v2870_v55 = vld [vmem:[#allocation16 + $0xff8] sm:$0xff] }
 0x630   :  { %4434 = vmatpush1.msra.mxu0 %v2941_v62  ;;  %4362 = vmatprep.subr.mxu1 %v2686_v2  ;;  %v3125_v54 = vld [vmem:[#allocation16 + $0x17f0] sm:$0xff]  ;;  %v3118_v56 = vld [vmem:[#allocation16 + $0x17b8] sm:$0xff]  ;;  %v4586_v62 = vmul.f32 0.044715, %v4578_v46 }
 0x631   :  { %4435 = vmatprep.subr.mxu0 %v2934_v8  ;;  %4363 = vmatpush1.msra.mxu1 %v2685_v12  ;;  %v2869_v57 = vld [vmem:[#allocation16 + $0xff0] sm:$0xff]  ;;  %v2862_v8 = vld [vmem:[#allocation16 + $0xfb8] sm:$0xff] }
 0x632   :  { %4436 = vmatpush1.msra.mxu0 %v2933_v16  ;;  %4364 = vmatprep.subr.mxu1 %v2678_v18  ;;  %v3117_v2 = vld [vmem:[#allocation16 + $0x17b0] sm:$0xff]  ;;  %v3110_v12 = vld [vmem:[#allocation16 + $0x1778] sm:$0xff]  ;;  %v4594_v23 = vadd.f32 %v4586_v62, %v7921_v11 }
 0x633   :  { %4437 = vmatprep.subr.mxu0 %v2926_v19  ;;  %4365 = vmatpush1.msra.mxu1 %v2677_v21  ;;  %v2861_v15 = vld [vmem:[#allocation16 + $0xfb0] sm:$0xff]  ;;  %v2854_v18 = vld [vmem:[#allocation16 + $0xf78] sm:$0xff] }
 0x634   :  { %4438 = vmatpush1.msra.mxu0 %v2925_v26  ;;  %4366 = vmatprep.subr.mxu1 %v2670_v60  ;;  %v3109_v16 = vld [vmem:[#allocation16 + $0x1770] sm:$0xff]  ;;  %v3102_v19 = vld [vmem:[#allocation16 + $0x1738] sm:$0xff] }
 0x635   :  { %4439 = vmatprep.subr.mxu0 %v2918_v14  ;;  %4367 = vmatpush1.msra.mxu1 %v2669_v28  ;;  %v2853_v21 = vld [vmem:[#allocation16 + $0xf70] sm:$0xff]  ;;  %v2846_v60 = vld [vmem:[#allocation16 + $0xf38] sm:$0xff] }
 0x636   :  { %4440 = vmatpush1.msra.mxu0 %v2917_v61  ;;  %4368 = vmatprep.subr.mxu1 %v2662_v30  ;;  %v3101_v26 = vld [vmem:[#allocation16 + $0x1730] sm:$0xff]  ;;  %v3094_v14 = vld [vmem:[#allocation16 + $0x16f8] sm:$0xff] }
 0x637   :  { %4441 = vmatprep.subr.mxu0 %v2910_v13  ;;  %4369 = vmatpush1.msra.mxu1 %v2661_v39  ;;  %v2845_v28 = vld [vmem:[#allocation16 + $0xf30] sm:$0xff]  ;;  %v2838_v61 = vld [vmem:[#allocation16 + $0xef8] sm:$0xff]  ;;  %v4602_v39 = vmul.f32 0.7978846, %v4594_v23 }
 0x638   :  { %4442 = vmatpush1.msra.mxu0 %v2909_v25  ;;  %4370 = vmatprep.subr.mxu1 %v2654_v33  ;;  %v3093_v3 = vld [vmem:[#allocation16 + $0x16f0] sm:$0xff]  ;;  %v3086_v30 = vld [vmem:[#allocation16 + $0x16b8] sm:$0xff] }
 0x639   :  { %4443 = vmatprep.subr.mxu0 %v2902_v0  ;;  %4371 = vmatpush1.msra.mxu1 %v2653_v49  ;;  %v2837_v13 = vld [vmem:[#allocation16 + $0xef0] sm:$0xff]  ;;  %v2830_v33 = vld [vmem:[#allocation16 + $0xeb8] sm:$0xff]  ;;  %7096 = vtanh.f32 %v4602_v39 }
 0x63a   :  { %4444 = vmatpush1.msra.mxu0 %v2901_v45  ;;  %4372 = vmatprep.subr.mxu1 %v2646_v24  ;;  %v3085_v25 = vld [vmem:[#allocation16 + $0x16b0] sm:$0xff]  ;;  %v3078_v0 = vld [vmem:[#allocation16 + $0x1678] sm:$0xff] }
 0x63b   :  { %4445 = vmatprep.subr.mxu0 %v2894_v58  ;;  %4373 = vmatpush1.msra.mxu1 %v2645_v37  ;;  %v2829_v49 = vld [vmem:[#allocation16 + $0xeb0] sm:$0xff]  ;;  %v2822_v24 = vld [vmem:[#allocation16 + $0xe78] sm:$0xff] }
 0x63c   :  { %4446 = vmatpush1.msra.mxu0 %v2893_v31  ;;  %4374 = vmatprep.subr.mxu1 %v2638_v38  ;;  %v3077_v45 = vld [vmem:[#allocation16 + $0x1670] sm:$0xff]  ;;  %v3070_v58 = vld [vmem:[#allocation16 + $0x1638] sm:$0xff] }
 0x63d   :  { %4447 = vmatprep.subr.mxu0 %v2886_v29  ;;  %4375 = vmatpush1.msra.mxu1 %v2637_v40  ;;  %v2821_v37 = vld [vmem:[#allocation16 + $0xe70] sm:$0xff]  ;;  %v2814_v31 = vld [vmem:[#allocation16 + $0xe38] sm:$0xff] }
 0x63e   :  { %4448 = vmatpush1.msra.mxu0 %v2885_v41  ;;  %4376 = vmatprep.subr.mxu1 %v2630_v42  ;;  %v3069_v35 = vld [vmem:[#allocation16 + $0x1630] sm:$0xff]  ;;  %v3062_v38 = vld [vmem:[#allocation16 + $0x15f8] sm:$0xff] }
 0x63f   :  { %4449 = vmatprep.subr.mxu0 %v2878_v27  ;;  %4377 = vmatpush1.msra.mxu1 %v2629_v44  ;;  %v2813_v29 = vld [vmem:[#allocation16 + $0xe30] sm:$0xff]  ;;  %v2806_v41 = vld [vmem:[#allocation16 + $0xdf8] sm:$0xff] }
 0x640   :  { %4450 = vmatpush1.msra.mxu0 %v2877_v47  ;;  %4378 = vmatprep.subr.mxu1 %v2622_v51  ;;  %v3061_v40 = vld [vmem:[#allocation16 + $0x15f0] sm:$0xff]  ;;  %v3054_v42 = vld [vmem:[#allocation16 + $0x15b8] sm:$0xff] }
 0x641   :  { %4451 = vmatprep.subr.mxu0 %v3126_v52  ;;  %4379 = vmatpush1.msra.mxu1 %v2621_v53  ;;  %v2805_v27 = vld [vmem:[#allocation16 + $0xdf0] sm:$0xff]  ;;  %v2798_v46 = vld [vmem:[#allocation16 + $0xdb8] sm:$0xff] }
 0x642   :  { %4452 = vmatpush2.msra.mxu0 %v3125_v54  ;;  %4380 = vmatprep.subr.mxu1 %v2870_v55  ;;  %v3053_v44 = vld [vmem:[#allocation16 + $0x15b0] sm:$0xff]  ;;  %v3046_v47 = vld [vmem:[#allocation16 + $0x1578] sm:$0xff] }
 0x643   :  { %4453 = vmatprep.subr.mxu0 %v3118_v56  ;;  %4381 = vmatpush2.msra.mxu1 %v2869_v57  ;;  %v2797_v51 = vld [vmem:[#allocation16 + $0xdb0] sm:$0xff]  ;;  %v2790_v53 = vld [vmem:[#allocation16 + $0xd78] sm:$0xff] }
 0x644   :  { %4454 = vmatpush2.msra.mxu0 %v3117_v2  ;;  %4382 = vmatprep.subr.mxu1 %v2862_v8  ;;  %v3045_v52 = vld [vmem:[#allocation16 + $0x1570] sm:$0xff]  ;;  %v3038_v54 = vld [vmem:[#allocation16 + $0x1538] sm:$0xff] }
 0x645   :  { %4455 = vmatprep.subr.mxu0 %v3110_v12  ;;  %4383 = vmatpush2.msra.mxu1 %v2861_v15  ;;  %v2789_v55 = vld [vmem:[#allocation16 + $0xd70] sm:$0xff]  ;;  %v2782_v57 = vld [vmem:[#allocation16 + $0xd38] sm:$0xff] }
 0x646   :  { %4456 = vmatpush2.msra.mxu0 %v3109_v16  ;;  %4384 = vmatprep.subr.mxu1 %v2854_v18  ;;  %v3037_v56 = vld [vmem:[#allocation16 + $0x1530] sm:$0xff]  ;;  %v3030_v62 = vld [vmem:[#allocation16 + $0x14f8] sm:$0xff] }
 0x647   :  { %4457 = vmatprep.subr.mxu0 %v3102_v19  ;;  %4385 = vmatpush2.msra.mxu1 %v2853_v21  ;;  %v2781_v2 = vld [vmem:[#allocation16 + $0xd30] sm:$0xff]  ;;  %v2774_v12 = vld [vmem:[#allocation16 + $0xcf8] sm:$0xff]  ;;  %v7097_v21 = vpop.eup %7096 }
 0x648   :  { %4458 = vmatpush2.msra.mxu0 %v3101_v26  ;;  %4386 = vmatprep.subr.mxu1 %v2846_v60  ;;  %v3029_v8 = vld [vmem:[#allocation16 + $0x14f0] sm:$0xff]  ;;  %v3022_v15 = vld [vmem:[#allocation16 + $0x14b8] sm:$0xff]  ;;  %v7927_v60 = vpop.f32.mrf.mxu1  ;;  %v4618_v39 = vadd.f32 1.0, %v7097_v21 }
 0x649   :  { %4459 = vmatprep.subr.mxu0 %v3094_v14  ;;  %4387 = vmatpush2.msra.mxu1 %v2845_v28  ;;  %v2773_v16 = vld [vmem:[#allocation16 + $0xcf0] sm:$0xff]  ;;  %v2766_v19 = vld [vmem:[#allocation16 + $0xcb8] sm:$0xff] }
 0x64a   :  { %4460 = vmatpush2.msra.mxu0 %v3093_v3  ;;  %4388 = vmatprep.subr.mxu1 %v2838_v61  ;;  %v3021_v18 = vld [vmem:[#allocation16 + $0x14b0] sm:$0xff]  ;;  %v3014_v23 = vld [vmem:[#allocation16 + $0x1478] sm:$0xff] }
 0x64b   :  { %4461 = vmatprep.subr.mxu0 %v3086_v30  ;;  %4389 = vmatpush2.msra.mxu1 %v2837_v13  ;;  %v2765_v26 = vld [vmem:[#allocation16 + $0xcb0] sm:$0xff]  ;;  %v2758_v28 = vld [vmem:[#allocation16 + $0xc78] sm:$0xff] }
 0x64c   :  { %4462 = vmatpush2.msra.mxu0 %v3085_v25  ;;  %4390 = vmatprep.subr.mxu1 %v2830_v33  ;;  %v3013_v14 = vld [vmem:[#allocation16 + $0x1470] sm:$0xff]  ;;  %v3006_v3 = vld [vmem:[#allocation16 + $0x1438] sm:$0xff]  ;;  %v4709_v33 = vld [vmem:[#allocation19 + $0x260] sm:$0xff] }
 0x64d   :  { %4463 = vmatprep.subr.mxu0 %v3078_v0  ;;  %4391 = vmatpush2.msra.mxu1 %v2829_v49  ;;  %v2757_v61 = vld [vmem:[#allocation16 + $0xc70] sm:$0xff]  ;;  %v2750_v13 = vld [vmem:[#allocation16 + $0xc38] sm:$0xff] }
 0x64e   :  { %4464 = vmatpush2.msra.mxu0 %v3077_v45  ;;  %4392 = vmatprep.subr.mxu1 %v2822_v24  ;;  %v3005_v30 = vld [vmem:[#allocation16 + $0x1430] sm:$0xff]  ;;  %v4708_v45 = vld [vmem:[#allocation19 + $0x258] sm:$0xff]  ;;  %v4562_v24 = vmul.f32 0.5, %v7921_v11  ;;  %v4699_v11 = vld [vmem:[#allocation19 + $0x210] sm:$0xff] }
 0x64f   :  { %4465 = vmatprep.subr.mxu0 %v3070_v58  ;;  %4393 = vmatpush2.msra.mxu1 %v2821_v37  ;;  %v2749_v49 = vld [vmem:[#allocation16 + $0xc30] sm:$0xff]  ;;  %v3254_v37 = vld [vmem:[#allocation16 + $0x1bf8] sm:$0xff] }
 0x650   :  { %4466 = vmatpush2.msra.mxu0 %v3069_v35  ;;  %4394 = vmatprep.subr.mxu1 %v2814_v31  ;;  %v7934_v58 = vmul.f32 %v4618_v39, %v4562_v24  ;;  %v4704_v35 = vld [vmem:[#allocation19 + $0x238] sm:$0xff]  ;;  %v3253_v31 = vld [vmem:[#allocation16 + $0x1bf0] sm:$0xff] }
 0x651   :  { %4467 = vmatprep.subr.mxu0 %v3062_v38  ;;  %4395 = vmatpush2.msra.mxu1 %v2813_v29  ;;  %v3246_v38 = vld [vmem:[#allocation16 + $0x1bb8] sm:$0xff]  ;;  %v3245_v29 = vld [vmem:[#allocation16 + $0x1bb0] sm:$0xff] }
 0x652   :  { %4468 = vmatpush2.msra.mxu0 %v3061_v40  ;;  %4396 = vmatprep.subr.mxu1 %v2806_v41  ;;  %v3238_v40 = vld [vmem:[#allocation16 + $0x1b78] sm:$0xff]  ;;  %v4694_v41 = vld [vmem:[#allocation19 + $0x1e8] sm:$0xff] }
 0x653   :  { %4469 = vmatprep.subr.mxu0 %v3054_v42  ;;  %4397 = vmatpush2.msra.mxu1 %v2805_v27  ;;  %v3237_v42 = vld [vmem:[#allocation16 + $0x1b70] sm:$0xff]  ;;  %v4693_v27 = vld [vmem:[#allocation19 + $0x1e0] sm:$0xff] }
 0x654   :  { %4470 = vmatpush2.msra.mxu0 %v3053_v44  ;;  %4398 = vmatprep.subr.mxu1 %v2798_v46  ;;  %v3230_v44 = vld [vmem:[#allocation16 + $0x1b38] sm:$0xff]  ;;  %v3229_v46 = vld [vmem:[#allocation16 + $0x1b30] sm:$0xff] }
 0x655   :  { %4471 = vmatprep.subr.mxu0 %v3046_v47  ;;  %4399 = vmatpush2.msra.mxu1 %v2797_v51  ;;  %v4688_v47 = vld [vmem:[#allocation19 + $0x1b8] sm:$0xff]  ;;  %v3222_v51 = vld [vmem:[#allocation16 + $0x1af8] sm:$0xff]  ;;  %v3181_v39 = vld [vmem:[#allocation16 + $0x19b0] sm:$0xff] }
 0x656   :  { %4472 = vmatpush2.msra.mxu0 %v3045_v52  ;;  %4400 = vmatprep.subr.mxu1 %v2790_v53  ;;  %v3221_v52 = vld [vmem:[#allocation16 + $0x1af0] sm:$0xff]  ;;  %v3400_v53 = vrot.slane %v7901_v48, %v7724_v10  ;;  %v4673_v48 = vld [vmem:[#allocation19 + $0x140] sm:$0xff] }
 0x657   :  { %4473 = vmatprep.subr.mxu0 %v3038_v54  ;;  %4401 = vmatpush2.msra.mxu1 %v2789_v55  ;;  %v4683_v54 = vld [vmem:[#allocation19 + $0x190] sm:$0xff] }
 0x658   :  { %4474 = vmatpush2.msra.mxu0 %v3037_v56  ;;  %4402 = vmatprep.subr.mxu1 %v2782_v57  ;;  %v3214_v55 = vld [vmem:[#allocation16 + $0x1ab8] sm:$0xff]  ;;  %v3213_v57 = vld [vmem:[#allocation16 + $0x1ab0] sm:$0xff] }
 0x659   :  { %4475 = vmatprep.subr.mxu0 %v3030_v62  ;;  %4403 = vmatpush2.msra.mxu1 %v2781_v2  ;;  %v4679_v56 = vld [vmem:[#allocation19 + $0x170] sm:$0xff]  ;;  %v4678_v62 = vld [vmem:[#allocation19 + $0x168] sm:$0xff] }
 0x65a   :  { %4476 = vmatpush2.msra.mxu0 %v3029_v8  ;;  %4404 = vmatprep.subr.mxu1 %v2774_v12  ;;  %v3206_v2 = vld [vmem:[#allocation16 + $0x1a78] sm:$0xff]  ;;  %v4674_v8 = vld [vmem:[#allocation19 + $0x148] sm:$0xff] }
 0x65b   :  { %4477 = vmatprep.subr.mxu0 %v3022_v15  ;;  %4405 = vmatpush2.msra.mxu1 %v2773_v16  ;;  %v3205_v12 = vld [vmem:[#allocation16 + $0x1a70] sm:$0xff]  ;;  %v3778_v15 = vadd.f32 %v7907_v17, %v3400_v53  ;;  %v3198_v16 = vld [vmem:[#allocation16 + $0x1a38] sm:$0xff] }
 0x65c   :  { %4478 = vmatpush2.msra.mxu0 %v3021_v18  ;;  %4406 = vmatprep.subr.mxu1 %v2766_v19  ;;  %v4669_v18 = vld [vmem:[#allocation19 + $0x120] sm:$0xff]  ;;  %v3197_v19 = vld [vmem:[#allocation16 + $0x1a30] sm:$0xff]  ;;  %v4663_v17 = vld [vmem:[#allocation19 + $0xf0] sm:$0xff] }
 0x65d   :  { %4479 = vmatprep.subr.mxu0 %v3014_v23  ;;  %4407 = vmatpush2.msra.mxu1 %v2765_v26  ;;  %v3988_v25 = vpop.f32.mrf.mxu1  ;;  %v3849_v21 = vadd.f32 %v7927_v60, %v3778_v15  ;;  %v4668_v23 = vld [vmem:[#allocation19 + $0x118] sm:$0xff]  ;;  %v3190_v26 = vld [vmem:[#allocation16 + $0x19f8] sm:$0xff]  ;;  %v4658_v60 = vld [vmem:[#allocation19 + $0xc8] sm:$0xff] }
 0x65e   :  { %4480 = vmatpush2.msra.mxu0 %v3013_v14  ;;  %4408 = vmatprep.subr.mxu1 %v2758_v28  ;;  %v7930_v0 = vadd.f32 %v3988_v25, %v7909_v50  ;;  %v4703_v50 = vld [vmem:[#allocation19 + $0x230] sm:$0xff]  ;;  %v4664_v14 = vld [vmem:[#allocation19 + $0xf8] sm:$0xff]  ;;  %v3189_v28 = vld [vmem:[#allocation16 + $0x19f0] sm:$0xff] }
 0x65f   :  { %4481 = vmatprep.subr.mxu0 %v3006_v3  ;;  %4409 = vmatpush2.msra.mxu1 %v2757_v61  ;;  %v3182_v3 = vld [vmem:[#allocation16 + $0x19b8] sm:$0xff]  ;;  %v3919_v61 = vpop.f32.mrf.mxu0  ;;  %v3381_v15 = vld [vmem:[#allocation16 + $0x1ff0] sm:$0xff] }
 0x660   :  { %4482 = vmatpush2.msra.mxu0 %v3005_v30  ;;  %4410 = vmatprep.subr.mxu1 %v2750_v13  ;;  %v3990_v30 = vpop.f32.mrf.mxu1  ;;  %v4659_v13 = vld [vmem:[#allocation19 + $0xd0] sm:$0xff]  ;;  %v3920_v25 = vadd.f32 %v3919_v61, %v3849_v21  ;;  %v3373_v21 = vld [vmem:[#allocation16 + $0x1fb0] sm:$0xff]  ;;  %v4773_v61 = vld [vmem:[#allocation19 + $0x460] sm:$0xff] }
 0x661   :  { %4484 = vmatmul.mubr.f32.vlgmr.msra.gmra.mxu0 %v7838_v32  ;;  %5300 = vmatprep.subr.mxu0 %v4709_v33  ;;  %v4698_v32 = vld [vmem:[#allocation19 + $0x208] sm:$0xff]  ;;  %v3174_v33 = vld [vmem:[#allocation16 + $0x1978] sm:$0xff] }
 0x662   :  { %4411 = vmatpush2.msra.mxu1 %v2749_v49  ;;  %5301 = vmatpush1.msra.mxu0 %v4708_v45  ;;  %v4654_v49 = vld [vmem:[#allocation19 + $0xa8] sm:$0xff]  ;;  %v7943_v24 = vadd.f32 %v3990_v30, %v3920_v25  ;;  %v3358_v30 = vld [vmem:[#allocation16 + $0x1f38] sm:$0xff] }
 0x663   :  { %5364 = vmatprep.mubr.f32.mxu0 %v7934_v58  ;;  %4413 = vmatmul.mubr.f32.vlgmr.msra.gmra.mxu1 %v7824_v59  ;;  %v4689_v59 = vld [vmem:[#allocation19 + $0x1c0] sm:$0xff]  ;;  %v3173_v45 = vld [vmem:[#allocation16 + $0x1970] sm:$0xff] }
 0x664   :  { %4490 = vmatprep.subr.mxu1 %v3254_v37  ;;  %5302 = vmatprep.subr.mxu0 %v4704_v35  ;;  %v4653_v37 = vld [vmem:[#allocation19 + $0xa0] sm:$0xff]  ;;  %v3166_v35 = vld [vmem:[#allocation16 + $0x1938] sm:$0xff] }
 0x665   :  { %4491 = vmatpush1.msra.mxu1 %v3253_v31  ;;  %4554 = vmatprep.mubr.f32.mxu1 %v7867_v34  ;;  %v4684_v34 = vld [vmem:[#allocation19 + $0x198] sm:$0xff]  ;;  %v4649_v31 = vld [vmem:[#allocation19 + $0x80] sm:$0xff] }
 0x666   :  { %5303 = vmatpush1.msra.mxu0 %v4703_v50  ;;  %4492 = vmatprep.subr.mxu1 %v3246_v38  ;;  %v3165_v50 = vld [vmem:[#allocation16 + $0x1930] sm:$0xff]  ;;  %v4569_v38 = vmul.f32 %v7893_v20, %v7893_v20 }
 0x667   :  { %5304 = vmatprep.subr.mxu0 %v4699_v11  ;;  %4493 = vmatpush1.msra.mxu1 %v3245_v29  ;;  %v4648_v11 = vld [vmem:[#allocation19 + $0x78] sm:$0xff]  ;;  %v3158_v29 = vld [vmem:[#allocation16 + $0x18f8] sm:$0xff] }
 0x668   :  { %5305 = vmatpush1.msra.mxu0 %v4698_v32  ;;  %4494 = vmatprep.subr.mxu1 %v3238_v40  ;;  %v4644_v32 = vld [vmem:[#allocation19 + $0x58] sm:$0xff]  ;;  %v3157_v40 = vld [vmem:[#allocation16 + $0x18f0] sm:$0xff] }
 0x669   :  { %5306 = vmatprep.subr.mxu0 %v4694_v41  ;;  %4495 = vmatpush1.msra.mxu1 %v3237_v42  ;;  %v4572_v41 = vmul.f32 %v7943_v24, %v7943_v24  ;;  %v4643_v42 = vld [vmem:[#allocation19 + $0x50] sm:$0xff] }
 0x66a   :  { %5307 = vmatpush1.msra.mxu0 %v4693_v27  ;;  %4496 = vmatprep.subr.mxu1 %v3230_v44  ;;  %v3150_v27 = vld [vmem:[#allocation16 + $0x18b8] sm:$0xff] }
 0x66b   :  { %5308 = vmatprep.subr.mxu0 %v4689_v59  ;;  %4497 = vmatpush1.msra.mxu1 %v3229_v46  ;;  %v4639_v44 = vld [vmem:[#allocation19 + $0x30] sm:$0xff]  ;;  %v3149_v59 = vld [vmem:[#allocation16 + $0x18b0] sm:$0xff]  ;;  %v4577_v46 = vmul.f32 %v4569_v38, %v7893_v20  ;;  %v4580_v53 = vmul.f32 %v4572_v41, %v7943_v24  ;;  %v4753_v41 = vld [vmem:[#allocation19 + $0x3c0] sm:$0xff] }
 0x66c   :  { %5309 = vmatpush1.msra.mxu0 %v4688_v47  ;;  %4498 = vmatprep.subr.mxu1 %v3222_v51  ;;  %v4638_v47 = vld [vmem:[#allocation19 + $0x28] sm:$0xff]  ;;  %v3142_v51 = vld [vmem:[#allocation16 + $0x1878] sm:$0xff] }
 0x66d   :  { %5310 = vmatprep.subr.mxu0 %v4684_v34  ;;  %4499 = vmatpush1.msra.mxu1 %v3221_v52  ;;  %v4634_v34 = vld [vmem:[#allocation19 + $0x8] sm:$0xff] }
 0x66e   :  { %5311 = vmatpush1.msra.mxu0 %v4683_v54  ;;  %4500 = vmatprep.subr.mxu1 %v3214_v55  ;;  %v3141_v52 = vld [vmem:[#allocation16 + $0x1870] sm:$0xff]  ;;  %v4633_v54 = vld [vmem:[#allocation19] sm:$0xff]  ;;  %v3134_v55 = vld [vmem:[#allocation16 + $0x1838] sm:$0xff] }
 0x66f   :  { %5312 = vmatprep.subr.mxu0 %v4679_v56  ;;  %4501 = vmatpush1.msra.mxu1 %v3213_v57  ;;  %v4789_v56 = vld [vmem:[#allocation19 + $0x4e0] sm:$0xff]  ;;  %v3133_v57 = vld [vmem:[#allocation16 + $0x1830] sm:$0xff] }
 0x670   :  { %5313 = vmatpush1.msra.mxu0 %v4678_v62  ;;  %4502 = vmatprep.subr.mxu1 %v3206_v2  ;;  %v4585_v62 = vmul.f32 0.044715, %v4577_v46  ;;  %v4788_v2 = vld [vmem:[#allocation19 + $0x4d8] sm:$0xff]  ;;  %v3341_v38 = vld [vmem:[#allocation16 + $0x1eb0] sm:$0xff]  ;;  %v3318_v46 = vld [vmem:[#allocation16 + $0x1df8] sm:$0xff] }
 0x671   :  { %5314 = vmatprep.subr.mxu0 %v4674_v8  ;;  %4503 = vmatpush1.msra.mxu1 %v3205_v12  ;;  %v3382_v8 = vld [vmem:[#allocation16 + $0x1ff8] sm:$0xff]  ;;  %v4784_v12 = vld [vmem:[#allocation19 + $0x4b8] sm:$0xff] }
 0x672   :  { %5315 = vmatpush1.msra.mxu0 %v4673_v48  ;;  %4504 = vmatprep.subr.mxu1 %v3198_v16  ;;  %v4588_v48 = vmul.f32 0.044715, %v4580_v53  ;;  %v4783_v16 = vld [vmem:[#allocation19 + $0x4b0] sm:$0xff] }
 0x673   :  { %5316 = vmatprep.subr.mxu0 %v4669_v18  ;;  %4505 = vmatpush1.msra.mxu1 %v3197_v19  ;;  %v3374_v18 = vld [vmem:[#allocation16 + $0x1fb8] sm:$0xff] }
 0x674   :  { %5317 = vmatpush1.msra.mxu0 %v4668_v23  ;;  %4506 = vmatprep.subr.mxu1 %v3190_v26  ;;  %v4779_v19 = vld [vmem:[#allocation19 + $0x490] sm:$0xff]  ;;  %v4593_v23 = vadd.f32 %v4585_v62, %v7893_v20  ;;  %v4778_v26 = vld [vmem:[#allocation19 + $0x488] sm:$0xff] }
 0x675   :  { %5318 = vmatprep.subr.mxu0 %v4664_v14  ;;  %4507 = vmatpush1.msra.mxu1 %v3189_v28  ;;  %v3366_v14 = vld [vmem:[#allocation16 + $0x1f78] sm:$0xff]  ;;  %v4774_v28 = vld [vmem:[#allocation19 + $0x468] sm:$0xff] }
 0x676   :  { %5319 = vmatpush1.msra.mxu0 %v4663_v17  ;;  %4508 = vmatprep.subr.mxu1 %v3182_v3  ;;  %v3365_v17 = vld [vmem:[#allocation16 + $0x1f70] sm:$0xff]  ;;  %v4596_v3 = vadd.f32 %v4588_v48, %v7943_v24  ;;  %v4601_v25 = vmul.f32 0.7978846, %v4593_v23  ;;  %v4739_v53 = vld [vmem:[#allocation19 + $0x350] sm:$0xff]  ;;  %v4728_v48 = vld [vmem:[#allocation19 + $0x2f8] sm:$0xff] }
 0x677   :  { %5320 = vmatprep.subr.mxu0 %v4659_v13  ;;  %4509 = vmatpush1.msra.mxu1 %v3181_v39  ;;  %v4769_v13 = vld [vmem:[#allocation19 + $0x440] sm:$0xff]  ;;  %v3357_v39 = vld [vmem:[#allocation16 + $0x1f30] sm:$0xff]  ;;  %v4723_v23 = vld [vmem:[#allocation19 + $0x2d0] sm:$0xff] }
 0x678   :  { %5321 = vmatpush1.msra.mxu0 %v4658_v60  ;;  %4510 = vmatprep.subr.mxu1 %v3174_v33  ;;  %v4768_v60 = vld [vmem:[#allocation19 + $0x438] sm:$0xff]  ;;  %v3350_v33 = vld [vmem:[#allocation16 + $0x1ef8] sm:$0xff]  ;;  %7098 = vtanh.f32 %v4601_v25  ;;  %v3301_v62 = vld [vmem:[#allocation16 + $0x1d70] sm:$0xff]  ;;  %v4561_v25 = vmul.f32 0.5, %v7893_v20 }
 0x679   :  { %5322 = vmatprep.subr.mxu0 %v4654_v49  ;;  %4511 = vmatpush1.msra.mxu1 %v3173_v45  ;;  %v4764_v49 = vld [vmem:[#allocation19 + $0x418] sm:$0xff]  ;;  %v3349_v45 = vld [vmem:[#allocation16 + $0x1ef0] sm:$0xff] }
 0x67a   :  { %5323 = vmatpush1.msra.mxu0 %v4653_v37  ;;  %4512 = vmatprep.subr.mxu1 %v3166_v35  ;;  %v4604_v37 = vmul.f32 0.7978846, %v4596_v3  ;;  %v4763_v35 = vld [vmem:[#allocation19 + $0x410] sm:$0xff]  ;;  %v4718_v3 = vld [vmem:[#allocation19 + $0x2a8] sm:$0xff] }
 0x67b   :  { %5324 = vmatprep.subr.mxu0 %v4649_v31  ;;  %4513 = vmatpush1.msra.mxu1 %v3165_v50  ;;  %v3342_v31 = vld [vmem:[#allocation16 + $0x1eb8] sm:$0xff] }
 0x67c   :  { %5325 = vmatpush1.msra.mxu0 %v4648_v11  ;;  %4514 = vmatprep.subr.mxu1 %v3158_v29  ;;  %v4759_v50 = vld [vmem:[#allocation19 + $0x3f0] sm:$0xff]  ;;  %v4758_v11 = vld [vmem:[#allocation19 + $0x3e8] sm:$0xff]  ;;  %7100 = vtanh.f32 %v4604_v37 }
 0x67d   :  { %5326 = vmatprep.subr.mxu0 %v4644_v32  ;;  %4515 = vmatpush1.msra.mxu1 %v3157_v40  ;;  %v3334_v29 = vld [vmem:[#allocation16 + $0x1e78] sm:$0xff]  ;;  %v4754_v32 = vld [vmem:[#allocation19 + $0x3c8] sm:$0xff] }
 0x67e   :  { %5327 = vmatpush1.msra.mxu0 %v4643_v42  ;;  %4516 = vmatprep.subr.mxu1 %v3150_v27  ;;  %v3333_v40 = vld [vmem:[#allocation16 + $0x1e70] sm:$0xff]  ;;  %v3326_v42 = vld [vmem:[#allocation16 + $0x1e38] sm:$0xff]  ;;  %v4749_v27 = vld [vmem:[#allocation19 + $0x3a0] sm:$0xff] }
 0x67f   :  { %5328 = vmatprep.subr.mxu0 %v4639_v44  ;;  %4517 = vmatpush1.msra.mxu1 %v3149_v59  ;;  %v3325_v44 = vld [vmem:[#allocation16 + $0x1e30] sm:$0xff]  ;;  %v4748_v59 = vld [vmem:[#allocation19 + $0x398] sm:$0xff] }
 0x680   :  { %5329 = vmatpush1.msra.mxu0 %v4638_v47  ;;  %4518 = vmatprep.subr.mxu1 %v3142_v51  ;;  %v4744_v47 = vld [vmem:[#allocation19 + $0x378] sm:$0xff]  ;;  %v3317_v51 = vld [vmem:[#allocation16 + $0x1df0] sm:$0xff] }
 0x681   :  { %5330 = vmatprep.subr.mxu0 %v4634_v34  ;;  %4519 = vmatpush1.msra.mxu1 %v3141_v52  ;;  %v4743_v34 = vld [vmem:[#allocation19 + $0x370] sm:$0xff] }
 0x682   :  { %5331 = vmatpush1.msra.mxu0 %v4633_v54  ;;  %4520 = vmatprep.subr.mxu1 %v3134_v55  ;;  %v3310_v52 = vld [vmem:[#allocation16 + $0x1db8] sm:$0xff]  ;;  %v3309_v54 = vld [vmem:[#allocation16 + $0x1db0] sm:$0xff] }
 0x683   :  { %5332 = vmatprep.subr.mxu0 %v4789_v56  ;;  %4521 = vmatpush1.msra.mxu1 %v3133_v57  ;;  %v4738_v55 = vld [vmem:[#allocation19 + $0x348] sm:$0xff]  ;;  %v3302_v56 = vld [vmem:[#allocation16 + $0x1d78] sm:$0xff] }
 0x684   :  { %5333 = vmatpush2.msra.mxu0 %v4788_v2  ;;  %4522 = vmatprep.subr.mxu1 %v3382_v8  ;;  %v4734_v57 = vld [vmem:[#allocation19 + $0x328] sm:$0xff]  ;;  %v4733_v2 = vld [vmem:[#allocation19 + $0x320] sm:$0xff]  ;;  %v3294_v8 = vld [vmem:[#allocation16 + $0x1d38] sm:$0xff] }
 0x685   :  { %5334 = vmatprep.subr.mxu0 %v4784_v12  ;;  %4523 = vmatpush2.msra.mxu1 %v3381_v15  ;;  %v4729_v12 = vld [vmem:[#allocation19 + $0x300] sm:$0xff]  ;;  %v3293_v15 = vld [vmem:[#allocation16 + $0x1d30] sm:$0xff] }
 0x686   :  { %5335 = vmatpush2.msra.mxu0 %v4783_v16  ;;  %4524 = vmatprep.subr.mxu1 %v3374_v18  ;;  %v3286_v16 = vld [vmem:[#allocation16 + $0x1cf8] sm:$0xff]  ;;  %v7099_v18 = vpop.eup %7098 }
 0x687   :  { %5336 = vmatprep.subr.mxu0 %v4779_v19  ;;  %4525 = vmatpush2.msra.mxu1 %v3373_v21  ;;  %v4724_v19 = vld [vmem:[#allocation19 + $0x2d8] sm:$0xff]  ;;  %v3285_v21 = vld [vmem:[#allocation16 + $0x1cf0] sm:$0xff] }
 0x688   :  { %5337 = vmatpush2.msra.mxu0 %v4778_v26  ;;  %4526 = vmatprep.subr.mxu1 %v3366_v14  ;;  %v3278_v26 = vld [vmem:[#allocation16 + $0x1cb8] sm:$0xff] }
 0x689   :  { %5338 = vmatprep.subr.mxu0 %v4774_v28  ;;  %4527 = vmatpush2.msra.mxu1 %v3365_v17  ;;  %v7101_v14 = vpop.eup %7100  ;;  %v4719_v28 = vld [vmem:[#allocation19 + $0x2b0] sm:$0xff]  ;;  %v3277_v17 = vld [vmem:[#allocation16 + $0x1cb0] sm:$0xff] }
 0x68a   :  { %5339 = vmatpush2.msra.mxu0 %v4773_v61  ;;  %4528 = vmatprep.subr.mxu1 %v3358_v30  ;;  %v3270_v61 = vld [vmem:[#allocation16 + $0x1c78] sm:$0xff]  ;;  %v4617_v30 = vadd.f32 1.0, %v7099_v18  ;;  %v4994_v18 = vld [vmem:[#allocation19 + $0xb48] sm:$0xff] }
 0x68b   :  { %5340 = vmatprep.subr.mxu0 %v4769_v13  ;;  %4529 = vmatpush2.msra.mxu1 %v3357_v39  ;;  %v4714_v13 = vld [vmem:[#allocation19 + $0x288] sm:$0xff] }
 0x68c   :  { %5341 = vmatpush2.msra.mxu0 %v4768_v60  ;;  %4530 = vmatprep.subr.mxu1 %v3350_v33  ;;  %v3269_v39 = vld [vmem:[#allocation16 + $0x1c70] sm:$0xff]  ;;  %v4713_v60 = vld [vmem:[#allocation19 + $0x280] sm:$0xff]  ;;  %v3262_v33 = vld [vmem:[#allocation16 + $0x1c38] sm:$0xff]  ;;  %v7954_v37 = vmul.f32 %v4617_v30, %v4561_v25 }
 0x68d   :  { %5342 = vmatprep.subr.mxu0 %v4764_v49  ;;  %4531 = vmatpush2.msra.mxu1 %v3349_v45  ;;  %v4620_v49 = vadd.f32 1.0, %v7101_v14  ;;  %v3261_v45 = vld [vmem:[#allocation16 + $0x1c30] sm:$0xff]  ;;  %v4823_v14 = vld [vmem:[#allocation19 + $0x5f0] sm:$0xff]  ;;  %v4813_v25 = vld [vmem:[#allocation19 + $0x5a0] sm:$0xff] }
 0x68e   :  { %5343 = vmatpush2.msra.mxu0 %v4763_v35  ;;  %4532 = vmatprep.subr.mxu1 %v3342_v31  ;;  %v4869_v35 = vld [vmem:[#allocation19 + $0x760] sm:$0xff]  ;;  %v4564_v31 = vmul.f32 0.5, %v7943_v24  ;;  %v5024_v24 = vld [vmem:[#allocation19 + $0xc38] sm:$0xff]  ;;  %v4983_v30 = vld [vmem:[#allocation19 + $0xaf0] sm:$0xff] }
 0x68f   :  { %5344 = vmatprep.subr.mxu0 %v4759_v50  ;;  %4533 = vmatpush2.msra.mxu1 %v3341_v38  ;;  %v4868_v50 = vld [vmem:[#allocation19 + $0x758] sm:$0xff] }
 0x690   :  { %5345 = vmatpush2.msra.mxu0 %v4758_v11  ;;  %4534 = vmatprep.subr.mxu1 %v3334_v29  ;;  %v7958_v20 = vmul.f32 %v4620_v49, %v4564_v31  ;;  %v4864_v38 = vld [vmem:[#allocation19 + $0x738] sm:$0xff]  ;;  %v5029_v11 = vld [vmem:[#allocation19 + $0xc60] sm:$0xff]  ;;  %v4863_v29 = vld [vmem:[#allocation19 + $0x730] sm:$0xff] }
 0x691   :  { %5346 = vmatprep.subr.mxu0 %v4754_v32  ;;  %4535 = vmatpush2.msra.mxu1 %v3333_v40  ;;  %v5028_v32 = vld [vmem:[#allocation19 + $0xc58] sm:$0xff]  ;;  %v4859_v40 = vld [vmem:[#allocation19 + $0x710] sm:$0xff]  ;;  %v4974_v49 = vld [vmem:[#allocation19 + $0xaa8] sm:$0xff] }
 0x692   :  { %5347 = vmatpush2.msra.mxu0 %v4753_v41  ;;  %4536 = vmatprep.subr.mxu1 %v3326_v42  ;;  %v4858_v41 = vld [vmem:[#allocation19 + $0x708] sm:$0xff]  ;;  %v5023_v42 = vld [vmem:[#allocation19 + $0xc30] sm:$0xff]  ;;  %v4973_v31 = vld [vmem:[#allocation19 + $0xaa0] sm:$0xff] }
 0x693   :  { %5348 = vmatprep.subr.mxu0 %v4749_v27  ;;  %4537 = vmatpush2.msra.mxu1 %v3325_v44  ;;  %v4854_v27 = vld [vmem:[#allocation19 + $0x6e8] sm:$0xff]  ;;  %v5019_v44 = vld [vmem:[#allocation19 + $0xc10] sm:$0xff] }
 0x694   :  { %5349 = vmatpush2.msra.mxu0 %v4748_v59  ;;  %4538 = vmatprep.subr.mxu1 %v3318_v46  ;;  %v4853_v59 = vld [vmem:[#allocation19 + $0x6e0] sm:$0xff] }
 0x695   :  { %5350 = vmatprep.subr.mxu0 %v4744_v47  ;;  %4539 = vmatpush2.msra.mxu1 %v3317_v51  ;;  %v4849_v46 = vld [vmem:[#allocation19 + $0x6c0] sm:$0xff]  ;;  %v5014_v47 = vld [vmem:[#allocation19 + $0xbe8] sm:$0xff]  ;;  %v4848_v51 = vld [vmem:[#allocation19 + $0x6b8] sm:$0xff] }
 0x696   :  { %5351 = vmatpush2.msra.mxu0 %v4743_v34  ;;  %4540 = vmatprep.subr.mxu1 %v3310_v52  ;;  %v5013_v34 = vld [vmem:[#allocation19 + $0xbe0] sm:$0xff]  ;;  %v4844_v52 = vld [vmem:[#allocation19 + $0x698] sm:$0xff] }
 0x697   :  { %5352 = vmatprep.subr.mxu0 %v4739_v53  ;;  %4541 = vmatpush2.msra.mxu1 %v3309_v54  ;;  %v5009_v53 = vld [vmem:[#allocation19 + $0xbc0] sm:$0xff]  ;;  %v4843_v54 = vld [vmem:[#allocation19 + $0x690] sm:$0xff] }
 0x698   :  { %5353 = vmatpush2.msra.mxu0 %v4738_v55  ;;  %4542 = vmatprep.subr.mxu1 %v3302_v56  ;;  %v5008_v55 = vld [vmem:[#allocation19 + $0xbb8] sm:$0xff]  ;;  %v4839_v56 = vld [vmem:[#allocation19 + $0x670] sm:$0xff] }
 0x699   :  { %5354 = vmatprep.subr.mxu0 %v4734_v57  ;;  %4543 = vmatpush2.msra.mxu1 %v3301_v62  ;;  %v5004_v57 = vld [vmem:[#allocation19 + $0xb98] sm:$0xff]  ;;  %v4838_v62 = vld [vmem:[#allocation19 + $0x668] sm:$0xff] }
 0x69a   :  { %5355 = vmatpush2.msra.mxu0 %v4733_v2  ;;  %4544 = vmatprep.subr.mxu1 %v3294_v8  ;;  %v5003_v2 = vld [vmem:[#allocation19 + $0xb90] sm:$0xff]  ;;  %v4834_v8 = vld [vmem:[#allocation19 + $0x648] sm:$0xff] }
 0x69b   :  { %5356 = vmatprep.subr.mxu0 %v4729_v12  ;;  %4545 = vmatpush2.msra.mxu1 %v3293_v15  ;;  %v4999_v12 = vld [vmem:[#allocation19 + $0xb70] sm:$0xff]  ;;  %v4833_v15 = vld [vmem:[#allocation19 + $0x640] sm:$0xff] }
 0x69c   :  { %5357 = vmatpush2.msra.mxu0 %v4728_v48  ;;  %4546 = vmatprep.subr.mxu1 %v3286_v16  ;;  %v4998_v48 = vld [vmem:[#allocation19 + $0xb68] sm:$0xff]  ;;  %v4829_v16 = vld [vmem:[#allocation19 + $0x620] sm:$0xff] }
 0x69d   :  { %5358 = vmatprep.subr.mxu0 %v4724_v19  ;;  %4547 = vmatpush2.msra.mxu1 %v3285_v21  ;;  %v4828_v19 = vld [vmem:[#allocation19 + $0x618] sm:$0xff]  ;;  %v4993_v21 = vld [vmem:[#allocation19 + $0xb40] sm:$0xff] }
 0x69e   :  { %5359 = vmatpush2.msra.mxu0 %v4723_v23  ;;  %4548 = vmatprep.subr.mxu1 %v3278_v26  ;;  %v4824_v23 = vld [vmem:[#allocation19 + $0x5f8] sm:$0xff]  ;;  %v4989_v26 = vld [vmem:[#allocation19 + $0xb20] sm:$0xff] }
 0x69f   :  { %5360 = vmatprep.subr.mxu0 %v4719_v28  ;;  %4549 = vmatpush2.msra.mxu1 %v3277_v17  ;;  %v4988_v28 = vld [vmem:[#allocation19 + $0xb18] sm:$0xff]  ;;  %v4819_v17 = vld [vmem:[#allocation19 + $0x5d0] sm:$0xff] }
 0x6a0   :  { %5361 = vmatpush2.msra.mxu0 %v4718_v3  ;;  %4550 = vmatprep.subr.mxu1 %v3270_v61  ;;  %v4984_v3 = vld [vmem:[#allocation19 + $0xaf8] sm:$0xff]  ;;  %v4818_v61 = vld [vmem:[#allocation19 + $0x5c8] sm:$0xff] }
 0x6a1   :  { %5362 = vmatprep.subr.mxu0 %v4714_v13  ;;  %4551 = vmatpush2.msra.mxu1 %v3269_v39  ;;  %v4814_v13 = vld [vmem:[#allocation19 + $0x5a8] sm:$0xff]  ;;  %v4979_v39 = vld [vmem:[#allocation19 + $0xad0] sm:$0xff] }
 0x6a2   :  { %5363 = vmatpush2.msra.mxu0 %v4713_v60  ;;  %4552 = vmatprep.subr.mxu1 %v3262_v33  ;;  %v4978_v60 = vld [vmem:[#allocation19 + $0xac8] sm:$0xff]  ;;  %v4809_v33 = vld [vmem:[#allocation19 + $0x580] sm:$0xff] }
 0x6a3   :  { %5365 = vmatmul.mubr.f32.vlgmr.msra.gmra.mxu0 %v7954_v37  ;;  %4553 = vmatpush2.msra.mxu1 %v3261_v45  ;;  %v4571_v45 = vmul.f32 %v7930_v0, %v7930_v0 }
 0x6a4   :  { %4555 = vmatmul.mubr.f32.vlgmr.msra.gmra.mxu1 %v7869_v36  ;;  %5371 = vmatprep.subr.mxu1 %v4869_v35  ;;  %v5018_v36 = vld [vmem:[#allocation19 + $0xc08] sm:$0xff]  ;;  %v4808_v35 = vld [vmem:[#allocation19 + $0x578] sm:$0xff] }
 0x6a5   :  { %5372 = vmatpush1.msra.mxu1 %v4868_v50  ;;  %5435 = vmatprep.mubr.f32.mxu1 %v7958_v20  ;;  %v4804_v50 = vld [vmem:[#allocation19 + $0x558] sm:$0xff] }
 0x6a6   :  { %5373 = vmatprep.subr.mxu1 %v4864_v38  ;;  %5442 = vmatprep.subr.mxu0 %v5029_v11  ;;  %v4969_v38 = vld [vmem:[#allocation19 + $0xa80] sm:$0xff]  ;;  %v4803_v11 = vld [vmem:[#allocation19 + $0x550] sm:$0xff] }
 0x6a7   :  { %5374 = vmatpush1.msra.mxu1 %v4863_v29  ;;  %5443 = vmatpush1.msra.mxu0 %v5028_v32  ;;  %v4968_v29 = vld [vmem:[#allocation19 + $0xa78] sm:$0xff]  ;;  %v4799_v32 = vld [vmem:[#allocation19 + $0x530] sm:$0xff] }
 0x6a8   :  { %5375 = vmatprep.subr.mxu1 %v4859_v40  ;;  %5444 = vmatprep.subr.mxu0 %v5024_v24  ;;  %v4964_v40 = vld [vmem:[#allocation19 + $0xa58] sm:$0xff]  ;;  %v4579_v24 = vmul.f32 %v4571_v45, %v7930_v0  ;;  %v5078_v45 = vld [vmem:[#allocation19 + $0xde8] sm:$0xff] }
 0x6a9   :  { %5376 = vmatpush1.msra.mxu1 %v4858_v41  ;;  %5445 = vmatpush1.msra.mxu0 %v5023_v42  ;;  %v4798_v41 = vld [vmem:[#allocation19 + $0x528] sm:$0xff]  ;;  %v4963_v42 = vld [vmem:[#allocation19 + $0xa50] sm:$0xff] }
 0x6aa   :  { %5377 = vmatprep.subr.mxu1 %v4854_v27  ;;  %5446 = vmatprep.subr.mxu0 %v5019_v44  ;;  %v4794_v27 = vld [vmem:[#allocation19 + $0x508] sm:$0xff]  ;;  %v4959_v44 = vld [vmem:[#allocation19 + $0xa30] sm:$0xff] }
 0x6ab   :  { %5378 = vmatpush1.msra.mxu1 %v4853_v59  ;;  %5447 = vmatpush1.msra.mxu0 %v5018_v36  ;;  %v4793_v59 = vld [vmem:[#allocation19 + $0x500] sm:$0xff]  ;;  %v4958_v36 = vld [vmem:[#allocation19 + $0xa28] sm:$0xff] }
 0x6ac   :  { %5379 = vmatprep.subr.mxu1 %v4849_v46  ;;  %5448 = vmatprep.subr.mxu0 %v5014_v47  ;;  %v4949_v46 = vld [vmem:[#allocation19 + $0x9e0] sm:$0xff]  ;;  %v4954_v47 = vld [vmem:[#allocation19 + $0xa08] sm:$0xff] }
 0x6ad   :  { %5380 = vmatpush1.msra.mxu1 %v4848_v51  ;;  %5449 = vmatpush1.msra.mxu0 %v5013_v34  ;;  %v4587_v51 = vmul.f32 0.044715, %v4579_v24  ;;  %v4948_v34 = vld [vmem:[#allocation19 + $0x9d8] sm:$0xff]  ;;  %v4059_v24 = vpop.f32.mrf.mxu0 }
 0x6ae   :  { %5381 = vmatprep.subr.mxu1 %v4844_v52  ;;  %5450 = vmatprep.subr.mxu0 %v5009_v53  ;;  %v4953_v52 = vld [vmem:[#allocation19 + $0xa00] sm:$0xff]  ;;  %v4944_v53 = vld [vmem:[#allocation19 + $0x9b8] sm:$0xff] }
 0x6af   :  { %5382 = vmatpush1.msra.mxu1 %v4843_v54  ;;  %5451 = vmatpush1.msra.mxu0 %v5008_v55  ;;  %v5109_v54 = vld [vmem:[#allocation19 + $0xee0] sm:$0xff]  ;;  %v4943_v55 = vld [vmem:[#allocation19 + $0x9b0] sm:$0xff] }
 0x6b0   :  { %5383 = vmatprep.subr.mxu1 %v4839_v56  ;;  %5452 = vmatprep.subr.mxu0 %v5004_v57  ;;  %v5108_v56 = vld [vmem:[#allocation19 + $0xed8] sm:$0xff]  ;;  %v4939_v57 = vld [vmem:[#allocation19 + $0x990] sm:$0xff] }
 0x6b1   :  { %5384 = vmatpush1.msra.mxu1 %v4838_v62  ;;  %5453 = vmatpush1.msra.mxu0 %v5003_v2  ;;  %v5104_v62 = vld [vmem:[#allocation19 + $0xeb8] sm:$0xff]  ;;  %v4595_v2 = vadd.f32 %v4587_v51, %v7930_v0  ;;  %v5059_v51 = vld [vmem:[#allocation19 + $0xd50] sm:$0xff] }
 0x6b2   :  { %5385 = vmatprep.subr.mxu1 %v4834_v8  ;;  %5454 = vmatprep.subr.mxu0 %v4999_v12  ;;  %v4938_v8 = vld [vmem:[#allocation19 + $0x988] sm:$0xff]  ;;  %v5103_v12 = vld [vmem:[#allocation19 + $0xeb0] sm:$0xff] }
 0x6b3   :  { %5386 = vmatpush1.msra.mxu1 %v4833_v15  ;;  %5455 = vmatpush1.msra.mxu0 %v4998_v48  ;;  %v4934_v15 = vld [vmem:[#allocation19 + $0x968] sm:$0xff]  ;;  %v5099_v48 = vld [vmem:[#allocation19 + $0xe90] sm:$0xff] }
 0x6b4   :  { %5387 = vmatprep.subr.mxu1 %v4829_v16  ;;  %5456 = vmatprep.subr.mxu0 %v4994_v18  ;;  %v4933_v16 = vld [vmem:[#allocation19 + $0x960] sm:$0xff]  ;;  %v5098_v18 = vld [vmem:[#allocation19 + $0xe88] sm:$0xff] }
 0x6b5   :  { %5388 = vmatpush1.msra.mxu1 %v4828_v19  ;;  %5457 = vmatpush1.msra.mxu0 %v4993_v21  ;;  %v4929_v19 = vld [vmem:[#allocation19 + $0x940] sm:$0xff]  ;;  %v5094_v21 = vld [vmem:[#allocation19 + $0xe68] sm:$0xff] }
 0x6b6   :  { %5389 = vmatprep.subr.mxu1 %v4824_v23  ;;  %5458 = vmatprep.subr.mxu0 %v4989_v26  ;;  %v4603_v23 = vmul.f32 0.7978846, %v4595_v2  ;;  %v4928_v26 = vld [vmem:[#allocation19 + $0x938] sm:$0xff]  ;;  %v5053_v2 = vld [vmem:[#allocation19 + $0xd20] sm:$0xff] }
 0x6b7   :  { %5390 = vmatpush1.msra.mxu1 %v4823_v14  ;;  %5459 = vmatpush1.msra.mxu0 %v4988_v28  ;;  %v5093_v14 = vld [vmem:[#allocation19 + $0xe60] sm:$0xff]  ;;  %v4924_v28 = vld [vmem:[#allocation19 + $0x918] sm:$0xff] }
 0x6b8   :  { %5391 = vmatprep.subr.mxu1 %v4819_v17  ;;  %5460 = vmatprep.subr.mxu0 %v4984_v3  ;;  %v5089_v17 = vld [vmem:[#allocation19 + $0xe40] sm:$0xff]  ;;  %v4923_v3 = vld [vmem:[#allocation19 + $0x910] sm:$0xff]  ;;  %7102 = vtanh.f32 %v4603_v23 }
 0x6b9   :  { %5392 = vmatpush1.msra.mxu1 %v4818_v61  ;;  %5461 = vmatpush1.msra.mxu0 %v4983_v30  ;;  %v5088_v61 = vld [vmem:[#allocation19 + $0xe38] sm:$0xff]  ;;  %v4919_v30 = vld [vmem:[#allocation19 + $0x8f0] sm:$0xff] }
 0x6ba   :  { %5393 = vmatprep.subr.mxu1 %v4814_v13  ;;  %5462 = vmatprep.subr.mxu0 %v4979_v39  ;;  %v5084_v13 = vld [vmem:[#allocation19 + $0xe18] sm:$0xff]  ;;  %v4918_v39 = vld [vmem:[#allocation19 + $0x8e8] sm:$0xff]  ;;  %v4879_v23 = vld [vmem:[#allocation19 + $0x7b0] sm:$0xff] }
 0x6bb   :  { %5394 = vmatpush1.msra.mxu1 %v4813_v25  ;;  %5463 = vmatpush1.msra.mxu0 %v4978_v60  ;;  %v5083_v25 = vld [vmem:[#allocation19 + $0xe10] sm:$0xff]  ;;  %v4914_v60 = vld [vmem:[#allocation19 + $0x8c8] sm:$0xff] }
 0x6bc   :  { %5395 = vmatprep.subr.mxu1 %v4809_v33  ;;  %5464 = vmatprep.subr.mxu0 %v4974_v49  ;;  %v5079_v33 = vld [vmem:[#allocation19 + $0xdf0] sm:$0xff]  ;;  %v4913_v49 = vld [vmem:[#allocation19 + $0x8c0] sm:$0xff] }
 0x6bd   :  { %5396 = vmatpush1.msra.mxu1 %v4808_v35  ;;  %5465 = vmatpush1.msra.mxu0 %v4973_v31  ;;  %v4909_v35 = vld [vmem:[#allocation19 + $0x8a0] sm:$0xff]  ;;  %v5074_v31 = vld [vmem:[#allocation19 + $0xdc8] sm:$0xff] }
 0x6be   :  { %5397 = vmatprep.subr.mxu1 %v4804_v50  ;;  %5466 = vmatprep.subr.mxu0 %v4969_v38  ;;  %v4908_v50 = vld [vmem:[#allocation19 + $0x898] sm:$0xff]  ;;  %v5073_v38 = vld [vmem:[#allocation19 + $0xdc0] sm:$0xff] }
 0x6bf   :  { %5398 = vmatpush1.msra.mxu1 %v4803_v11  ;;  %5467 = vmatpush1.msra.mxu0 %v4968_v29  ;;  %v4904_v11 = vld [vmem:[#allocation19 + $0x878] sm:$0xff]  ;;  %v5069_v29 = vld [vmem:[#allocation19 + $0xda0] sm:$0xff] }
 0x6c0   :  { %5399 = vmatprep.subr.mxu1 %v4799_v32  ;;  %5468 = vmatprep.subr.mxu0 %v4964_v40  ;;  %v4903_v32 = vld [vmem:[#allocation19 + $0x870] sm:$0xff]  ;;  %v5068_v40 = vld [vmem:[#allocation19 + $0xd98] sm:$0xff] }
 0x6c1   :  { %5400 = vmatpush1.msra.mxu1 %v4798_v41  ;;  %5469 = vmatpush1.msra.mxu0 %v4963_v42  ;;  %v4899_v41 = vld [vmem:[#allocation19 + $0x850] sm:$0xff]  ;;  %v5064_v42 = vld [vmem:[#allocation19 + $0xd78] sm:$0xff] }
 0x6c2   :  { %5401 = vmatprep.subr.mxu1 %v4794_v27  ;;  %5470 = vmatprep.subr.mxu0 %v4959_v44  ;;  %v7966_v27 = vld [vmem:[#allocation17] sm:$0xff] }
 0x6c3   :  { %5402 = vmatpush1.msra.mxu1 %v4793_v59  ;;  %5471 = vmatpush1.msra.mxu0 %v4958_v36  ;;  %v3404_v44 = vrot.slane %v7966_v27, %v7731_v43  ;;  %v4898_v59 = vld [vmem:[#allocation19 + $0x848] sm:$0xff]  ;;  %v5063_v36 = vld [vmem:[#allocation19 + $0xd70] sm:$0xff] }
 0x6c4   :  { %5403 = vmatprep.subr.mxu1 %v4949_v46  ;;  %5472 = vmatprep.subr.mxu0 %v4954_v47  ;;  %v4130_v46 = vpop.f32.mrf.mxu1  ;;  %v4894_v47 = vld [vmem:[#allocation19 + $0x828] sm:$0xff] }
 0x6c5   :  { %5404 = vmatpush2.msra.mxu1 %v4948_v34  ;;  %5473 = vmatpush1.msra.mxu0 %v4953_v52  ;;  %v3408_v34 = vrot.slane %v7966_v27, %v1417_v22  ;;  %v4893_v52 = vld [vmem:[#allocation19 + $0x820] sm:$0xff] }
 0x6c6   :  { %5405 = vmatprep.subr.mxu1 %v4944_v53  ;;  %5474 = vmatprep.subr.mxu0 %v5109_v54  ;;  %v5058_v53 = vld [vmem:[#allocation19 + $0xd48] sm:$0xff]  ;;  %v4061_v54 = vpop.f32.mrf.mxu0  ;;  %v5049_v22 = vld [vmem:[#allocation19 + $0xd00] sm:$0xff] }
 0x6c7   :  { %5406 = vmatpush2.msra.mxu1 %v4943_v55  ;;  %5475 = vmatpush2.msra.mxu0 %v5108_v56  ;;  %v4889_v55 = vld [vmem:[#allocation19 + $0x800] sm:$0xff]  ;;  %v5054_v56 = vld [vmem:[#allocation19 + $0xd28] sm:$0xff] }
 0x6c8   :  { %5407 = vmatprep.subr.mxu1 %v4939_v57  ;;  %5476 = vmatprep.subr.mxu0 %v5104_v62  ;;  %v4060_v57 = vadd.f32 %v4059_v24, %v3404_v44  ;;  %v4888_v62 = vld [vmem:[#allocation19 + $0x7f8] sm:$0xff] }
 0x6c9   :  { %5408 = vmatpush2.msra.mxu1 %v4938_v8  ;;  %5477 = vmatpush2.msra.mxu0 %v5103_v12  ;;  %v7103_v8 = vpop.eup %7102  ;;  %v4132_v12 = vpop.f32.mrf.mxu1 }
 0x6ca   :  { %5409 = vmatprep.subr.mxu1 %v4934_v15  ;;  %5478 = vmatprep.subr.mxu0 %v5099_v48  ;;  %v4884_v15 = vld [vmem:[#allocation19 + $0x7d8] sm:$0xff]  ;;  %v4062_v48 = vadd.f32 %v4061_v54, %v3408_v34  ;;  %v5174_v34 = vld [vmem:[#allocation19 + $0x10e8] sm:$0xff] }
 0x6cb   :  { %5410 = vmatpush2.msra.mxu1 %v4933_v16  ;;  %5479 = vmatpush2.msra.mxu0 %v5098_v18  ;;  %v4131_v16 = vadd.f32 %v4130_v46, %v4060_v57  ;;  %v4883_v18 = vld [vmem:[#allocation19 + $0x7d0] sm:$0xff]  ;;  %v5178_v46 = vld [vmem:[#allocation19 + $0x1108] sm:$0xff] }
 0x6cc   :  { %5411 = vmatprep.subr.mxu1 %v4929_v19  ;;  %5480 = vmatprep.subr.mxu0 %v5094_v21  ;;  %v5048_v19 = vld [vmem:[#allocation19 + $0xcf8] sm:$0xff]  ;;  %v4201_v21 = vpop.f32.mrf.mxu0 }
 0x6cd   :  { %5412 = vmatpush2.msra.mxu1 %v4928_v26  ;;  %5481 = vmatpush2.msra.mxu0 %v5093_v14  ;;  %v5044_v26 = vld [vmem:[#allocation19 + $0xcd8] sm:$0xff]  ;;  %v4133_v14 = vadd.f32 %v4132_v12, %v4062_v48  ;;  %v5154_v48 = vld [vmem:[#allocation19 + $0x1048] sm:$0xff] }
 0x6ce   :  { %5413 = vmatprep.subr.mxu1 %v4924_v28  ;;  %5482 = vmatprep.subr.mxu0 %v5089_v17  ;;  %v4878_v28 = vld [vmem:[#allocation19 + $0x7a8] sm:$0xff]  ;;  %v4619_v17 = vadd.f32 1.0, %v7103_v8  ;;  %v5163_v8 = vld [vmem:[#allocation19 + $0x1090] sm:$0xff] }
 0x6cf   :  { %5414 = vmatpush2.msra.mxu1 %v4923_v3  ;;  %5483 = vmatpush2.msra.mxu0 %v5088_v61  ;;  %v5043_v3 = vld [vmem:[#allocation19 + $0xcd0] sm:$0xff]  ;;  %v4874_v61 = vld [vmem:[#allocation19 + $0x788] sm:$0xff] }
 0x6d0   :  { %5415 = vmatprep.subr.mxu1 %v4919_v30  ;;  %5484 = vmatprep.subr.mxu0 %v5084_v13  ;;  %v5039_v30 = vld [vmem:[#allocation19 + $0xcb0] sm:$0xff]  ;;  %v4563_v13 = vmul.f32 0.5, %v7930_v0 }
 0x6d1   :  { %5416 = vmatpush2.msra.mxu1 %v4918_v39  ;;  %5485 = vmatpush2.msra.mxu0 %v5083_v25  ;;  %v4873_v39 = vld [vmem:[#allocation19 + $0x780] sm:$0xff]  ;;  %v4202_v25 = vadd.f32 %v4201_v21, %v4131_v16  ;;  %v5144_v21 = vld [vmem:[#allocation19 + $0xff8] sm:$0xff] }
 0x6d2   :  { %5417 = vmatprep.subr.mxu1 %v4914_v60  ;;  %5486 = vmatprep.subr.mxu0 %v5079_v33  ;;  %v5038_v60 = vld [vmem:[#allocation19 + $0xca8] sm:$0xff]  ;;  %v4203_v33 = vpop.f32.mrf.mxu0  ;;  %v5153_v16 = vld [vmem:[#allocation19 + $0x1040] sm:$0xff] }
 0x6d3   :  { %5418 = vmatpush2.msra.mxu1 %v4913_v49  ;;  %5487 = vmatpush2.msra.mxu0 %v5078_v45  ;;  %v5034_v45 = vld [vmem:[#allocation19 + $0xc88] sm:$0xff] }
 0x6d4   :  { %5419 = vmatprep.subr.mxu1 %v4909_v35  ;;  %5488 = vmatprep.subr.mxu0 %v5074_v31  ;;  %v7976_v31 = vmul.f32 %v4619_v17, %v4563_v13  ;;  %v5133_v17 = vld [vmem:[#allocation19 + $0xfa0] sm:$0xff]  ;;  %v5124_v13 = vld [vmem:[#allocation19 + $0xf58] sm:$0xff] }
 0x6d5   :  { %5420 = vmatpush2.msra.mxu1 %v4908_v50  ;;  %5489 = vmatpush2.msra.mxu0 %v5073_v38  ;;  %v4204_v50 = vadd.f32 %v4203_v33, %v4133_v14  ;;  %v5033_v38 = vld [vmem:[#allocation19 + $0xc80] sm:$0xff]  ;;  %v5138_v14 = vld [vmem:[#allocation19 + $0xfc8] sm:$0xff] }
 0x6d6   :  { %5421 = vmatprep.subr.mxu1 %v4904_v11  ;;  %5490 = vmatprep.subr.mxu0 %v5069_v29  ;;  %v5189_v11 = vld [vmem:[#allocation19 + $0x1160] sm:$0xff]  ;;  %v4711_v29 = vld [vmem:[#allocation19 + $0x270] sm:$0xff] }
 0x6d7   :  { %5422 = vmatpush2.msra.mxu1 %v4903_v32  ;;  %5491 = vmatpush2.msra.mxu0 %v5068_v40  ;;  %v5188_v32 = vld [vmem:[#allocation19 + $0x1158] sm:$0xff] }
 0x6d8   :  { %5423 = vmatprep.subr.mxu1 %v4899_v41  ;;  %5492 = vmatprep.subr.mxu0 %v5064_v42  ;;  %v5184_v41 = vld [vmem:[#allocation19 + $0x1138] sm:$0xff]  ;;  %v5183_v42 = vld [vmem:[#allocation19 + $0x1130] sm:$0xff] }
 0x6d9   :  { %5424 = vmatpush2.msra.mxu1 %v4898_v59  ;;  %5493 = vmatpush2.msra.mxu0 %v5063_v36  ;;  %v5179_v36 = vld [vmem:[#allocation19 + $0x1110] sm:$0xff] }
 0x6da   :  { %5425 = vmatprep.subr.mxu1 %v4894_v47  ;;  %5494 = vmatprep.subr.mxu0 %v5059_v51 }
 0x6db   :  { %5426 = vmatpush2.msra.mxu1 %v4893_v52  ;;  %5495 = vmatpush2.msra.mxu0 %v5058_v53  ;;  %v5173_v52 = vld [vmem:[#allocation19 + $0x10e0] sm:$0xff] }
 0x6dc   :  { %5427 = vmatprep.subr.mxu1 %v4889_v55  ;;  %5496 = vmatprep.subr.mxu0 %v5054_v56  ;;  %v5169_v55 = vld [vmem:[#allocation19 + $0x10c0] sm:$0xff]  ;;  %v5168_v56 = vld [vmem:[#allocation19 + $0x10b8] sm:$0xff] }
 0x6dd   :  { %5428 = vmatpush2.msra.mxu1 %v4888_v62  ;;  %5497 = vmatpush2.msra.mxu0 %v5053_v2  ;;  %v5164_v2 = vld [vmem:[#allocation19 + $0x1098] sm:$0xff] }
 0x6de   :  { %5429 = vmatprep.subr.mxu1 %v4884_v15  ;;  %5498 = vmatprep.subr.mxu0 %v5049_v22  ;;  %v5159_v15 = vld [vmem:[#allocation19 + $0x1070] sm:$0xff]  ;;  %v5158_v22 = vld [vmem:[#allocation19 + $0x1068] sm:$0xff] }
 0x6df   :  { %5430 = vmatpush2.msra.mxu1 %v4883_v18  ;;  %5499 = vmatpush2.msra.mxu0 %v5048_v19  ;;  %v5149_v18 = vld [vmem:[#allocation19 + $0x1020] sm:$0xff]  ;;  %v5148_v19 = vld [vmem:[#allocation19 + $0x1018] sm:$0xff] }
 0x6e0   :  { %5431 = vmatprep.subr.mxu1 %v4879_v23  ;;  %5500 = vmatprep.subr.mxu0 %v5044_v26  ;;  %v5143_v23 = vld [vmem:[#allocation19 + $0xff0] sm:$0xff] }
 0x6e1   :  { %5432 = vmatpush2.msra.mxu1 %v4878_v28  ;;  %v4272_v49 = vpop.f32.mrf.mxu1  ;;  %5501 = vmatpush2.msra.mxu0 %v5043_v3  ;;  %v5139_v26 = vld [vmem:[#allocation19 + $0xfd0] sm:$0xff]  ;;  %v5134_v28 = vld [vmem:[#allocation19 + $0xfa8] sm:$0xff]  ;;  %v5129_v3 = vld [vmem:[#allocation19 + $0xf80] sm:$0xff] }
 0x6e2   :  { %5433 = vmatprep.subr.mxu1 %v4874_v61  ;;  %v7974_v35 = vadd.f32 %v4272_v49, %v4202_v25  ;;  %5502 = vmatprep.subr.mxu0 %v5039_v30  ;;  %v5128_v30 = vld [vmem:[#allocation19 + $0xf78] sm:$0xff] }
 0x6e3   :  { %5434 = vmatpush2.msra.mxu1 %v4873_v39  ;;  %v4274_v0 = vpop.f32.mrf.mxu1  ;;  %5503 = vmatpush2.msra.mxu0 %v5038_v60  ;;  %v5123_v60 = vld [vmem:[#allocation19 + $0xf50] sm:$0xff] }
 0x6e4   :  { %v4573_v40 = vmul.f32 %v7974_v35, %v7974_v35  ;;  %5436 = vmatmul.mubr.f32.vlgmr.msra.gmra.mxu1 %v7976_v31  ;;  %v7981_v24 = vadd.f32 %v4274_v0, %v4204_v50  ;;  %5504 = vmatprep.subr.mxu0 %v5034_v45  ;;  %v5119_v45 = vld [vmem:[#allocation19 + $0xf30] sm:$0xff]  ;;  %v4565_v50 = vmul.f32 0.5, %v7974_v35  ;;  %v5114_v0 = vld [vmem:[#allocation19 + $0xf08] sm:$0xff] }
 0x6e5   :  { %5505 = vmatpush2.msra.mxu0 %v5033_v38  ;;  %5513 = vmatprep.subr.mxu1 %v5189_v11  ;;  %v5118_v38 = vld [vmem:[#allocation19 + $0xf28] sm:$0xff] }
 0x6e6   :  { %v4581_v44 = vmul.f32 %v4573_v40, %v7974_v35  ;;  %v4574_v59 = vmul.f32 %v7981_v24, %v7981_v24  ;;  %5584 = vmatprep.subr.mxu0 %v4711_v29  ;;  %5514 = vmatpush1.msra.mxu1 %v5188_v32  ;;  %v4566_v33 = vmul.f32 0.5, %v7981_v24  ;;  %v4710_v32 = vld [vmem:[#allocation19 + $0x268] sm:$0xff] }
 0x6e7   :  { %5515 = vmatprep.subr.mxu1 %v5184_v41  ;;  %v4706_v40 = vld [vmem:[#allocation19 + $0x248] sm:$0xff]  ;;  %v4705_v41 = vld [vmem:[#allocation19 + $0x240] sm:$0xff] }
 0x6e8   :  { %v4589_v47 = vmul.f32 0.044715, %v4581_v44  ;;  %v4582_v51 = vmul.f32 %v4574_v59, %v7981_v24  ;;  %5516 = vmatpush1.msra.mxu1 %v5183_v42  ;;  %v4701_v42 = vld [vmem:[#allocation19 + $0x220] sm:$0xff]  ;;  %v5268_v44 = vld [vmem:[#allocation19 + $0x13d8] sm:$0xff] }
 0x6e9   :  { %5517 = vmatprep.subr.mxu1 %v5179_v36  ;;  %v4700_v59 = vld [vmem:[#allocation19 + $0x218] sm:$0xff] }
 0x6ea   :  { %v4597_v53 = vadd.f32 %v4589_v47, %v7974_v35  ;;  %v4590_v54 = vmul.f32 0.044715, %v4582_v51  ;;  %5518 = vmatpush1.msra.mxu1 %v5178_v46  ;;  %v5269_v35 = vld [vmem:[#allocation19 + $0x13e0] sm:$0xff]  ;;  %v5264_v36 = vld [vmem:[#allocation19 + $0x13b8] sm:$0xff]  ;;  %v5263_v47 = vld [vmem:[#allocation19 + $0x13b0] sm:$0xff] }
 0x6eb   :  { %5519 = vmatprep.subr.mxu1 %v5174_v34  ;;  %v4696_v46 = vld [vmem:[#allocation19 + $0x1f8] sm:$0xff]  ;;  %v4695_v51 = vld [vmem:[#allocation19 + $0x1f0] sm:$0xff] }
 0x6ec   :  { %v4605_v57 = vmul.f32 0.7978846, %v4597_v53  ;;  %v4598_v62 = vadd.f32 %v4590_v54, %v7981_v24  ;;  %5520 = vmatpush1.msra.mxu1 %v5173_v52  ;;  %v5113_v24 = vld [vmem:[#allocation19 + $0xf00] sm:$0xff]  ;;  %v5259_v34 = vld [vmem:[#allocation19 + $0x1390] sm:$0xff]  ;;  %v5258_v53 = vld [vmem:[#allocation19 + $0x1388] sm:$0xff] }
 0x6ed   :  { %5521 = vmatprep.subr.mxu1 %v5169_v55  ;;  %v4691_v52 = vld [vmem:[#allocation19 + $0x1d0] sm:$0xff]  ;;  %v4690_v54 = vld [vmem:[#allocation19 + $0x1c8] sm:$0xff] }
 0x6ee   :  { %7104 = vtanh.f32 %v4605_v57  ;;  %v4606_v12 = vmul.f32 0.7978846, %v4598_v62  ;;  %5522 = vmatpush1.msra.mxu1 %v5168_v56  ;;  %v5254_v55 = vld [vmem:[#allocation19 + $0x1368] sm:$0xff]  ;;  %v5253_v57 = vld [vmem:[#allocation19 + $0x1360] sm:$0xff] }
 0x6ef   :  { %5523 = vmatprep.subr.mxu1 %v5164_v2  ;;  %v4686_v56 = vld [vmem:[#allocation19 + $0x1a8] sm:$0xff]  ;;  %v4685_v62 = vld [vmem:[#allocation19 + $0x1a0] sm:$0xff] }
 0x6f0   :  { %7106 = vtanh.f32 %v4606_v12  ;;  %5524 = vmatpush1.msra.mxu1 %v5163_v8  ;;  %v5249_v2 = vld [vmem:[#allocation19 + $0x1340] sm:$0xff]  ;;  %v5248_v12 = vld [vmem:[#allocation19 + $0x1338] sm:$0xff] }
 0x6f1   :  { %5525 = vmatprep.subr.mxu1 %v5159_v15  ;;  %v4681_v8 = vld [vmem:[#allocation19 + $0x180] sm:$0xff]  ;;  %v4680_v15 = vld [vmem:[#allocation19 + $0x178] sm:$0xff] }
 0x6f2   :  { %5526 = vmatpush1.msra.mxu1 %v5158_v22  ;;  %v5244_v22 = vld [vmem:[#allocation19 + $0x1318] sm:$0xff] }
 0x6f3   :  { %5527 = vmatprep.subr.mxu1 %v5154_v48  ;;  %v4676_v48 = vld [vmem:[#allocation19 + $0x158] sm:$0xff] }
 0x6f4   :  { %5528 = vmatpush1.msra.mxu1 %v5153_v16  ;;  %v5243_v16 = vld [vmem:[#allocation19 + $0x1310] sm:$0xff] }
 0x6f5   :  { %5529 = vmatprep.subr.mxu1 %v5149_v18  ;;  %v4675_v18 = vld [vmem:[#allocation19 + $0x150] sm:$0xff] }
 0x6f6   :  { %5530 = vmatpush1.msra.mxu1 %v5148_v19  ;;  %v5239_v19 = vld [vmem:[#allocation19 + $0x12f0] sm:$0xff] }
 0x6f7   :  { %5531 = vmatprep.subr.mxu1 %v5144_v21  ;;  %v4671_v21 = vld [vmem:[#allocation19 + $0x130] sm:$0xff] }
 0x6f8   :  { %5532 = vmatpush1.msra.mxu1 %v5143_v23  ;;  %v5238_v23 = vld [vmem:[#allocation19 + $0x12e8] sm:$0xff] }
 0x6f9   :  { %5533 = vmatprep.subr.mxu1 %v5139_v26  ;;  %v4670_v26 = vld [vmem:[#allocation19 + $0x128] sm:$0xff] }
 0x6fa   :  { %5534 = vmatpush1.msra.mxu1 %v5138_v14  ;;  %v5234_v14 = vld [vmem:[#allocation19 + $0x12c8] sm:$0xff] }
 0x6fb   :  { %v7105_v61 = vpop.eup %7104  ;;  %5535 = vmatprep.subr.mxu1 %v5134_v28  ;;  %v4666_v28 = vld [vmem:[#allocation19 + $0x108] sm:$0xff] }
 0x6fc   :  { %5536 = vmatpush1.msra.mxu1 %v5133_v17  ;;  %v4621_v25 = vadd.f32 1.0, %v7105_v61  ;;  %v5233_v17 = vld [vmem:[#allocation19 + $0x12c0] sm:$0xff] }
 0x6fd   :  { %v7107_v39 = vpop.eup %7106  ;;  %5537 = vmatprep.subr.mxu1 %v5129_v3  ;;  %v4665_v3 = vld [vmem:[#allocation19 + $0x100] sm:$0xff] }
 0x6fe   :  { %v4622_v49 = vadd.f32 1.0, %v7107_v39  ;;  %5538 = vmatpush1.msra.mxu1 %v5128_v30  ;;  %v7993_v29 = vmul.f32 %v4621_v25, %v4565_v50  ;;  %v5229_v61 = vld [vmem:[#allocation19 + $0x12a0] sm:$0xff]  ;;  %v4660_v39 = vld [vmem:[#allocation19 + $0xd8] sm:$0xff]  ;;  %v4651_v50 = vld [vmem:[#allocation19 + $0x90] sm:$0xff] }
 0x6ff   :  { %5539 = vmatprep.subr.mxu1 %v5124_v13  ;;  %v4661_v30 = vld [vmem:[#allocation19 + $0xe0] sm:$0xff]  ;;  %v5228_v13 = vld [vmem:[#allocation19 + $0x1298] sm:$0xff] }
 0x700   :  { %v7991_v11 = vmul.f32 %v4622_v49, %v4566_v33  ;;  %5540 = vmatpush1.msra.mxu1 %v5123_v60  ;;  %v5224_v25 = vld [vmem:[#allocation19 + $0x1278] sm:$0xff]  ;;  %v5223_v33 = vld [vmem:[#allocation19 + $0x1270] sm:$0xff] }
 0x701   :  { %5541 = vmatprep.subr.mxu1 %v5119_v45  ;;  %v4656_v60 = vld [vmem:[#allocation19 + $0xb8] sm:$0xff]  ;;  %v4655_v49 = vld [vmem:[#allocation19 + $0xb0] sm:$0xff] }
 0x702   :  { %5506 = vmatprep.mubr.f32.mxu0 %v7991_v11  ;;  %5542 = vmatpush1.msra.mxu1 %v5118_v38  ;;  %v5219_v45 = vld [vmem:[#allocation19 + $0x1250] sm:$0xff]  ;;  %v5218_v38 = vld [vmem:[#allocation19 + $0x1248] sm:$0xff] }
 0x703   :  { %5507 = vmatmul.mubr.f32.vlgmr.msra.gmra.mxu0 %v7993_v29  ;;  %5543 = vmatprep.subr.mxu1 %v5114_v0  ;;  %v4650_v0 = vld [vmem:[#allocation19 + $0x88] sm:$0xff] }
 0x704   :  { %5585 = vmatpush1.msra.mxu0 %v4710_v32  ;;  %5648 = vmatprep.mubr.f32.mxu0 %v7934_v58  ;;  %v5214_v32 = vld [vmem:[#allocation19 + $0x1228] sm:$0xff] }
 0x705   :  { %5586 = vmatprep.subr.mxu0 %v4706_v40  ;;  %5544 = vmatpush1.msra.mxu1 %v5113_v24  ;;  %v4646_v40 = vld [vmem:[#allocation19 + $0x68] sm:$0xff]  ;;  %v5213_v24 = vld [vmem:[#allocation19 + $0x1220] sm:$0xff] }
 0x706   :  { %5587 = vmatpush1.msra.mxu0 %v4705_v41  ;;  %5545 = vmatprep.subr.mxu1 %v5269_v35  ;;  %v4645_v41 = vld [vmem:[#allocation19 + $0x60] sm:$0xff] }
 0x707   :  { %5588 = vmatprep.subr.mxu0 %v4701_v42  ;;  %5546 = vmatpush2.msra.mxu1 %v5268_v44  ;;  %v5209_v35 = vld [vmem:[#allocation19 + $0x1200] sm:$0xff]  ;;  %v5208_v44 = vld [vmem:[#allocation19 + $0x11f8] sm:$0xff] }
 0x708   :  { %5589 = vmatpush1.msra.mxu0 %v4700_v59  ;;  %5547 = vmatprep.subr.mxu1 %v5264_v36  ;;  %v4641_v42 = vld [vmem:[#allocation19 + $0x40] sm:$0xff]  ;;  %v4640_v59 = vld [vmem:[#allocation19 + $0x38] sm:$0xff] }
 0x709   :  { %5590 = vmatprep.subr.mxu0 %v4696_v46  ;;  %5548 = vmatpush2.msra.mxu1 %v5263_v47  ;;  %v5204_v36 = vld [vmem:[#allocation19 + $0x11d8] sm:$0xff]  ;;  %v5203_v47 = vld [vmem:[#allocation19 + $0x11d0] sm:$0xff] }
 0x70a   :  { %5591 = vmatpush1.msra.mxu0 %v4695_v51  ;;  %5549 = vmatprep.subr.mxu1 %v5259_v34  ;;  %v4636_v46 = vld [vmem:[#allocation19 + $0x18] sm:$0xff]  ;;  %v4635_v51 = vld [vmem:[#allocation19 + $0x10] sm:$0xff] }
 0x70b   :  { %5592 = vmatprep.subr.mxu0 %v4691_v52  ;;  %5550 = vmatpush2.msra.mxu1 %v5258_v53  ;;  %v5199_v34 = vld [vmem:[#allocation19 + $0x11b0] sm:$0xff]  ;;  %v5198_v53 = vld [vmem:[#allocation19 + $0x11a8] sm:$0xff] }
 0x70c   :  { %5593 = vmatpush1.msra.mxu0 %v4690_v54  ;;  %5551 = vmatprep.subr.mxu1 %v5254_v55  ;;  %v4791_v52 = vld [vmem:[#allocation19 + $0x4f0] sm:$0xff]  ;;  %v4790_v54 = vld [vmem:[#allocation19 + $0x4e8] sm:$0xff] }
 0x70d   :  { %5594 = vmatprep.subr.mxu0 %v4686_v56  ;;  %5552 = vmatpush2.msra.mxu1 %v5253_v57  ;;  %v5194_v55 = vld [vmem:[#allocation19 + $0x1188] sm:$0xff]  ;;  %v5193_v57 = vld [vmem:[#allocation19 + $0x1180] sm:$0xff] }
 0x70e   :  { %5595 = vmatpush1.msra.mxu0 %v4685_v62  ;;  %5553 = vmatprep.subr.mxu1 %v5249_v2  ;;  %v4786_v56 = vld [vmem:[#allocation19 + $0x4c8] sm:$0xff]  ;;  %v4785_v62 = vld [vmem:[#allocation19 + $0x4c0] sm:$0xff]  ;;  %v4871_v2 = vld [vmem:[#allocation19 + $0x770] sm:$0xff] }
 0x70f   :  { %5596 = vmatprep.subr.mxu0 %v4681_v8  ;;  %5554 = vmatpush2.msra.mxu1 %v5248_v12  ;;  %v4781_v8 = vld [vmem:[#allocation19 + $0x4a0] sm:$0xff]  ;;  %v4780_v12 = vld [vmem:[#allocation19 + $0x498] sm:$0xff] }
 0x710   :  { %5597 = vmatpush1.msra.mxu0 %v4680_v15  ;;  %5555 = vmatprep.subr.mxu1 %v5244_v22  ;;  %v4776_v15 = vld [vmem:[#allocation19 + $0x478] sm:$0xff]  ;;  %v4775_v22 = vld [vmem:[#allocation19 + $0x470] sm:$0xff] }
 0x711   :  { %5598 = vmatprep.subr.mxu0 %v4676_v48  ;;  %5556 = vmatpush2.msra.mxu1 %v5243_v16  ;;  %v4771_v48 = vld [vmem:[#allocation19 + $0x450] sm:$0xff]  ;;  %v4770_v16 = vld [vmem:[#allocation19 + $0x448] sm:$0xff] }
 0x712   :  { %5599 = vmatpush1.msra.mxu0 %v4675_v18  ;;  %5557 = vmatprep.subr.mxu1 %v5239_v19  ;;  %v4766_v18 = vld [vmem:[#allocation19 + $0x428] sm:$0xff]  ;;  %v4765_v19 = vld [vmem:[#allocation19 + $0x420] sm:$0xff] }
 0x713   :  { %5600 = vmatprep.subr.mxu0 %v4671_v21  ;;  %5558 = vmatpush2.msra.mxu1 %v5238_v23  ;;  %v4761_v21 = vld [vmem:[#allocation19 + $0x400] sm:$0xff]  ;;  %v4760_v23 = vld [vmem:[#allocation19 + $0x3f8] sm:$0xff] }
 0x714   :  { %5601 = vmatpush1.msra.mxu0 %v4670_v26  ;;  %5559 = vmatprep.subr.mxu1 %v5234_v14  ;;  %v4756_v26 = vld [vmem:[#allocation19 + $0x3d8] sm:$0xff]  ;;  %v4755_v14 = vld [vmem:[#allocation19 + $0x3d0] sm:$0xff] }
 0x715   :  { %5602 = vmatprep.subr.mxu0 %v4666_v28  ;;  %5560 = vmatpush2.msra.mxu1 %v5233_v17  ;;  %v4751_v28 = vld [vmem:[#allocation19 + $0x3b0] sm:$0xff]  ;;  %v4750_v17 = vld [vmem:[#allocation19 + $0x3a8] sm:$0xff] }
 0x716   :  { %5603 = vmatpush1.msra.mxu0 %v4665_v3  ;;  %5561 = vmatprep.subr.mxu1 %v5229_v61  ;;  %v4746_v3 = vld [vmem:[#allocation19 + $0x388] sm:$0xff]  ;;  %v4745_v61 = vld [vmem:[#allocation19 + $0x380] sm:$0xff] }
 0x717   :  { %5604 = vmatprep.subr.mxu0 %v4661_v30  ;;  %5562 = vmatpush2.msra.mxu1 %v5228_v13  ;;  %v4741_v30 = vld [vmem:[#allocation19 + $0x360] sm:$0xff]  ;;  %v4740_v13 = vld [vmem:[#allocation19 + $0x358] sm:$0xff] }
 0x718   :  { %5605 = vmatpush1.msra.mxu0 %v4660_v39  ;;  %5563 = vmatprep.subr.mxu1 %v5224_v25  ;;  %v4736_v39 = vld [vmem:[#allocation19 + $0x338] sm:$0xff]  ;;  %v4735_v25 = vld [vmem:[#allocation19 + $0x330] sm:$0xff] }
 0x719   :  { %5606 = vmatprep.subr.mxu0 %v4656_v60  ;;  %5564 = vmatpush2.msra.mxu1 %v5223_v33  ;;  %v4731_v60 = vld [vmem:[#allocation19 + $0x310] sm:$0xff]  ;;  %v4730_v33 = vld [vmem:[#allocation19 + $0x308] sm:$0xff] }
 0x71a   :  { %5607 = vmatpush1.msra.mxu0 %v4655_v49  ;;  %5565 = vmatprep.subr.mxu1 %v5219_v45  ;;  %v4726_v49 = vld [vmem:[#allocation19 + $0x2e8] sm:$0xff]  ;;  %v4725_v45 = vld [vmem:[#allocation19 + $0x2e0] sm:$0xff] }
 0x71b   :  { %5608 = vmatprep.subr.mxu0 %v4651_v50  ;;  %5566 = vmatpush2.msra.mxu1 %v5218_v38  ;;  %v4721_v50 = vld [vmem:[#allocation19 + $0x2c0] sm:$0xff]  ;;  %v4720_v38 = vld [vmem:[#allocation19 + $0x2b8] sm:$0xff] }
 0x71c   :  { %5609 = vmatpush1.msra.mxu0 %v4650_v0  ;;  %5567 = vmatprep.subr.mxu1 %v5214_v32  ;;  %v4716_v0 = vld [vmem:[#allocation19 + $0x298] sm:$0xff]  ;;  %v4715_v32 = vld [vmem:[#allocation19 + $0x290] sm:$0xff] }
 0x71d   :  { %5610 = vmatprep.subr.mxu0 %v4646_v40  ;;  %5568 = vmatpush2.msra.mxu1 %v5213_v24  ;;  %v5031_v40 = vld [vmem:[#allocation19 + $0xc70] sm:$0xff]  ;;  %v5030_v24 = vld [vmem:[#allocation19 + $0xc68] sm:$0xff] }
 0x71e   :  { %5611 = vmatpush1.msra.mxu0 %v4645_v41  ;;  %5569 = vmatprep.subr.mxu1 %v5209_v35  ;;  %v5026_v41 = vld [vmem:[#allocation19 + $0xc48] sm:$0xff]  ;;  %v5025_v35 = vld [vmem:[#allocation19 + $0xc40] sm:$0xff] }
 0x71f   :  { %5612 = vmatprep.subr.mxu0 %v4641_v42  ;;  %5570 = vmatpush2.msra.mxu1 %v5208_v44  ;;  %v5021_v42 = vld [vmem:[#allocation19 + $0xc20] sm:$0xff]  ;;  %v5020_v44 = vld [vmem:[#allocation19 + $0xc18] sm:$0xff] }
 0x720   :  { %5613 = vmatpush1.msra.mxu0 %v4640_v59  ;;  %5571 = vmatprep.subr.mxu1 %v5204_v36  ;;  %v5016_v59 = vld [vmem:[#allocation19 + $0xbf8] sm:$0xff]  ;;  %v5015_v36 = vld [vmem:[#allocation19 + $0xbf0] sm:$0xff] }
 0x721   :  { %5614 = vmatprep.subr.mxu0 %v4636_v46  ;;  %5572 = vmatpush2.msra.mxu1 %v5203_v47  ;;  %v5011_v46 = vld [vmem:[#allocation19 + $0xbd0] sm:$0xff]  ;;  %v5010_v47 = vld [vmem:[#allocation19 + $0xbc8] sm:$0xff] }
 0x722   :  { %5615 = vmatpush1.msra.mxu0 %v4635_v51  ;;  %5573 = vmatprep.subr.mxu1 %v5199_v34  ;;  %v5006_v51 = vld [vmem:[#allocation19 + $0xba8] sm:$0xff]  ;;  %v5005_v34 = vld [vmem:[#allocation19 + $0xba0] sm:$0xff] }
 0x723   :  { %5616 = vmatprep.subr.mxu0 %v4791_v52  ;;  %5574 = vmatpush2.msra.mxu1 %v5198_v53  ;;  %v5001_v52 = vld [vmem:[#allocation19 + $0xb80] sm:$0xff]  ;;  %v5000_v53 = vld [vmem:[#allocation19 + $0xb78] sm:$0xff] }
 0x724   :  { %5617 = vmatpush2.msra.mxu0 %v4790_v54  ;;  %5575 = vmatprep.subr.mxu1 %v5194_v55  ;;  %v4996_v54 = vld [vmem:[#allocation19 + $0xb58] sm:$0xff]  ;;  %v4995_v55 = vld [vmem:[#allocation19 + $0xb50] sm:$0xff] }
 0x725   :  { %5618 = vmatprep.subr.mxu0 %v4786_v56  ;;  %5576 = vmatpush2.msra.mxu1 %v5193_v57  ;;  %v4991_v56 = vld [vmem:[#allocation19 + $0xb30] sm:$0xff]  ;;  %v4990_v57 = vld [vmem:[#allocation19 + $0xb28] sm:$0xff] }
 0x726   :  { %5619 = vmatpush2.msra.mxu0 %v4785_v62  ;;  %5655 = vmatprep.subr.mxu1 %v4871_v2  ;;  %v4986_v62 = vld [vmem:[#allocation19 + $0xb08] sm:$0xff]  ;;  %v4985_v2 = vld [vmem:[#allocation19 + $0xb00] sm:$0xff] }
 0x727   :  { %5620 = vmatprep.subr.mxu0 %v4781_v8  ;;  %v4981_v8 = vld [vmem:[#allocation19 + $0xae0] sm:$0xff] }
 0x728   :  { %5621 = vmatpush2.msra.mxu0 %v4780_v12  ;;  %v4980_v12 = vld [vmem:[#allocation19 + $0xad8] sm:$0xff] }
 0x729   :  { %5622 = vmatprep.subr.mxu0 %v4776_v15  ;;  %v4976_v15 = vld [vmem:[#allocation19 + $0xab8] sm:$0xff] }
 0x72a   :  { %5623 = vmatpush2.msra.mxu0 %v4775_v22  ;;  %v4975_v22 = vld [vmem:[#allocation19 + $0xab0] sm:$0xff] }
 0x72b   :  { %5624 = vmatprep.subr.mxu0 %v4771_v48  ;;  %v4343_v48 = vpop.f32.mrf.mxu0 }
 0x72c   :  { %5625 = vmatpush2.msra.mxu0 %v4770_v16  ;;  %v4971_v16 = vld [vmem:[#allocation19 + $0xa90] sm:$0xff] }
 0x72d   :  { %5626 = vmatprep.subr.mxu0 %v4766_v18  ;;  %v3412_v18 = vrot.slane %v7966_v27, %v1421_v63  ;;  %v4956_v63 = vld [vmem:[#allocation19 + $0xa18] sm:$0xff] }
 0x72e   :  { %5627 = vmatpush2.msra.mxu0 %v4765_v19  ;;  %v4970_v19 = vld [vmem:[#allocation19 + $0xa88] sm:$0xff] }
 0x72f   :  { %5628 = vmatprep.subr.mxu0 %v4761_v21  ;;  %v4414_v21 = vpop.f32.mrf.mxu1 }
 0x730   :  { %5629 = vmatpush2.msra.mxu0 %v4760_v23  ;;  %v4966_v23 = vld [vmem:[#allocation19 + $0xa68] sm:$0xff] }
 0x731   :  { %5630 = vmatprep.subr.mxu0 %v4756_v26  ;;  %v3416_v26 = vrot.slane %v7966_v27, %v1425_v4  ;;  %v5110_v4 = vld [vmem:[#allocation19 + $0xee8] sm:$0xff] }
 0x732   :  { %5631 = vmatpush2.msra.mxu0 %v4755_v14  ;;  %v4965_v14 = vld [vmem:[#allocation19 + $0xa60] sm:$0xff]  ;;  %v5106_v27 = vld [vmem:[#allocation19 + $0xec8] sm:$0xff] }
 0x733   :  { %5632 = vmatprep.subr.mxu0 %v4751_v28  ;;  %v4345_v28 = vpop.f32.mrf.mxu0 }
 0x734   :  { %5633 = vmatpush2.msra.mxu0 %v4750_v17  ;;  %v4961_v17 = vld [vmem:[#allocation19 + $0xa40] sm:$0xff] }
 0x735   :  { %5634 = vmatprep.subr.mxu0 %v4746_v3  ;;  %v4344_v3 = vadd.f32 %v4343_v48, %v3412_v18  ;;  %v5066_v18 = vld [vmem:[#allocation19 + $0xd88] sm:$0xff] }
 0x736   :  { %5635 = vmatpush2.msra.mxu0 %v4745_v61  ;;  %v4960_v61 = vld [vmem:[#allocation19 + $0xa38] sm:$0xff] }
 0x737   :  { %5636 = vmatprep.subr.mxu0 %v4741_v30  ;;  %v4416_v30 = vpop.f32.mrf.mxu1 }
 0x738   :  { %5637 = vmatpush2.msra.mxu0 %v4740_v13  ;;  %v4346_v13 = vadd.f32 %v4345_v28, %v3416_v26  ;;  %v5056_v26 = vld [vmem:[#allocation19 + $0xd38] sm:$0xff]  ;;  %v5051_v28 = vld [vmem:[#allocation19 + $0xd10] sm:$0xff] }
 0x739   :  { %5638 = vmatprep.subr.mxu0 %v4736_v39  ;;  %v4415_v39 = vadd.f32 %v4414_v21, %v4344_v3  ;;  %v5061_v21 = vld [vmem:[#allocation19 + $0xd60] sm:$0xff]  ;;  %v5046_v3 = vld [vmem:[#allocation19 + $0xce8] sm:$0xff] }
 0x73a   :  { %5639 = vmatpush2.msra.mxu0 %v4735_v25  ;;  %v4955_v25 = vld [vmem:[#allocation19 + $0xa10] sm:$0xff] }
 0x73b   :  { %5640 = vmatprep.subr.mxu0 %v4731_v60  ;;  %v4485_v60 = vpop.f32.mrf.mxu0 }
 0x73c   :  { %5641 = vmatpush2.msra.mxu0 %v4730_v33  ;;  %v4417_v33 = vadd.f32 %v4416_v30, %v4346_v13  ;;  %v5041_v30 = vld [vmem:[#allocation19 + $0xcc0] sm:$0xff] }
 0x73d   :  { %5642 = vmatprep.subr.mxu0 %v4726_v49  ;;  %v4486_v49 = vadd.f32 %v4485_v60, %v4415_v39  ;;  %v5036_v39 = vld [vmem:[#allocation19 + $0xc98] sm:$0xff] }
 0x73e   :  { %5643 = vmatpush2.msra.mxu0 %v4725_v45  ;;  %v5105_v45 = vld [vmem:[#allocation19 + $0xec0] sm:$0xff] }
 0x73f   :  { %5644 = vmatprep.subr.mxu0 %v4721_v50  ;;  %v4487_v50 = vpop.f32.mrf.mxu0 }
 0x740   :  { %5645 = vmatpush2.msra.mxu0 %v4720_v38 }
 0x741   :  { %5646 = vmatprep.subr.mxu0 %v4716_v0  ;;  %v5101_v0 = vld [vmem:[#allocation19 + $0xea0] sm:$0xff] }
 0x742   :  { %5647 = vmatpush2.msra.mxu0 %v4715_v32 }
 0x743   :  { %5649 = vmatmul.mubr.f32.vlgmr.msra.gmra.mxu0 %v7954_v37  ;;  %5726 = vmatprep.subr.mxu0 %v5031_v40  ;;  %v4488_v40 = vadd.f32 %v4487_v50, %v4417_v33  ;;  %v4787_v50 = vld [vmem:[#allocation19 + $0x4d0] sm:$0xff] }
 0x744   :  { %5727 = vmatpush1.msra.mxu0 %v5030_v24  ;;  %5790 = vmatprep.mubr.f32.mxu0 %v7991_v11  ;;  %v5100_v24 = vld [vmem:[#allocation19 + $0xe98] sm:$0xff] }
 0x745   :  { %5728 = vmatprep.subr.mxu0 %v5026_v41 }
 0x746   :  { %5729 = vmatpush1.msra.mxu0 %v5025_v35  ;;  %v5096_v35 = vld [vmem:[#allocation19 + $0xe78] sm:$0xff] }
 0x747   :  { %5730 = vmatprep.subr.mxu0 %v5021_v42 }
 0x748   :  { %5731 = vmatpush1.msra.mxu0 %v5020_v44 }
 0x749   :  { %5732 = vmatprep.subr.mxu0 %v5016_v59  ;;  %v5095_v59 = vld [vmem:[#allocation19 + $0xe70] sm:$0xff] }
 0x74a   :  { %5733 = vmatpush1.msra.mxu0 %v5015_v36  ;;  %v5091_v36 = vld [vmem:[#allocation19 + $0xe50] sm:$0xff] }
 0x74b   :  { %5734 = vmatprep.subr.mxu0 %v5011_v46 }
 0x74c   :  { %5735 = vmatpush1.msra.mxu0 %v5010_v47 }
 0x74d   :  { %5736 = vmatprep.subr.mxu0 %v5006_v51  ;;  %v5090_v51 = vld [vmem:[#allocation19 + $0xe48] sm:$0xff] }
 0x74e   :  { %5737 = vmatpush1.msra.mxu0 %v5005_v34  ;;  %v5086_v34 = vld [vmem:[#allocation19 + $0xe28] sm:$0xff] }
 0x74f   :  { %5738 = vmatprep.subr.mxu0 %v5001_v52 }
 0x750   :  { %5739 = vmatpush1.msra.mxu0 %v5000_v53 }
 0x751   :  { %5740 = vmatprep.subr.mxu0 %v4996_v54  ;;  %v5085_v54 = vld [vmem:[#allocation19 + $0xe20] sm:$0xff] }
 0x752   :  { %5741 = vmatpush1.msra.mxu0 %v4995_v55  ;;  %v5081_v55 = vld [vmem:[#allocation19 + $0xe00] sm:$0xff] }
 0x753   :  { %5742 = vmatprep.subr.mxu0 %v4991_v56 }
 0x754   :  { %5743 = vmatpush1.msra.mxu0 %v4990_v57 }
 0x755   :  { %5744 = vmatprep.subr.mxu0 %v4986_v62  ;;  %v5080_v62 = vld [vmem:[#allocation19 + $0xdf8] sm:$0xff] }
 0x756   :  { %5745 = vmatpush1.msra.mxu0 %v4985_v2  ;;  %v5076_v2 = vld [vmem:[#allocation19 + $0xdd8] sm:$0xff] }
 0x757   :  { %5746 = vmatprep.subr.mxu0 %v4981_v8 }
 0x758   :  { %5747 = vmatpush1.msra.mxu0 %v4980_v12 }
 0x759   :  { %5748 = vmatprep.subr.mxu0 %v4976_v15  ;;  %v5075_v15 = vld [vmem:[#allocation19 + $0xdd0] sm:$0xff] }
 0x75a   :  { %5749 = vmatpush1.msra.mxu0 %v4975_v22  ;;  %v5071_v22 = vld [vmem:[#allocation19 + $0xdb0] sm:$0xff] }
 0x75b   :  { %5750 = vmatprep.subr.mxu0 %v4971_v16  ;;  %v5070_v16 = vld [vmem:[#allocation19 + $0xda8] sm:$0xff] }
 0x75c   :  { %5751 = vmatpush1.msra.mxu0 %v4970_v19  ;;  %v5065_v19 = vld [vmem:[#allocation19 + $0xd80] sm:$0xff] }
 0x75d   :  { %5752 = vmatprep.subr.mxu0 %v4966_v23  ;;  %v5060_v23 = vld [vmem:[#allocation19 + $0xd58] sm:$0xff] }
 0x75e   :  { %5753 = vmatpush1.msra.mxu0 %v4965_v14  ;;  %v5055_v14 = vld [vmem:[#allocation19 + $0xd30] sm:$0xff] }
 0x75f   :  { %5754 = vmatprep.subr.mxu0 %v4961_v17  ;;  %v5050_v17 = vld [vmem:[#allocation19 + $0xd08] sm:$0xff] }
 0x760   :  { %5755 = vmatpush1.msra.mxu0 %v4960_v61  ;;  %v5045_v61 = vld [vmem:[#allocation19 + $0xce0] sm:$0xff] }
 0x761   :  { %5756 = vmatprep.subr.mxu0 %v4956_v63  ;;  %v5040_v63 = vld [vmem:[#allocation19 + $0xcb8] sm:$0xff] }
 0x762   :  { %5757 = vmatpush1.msra.mxu0 %v4955_v25  ;;  %v5035_v25 = vld [vmem:[#allocation19 + $0xc90] sm:$0xff] }
 0x763   :  { %5758 = vmatprep.subr.mxu0 %v5111_v5  ;;  %v4792_v5 = vld [vmem:[#allocation19 + $0x4f8] sm:$0xff] }
 0x764   :  { %v4556_v38 = vpop.f32.mrf.mxu1  ;;  %5759 = vmatpush2.msra.mxu0 %v5110_v4 }
 0x765   :  { %v8006_v32 = vadd.f32 %v4556_v38, %v4486_v49  ;;  %5760 = vmatprep.subr.mxu0 %v5106_v27  ;;  %v4712_v49 = vld [vmem:[#allocation19 + $0x278] sm:$0xff] }
 0x766   :  { %v4558_v41 = vpop.f32.mrf.mxu1  ;;  %5761 = vmatpush2.msra.mxu0 %v5105_v45 }
 0x767   :  { %v4575_v42 = vmul.f32 %v8006_v32, %v8006_v32  ;;  %v8010_v44 = vadd.f32 %v4558_v41, %v4488_v40  ;;  %5762 = vmatprep.subr.mxu0 %v5101_v0  ;;  %v4567_v45 = vmul.f32 0.5, %v8006_v32  ;;  %v4707_v0 = vld [vmem:[#allocation19 + $0x250] sm:$0xff]  ;;  %v4866_v41 = vld [vmem:[#allocation19 + $0x748] sm:$0xff] }
 0x768   :  { %5763 = vmatpush2.msra.mxu0 %v5100_v24  ;;  %v4870_v24 = vld [vmem:[#allocation19 + $0x768] sm:$0xff] }
 0x769   :  { %v4583_v46 = vmul.f32 %v4575_v42, %v8006_v32  ;;  %v4576_v47 = vmul.f32 %v8010_v44, %v8010_v44  ;;  %5764 = vmatprep.subr.mxu0 %v5096_v35  ;;  %v4568_v4 = vmul.f32 0.5, %v8010_v44  ;;  %v4782_v35 = vld [vmem:[#allocation19 + $0x4a8] sm:$0xff] }
 0x76a   :  { %5765 = vmatpush2.msra.mxu0 %v5095_v59  ;;  %v4702_v42 = vld [vmem:[#allocation19 + $0x228] sm:$0xff]  ;;  %v4777_v59 = vld [vmem:[#allocation19 + $0x480] sm:$0xff] }
 0x76b   :  { %v4591_v52 = vmul.f32 0.044715, %v4583_v46  ;;  %v4584_v53 = vmul.f32 %v4576_v47, %v8010_v44  ;;  %5766 = vmatprep.subr.mxu0 %v5091_v36  ;;  %v4860_v36 = vld [vmem:[#allocation19 + $0x718] sm:$0xff]  ;;  %v4697_v46 = vld [vmem:[#allocation19 + $0x200] sm:$0xff] }
 0x76c   :  { %5767 = vmatpush2.msra.mxu0 %v5090_v51  ;;  %v4772_v47 = vld [vmem:[#allocation19 + $0x458] sm:$0xff]  ;;  %v4855_v51 = vld [vmem:[#allocation19 + $0x6f0] sm:$0xff] }
 0x76d   :  { %v4599_v56 = vadd.f32 %v4591_v52, %v8006_v32  ;;  %v4592_v57 = vmul.f32 0.044715, %v4584_v53  ;;  %5768 = vmatprep.subr.mxu0 %v5086_v34  ;;  %v4865_v32 = vld [vmem:[#allocation19 + $0x740] sm:$0xff]  ;;  %v4692_v34 = vld [vmem:[#allocation19 + $0x1d8] sm:$0xff]  ;;  %v4851_v52 = vld [vmem:[#allocation19 + $0x6d0] sm:$0xff] }
 0x76e   :  { %5769 = vmatpush2.msra.mxu0 %v5085_v54  ;;  %v4767_v53 = vld [vmem:[#allocation19 + $0x430] sm:$0xff]  ;;  %v4850_v54 = vld [vmem:[#allocation19 + $0x6c8] sm:$0xff] }
 0x76f   :  { %v4607_v8 = vmul.f32 0.7978846, %v4599_v56  ;;  %v4600_v12 = vadd.f32 %v4592_v57, %v8010_v44  ;;  %5770 = vmatprep.subr.mxu0 %v5081_v55  ;;  %v4861_v44 = vld [vmem:[#allocation19 + $0x720] sm:$0xff]  ;;  %v4687_v55 = vld [vmem:[#allocation19 + $0x1b0] sm:$0xff]  ;;  %v4846_v56 = vld [vmem:[#allocation19 + $0x6a8] sm:$0xff] }
 0x770   :  { %5771 = vmatpush2.msra.mxu0 %v5080_v62  ;;  %v4762_v57 = vld [vmem:[#allocation19 + $0x408] sm:$0xff]  ;;  %v4845_v62 = vld [vmem:[#allocation19 + $0x6a0] sm:$0xff] }
 0x771   :  { %7108 = vtanh.f32 %v4607_v8  ;;  %v4608_v48 = vmul.f32 0.7978846, %v4600_v12  ;;  %5772 = vmatprep.subr.mxu0 %v5076_v2  ;;  %v4682_v2 = vld [vmem:[#allocation19 + $0x188] sm:$0xff]  ;;  %v4841_v8 = vld [vmem:[#allocation19 + $0x680] sm:$0xff] }
 0x772   :  { %5773 = vmatpush2.msra.mxu0 %v5075_v15  ;;  %v4757_v12 = vld [vmem:[#allocation19 + $0x3e0] sm:$0xff]  ;;  %v4840_v15 = vld [vmem:[#allocation19 + $0x678] sm:$0xff] }
 0x773   :  { %5774 = vmatprep.subr.mxu0 %v5071_v22  ;;  %7110 = vtanh.f32 %v4608_v48  ;;  %v4677_v22 = vld [vmem:[#allocation19 + $0x160] sm:$0xff]  ;;  %v4836_v48 = vld [vmem:[#allocation19 + $0x658] sm:$0xff] }
 0x774   :  { %5775 = vmatpush2.msra.mxu0 %v5070_v16  ;;  %v4752_v16 = vld [vmem:[#allocation19 + $0x3b8] sm:$0xff] }
 0x775   :  { %5776 = vmatprep.subr.mxu0 %v5066_v18  ;;  %v4835_v18 = vld [vmem:[#allocation19 + $0x650] sm:$0xff] }
 0x776   :  { %5777 = vmatpush2.msra.mxu0 %v5065_v19  ;;  %v4672_v19 = vld [vmem:[#allocation19 + $0x138] sm:$0xff] }
 0x777   :  { %5778 = vmatprep.subr.mxu0 %v5061_v21  ;;  %v4831_v21 = vld [vmem:[#allocation19 + $0x630] sm:$0xff] }
 0x778   :  { %5779 = vmatpush2.msra.mxu0 %v5060_v23  ;;  %v4747_v23 = vld [vmem:[#allocation19 + $0x390] sm:$0xff] }
 0x779   :  { %5780 = vmatprep.subr.mxu0 %v5056_v26  ;;  %v4830_v26 = vld [vmem:[#allocation19 + $0x628] sm:$0xff] }
 0x77a   :  { %5781 = vmatpush2.msra.mxu0 %v5055_v14  ;;  %v4667_v14 = vld [vmem:[#allocation19 + $0x110] sm:$0xff] }
 0x77b   :  { %5782 = vmatprep.subr.mxu0 %v5051_v28  ;;  %v4826_v28 = vld [vmem:[#allocation19 + $0x608] sm:$0xff] }
 0x77c   :  { %5783 = vmatpush2.msra.mxu0 %v5050_v17  ;;  %v4742_v17 = vld [vmem:[#allocation19 + $0x368] sm:$0xff] }
 0x77d   :  { %5784 = vmatprep.subr.mxu0 %v5046_v3  ;;  %v4825_v3 = vld [vmem:[#allocation19 + $0x600] sm:$0xff] }
 0x77e   :  { %v7109_v13 = vpop.eup %7108  ;;  %5785 = vmatpush2.msra.mxu0 %v5045_v61  ;;  %v4662_v61 = vld [vmem:[#allocation19 + $0xe8] sm:$0xff] }
 0x77f   :  { %5786 = vmatprep.subr.mxu0 %v5041_v30  ;;  %v4623_v33 = vadd.f32 1.0, %v7109_v13  ;;  %v4821_v30 = vld [vmem:[#allocation19 + $0x5e0] sm:$0xff]  ;;  %v4820_v13 = vld [vmem:[#allocation19 + $0x5d8] sm:$0xff] }
 0x780   :  { %v7111_v60 = vpop.eup %7110  ;;  %5787 = vmatpush2.msra.mxu0 %v5040_v63  ;;  %v4737_v63 = vld [vmem:[#allocation19 + $0x340] sm:$0xff] }
 0x781   :  { %5788 = vmatprep.subr.mxu0 %v5036_v39  ;;  %v4624_v27 = vadd.f32 1.0, %v7111_v60  ;;  %v8023_v40 = vmul.f32 %v4623_v33, %v4567_v45  ;;  %v4657_v39 = vld [vmem:[#allocation19 + $0xc0] sm:$0xff]  ;;  %v4732_v60 = vld [vmem:[#allocation19 + $0x318] sm:$0xff]  ;;  %v4647_v45 = vld [vmem:[#allocation19 + $0x70] sm:$0xff] }
 0x782   :  { %5789 = vmatpush2.msra.mxu0 %v5035_v25  ;;  %v4816_v25 = vld [vmem:[#allocation19 + $0x5b8] sm:$0xff] }
 0x783   :  { %v8020_v38 = vmul.f32 %v4624_v27, %v4568_v4  ;;  %5791 = vmatmul.mubr.f32.vlgmr.msra.gmra.mxu0 %v7993_v29  ;;  %6655 = vmatprep.subr.mxu0 %v4792_v5  ;;  %v4815_v5 = vld [vmem:[#allocation19 + $0x5b0] sm:$0xff]  ;;  %v4652_v33 = vld [vmem:[#allocation19 + $0x98] sm:$0xff] }
 0x784   :  { %6656 = vmatpush3.msra.mxu0 %v4712_v49  ;;  %5932 = vmatprep.mubr.f32.mxu0 %v7934_v58  ;;  %v4856_v58 = vld [vmem:[#allocation19 + $0x6f8] sm:$0xff]  ;;  %v4811_v4 = vld [vmem:[#allocation19 + $0x590] sm:$0xff]  ;;  %v4810_v49 = vld [vmem:[#allocation19 + $0x588] sm:$0xff] }
 0x785   :  { %5577 = vmatprep.mubr.f32.mxu1 %v8020_v38  ;;  %6657 = vmatprep.subr.mxu0 %v4787_v50  ;;  %v4727_v27 = vld [vmem:[#allocation19 + $0x2f0] sm:$0xff]  ;;  %v4806_v50 = vld [vmem:[#allocation19 + $0x568] sm:$0xff] }
 0x786   :  { %5578 = vmatmul.mubr.f32.vlgmr.msra.gmra.mxu1 %v8023_v40  ;;  %6658 = vmatpush3.msra.mxu0 %v4707_v0  ;;  %v4722_v0 = vld [vmem:[#allocation19 + $0x2c8] sm:$0xff] }
 0x787   :  { %5656 = vmatpush1.msra.mxu1 %v4870_v24  ;;  %5719 = vmatprep.mubr.f32.mxu1 %v7958_v20  ;;  %v4805_v24 = vld [vmem:[#allocation19 + $0x560] sm:$0xff] }
 0x788   :  { %5657 = vmatprep.subr.mxu1 %v4866_v41  ;;  %6659 = vmatprep.subr.mxu0 %v4782_v35  ;;  %v4642_v41 = vld [vmem:[#allocation19 + $0x48] sm:$0xff]  ;;  %v4801_v35 = vld [vmem:[#allocation19 + $0x540] sm:$0xff] }
 0x789   :  { %5658 = vmatpush1.msra.mxu1 %v4865_v32  ;;  %6660 = vmatpush3.msra.mxu0 %v4702_v42  ;;  %v4717_v32 = vld [vmem:[#allocation19 + $0x2a0] sm:$0xff]  ;;  %v4800_v42 = vld [vmem:[#allocation19 + $0x538] sm:$0xff] }
 0x78a   :  { %5659 = vmatprep.subr.mxu1 %v4861_v44  ;;  %6661 = vmatprep.subr.mxu0 %v4777_v59  ;;  %v4637_v44 = vld [vmem:[#allocation19 + $0x20] sm:$0xff]  ;;  %v4796_v59 = vld [vmem:[#allocation19 + $0x518] sm:$0xff] }
 0x78b   :  { %5660 = vmatpush1.msra.mxu1 %v4860_v36  ;;  %6662 = vmatpush3.msra.mxu0 %v4697_v46  ;;  %v4795_v36 = vld [vmem:[#allocation19 + $0x510] sm:$0xff]  ;;  %v5112_v46 = vld [vmem:[#allocation19 + $0xef8] sm:$0xff] }
 0x78c   :  { %5661 = vmatprep.subr.mxu1 %v4856_v58  ;;  %6663 = vmatprep.subr.mxu0 %v4772_v47  ;;  %v4951_v58 = vld [vmem:[#allocation19 + $0x9f0] sm:$0xff]  ;;  %v5032_v47 = vld [vmem:[#allocation19 + $0xc78] sm:$0xff] }
 0x78d   :  { %5662 = vmatpush1.msra.mxu1 %v4855_v51  ;;  %6664 = vmatpush3.msra.mxu0 %v4692_v34  ;;  %v4950_v51 = vld [vmem:[#allocation19 + $0x9e8] sm:$0xff] }
 0x78e   :  { %5663 = vmatprep.subr.mxu1 %v4851_v52  ;;  %6665 = vmatprep.subr.mxu0 %v4767_v53  ;;  %v4946_v34 = vld [vmem:[#allocation19 + $0x9c8] sm:$0xff]  ;;  %v5107_v52 = vld [vmem:[#allocation19 + $0xed0] sm:$0xff]  ;;  %v4945_v53 = vld [vmem:[#allocation19 + $0x9c0] sm:$0xff] }
 0x78f   :  { %5664 = vmatpush1.msra.mxu1 %v4850_v54  ;;  %6666 = vmatpush3.msra.mxu0 %v4687_v55  ;;  %v5027_v54 = vld [vmem:[#allocation19 + $0xc50] sm:$0xff]  ;;  %v4941_v55 = vld [vmem:[#allocation19 + $0x9a0] sm:$0xff] }
 0x790   :  { %5665 = vmatprep.subr.mxu1 %v4846_v56  ;;  %6667 = vmatprep.subr.mxu0 %v4762_v57  ;;  %v5102_v56 = vld [vmem:[#allocation19 + $0xea8] sm:$0xff]  ;;  %v4940_v57 = vld [vmem:[#allocation19 + $0x998] sm:$0xff] }
 0x791   :  { %5666 = vmatpush1.msra.mxu1 %v4845_v62  ;;  %6668 = vmatpush3.msra.mxu0 %v4682_v2  ;;  %v5022_v62 = vld [vmem:[#allocation19 + $0xc28] sm:$0xff]  ;;  %v5097_v2 = vld [vmem:[#allocation19 + $0xe80] sm:$0xff] }
 0x792   :  { %5667 = vmatprep.subr.mxu1 %v4841_v8  ;;  %6669 = vmatprep.subr.mxu0 %v4757_v12  ;;  %v4935_v8 = vld [vmem:[#allocation19 + $0x970] sm:$0xff]  ;;  %v5017_v12 = vld [vmem:[#allocation19 + $0xc00] sm:$0xff] }
 0x793   :  { %5668 = vmatpush1.msra.mxu1 %v4840_v15  ;;  %6670 = vmatpush3.msra.mxu0 %v4677_v22  ;;  %v4931_v15 = vld [vmem:[#allocation19 + $0x950] sm:$0xff]  ;;  %v5092_v22 = vld [vmem:[#allocation19 + $0xe58] sm:$0xff] }
 0x794   :  { %5669 = vmatprep.subr.mxu1 %v4836_v48  ;;  %6671 = vmatprep.subr.mxu0 %v4752_v16  ;;  %v5012_v48 = vld [vmem:[#allocation19 + $0xbd8] sm:$0xff]  ;;  %v4926_v16 = vld [vmem:[#allocation19 + $0x928] sm:$0xff] }
 0x795   :  { %5670 = vmatpush1.msra.mxu1 %v4835_v18  ;;  %6672 = vmatpush3.msra.mxu0 %v4672_v19  ;;  %v5087_v18 = vld [vmem:[#allocation19 + $0xe30] sm:$0xff]  ;;  %v4925_v19 = vld [vmem:[#allocation19 + $0x920] sm:$0xff] }
 0x796   :  { %5671 = vmatprep.subr.mxu1 %v4831_v21  ;;  %6673 = vmatprep.subr.mxu0 %v4747_v23  ;;  %v5007_v21 = vld [vmem:[#allocation19 + $0xbb0] sm:$0xff]  ;;  %v4921_v23 = vld [vmem:[#allocation19 + $0x900] sm:$0xff] }
 0x797   :  { %5672 = vmatpush1.msra.mxu1 %v4830_v26  ;;  %6674 = vmatpush3.msra.mxu0 %v4667_v14  ;;  %v5082_v26 = vld [vmem:[#allocation19 + $0xe08] sm:$0xff]  ;;  %v4920_v14 = vld [vmem:[#allocation19 + $0x8f8] sm:$0xff] }
 0x798   :  { %5673 = vmatprep.subr.mxu1 %v4826_v28  ;;  %6675 = vmatprep.subr.mxu0 %v4742_v17  ;;  %v5002_v28 = vld [vmem:[#allocation19 + $0xb88] sm:$0xff]  ;;  %v4916_v17 = vld [vmem:[#allocation19 + $0x8d8] sm:$0xff] }
 0x799   :  { %5674 = vmatpush1.msra.mxu1 %v4825_v3  ;;  %6676 = vmatpush3.msra.mxu0 %v4662_v61  ;;  %v5077_v3 = vld [vmem:[#allocation19 + $0xde0] sm:$0xff]  ;;  %v4915_v61 = vld [vmem:[#allocation19 + $0x8d0] sm:$0xff] }
 0x79a   :  { %5675 = vmatprep.subr.mxu1 %v4821_v30  ;;  %6677 = vmatprep.subr.mxu0 %v4737_v63  ;;  %v4997_v30 = vld [vmem:[#allocation19 + $0xb60] sm:$0xff]  ;;  %v4911_v63 = vld [vmem:[#allocation19 + $0x8b0] sm:$0xff] }
 0x79b   :  { %5676 = vmatpush1.msra.mxu1 %v4820_v13  ;;  %6678 = vmatpush3.msra.mxu0 %v4657_v39  ;;  %v5072_v13 = vld [vmem:[#allocation19 + $0xdb8] sm:$0xff]  ;;  %v4910_v39 = vld [vmem:[#allocation19 + $0x8a8] sm:$0xff] }
 0x79c   :  { %5677 = vmatprep.subr.mxu1 %v4816_v25  ;;  %6679 = vmatprep.subr.mxu0 %v4732_v60  ;;  %v4992_v25 = vld [vmem:[#allocation19 + $0xb38] sm:$0xff]  ;;  %v4906_v60 = vld [vmem:[#allocation19 + $0x888] sm:$0xff] }
 0x79d   :  { %5678 = vmatpush1.msra.mxu1 %v4815_v5  ;;  %6680 = vmatpush3.msra.mxu0 %v4652_v33  ;;  %v5067_v5 = vld [vmem:[#allocation19 + $0xd90] sm:$0xff]  ;;  %v4905_v33 = vld [vmem:[#allocation19 + $0x880] sm:$0xff] }
 0x79e   :  { %5679 = vmatprep.subr.mxu1 %v4811_v4  ;;  %6681 = vmatprep.subr.mxu0 %v4727_v27  ;;  %v4987_v4 = vld [vmem:[#allocation19 + $0xb10] sm:$0xff]  ;;  %v4901_v27 = vld [vmem:[#allocation19 + $0x860] sm:$0xff] }
 0x79f   :  { %5680 = vmatpush1.msra.mxu1 %v4810_v49  ;;  %6682 = vmatpush3.msra.mxu0 %v4647_v45  ;;  %v5062_v49 = vld [vmem:[#allocation19 + $0xd68] sm:$0xff]  ;;  %v4900_v45 = vld [vmem:[#allocation19 + $0x858] sm:$0xff] }
 0x7a0   :  { %5681 = vmatprep.subr.mxu1 %v4806_v50  ;;  %6683 = vmatprep.subr.mxu0 %v4722_v0  ;;  %v4982_v50 = vld [vmem:[#allocation19 + $0xae8] sm:$0xff]  ;;  %v4896_v0 = vld [vmem:[#allocation19 + $0x838] sm:$0xff] }
 0x7a1   :  { %5682 = vmatpush1.msra.mxu1 %v4805_v24  ;;  %6684 = vmatpush3.msra.mxu0 %v4642_v41  ;;  %v5057_v24 = vld [vmem:[#allocation19 + $0xd40] sm:$0xff]  ;;  %v4895_v41 = vld [vmem:[#allocation19 + $0x830] sm:$0xff] }
 0x7a2   :  { %5683 = vmatprep.subr.mxu1 %v4801_v35  ;;  %6685 = vmatprep.subr.mxu0 %v4717_v32  ;;  %v4977_v35 = vld [vmem:[#allocation19 + $0xac0] sm:$0xff]  ;;  %v4891_v32 = vld [vmem:[#allocation19 + $0x810] sm:$0xff] }
 0x7a3   :  { %5684 = vmatpush1.msra.mxu1 %v4800_v42  ;;  %6686 = vmatpush3.msra.mxu0 %v4637_v44  ;;  %v5052_v42 = vld [vmem:[#allocation19 + $0xd18] sm:$0xff]  ;;  %v4890_v44 = vld [vmem:[#allocation19 + $0x808] sm:$0xff] }
 0x7a4   :  { %5685 = vmatprep.subr.mxu1 %v4796_v59  ;;  %5933 = vmatmul.mubr.f32.vlgmr.msra.gmra.mxu0 %v7954_v37  ;;  %v4936_v37 = vld [vmem:[#allocation19 + $0x978] sm:$0xff] }
 0x7a5   :  { %5686 = vmatpush1.msra.mxu1 %v4795_v36  ;;  %6725 = vmatprep.subr.mxu0 %v5112_v46  ;;  %v4972_v59 = vld [vmem:[#allocation19 + $0xa98] sm:$0xff]  ;;  %v4886_v36 = vld [vmem:[#allocation19 + $0x7e8] sm:$0xff]  ;;  %v5047_v46 = vld [vmem:[#allocation19 + $0xcf0] sm:$0xff] }
 0x7a6   :  { %5687 = vmatprep.subr.mxu1 %v4951_v58  ;;  %6726 = vmatpush3.msra.mxu0 %v5032_v47  ;;  %v4885_v58 = vld [vmem:[#allocation19 + $0x7e0] sm:$0xff]  ;;  %v4967_v47 = vld [vmem:[#allocation19 + $0xa70] sm:$0xff] }
 0x7a7   :  { %5688 = vmatpush2.msra.mxu1 %v4950_v51  ;;  %6072 = vmatprep.mubr.f32.mxu0 %v7991_v11  ;;  %v4930_v11 = vld [vmem:[#allocation19 + $0x948] sm:$0xff]  ;;  %v4881_v51 = vld [vmem:[#allocation19 + $0x7c0] sm:$0xff] }
 0x7a8   :  { %5689 = vmatprep.subr.mxu1 %v4946_v34  ;;  %6727 = vmatprep.subr.mxu0 %v5107_v52  ;;  %v5042_v34 = vld [vmem:[#allocation19 + $0xcc8] sm:$0xff]  ;;  %v4880_v52 = vld [vmem:[#allocation19 + $0x7b8] sm:$0xff] }
 0x7a9   :  { %5690 = vmatpush2.msra.mxu1 %v4945_v53  ;;  %6728 = vmatpush3.msra.mxu0 %v5027_v54  ;;  %v4962_v53 = vld [vmem:[#allocation19 + $0xa48] sm:$0xff]  ;;  %v4876_v54 = vld [vmem:[#allocation19 + $0x798] sm:$0xff] }
 0x7aa   :  { %5691 = vmatprep.subr.mxu1 %v4941_v55  ;;  %6729 = vmatprep.subr.mxu0 %v5102_v56  ;;  %v5037_v55 = vld [vmem:[#allocation19 + $0xca0] sm:$0xff]  ;;  %v4875_v56 = vld [vmem:[#allocation19 + $0x790] sm:$0xff] }
 0x7ab   :  { %5692 = vmatpush2.msra.mxu1 %v4940_v57  ;;  %6730 = vmatpush3.msra.mxu0 %v5022_v62  ;;  %v4957_v57 = vld [vmem:[#allocation19 + $0xa20] sm:$0xff]  ;;  %v5191_v62 = vld [vmem:[#allocation19 + $0x1170] sm:$0xff] }
 0x7ac   :  { %5693 = vmatprep.subr.mxu1 %v4936_v37  ;;  %6731 = vmatprep.subr.mxu0 %v5097_v2  ;;  %v5190_v37 = vld [vmem:[#allocation19 + $0x1168] sm:$0xff] }
 0x7ad   :  { %5694 = vmatpush2.msra.mxu1 %v4935_v8  ;;  %6732 = vmatpush3.msra.mxu0 %v5017_v12  ;;  %v5186_v2 = vld [vmem:[#allocation19 + $0x1148] sm:$0xff]  ;;  %v5185_v8 = vld [vmem:[#allocation19 + $0x1140] sm:$0xff] }
 0x7ae   :  { %5695 = vmatprep.subr.mxu1 %v4931_v15  ;;  %6733 = vmatprep.subr.mxu0 %v5092_v22  ;;  %v5181_v12 = vld [vmem:[#allocation19 + $0x1120] sm:$0xff]  ;;  %v5180_v15 = vld [vmem:[#allocation19 + $0x1118] sm:$0xff] }
 0x7af   :  { %5696 = vmatpush2.msra.mxu1 %v4930_v11  ;;  %6734 = vmatpush3.msra.mxu0 %v5012_v48  ;;  %v5176_v22 = vld [vmem:[#allocation19 + $0x10f8] sm:$0xff]  ;;  %v5175_v48 = vld [vmem:[#allocation19 + $0x10f0] sm:$0xff] }
 0x7b0   :  { %5697 = vmatprep.subr.mxu1 %v4926_v16  ;;  %6735 = vmatprep.subr.mxu0 %v5087_v18  ;;  %v6224_v11 = vld [vmem:[#allocation22 + $0xf8] sm:$0xff]  ;;  %v5171_v18 = vld [vmem:[#allocation19 + $0x10d0] sm:$0xff] }
 0x7b1   :  { %5698 = vmatpush2.msra.mxu1 %v4925_v19  ;;  %6736 = vmatpush3.msra.mxu0 %v5007_v21  ;;  %v6208_v16 = vld [vmem:[#allocation22 + $0x78] sm:$0xff]  ;;  %v6223_v19 = vld [vmem:[#allocation22 + $0xf0] sm:$0xff]  ;;  %v5170_v21 = vld [vmem:[#allocation19 + $0x10c8] sm:$0xff] }
 0x7b2   :  { %5699 = vmatprep.subr.mxu1 %v4921_v23  ;;  %6737 = vmatprep.subr.mxu0 %v5082_v26  ;;  %v5166_v23 = vld [vmem:[#allocation19 + $0x10a8] sm:$0xff] }
 0x7b3   :  { %5700 = vmatpush2.msra.mxu1 %v4920_v14  ;;  %6738 = vmatpush3.msra.mxu0 %v5002_v28  ;;  %v6222_v26 = vld [vmem:[#allocation22 + $0xe8] sm:$0xff]  ;;  %v5165_v14 = vld [vmem:[#allocation19 + $0x10a0] sm:$0xff] }
 0x7b4   :  { %5701 = vmatprep.subr.mxu1 %v4916_v17  ;;  %6739 = vmatprep.subr.mxu0 %v5077_v3  ;;  %v6206_v28 = vld [vmem:[#allocation22 + $0x68] sm:$0xff]  ;;  %v5161_v17 = vld [vmem:[#allocation19 + $0x1080] sm:$0xff] }
 0x7b5   :  { %5702 = vmatpush2.msra.mxu1 %v4915_v61  ;;  %6740 = vmatpush3.msra.mxu0 %v4997_v30  ;;  %v6221_v3 = vld [vmem:[#allocation22 + $0xe0] sm:$0xff]  ;;  %v5160_v61 = vld [vmem:[#allocation19 + $0x1078] sm:$0xff] }
 0x7b6   :  { %5703 = vmatprep.subr.mxu1 %v4911_v63  ;;  %6741 = vmatprep.subr.mxu0 %v5072_v13  ;;  %v6205_v30 = vld [vmem:[#allocation22 + $0x60] sm:$0xff]  ;;  %v5156_v63 = vld [vmem:[#allocation19 + $0x1058] sm:$0xff] }
 0x7b7   :  { %5704 = vmatpush2.msra.mxu1 %v4910_v39  ;;  %6742 = vmatpush3.msra.mxu0 %v4992_v25  ;;  %v6220_v13 = vld [vmem:[#allocation22 + $0xd8] sm:$0xff]  ;;  %v5155_v39 = vld [vmem:[#allocation19 + $0x1050] sm:$0xff] }
 0x7b8   :  { %5705 = vmatprep.subr.mxu1 %v4906_v60  ;;  %6743 = vmatprep.subr.mxu0 %v5067_v5  ;;  %v5151_v25 = vld [vmem:[#allocation19 + $0x1030] sm:$0xff]  ;;  %v6204_v60 = vld [vmem:[#allocation22 + $0x58] sm:$0xff] }
 0x7b9   :  { %5706 = vmatpush2.msra.mxu1 %v4905_v33  ;;  %6744 = vmatpush3.msra.mxu0 %v4987_v4  ;;  %v6219_v5 = vld [vmem:[#allocation22 + $0xd0] sm:$0xff]  ;;  %v6218_v4 = vld [vmem:[#allocation22 + $0xc8] sm:$0xff] }
 0x7ba   :  { %5707 = vmatprep.subr.mxu1 %v4901_v27  ;;  %6745 = vmatprep.subr.mxu0 %v5062_v49  ;;  %v6203_v33 = vld [vmem:[#allocation22 + $0x50] sm:$0xff]  ;;  %v5150_v27 = vld [vmem:[#allocation19 + $0x1028] sm:$0xff] }
 0x7bb   :  { %5708 = vmatpush2.msra.mxu1 %v4900_v45  ;;  %6746 = vmatpush3.msra.mxu0 %v4982_v50  ;;  %v6202_v49 = vld [vmem:[#allocation22 + $0x48] sm:$0xff]  ;;  %v6217_v50 = vld [vmem:[#allocation22 + $0xc0] sm:$0xff] }
 0x7bc   :  { %5709 = vmatprep.subr.mxu1 %v4896_v0  ;;  %6747 = vmatprep.subr.mxu0 %v5057_v24  ;;  %v5146_v45 = vld [vmem:[#allocation19 + $0x1008] sm:$0xff]  ;;  %v5145_v0 = vld [vmem:[#allocation19 + $0x1000] sm:$0xff] }
 0x7bd   :  { %5710 = vmatpush2.msra.mxu1 %v4895_v41  ;;  %6748 = vmatpush3.msra.mxu0 %v4977_v35  ;;  %v6201_v24 = vld [vmem:[#allocation22 + $0x40] sm:$0xff]  ;;  %v6216_v35 = vld [vmem:[#allocation22 + $0xb8] sm:$0xff] }
 0x7be   :  { %5711 = vmatprep.subr.mxu1 %v4891_v32  ;;  %6749 = vmatprep.subr.mxu0 %v5052_v42  ;;  %v5141_v41 = vld [vmem:[#allocation19 + $0xfe0] sm:$0xff]  ;;  %v5140_v32 = vld [vmem:[#allocation19 + $0xfd8] sm:$0xff] }
 0x7bf   :  { %5712 = vmatpush2.msra.mxu1 %v4890_v44  ;;  %6750 = vmatpush3.msra.mxu0 %v4972_v59  ;;  %v6200_v42 = vld [vmem:[#allocation22 + $0x38] sm:$0xff]  ;;  %v6215_v59 = vld [vmem:[#allocation22 + $0xb0] sm:$0xff] }
 0x7c0   :  { %5713 = vmatprep.subr.mxu1 %v4886_v36  ;;  %6751 = vmatprep.subr.mxu0 %v5047_v46  ;;  %v5136_v44 = vld [vmem:[#allocation19 + $0xfb8] sm:$0xff]  ;;  %v5135_v36 = vld [vmem:[#allocation19 + $0xfb0] sm:$0xff] }
 0x7c1   :  { %5714 = vmatpush2.msra.mxu1 %v4885_v58  ;;  %6752 = vmatpush3.msra.mxu0 %v4967_v47  ;;  %v6199_v46 = vld [vmem:[#allocation22 + $0x30] sm:$0xff]  ;;  %v6214_v47 = vld [vmem:[#allocation22 + $0xa8] sm:$0xff] }
 0x7c2   :  { %5715 = vmatprep.subr.mxu1 %v4881_v51  ;;  %6753 = vmatprep.subr.mxu0 %v5042_v34  ;;  %v5131_v58 = vld [vmem:[#allocation19 + $0xf90] sm:$0xff]  ;;  %v5130_v51 = vld [vmem:[#allocation19 + $0xf88] sm:$0xff] }
 0x7c3   :  { %5716 = vmatpush2.msra.mxu1 %v4880_v52  ;;  %6754 = vmatpush3.msra.mxu0 %v4962_v53  ;;  %v6198_v34 = vld [vmem:[#allocation22 + $0x28] sm:$0xff]  ;;  %v6213_v53 = vld [vmem:[#allocation22 + $0xa0] sm:$0xff] }
 0x7c4   :  { %5717 = vmatprep.subr.mxu1 %v4876_v54  ;;  %6755 = vmatprep.subr.mxu0 %v5037_v55  ;;  %v5126_v52 = vld [vmem:[#allocation19 + $0xf68] sm:$0xff]  ;;  %v5125_v54 = vld [vmem:[#allocation19 + $0xf60] sm:$0xff] }
 0x7c5   :  { %5718 = vmatpush2.msra.mxu1 %v4875_v56  ;;  %6756 = vmatpush3.msra.mxu0 %v4957_v57  ;;  %v6197_v55 = vld [vmem:[#allocation22 + $0x20] sm:$0xff]  ;;  %v6212_v57 = vld [vmem:[#allocation22 + $0x98] sm:$0xff] }
 0x7c6   :  { %5720 = vmatmul.mubr.f32.vlgmr.msra.gmra.mxu1 %v7976_v31  ;;  %5797 = vmatprep.subr.mxu1 %v5191_v62  ;;  %v5121_v56 = vld [vmem:[#allocation19 + $0xf40] sm:$0xff]  ;;  %v5120_v62 = vld [vmem:[#allocation19 + $0xf38] sm:$0xff] }
 0x7c7   :  { %6073 = vmatmul.mubr.f32.vlgmr.msra.gmra.mxu0 %v7993_v29  ;;  %5798 = vmatpush1.msra.mxu1 %v5190_v37  ;;  %v6207_v29 = vld [vmem:[#allocation22 + $0x70] sm:$0xff]  ;;  %v6196_v37 = vld [vmem:[#allocation22 + $0x18] sm:$0xff] }
 0x7c8   :  { %5861 = vmatprep.mubr.f32.mxu1 %v8020_v38  ;;  %5799 = vmatprep.subr.mxu1 %v5186_v2  ;;  %v5116_v2 = vld [vmem:[#allocation19 + $0xf18] sm:$0xff] }
 0x7c9   :  { %5800 = vmatpush1.msra.mxu1 %v5185_v8  ;;  %6795 = vmatprep.subr.mxu0 %v6224_v11  ;;  %v6211_v8 = vld [vmem:[#allocation22 + $0x90] sm:$0xff]  ;;  %v6210_v11 = vld [vmem:[#allocation22 + $0x88] sm:$0xff] }
 0x7ca   :  { %5801 = vmatprep.subr.mxu1 %v5181_v12  ;;  %6796 = vmatpush3.msra.mxu0 %v6208_v16  ;;  %v5115_v12 = vld [vmem:[#allocation19 + $0xf10] sm:$0xff] }
 0x7cb   :  { %5802 = vmatpush1.msra.mxu1 %v5180_v15  ;;  %6797 = vmatprep.subr.mxu0 %v6223_v19  ;;  %v6195_v15 = vld [vmem:[#allocation22 + $0x10] sm:$0xff]  ;;  %v6194_v16 = vld [vmem:[#allocation22 + $0x8] sm:$0xff]  ;;  %v6209_v19 = vld [vmem:[#allocation22 + $0x80] sm:$0xff] }
 0x7cc   :  { %5803 = vmatprep.subr.mxu1 %v5176_v22  ;;  %6798 = vmatpush3.msra.mxu0 %v6207_v29  ;;  %v5271_v22 = vld [vmem:[#allocation19 + $0x13f0] sm:$0xff]  ;;  %v5261_v29 = vld [vmem:[#allocation19 + $0x13a0] sm:$0xff] }
 0x7cd   :  { %5804 = vmatpush1.msra.mxu1 %v5175_v48  ;;  %6799 = vmatprep.subr.mxu0 %v6222_v26  ;;  %v5270_v48 = vld [vmem:[#allocation19 + $0x13e8] sm:$0xff] }
 0x7ce   :  { %5805 = vmatprep.subr.mxu1 %v5171_v18  ;;  %6800 = vmatpush3.msra.mxu0 %v6206_v28  ;;  %v5266_v18 = vld [vmem:[#allocation19 + $0x13c8] sm:$0xff]  ;;  %v5255_v28 = vld [vmem:[#allocation19 + $0x1370] sm:$0xff] }
 0x7cf   :  { %5806 = vmatpush1.msra.mxu1 %v5170_v21  ;;  %6801 = vmatprep.subr.mxu0 %v6221_v3  ;;  %v5265_v21 = vld [vmem:[#allocation19 + $0x13c0] sm:$0xff]  ;;  %v5250_v3 = vld [vmem:[#allocation19 + $0x1348] sm:$0xff] }
 0x7d0   :  { %5807 = vmatprep.subr.mxu1 %v5166_v23  ;;  %6802 = vmatpush3.msra.mxu0 %v6205_v30  ;;  %v5260_v23 = vld [vmem:[#allocation19 + $0x1398] sm:$0xff]  ;;  %v6193_v26 = vld [vmem:[#allocation22] sm:$0xff] }
 0x7d1   :  { %5808 = vmatpush1.msra.mxu1 %v5165_v14  ;;  %6803 = vmatprep.subr.mxu0 %v6220_v13  ;;  %v5256_v14 = vld [vmem:[#allocation19 + $0x1378] sm:$0xff]  ;;  %v5245_v30 = vld [vmem:[#allocation19 + $0x1320] sm:$0xff] }
 0x7d2   :  { %5809 = vmatprep.subr.mxu1 %v5161_v17  ;;  %6804 = vmatpush3.msra.mxu0 %v6204_v60  ;;  %v5251_v17 = vld [vmem:[#allocation19 + $0x1350] sm:$0xff]  ;;  %v5240_v13 = vld [vmem:[#allocation19 + $0x12f8] sm:$0xff] }
 0x7d3   :  { %5810 = vmatpush1.msra.mxu1 %v5160_v61  ;;  %6805 = vmatprep.subr.mxu0 %v6219_v5  ;;  %v5246_v61 = vld [vmem:[#allocation19 + $0x1328] sm:$0xff]  ;;  %v5231_v60 = vld [vmem:[#allocation19 + $0x12b0] sm:$0xff] }
 0x7d4   :  { %5811 = vmatprep.subr.mxu1 %v5156_v63  ;;  %6806 = vmatpush3.msra.mxu0 %v6203_v33  ;;  %v5241_v63 = vld [vmem:[#allocation19 + $0x1300] sm:$0xff]  ;;  %v5230_v5 = vld [vmem:[#allocation19 + $0x12a8] sm:$0xff] }
 0x7d5   :  { %5812 = vmatpush1.msra.mxu1 %v5155_v39  ;;  %6807 = vmatprep.subr.mxu0 %v6218_v4  ;;  %v5236_v39 = vld [vmem:[#allocation19 + $0x12d8] sm:$0xff]  ;;  %v5226_v33 = vld [vmem:[#allocation19 + $0x1288] sm:$0xff]  ;;  %v5225_v4 = vld [vmem:[#allocation19 + $0x1280] sm:$0xff] }
 0x7d6   :  { %5813 = vmatprep.subr.mxu1 %v5151_v25  ;;  %6808 = vmatpush3.msra.mxu0 %v6202_v49  ;;  %v5235_v25 = vld [vmem:[#allocation19 + $0x12d0] sm:$0xff]  ;;  %v5220_v49 = vld [vmem:[#allocation19 + $0x1258] sm:$0xff] }
 0x7d7   :  { %5814 = vmatpush1.msra.mxu1 %v5150_v27  ;;  %6809 = vmatprep.subr.mxu0 %v6217_v50  ;;  %v5221_v27 = vld [vmem:[#allocation19 + $0x1260] sm:$0xff]  ;;  %v5215_v50 = vld [vmem:[#allocation19 + $0x1230] sm:$0xff] }
 0x7d8   :  { %5815 = vmatprep.subr.mxu1 %v5146_v45  ;;  %6810 = vmatpush3.msra.mxu0 %v6201_v24  ;;  %v5216_v45 = vld [vmem:[#allocation19 + $0x1238] sm:$0xff]  ;;  %v5210_v24 = vld [vmem:[#allocation19 + $0x1208] sm:$0xff] }
 0x7d9   :  { %5816 = vmatpush1.msra.mxu1 %v5145_v0  ;;  %6811 = vmatprep.subr.mxu0 %v6216_v35  ;;  %v5211_v0 = vld [vmem:[#allocation19 + $0x1210] sm:$0xff]  ;;  %v5205_v35 = vld [vmem:[#allocation19 + $0x11e0] sm:$0xff] }
 0x7da   :  { %5817 = vmatprep.subr.mxu1 %v5141_v41  ;;  %6812 = vmatpush3.msra.mxu0 %v6200_v42  ;;  %v5206_v41 = vld [vmem:[#allocation19 + $0x11e8] sm:$0xff]  ;;  %v5200_v42 = vld [vmem:[#allocation19 + $0x11b8] sm:$0xff] }
 0x7db   :  { %5818 = vmatpush1.msra.mxu1 %v5140_v32  ;;  %6813 = vmatprep.subr.mxu0 %v6215_v59  ;;  %v5201_v32 = vld [vmem:[#allocation19 + $0x11c0] sm:$0xff]  ;;  %v5195_v59 = vld [vmem:[#allocation19 + $0x1190] sm:$0xff] }
 0x7dc   :  { %5819 = vmatprep.subr.mxu1 %v5136_v44  ;;  %6814 = vmatpush3.msra.mxu0 %v6199_v46  ;;  %v5196_v44 = vld [vmem:[#allocation19 + $0x1198] sm:$0xff] }
 0x7dd   :  { %5820 = vmatpush1.msra.mxu1 %v5135_v36  ;;  %6815 = vmatprep.subr.mxu0 %v6214_v47  ;;  %v4952_v36 = vld [vmem:[#allocation19 + $0x9f8] sm:$0xff]  ;;  %v4867_v47 = vld [vmem:[#allocation19 + $0x750] sm:$0xff] }
 0x7de   :  { %5821 = vmatprep.subr.mxu1 %v5131_v58  ;;  %6816 = vmatpush3.msra.mxu0 %v6198_v34  ;;  %v4872_v46 = vld [vmem:[#allocation19 + $0x778] sm:$0xff]  ;;  %v4947_v58 = vld [vmem:[#allocation19 + $0x9d0] sm:$0xff]  ;;  %v4862_v34 = vld [vmem:[#allocation19 + $0x728] sm:$0xff] }
 0x7df   :  { %5822 = vmatpush1.msra.mxu1 %v5130_v51  ;;  %6817 = vmatprep.subr.mxu0 %v6213_v53  ;;  %v4942_v51 = vld [vmem:[#allocation19 + $0x9a8] sm:$0xff]  ;;  %v4857_v53 = vld [vmem:[#allocation19 + $0x700] sm:$0xff] }
 0x7e0   :  { %5823 = vmatprep.subr.mxu1 %v5126_v52  ;;  %6818 = vmatpush3.msra.mxu0 %v6197_v55  ;;  %v4937_v52 = vld [vmem:[#allocation19 + $0x980] sm:$0xff]  ;;  %v4852_v55 = vld [vmem:[#allocation19 + $0x6d8] sm:$0xff] }
 0x7e1   :  { %5824 = vmatpush1.msra.mxu1 %v5125_v54  ;;  %6819 = vmatprep.subr.mxu0 %v6212_v57  ;;  %v4932_v54 = vld [vmem:[#allocation19 + $0x958] sm:$0xff]  ;;  %v4847_v57 = vld [vmem:[#allocation19 + $0x6b0] sm:$0xff] }
 0x7e2   :  { %5825 = vmatprep.subr.mxu1 %v5121_v56  ;;  %6820 = vmatpush3.msra.mxu0 %v6196_v37  ;;  %v4927_v56 = vld [vmem:[#allocation19 + $0x930] sm:$0xff]  ;;  %v4842_v37 = vld [vmem:[#allocation19 + $0x688] sm:$0xff] }
 0x7e3   :  { %5826 = vmatpush1.msra.mxu1 %v5120_v62  ;;  %6821 = vmatprep.subr.mxu0 %v6211_v8  ;;  %v4922_v62 = vld [vmem:[#allocation19 + $0x908] sm:$0xff]  ;;  %v4912_v8 = vld [vmem:[#allocation19 + $0x8b8] sm:$0xff] }
 0x7e4   :  { %5827 = vmatprep.subr.mxu1 %v5116_v2  ;;  %6822 = vmatpush3.msra.mxu0 %v6195_v15  ;;  %v4837_v2 = vld [vmem:[#allocation19 + $0x660] sm:$0xff]  ;;  %v4907_v15 = vld [vmem:[#allocation19 + $0x890] sm:$0xff] }
 0x7e5   :  { %5828 = vmatpush1.msra.mxu1 %v5115_v12  ;;  %6823 = vmatprep.subr.mxu0 %v6210_v11  ;;  %v4832_v12 = vld [vmem:[#allocation19 + $0x638] sm:$0xff]  ;;  %v4902_v11 = vld [vmem:[#allocation19 + $0x868] sm:$0xff] }
 0x7e6   :  { %5829 = vmatprep.subr.mxu1 %v5271_v22  ;;  %6824 = vmatpush3.msra.mxu0 %v6194_v16  ;;  %v4827_v22 = vld [vmem:[#allocation19 + $0x610] sm:$0xff]  ;;  %v4897_v16 = vld [vmem:[#allocation19 + $0x840] sm:$0xff] }
 0x7e7   :  { %5830 = vmatpush2.msra.mxu1 %v5270_v48  ;;  %6825 = vmatprep.subr.mxu0 %v6209_v19  ;;  %v4822_v48 = vld [vmem:[#allocation19 + $0x5e8] sm:$0xff]  ;;  %v4892_v19 = vld [vmem:[#allocation19 + $0x818] sm:$0xff] }
 0x7e8   :  { %5831 = vmatprep.subr.mxu1 %v5266_v18  ;;  %6826 = vmatpush3.msra.mxu0 %v6193_v26  ;;  %v4817_v18 = vld [vmem:[#allocation19 + $0x5c0] sm:$0xff]  ;;  %v4882_v26 = vld [vmem:[#allocation19 + $0x7c8] sm:$0xff] }
 0x7e9   :  { %5832 = vmatpush2.msra.mxu1 %v5265_v21  ;;  %6969 = vmatprep.subr.mxu0 %v7510_v1  ;;  %v4812_v21 = vld [vmem:[#allocation19 + $0x598] sm:$0xff] }
 0x7ea   :  { %5833 = vmatprep.subr.mxu1 %v5261_v29  ;;  %v4887_v29 = vld [vmem:[#allocation19 + $0x7f0] sm:$0xff] }
 0x7eb   :  { %5834 = vmatpush2.msra.mxu1 %v5260_v23  ;;  %v4807_v23 = vld [vmem:[#allocation19 + $0x570] sm:$0xff] }
 0x7ec   :  { %5835 = vmatprep.subr.mxu1 %v5256_v14  ;;  %v4802_v14 = vld [vmem:[#allocation19 + $0x548] sm:$0xff] }
 0x7ed   :  { %5836 = vmatpush2.msra.mxu1 %v5255_v28  ;;  %v4877_v28 = vld [vmem:[#allocation19 + $0x7a0] sm:$0xff] }
 0x7ee   :  { %5837 = vmatprep.subr.mxu1 %v5251_v17  ;;  %v4797_v17 = vld [vmem:[#allocation19 + $0x520] sm:$0xff] }
 0x7ef   :  { %5838 = vmatpush2.msra.mxu1 %v5250_v3  ;;  %v5272_v3 = vld [vmem:[#allocation19 + $0x13f8] sm:$0xff] }
 0x7f0   :  { %5839 = vmatprep.subr.mxu1 %v5246_v61  ;;  %v5192_v61 = vld [vmem:[#allocation19 + $0x1178] sm:$0xff] }
 0x7f1   :  { %5840 = vmatpush2.msra.mxu1 %v5245_v30  ;;  %v5267_v30 = vld [vmem:[#allocation19 + $0x13d0] sm:$0xff] }
 0x7f2   :  { %5841 = vmatprep.subr.mxu1 %v5241_v63  ;;  %v5187_v63 = vld [vmem:[#allocation19 + $0x1150] sm:$0xff] }
 0x7f3   :  { %5842 = vmatpush2.msra.mxu1 %v5240_v13  ;;  %v5262_v13 = vld [vmem:[#allocation19 + $0x13a8] sm:$0xff] }
 0x7f4   :  { %5843 = vmatprep.subr.mxu1 %v5236_v39  ;;  %v5182_v39 = vld [vmem:[#allocation19 + $0x1128] sm:$0xff] }
 0x7f5   :  { %5844 = vmatpush2.msra.mxu1 %v5235_v25  ;;  %v5257_v25 = vld [vmem:[#allocation19 + $0x1380] sm:$0xff] }
 0x7f6   :  { %5845 = vmatprep.subr.mxu1 %v5231_v60  ;;  %v5177_v60 = vld [vmem:[#allocation19 + $0x1100] sm:$0xff] }
 0x7f7   :  { %5846 = vmatpush2.msra.mxu1 %v5230_v5  ;;  %v5252_v5 = vld [vmem:[#allocation19 + $0x1358] sm:$0xff] }
 0x7f8   :  { %5847 = vmatprep.subr.mxu1 %v5226_v33  ;;  %v5172_v33 = vld [vmem:[#allocation19 + $0x10d8] sm:$0xff] }
 0x7f9   :  { %5848 = vmatpush2.msra.mxu1 %v5225_v4  ;;  %v5247_v4 = vld [vmem:[#allocation19 + $0x1330] sm:$0xff] }
 0x7fa   :  { %5849 = vmatprep.subr.mxu1 %v5221_v27  ;;  %v5242_v27 = vld [vmem:[#allocation19 + $0x1308] sm:$0xff] }
 0x7fb   :  { %5850 = vmatpush2.msra.mxu1 %v5220_v49  ;;  %v5162_v49 = vld [vmem:[#allocation19 + $0x1088] sm:$0xff] }
 0x7fc   :  { %5851 = vmatprep.subr.mxu1 %v5216_v45  ;;  %v5157_v45 = vld [vmem:[#allocation19 + $0x1060] sm:$0xff] }
 0x7fd   :  { %5852 = vmatpush2.msra.mxu1 %v5215_v50  ;;  %v5232_v50 = vld [vmem:[#allocation19 + $0x12b8] sm:$0xff] }
 0x7fe   :  { %5853 = vmatprep.subr.mxu1 %v5211_v0  ;;  %v5152_v0 = vld [vmem:[#allocation19 + $0x1038] sm:$0xff] }
 0x7ff   :  { %5854 = vmatpush2.msra.mxu1 %v5210_v24  ;;  %v5227_v24 = vld [vmem:[#allocation19 + $0x1290] sm:$0xff] }
 0x800   :  { %5855 = vmatprep.subr.mxu1 %v5206_v41  ;;  %v5147_v41 = vld [vmem:[#allocation19 + $0x1010] sm:$0xff] }
 0x801   :  { %5856 = vmatpush2.msra.mxu1 %v5205_v35  ;;  %v5222_v35 = vld [vmem:[#allocation19 + $0x1268] sm:$0xff] }
 0x802   :  { %5857 = vmatprep.subr.mxu1 %v5201_v32  ;;  %v5142_v32 = vld [vmem:[#allocation19 + $0xfe8] sm:$0xff] }
 0x803   :  { %5858 = vmatpush2.msra.mxu1 %v5200_v42  ;;  %v5217_v42 = vld [vmem:[#allocation19 + $0x1240] sm:$0xff] }
 0x804   :  { %5859 = vmatprep.subr.mxu1 %v5196_v44  ;;  %v8039_v44 = vld [vmem:[#allocation20] sm:$0x1f] }
 0x805   :  { %5860 = vmatpush2.msra.mxu1 %v5195_v59  ;;  %v5366_v59 = vpop.f32.mrf.mxu0 }
 0x806   :  { %5862 = vmatmul.mubr.f32.vlgmr.msra.gmra.mxu1 %v8023_v40  ;;  %6690 = vmatprep.subr.mxu1 %v4952_v36  ;;  %v5137_v36 = vld [vmem:[#allocation19 + $0xfc0] sm:$0xff] }
 0x807   :  { %6691 = vmatpush3.msra.mxu1 %v4872_v46  ;;  %6002 = vmatprep.mubr.f32.mxu1 %v7958_v20  ;;  %v4917_v20 = vld [vmem:[#allocation19 + $0x8e0] sm:$0xff]  ;;  %v5212_v46 = vld [vmem:[#allocation19 + $0x1218] sm:$0xff] }
 0x808   :  { %6692 = vmatprep.subr.mxu1 %v4947_v58  ;;  %v5132_v58 = vld [vmem:[#allocation19 + $0xf98] sm:$0xff] }
 0x809   :  { %6693 = vmatpush3.msra.mxu1 %v4867_v47  ;;  %v5278_v47 = vrot.slane %v8039_v44, %v7715_v6  ;;  %v5117_v6 = vld [vmem:[#allocation19 + $0xf20] sm:$0xff] }
 0x80a   :  { %6694 = vmatprep.subr.mxu1 %v4942_v51  ;;  %v5207_v51 = vld [vmem:[#allocation19 + $0x11f0] sm:$0xff] }
 0x80b   :  { %6695 = vmatpush3.msra.mxu1 %v4862_v34  ;;  %v5368_v34 = vpop.f32.mrf.mxu0 }
 0x80c   :  { %6696 = vmatprep.subr.mxu1 %v4937_v52  ;;  %v5437_v52 = vpop.f32.mrf.mxu1 }
 0x80d   :  { %6697 = vmatpush3.msra.mxu1 %v4857_v53  ;;  %v5127_v53 = vld [vmem:[#allocation19 + $0xf70] sm:$0xff] }
 0x80e   :  { %6698 = vmatprep.subr.mxu1 %v4932_v54  ;;  %v5282_v54 = vrot.slane %v8039_v44, %v7721_v9 }
 0x80f   :  { %6699 = vmatpush3.msra.mxu1 %v4852_v55  ;;  %v5202_v55 = vld [vmem:[#allocation19 + $0x11c8] sm:$0xff] }
 0x810   :  { %6700 = vmatprep.subr.mxu1 %v4927_v56  ;;  %v5508_v56 = vpop.f32.mrf.mxu0 }
 0x811   :  { %6701 = vmatpush3.msra.mxu1 %v4847_v57  ;;  %v5122_v57 = vld [vmem:[#allocation19 + $0xf48] sm:$0xff] }
 0x812   :  { %6702 = vmatprep.subr.mxu1 %v4922_v62  ;;  %v5367_v62 = vadd.f32 %v5366_v59, %v5278_v47  ;;  %v6245_v59 = vld [vmem:[#allocation22 + $0x1a0] sm:$0xff] }
 0x813   :  { %6703 = vmatpush3.msra.mxu1 %v4842_v37  ;;  %v5197_v37 = vld [vmem:[#allocation19 + $0x11a0] sm:$0xff] }
 0x814   :  { %6704 = vmatprep.subr.mxu1 %v4917_v20  ;;  %v5439_v20 = vpop.f32.mrf.mxu1 }
 0x815   :  { %6705 = vmatpush3.msra.mxu1 %v4837_v2  ;;  %v5369_v2 = vadd.f32 %v5368_v34, %v5282_v54  ;;  %v6227_v34 = vld [vmem:[#allocation22 + $0x110] sm:$0xff]  ;;  %v6242_v54 = vld [vmem:[#allocation22 + $0x188] sm:$0xff] }
 0x816   :  { %6706 = vmatprep.subr.mxu1 %v4912_v8  ;;  %v5438_v8 = vadd.f32 %v5437_v52, %v5367_v62 }
 0x817   :  { %6707 = vmatpush3.msra.mxu1 %v4832_v12  ;;  %v5510_v12 = vpop.f32.mrf.mxu0 }
 0x818   :  { %6708 = vmatprep.subr.mxu1 %v4907_v15  ;;  %v5440_v15 = vadd.f32 %v5439_v20, %v5369_v2  ;;  %v6225_v2 = vld [vmem:[#allocation22 + $0x100] sm:$0xff] }
 0x819   :  { %6709 = vmatpush3.msra.mxu1 %v4827_v22  ;;  %v5509_v22 = vadd.f32 %v5508_v56, %v5438_v8  ;;  %v6272_v8 = vld [vmem:[#allocation22 + $0x278] sm:$0xff] }
 0x81a   :  { %6710 = vmatprep.subr.mxu1 %v4902_v11  ;;  %v5511_v11 = vadd.f32 %v5510_v12, %v5440_v15  ;;  %v6271_v12 = vld [vmem:[#allocation22 + $0x270] sm:$0xff]  ;;  %v6270_v15 = vld [vmem:[#allocation22 + $0x268] sm:$0xff] }
 0x81b   :  { %6711 = vmatpush3.msra.mxu1 %v4822_v48 }
 0x81c   :  { %6712 = vmatprep.subr.mxu1 %v4897_v16 }
 0x81d   :  { %6713 = vmatpush3.msra.mxu1 %v4817_v18  ;;  %v6256_v18 = vld [vmem:[#allocation22 + $0x1f8] sm:$0xff] }
 0x81e   :  { %6714 = vmatprep.subr.mxu1 %v4892_v19 }
 0x81f   :  { %6715 = vmatpush3.msra.mxu1 %v4812_v21 }
 0x820   :  { %6716 = vmatprep.subr.mxu1 %v4887_v29  ;;  %v6240_v29 = vld [vmem:[#allocation22 + $0x178] sm:$0xff] }
 0x821   :  { %6717 = vmatpush3.msra.mxu1 %v4807_v23  ;;  %v6255_v23 = vld [vmem:[#allocation22 + $0x1f0] sm:$0xff] }
 0x822   :  { %6718 = vmatprep.subr.mxu1 %v4882_v26 }
 0x823   :  { %6719 = vmatpush3.msra.mxu1 %v4802_v14  ;;  %v6239_v14 = vld [vmem:[#allocation22 + $0x170] sm:$0xff] }
 0x824   :  { %6720 = vmatprep.subr.mxu1 %v4877_v28  ;;  %v6254_v28 = vld [vmem:[#allocation22 + $0x1e8] sm:$0xff] }
 0x825   :  { %6721 = vmatpush3.msra.mxu1 %v4797_v17 }
 0x826   :  { %6003 = vmatmul.mubr.f32.vlgmr.msra.gmra.mxu1 %v7976_v31  ;;  %6760 = vmatprep.subr.mxu1 %v5272_v3  ;;  %v5167_v31 = vld [vmem:[#allocation19 + $0x10b0] sm:$0xff] }
 0x827   :  { %6761 = vmatpush3.msra.mxu1 %v5192_v61  ;;  %6142 = vmatprep.mubr.f32.mxu1 %v8020_v38  ;;  %v5237_v38 = vld [vmem:[#allocation19 + $0x12e0] sm:$0xff]  ;;  %v6238_v61 = vld [vmem:[#allocation22 + $0x168] sm:$0xff] }
 0x828   :  { %6762 = vmatprep.subr.mxu1 %v5267_v30  ;;  %v6253_v30 = vld [vmem:[#allocation22 + $0x1e0] sm:$0xff] }
 0x829   :  { %6763 = vmatpush3.msra.mxu1 %v5187_v63 }
 0x82a   :  { %6764 = vmatprep.subr.mxu1 %v5262_v13 }
 0x82b   :  { %6765 = vmatpush3.msra.mxu1 %v5182_v39  ;;  %v6237_v39 = vld [vmem:[#allocation22 + $0x160] sm:$0xff] }
 0x82c   :  { %6766 = vmatprep.subr.mxu1 %v5257_v25  ;;  %v6252_v25 = vld [vmem:[#allocation22 + $0x1d8] sm:$0xff] }
 0x82d   :  { %6767 = vmatpush3.msra.mxu1 %v5177_v60 }
 0x82e   :  { %6768 = vmatprep.subr.mxu1 %v5252_v5 }
 0x82f   :  { %6769 = vmatpush3.msra.mxu1 %v5172_v33  ;;  %v6236_v33 = vld [vmem:[#allocation22 + $0x158] sm:$0xff] }
 0x830   :  { %6770 = vmatprep.subr.mxu1 %v5247_v4  ;;  %v6251_v4 = vld [vmem:[#allocation22 + $0x1d0] sm:$0xff] }
 0x831   :  { %6771 = vmatpush3.msra.mxu1 %v5167_v31 }
 0x832   :  { %6772 = vmatprep.subr.mxu1 %v5242_v27  ;;  %v6235_v27 = vld [vmem:[#allocation22 + $0x150] sm:$0xff] }
 0x833   :  { %6773 = vmatpush3.msra.mxu1 %v5162_v49  ;;  %v6250_v49 = vld [vmem:[#allocation22 + $0x1c8] sm:$0xff] }
 0x834   :  { %6774 = vmatprep.subr.mxu1 %v5237_v38  ;;  %v6234_v38 = vld [vmem:[#allocation22 + $0x148] sm:$0xff] }
 0x835   :  { %6775 = vmatpush3.msra.mxu1 %v5157_v45  ;;  %v6249_v45 = vld [vmem:[#allocation22 + $0x1c0] sm:$0xff] }
 0x836   :  { %6776 = vmatprep.subr.mxu1 %v5232_v50  ;;  %v6233_v50 = vld [vmem:[#allocation22 + $0x140] sm:$0xff] }
 0x837   :  { %6777 = vmatpush3.msra.mxu1 %v5152_v0  ;;  %v6248_v0 = vld [vmem:[#allocation22 + $0x1b8] sm:$0xff] }
 0x838   :  { %6778 = vmatprep.subr.mxu1 %v5227_v24  ;;  %v6232_v24 = vld [vmem:[#allocation22 + $0x138] sm:$0xff] }
 0x839   :  { %6779 = vmatpush3.msra.mxu1 %v5147_v41  ;;  %v6247_v41 = vld [vmem:[#allocation22 + $0x1b0] sm:$0xff] }
 0x83a   :  { %6780 = vmatprep.subr.mxu1 %v5222_v35  ;;  %v6231_v35 = vld [vmem:[#allocation22 + $0x130] sm:$0xff] }
 0x83b   :  { %6781 = vmatpush3.msra.mxu1 %v5142_v32  ;;  %v6246_v32 = vld [vmem:[#allocation22 + $0x1a8] sm:$0xff] }
 0x83c   :  { %6782 = vmatprep.subr.mxu1 %v5217_v42  ;;  %v6230_v42 = vld [vmem:[#allocation22 + $0x128] sm:$0xff] }
 0x83d   :  { %6783 = vmatpush3.msra.mxu1 %v5137_v36  ;;  %v6229_v36 = vld [vmem:[#allocation22 + $0x120] sm:$0xff] }
 0x83e   :  { %6784 = vmatprep.subr.mxu1 %v5212_v46  ;;  %v6244_v46 = vld [vmem:[#allocation22 + $0x198] sm:$0xff] }
 0x83f   :  { %6785 = vmatpush3.msra.mxu1 %v5132_v58  ;;  %v6228_v58 = vld [vmem:[#allocation22 + $0x118] sm:$0xff] }
 0x840   :  { %6786 = vmatprep.subr.mxu1 %v5207_v51  ;;  %v6243_v51 = vld [vmem:[#allocation22 + $0x190] sm:$0xff] }
 0x841   :  { %6787 = vmatpush3.msra.mxu1 %v5127_v53 }
 0x842   :  { %6788 = vmatprep.subr.mxu1 %v5202_v55 }
 0x843   :  { %6789 = vmatpush3.msra.mxu1 %v5122_v57  ;;  %v6226_v57 = vld [vmem:[#allocation22 + $0x108] sm:$0xff] }
 0x844   :  { %6790 = vmatprep.subr.mxu1 %v5197_v37 }
 0x845   :  { %6791 = vmatpush3.msra.mxu1 %v5117_v6  ;;  %v6241_v6 = vld [vmem:[#allocation22 + $0x180] sm:$0xff] }
 0x846   :  { %6143 = vmatmul.mubr.f32.vlgmr.msra.gmra.mxu1 %v8023_v40  ;;  %v5579_v9 = vpop.f32.mrf.mxu1  ;;  %6830 = vmatprep.subr.mxu1 %v6256_v18  ;;  %v6264_v18 = vld [vmem:[#allocation22 + $0x238] sm:$0xff] }
 0x847   :  { %v8046_v48 = vadd.f32 %v5579_v9, %v5509_v22  ;;  %6831 = vmatpush3.msra.mxu1 %v6240_v29  ;;  %v6269_v22 = vld [vmem:[#allocation22 + $0x260] sm:$0xff]  ;;  %v6268_v9 = vld [vmem:[#allocation22 + $0x258] sm:$0xff] }
 0x848   :  { %v5581_v16 = vpop.f32.mrf.mxu1  ;;  %6832 = vmatprep.subr.mxu1 %v6255_v23  ;;  %v6261_v29 = vld [vmem:[#allocation22 + $0x220] sm:$0xff]  ;;  %v6260_v23 = vld [vmem:[#allocation22 + $0x218] sm:$0xff] }
 0x849   :  { %v6153_v19 = vmul.f32 %v8046_v48, %v8046_v48  ;;  %v8050_v21 = vadd.f32 %v5581_v16, %v5511_v11  ;;  %6833 = vmatpush3.msra.mxu1 %v6239_v14  ;;  %v6148_v62 = vmul.f32 0.5, %v8046_v48  ;;  %v6267_v11 = vld [vmem:[#allocation22 + $0x250] sm:$0xff]  ;;  %v6265_v16 = vld [vmem:[#allocation22 + $0x240] sm:$0xff] }
 0x84a   :  { %6834 = vmatprep.subr.mxu1 %v6254_v28  ;;  %v6257_v14 = vld [vmem:[#allocation22 + $0x200] sm:$0xff]  ;;  %v5650_v28 = vpop.f32.mrf.mxu0 }
 0x84b   :  { %v6158_v26 = vmul.f32 %v6153_v19, %v8046_v48  ;;  %v6154_v40 = vmul.f32 %v8050_v21, %v8050_v21  ;;  %6835 = vmatpush3.msra.mxu1 %v6238_v61  ;;  %v6149_v55 = vmul.f32 0.5, %v8050_v21  ;;  %v6263_v19 = vld [vmem:[#allocation22 + $0x230] sm:$0xff]  ;;  %v5290_v61 = vrot.slane %v8039_v44, %v7724_v10 }
 0x84c   :  { %6836 = vmatprep.subr.mxu1 %v6253_v30  ;;  %v5652_v30 = vpop.f32.mrf.mxu0 }
 0x84d   :  { %v6163_v17 = vmul.f32 0.044715, %v6158_v26  ;;  %v6159_v3 = vmul.f32 %v6154_v40, %v8050_v21  ;;  %6837 = vmatpush3.msra.mxu1 %v6237_v39  ;;  %v6259_v26 = vld [vmem:[#allocation22 + $0x210] sm:$0xff]  ;;  %v6258_v40 = vld [vmem:[#allocation22 + $0x208] sm:$0xff]  ;;  %v5653_v39 = vadd.f32 %v5652_v30, %v5290_v61  ;;  %v6510_v61 = vld [vmem:[#allocation25 + $0x58] sm:$0xff] }
 0x84e   :  { %6838 = vmatprep.subr.mxu1 %v6252_v25  ;;  %v6509_v30 = vld [vmem:[#allocation25 + $0x50] sm:$0xff] }
 0x84f   :  { %v6168_v63 = vadd.f32 %v6163_v17, %v8046_v48  ;;  %v6164_v13 = vmul.f32 0.044715, %v6159_v3  ;;  %6839 = vmatpush3.msra.mxu1 %v6236_v33  ;;  %v6266_v48 = vld [vmem:[#allocation22 + $0x248] sm:$0xff]  ;;  %v5286_v17 = vrot.slane %v8039_v44, %v7718_v7 }
 0x850   :  { %6840 = vmatprep.subr.mxu1 %v6251_v4 }
 0x851   :  { %v6173_v60 = vmul.f32 0.7978846, %v6168_v63  ;;  %v6169_v5 = vadd.f32 %v6164_v13, %v8050_v21  ;;  %6841 = vmatpush3.msra.mxu1 %v6235_v27  ;;  %v6262_v21 = vld [vmem:[#allocation22 + $0x228] sm:$0xff]  ;;  %v5651_v63 = vadd.f32 %v5650_v28, %v5286_v17  ;;  %v6513_v28 = vld [vmem:[#allocation25 + $0x70] sm:$0xff] }
 0x852   :  { %6842 = vmatprep.subr.mxu1 %v6250_v49  ;;  %v6512_v17 = vld [vmem:[#allocation25 + $0x68] sm:$0xff] }
 0x853   :  { %7112 = vtanh.f32 %v6173_v60  ;;  %v6174_v31 = vmul.f32 0.7978846, %v6169_v5  ;;  %6843 = vmatpush3.msra.mxu1 %v6234_v38  ;;  %v5792_v60 = vpop.f32.mrf.mxu0 }
 0x854   :  { %6844 = vmatprep.subr.mxu1 %v6249_v45 }
 0x855   :  { %7114 = vtanh.f32 %v6174_v31  ;;  %6845 = vmatpush3.msra.mxu1 %v6233_v50  ;;  %v5794_v4 = vpop.f32.mrf.mxu0 }
 0x856   :  { %6846 = vmatprep.subr.mxu1 %v6248_v0 }
 0x857   :  { %6847 = vmatpush3.msra.mxu1 %v6232_v24 }
 0x858   :  { %6848 = vmatprep.subr.mxu1 %v6247_v41 }
 0x859   :  { %6849 = vmatpush3.msra.mxu1 %v6231_v35 }
 0x85a   :  { %6850 = vmatprep.subr.mxu1 %v6246_v32 }
 0x85b   :  { %6851 = vmatpush3.msra.mxu1 %v6230_v42 }
 0x85c   :  { %6852 = vmatprep.subr.mxu1 %v6245_v59 }
 0x85d   :  { %6853 = vmatpush3.msra.mxu1 %v6229_v36 }
 0x85e   :  { %6854 = vmatprep.subr.mxu1 %v6244_v46 }
 0x85f   :  { %6855 = vmatpush3.msra.mxu1 %v6228_v58 }
 0x860   :  { %v7113_v47 = vpop.eup %7112  ;;  %6856 = vmatprep.subr.mxu1 %v6243_v51 }
 0x861   :  { %v6183_v53 = vadd.f32 1.0, %v7113_v47  ;;  %6857 = vmatpush3.msra.mxu1 %v6227_v34 }
 0x862   :  { %v7115_v52 = vpop.eup %7114  ;;  %6858 = vmatprep.subr.mxu1 %v6242_v54 }
 0x863   :  { %v6184_v56 = vadd.f32 1.0, %v7115_v52  ;;  %v6188_v20 = vmul.f32 %v6183_v53, %v6148_v62  ;;  %6859 = vmatpush3.msra.mxu1 %v6226_v57  ;;  %v5294_v62 = vrot.slane %v8039_v44, %v7731_v43 }
 0x864   :  { %6860 = vmatprep.subr.mxu1 %v6241_v6  ;;  %v6687_v54 = vpop.f32.mrf.mxu0 }
 0x865   :  { %v6189_v37 = vmul.f32 %v6184_v56, %v6149_v55  ;;  %6861 = vmatpush3.msra.mxu1 %v6225_v2 }
 0x866   :  { %7004 = vmatprep.subr.mxu1 %v7510_v1  ;;  %v6688_v56 = vpop.f32.mrf.mxu0 }
 0x867   :  { %6344 = vmatprep.mubr.f32.mxu0 %v6189_v37  ;;  %v6689_v37 = vadd.f32 %v6688_v56, %v6687_v54 }
 0x868   :  { %6345 = vmatmul.mubr.f32.vlgmr.msra.gmra.mxu0 %v6188_v20 }
 0x869   :  { %7001 = vmatprep.mubr.msk.f32.mxu0 %vm7511_vm0, %v7510_v1  ;;  %6970 = vmatpush3.msra.mxu0 %v6272_v8  ;;  %v5935_v2 = vadd.f32 %v6689_v37, %v5294_v62 }
 0x86a   :  { %6971 = vmatprep.subr.mxu0 %v7510_v1 }
 0x86b   :  { %6972 = vmatpush3.msra.mxu0 %v6271_v12 }
 0x86c   :  { %6973 = vmatprep.subr.mxu0 %v7510_v1 }
 0x86d   :  { %6974 = vmatpush3.msra.mxu0 %v6270_v15 }
 0x86e   :  { %6975 = vmatprep.subr.mxu0 %v7510_v1 }
 0x86f   :  { %6976 = vmatpush3.msra.mxu0 %v6269_v22 }
 0x870   :  { %6977 = vmatprep.subr.mxu0 %v7510_v1 }
 0x871   :  { %6978 = vmatpush3.msra.mxu0 %v6268_v9 }
 0x872   :  { %6979 = vmatprep.subr.mxu0 %v7510_v1 }
 0x873   :  { %6980 = vmatpush3.msra.mxu0 %v6267_v11 }
 0x874   :  { %6981 = vmatprep.subr.mxu0 %v7510_v1 }
 0x875   :  { %6982 = vmatpush3.msra.mxu0 %v6266_v48 }
 0x876   :  { %6983 = vmatprep.subr.mxu0 %v7510_v1 }
 0x877   :  { %6984 = vmatpush3.msra.mxu0 %v6265_v16 }
 0x878   :  { %6985 = vmatprep.subr.mxu0 %v7510_v1 }
 0x879   :  { %6986 = vmatpush3.msra.mxu0 %v6264_v18 }
 0x87a   :  { %6987 = vmatprep.subr.mxu0 %v7510_v1 }
 0x87b   :  { %6988 = vmatpush3.msra.mxu0 %v6263_v19 }
 0x87c   :  { %6989 = vmatprep.subr.mxu0 %v7510_v1 }
 0x87d   :  { %6990 = vmatpush3.msra.mxu0 %v6262_v21 }
 0x87e   :  { %6991 = vmatprep.subr.mxu0 %v7510_v1 }
 0x87f   :  { %6992 = vmatpush3.msra.mxu0 %v6261_v29 }
 0x880   :  { %6993 = vmatprep.subr.mxu0 %v7510_v1 }
 0x881   :  { %6994 = vmatpush3.msra.mxu0 %v6260_v23 }
 0x882   :  { %6995 = vmatprep.subr.mxu0 %v7510_v1 }
 0x883   :  { %6996 = vmatpush3.msra.mxu0 %v6259_v26 }
 0x884   :  { %6997 = vmatprep.subr.mxu0 %v7510_v1 }
 0x885   :  { %6998 = vmatpush3.msra.mxu0 %v6258_v40 }
 0x886   :  { %6999 = vmatprep.subr.mxu0 %v7510_v1  ;;  %v5721_v3 = vpop.f32.mrf.mxu1 }
 0x887   :  { %7000 = vmatpush3.msra.mxu0 %v6257_v14  ;;  %v5722_v25 = vadd.f32 %v5721_v3, %v5651_v63  ;;  %v6757_v20 = vpop.f32.mrf.mxu0  ;;  %v6514_v14 = vld [vmem:[#allocation25 + $0x78] sm:$0xff]  ;;  %v6511_v3 = vld [vmem:[#allocation25 + $0x60] sm:$0xff]  ;;  %v6508_v63 = vld [vmem:[#allocation25 + $0x48] sm:$0xff] }
 0x888   :  { %v5723_v13 = vpop.f32.mrf.mxu1 }
 0x889   :  { %v5724_v5 = vadd.f32 %v5723_v13, %v5653_v39  ;;  %v5793_v33 = vadd.f32 %v5792_v60, %v5722_v25  ;;  %v6758_v8 = vpop.f32.mrf.mxu0  ;;  %v6507_v13 = vld [vmem:[#allocation25 + $0x40] sm:$0xff]  ;;  %v6506_v39 = vld [vmem:[#allocation25 + $0x38] sm:$0xff]  ;;  %v6505_v25 = vld [vmem:[#allocation25 + $0x30] sm:$0xff] }
 0x88a   :  { %v6759_v22 = vadd.f32 %v6758_v8, %v6757_v20  ;;  %v6504_v60 = vld [vmem:[#allocation25 + $0x28] sm:$0xff] }
 0x88b   :  { %v5795_v49 = vadd.f32 %v5794_v4, %v5724_v5  ;;  %v6503_v5 = vld [vmem:[#allocation25 + $0x20] sm:$0xff]  ;;  %v6501_v4 = vld [vmem:[#allocation25 + $0x10] sm:$0xff] }
 0x8c6   :  { %v5863_v31 = vpop.f32.mrf.mxu1 }
 0x8c7   :  { %v5864_v27 = vadd.f32 %v5863_v31, %v5793_v33  ;;  %v6502_v33 = vld [vmem:[#allocation25 + $0x18] sm:$0xff]  ;;  %v6500_v31 = vld [vmem:[#allocation25 + $0x8] sm:$0xff] }
 0x8c8   :  { %v5865_v38 = vpop.f32.mrf.mxu1 }
 0x8c9   :  { %v6155_v45 = vmul.f32 %v5864_v27, %v5864_v27  ;;  %v5866_v50 = vadd.f32 %v5865_v38, %v5795_v49  ;;  %v6150_v34 = vmul.f32 0.5, %v5864_v27 }
 0x8cb   :  { %v6160_v7 = vmul.f32 %v6155_v45, %v5864_v27  ;;  %v6156_v0 = vmul.f32 %v5866_v50, %v5866_v50  ;;  %v6151_v47 = vmul.f32 0.5, %v5866_v50 }
 0x8cd   :  { %v6165_v24 = vmul.f32 0.044715, %v6160_v7  ;;  %v6161_v41 = vmul.f32 %v6156_v0, %v5866_v50  ;;  %v6619_v0 = vld [vmem:[#allocation23] ss:$0 sm:$0xff] }
 0x8cf   :  { %v6170_v10 = vadd.f32 %v6165_v24, %v5864_v27  ;;  %v6166_v35 = vmul.f32 0.044715, %v6161_v41  ;;  %v6499_v27 = vld [vmem:[#allocation25] sm:$0xff] }
 0x8d1   :  { %v6175_v32 = vmul.f32 0.7978846, %v6170_v10  ;;  %v6171_v42 = vadd.f32 %v6166_v35, %v5866_v50 }
 0x8d3   :  { %7116 = vtanh.f32 %v6175_v32  ;;  %v6176_v59 = vmul.f32 0.7978846, %v6171_v42 }
 0x8d5   :  { %7118 = vtanh.f32 %v6176_v59 }
 0x8e0   :  { %v7117_v36 = vpop.eup %7116 }
 0x8e1   :  { %v6185_v58 = vadd.f32 1.0, %v7117_v36 }
 0x8e2   :  { %v7119_v46 = vpop.eup %7118 }
 0x8e3   :  { %v6186_v51 = vadd.f32 1.0, %v7119_v46  ;;  %v6190_v53 = vmul.f32 %v6185_v58, %v6150_v34 }
 0x8e5   :  { %v6191_v52 = vmul.f32 %v6186_v51, %v6151_v47 }
 0x8e6   :  { %v6722_v55 = vpop.f32.mrf.mxu1 }
 0x8e7   :  { %6414 = vmatprep.mubr.f32.mxu1 %v6191_v52 }
 0x8e8   :  { %6415 = vmatmul.mubr.f32.vlgmr.msra.gmra.mxu1 %v6190_v53  ;;  %v6723_v57 = vpop.f32.mrf.mxu1  ;;  %v6620_v53 = vld [vmem:[#allocation26] ss:$0 sm:$0xff] }
 0x8e9   :  { %7036 = vmatprep.mubr.msk.f32.mxu1 %vm7511_vm0, %v7510_v1  ;;  %v6724_v6 = vadd.f32 %v6723_v57, %v6722_v55  ;;  %7005 = vmatpush3.msra.mxu1 %v6514_v14 }
 0x8ea   :  { %7006 = vmatprep.subr.mxu1 %v7510_v1 }
 0x8eb   :  { %v6005_v12 = vadd.f32 %v6724_v6, %v5935_v2  ;;  %7007 = vmatpush3.msra.mxu1 %v6513_v28 }
 0x8ec   :  { %7008 = vmatprep.subr.mxu1 %v7510_v1 }
 0x8ed   :  { %v6075_v11 = vadd.f32 %v6759_v22, %v6005_v12  ;;  %7009 = vmatpush3.msra.mxu1 %v6512_v17 }
 0x8ee   :  { %7010 = vmatprep.subr.mxu1 %v7510_v1 }
 0x8ef   :  { %7011 = vmatpush3.msra.mxu1 %v6511_v3 }
 0x8f0   :  { %7012 = vmatprep.subr.mxu1 %v7510_v1 }
 0x8f1   :  { %7013 = vmatpush3.msra.mxu1 %v6510_v61 }
 0x8f2   :  { %7014 = vmatprep.subr.mxu1 %v7510_v1 }
 0x8f3   :  { %7015 = vmatpush3.msra.mxu1 %v6509_v30 }
 0x8f4   :  { %7016 = vmatprep.subr.mxu1 %v7510_v1 }
 0x8f5   :  { %7017 = vmatpush3.msra.mxu1 %v6508_v63 }
 0x8f6   :  { %7018 = vmatprep.subr.mxu1 %v7510_v1 }
 0x8f7   :  { %7019 = vmatpush3.msra.mxu1 %v6507_v13 }
 0x8f8   :  { %7020 = vmatprep.subr.mxu1 %v7510_v1 }
 0x8f9   :  { %7021 = vmatpush3.msra.mxu1 %v6506_v39 }
 0x8fa   :  { %7022 = vmatprep.subr.mxu1 %v7510_v1 }
 0x8fb   :  { %7023 = vmatpush3.msra.mxu1 %v6505_v25 }
 0x8fc   :  { %7024 = vmatprep.subr.mxu1 %v7510_v1 }
 0x8fd   :  { %7025 = vmatpush3.msra.mxu1 %v6504_v60 }
 0x8fe   :  { %7026 = vmatprep.subr.mxu1 %v7510_v1 }
 0x8ff   :  { %7027 = vmatpush3.msra.mxu1 %v6503_v5 }
 0x900   :  { %7028 = vmatprep.subr.mxu1 %v7510_v1 }
 0x901   :  { %7029 = vmatpush3.msra.mxu1 %v6502_v33 }
 0x902   :  { %7030 = vmatprep.subr.mxu1 %v7510_v1 }
 0x903   :  { %7031 = vmatpush3.msra.mxu1 %v6501_v4 }
 0x904   :  { %7032 = vmatprep.subr.mxu1 %v7510_v1 }
 0x905   :  { %7033 = vmatpush3.msra.mxu1 %v6500_v31 }
 0x906   :  { %v6792_v15 = vpop.f32.mrf.mxu1  ;;  %7034 = vmatprep.subr.mxu1 %v7510_v1 }
 0x907   :  { %7035 = vmatpush3.msra.mxu1 %v6499_v27 }
 0x908   :  { %v6793_v9 = vpop.f32.mrf.mxu1 }
 0x909   :  { %v6794_v48 = vadd.f32 %v6793_v9, %v6792_v15 }
 0x90b   :  { %v6145_v16 = vadd.f32 %v6794_v48, %v6075_v11 }
 0x90d   :  { %v6157_v18 = vmul.f32 %v6145_v16, %v6145_v16  ;;  %v6152_v43 = vmul.f32 0.5, %v6145_v16 }
 0x90f   :  { %v6162_v19 = vmul.f32 %v6157_v18, %v6145_v16 }
 0x911   :  { %v6167_v21 = vmul.f32 0.044715, %v6162_v19 }
 0x913   :  { %v6172_v29 = vadd.f32 %v6167_v21, %v6145_v16 }
 0x915   :  { %v6177_v23 = vmul.f32 0.7978846, %v6172_v29 }
 0x917   :  { %7120 = vtanh.f32 %v6177_v23 }
 0x924   :  { %v7121_v26 = vpop.eup %7120 }
 0x925   :  { %v6187_v44 = vadd.f32 1.0, %v7121_v26 }
 0x927   :  { %v6192_v40 = vmul.f32 %v6187_v44, %v6152_v43 }
 0x928   :  { %v6827_v49 = vpop.f32.mrf.mxu0 }
 0x929   :  { %7002 = vmatmul.mubr.f32.vlgmr.msra.gmra.mxu0 %v6192_v40 }
 0x92a   :  { %v6828_v45 = vpop.f32.mrf.mxu0 }
 0x92b   :  { %v6829_v7 = vadd.f32 %v6828_v45, %v6827_v49 }
 0x92d   :  { %v6347_v41 = vadd.f32 %v6829_v7, %v6619_v0 }
 0x9a8   :  { %v6862_v38 = vpop.f32.mrf.mxu1 }
 0x9aa   :  { %v6863_v50 = vpop.f32.mrf.mxu1 }
 0x9ab   :  { %v6864_v24 = vadd.f32 %v6863_v50, %v6862_v38 }
 0x9ad   :  { %v6417_v10 = vadd.f32 %v6864_v24, %v6347_v41 }
 0x9e9   :  { %v6486_v35 = vpop.f32.mrf.mxu0 }
 0x9ea   :  { %v6487_v32 = vadd.f32 %v6486_v35, %v6417_v10 }
 0x9eb   :  { %v7003_v42 = vpop.f32.mrf.mxu0 }
 0x9ec   :  { %v6491_v59 = vmul.f32 %v6487_v32, %v6487_v32  ;;  %v6490_v51 = vmul.f32 0.5, %v6487_v32 }
 0x9ee   :  { %v6492_v36 = vmul.f32 %v6491_v59, %v6487_v32 }
 0x9f0   :  { %v6493_v46 = vmul.f32 0.044715, %v6492_v36 }
 0x9f2   :  { %v6494_v58 = vadd.f32 %v6493_v46, %v6487_v32 }
 0x9f4   :  { %v6495_v47 = vmul.f32 0.7978846, %v6494_v58 }
 0x9f6   :  { %7122 = vtanh.f32 %v6495_v47 }
 0xa03   :  { %v7123_v1 = vpop.eup %7122 }
 0xa04   :  { %v6497_v34 = vadd.f32 1.0, %v7123_v1 }
 0xa06   :  { %v6498_v52 = vmul.f32 %v6497_v34, %v6490_v51 }
 0xa08   :  { %7037 = vmatmul.mubr.f32.vlgmr.msra.gmra.mxu1 %v6498_v52 }
 0xac8   :  { %v6588_v54 = vpop.f32.mrf.mxu1 }
 0xac9   :  { %v6589_v55 = vadd.f32 %v6620_v53, %v6588_v54 }
 0xaca   :  { %v7038_v56 = vpop.f32.mrf.mxu1 }
 0xacb   :  { %6592 = vst [vmem:[#allocation28] sm:$0xff] %v6589_v55 }
 0xacc   :  { %7458 = shalt.err (!%p7455_p0)
}
 0xacd   :  { %6602 = dma.vmem_to_hbm [thread:$0]  %s6600_s30, 128, %s8121_s17, [#allocation4]  }
 0xace   :  { %7485 = dma.done.wait [#allocation4], 128  }
 0xacf   :  { %7486 = vsyncadd [#allocation4], 4294967168 }
 0xad0   :  { %6606 = vsyncpa [#allocation3], 1 }
 0xad1   :  { %6607 = vsyncpa [#allocation6], 1 }
 0xad2   :  { %6608 = vsyncpa [#allocation9], 1 }
 0xad3   :  { %6609 = vsyncpa [#allocation12], 1 }
 0xad4   :  { %6610 = vsyncpa [#allocation15], 1 }
 0xad5   :  { %6611 = vsyncpa [#allocation18], 1 }
 0xad6   :  { %6612 = vsyncpa [#allocation21], 1 }
 0xad7   :  { %6613 = vsyncpa [#allocation24], 1 }
 0xad8   :  { %6614 = vsyncpa [#allocation27], 1 }
 0xad9   :  { %6615 = vsyncpa [#allocation4], 1 }

</bundles_post_ra>
